<compile_context>
chip_gen: v7x
topology: tpu7x:2x2x1
jax: 0.10.0
libtpu: 0.0.40
codegen_flags: <defaults>
</compile_context>

<pallas_src>
import functools

import jax
import jax.numpy as jnp
import numpy as np
from jax import lax
from jax.experimental import pallas as pl
from jax.experimental.pallas import tpu as pltpu


def _window_attention_kernel(x_ref, wqkv_ref, bqkv_ref, bias_t_ref, mask_ref,
                             wproj_ref, bproj_ref, o_ref,
                             *, num_heads, tokens, window_batch, matmul_dtype):
    """One grid step processes `window_batch` windows worth of tokens.

    x_ref:      (Bt*N, C)   tokens of Bt windows (row = window*N + token)
    wqkv_ref:   (C, 3C)     fused QKV weight, softmax scale pre-folded into the Q slice
    bqkv_ref:   (1, 3C)     fused QKV bias (Q slice pre-scaled)
    bias_t_ref: (N, H*N)    transposed relative-position bias, [j, h*N + i] = bias[h, i, j]
    mask_ref:   (H, C)      0/1 head-channel mask, mask[h, c] = (c // head_dim == h)
    wproj_ref:  (C, C), bproj_ref: (1, C)
    o_ref:      (Bt*N, C)
    """
    N, Bt, H = tokens, window_batch, num_heads

    x = x_ref[...]                                                  # (Bt*N, C)
    C = x.shape[-1]

    # Fused Q/K/V projection: one (Bt*N, C) @ (C, 3C) MXU op, f32 accumulation.
    qkv = jnp.dot(x, wqkv_ref[...],
                  preferred_element_type=jnp.float32) + bqkv_ref[...]   # (Bt*N, 3C)
    q = qkv[:, 0:C]
    k = qkv[:, C:2 * C]
    v = qkv[:, 2 * C:3 * C]

    q3 = q.reshape(Bt, N, C)                                        # leading split (free)
    k3 = k.reshape(Bt, N, C)
    v3 = v.reshape(Bt, N, C)
    mask = mask_ref[...]                                            # (H, C)

    # Head-expanded queries: zero channels outside head h and stack head copies along
    # the row axis -> rows ordered (head, token). A full-C contraction against K then
    # reproduces the per-head <q_h, k_h> dot products with no narrow lane slicing.
    q_exp = jnp.concatenate([q3 * mask[h:h + 1, :] for h in range(H)],
                            axis=1)                                 # (Bt, H*N, C)

    # Transposed scores: scores_T[b, j, h*N+i] = scale * <q_h[b,i], k_h[b,j]>.
    # Lane axis carries H*N (=64) instead of N (=16) -> dense softmax-phase VPU/EUP work.
    scores_t = lax.dot_general(k3.astype(matmul_dtype), q_exp.astype(matmul_dtype),
                               dimension_numbers=(((2,), (2,)), ((0,), (0,))),
                               preferred_element_type=jnp.float32)  # (Bt, N, H*N)
    scores_t = scores_t + bias_t_ref[...][None]                     # relative pos bias

    # Row softmax over the key (sublane) axis; every lane column is one (head, query)
    # pair. Denominator via the EUP approximate reciprocal.
    scores_t = scores_t - jnp.max(scores_t, axis=1, keepdims=True)
    p = jnp.exp(scores_t)
    p = p * pl.reciprocal(jnp.sum(p, axis=1, keepdims=True), approx=True)

    # out_exp[b, h*N+i, :] = P_h[b, i, :] @ V[b] : contract the key axis of the
    # transposed probabilities directly against V (no transpose needed).
    out_exp = lax.dot_general(p.astype(matmul_dtype), v3.astype(matmul_dtype),
                              dimension_numbers=(((1,), (1,)), ((0,), (0,))),
                              preferred_element_type=jnp.float32)   # (Bt, H*N, C)

    # Head combine: select head h's channels from its (sublane-aligned) row block and
    # accumulate in registers.
    out = out_exp[:, 0:N, :] * mask[0:1, :]
    for h in range(1, H):
        out = out + out_exp[:, h * N:(h + 1) * N, :] * mask[h:h + 1, :]   # (Bt, N, C)

    # Output projection over all Bt*N tokens at once.
    y = jnp.dot(out.reshape(Bt * N, C).astype(matmul_dtype), wproj_ref[...],
                preferred_element_type=jnp.float32) + bproj_ref[...]
    o_ref[...] = y.astype(o_ref.dtype)


def window_attention_pallas(x, w_qkv, b_qkv, rel_bias, w_proj, b_proj, *,
                            num_heads, grid_steps=2, compute_dtype=jnp.float32):
    """x: (B_, N, C); w_qkv: (3C, C) torch layout; b_qkv: (3C,); rel_bias: (H, N, N);
    w_proj: (C, C) torch layout; b_proj: (C,).
    Only the mask=None path of the PyTorch forward is implemented.

    grid_steps: number of grid iterations (2 keeps both v7x TensorCores busy; on
    single-TC v5e/v6e, 1 is optimal and 2 costs only one extra ~0.35 us step).
    compute_dtype=jnp.bfloat16 casts x, weights and the MXU matmul operands on v6e/v7x
    (softmax and all accumulations stay f32)."""
    B_, N, C = x.shape
    H = num_heads
    hd = C // H
    scale = hd ** (-0.5)

    steps = grid_steps if (grid_steps >= 1 and B_ % max(grid_steps, 1) == 0) else 1
    Bt = B_ // steps

    f32 = jnp.float32
    # One-time parameter prep (glue): transpose to (in, out) layout, fold the softmax
    # scale into the Q projection, fuse QKV, build the transposed relative-position
    # bias (key axis on sublanes, head*query on lanes) and the head-channel mask.
    wq_t = w_qkv[:C].T * scale
    wk_t = w_qkv[C:2 * C].T
    wv_t = w_qkv[2 * C:].T
    wqkv_t = jnp.concatenate([wq_t, wk_t, wv_t], axis=1).astype(compute_dtype)  # (C, 3C)
    bqkv = jnp.concatenate([b_qkv[:C] * scale, b_qkv[C:]]).reshape(1, 3 * C).astype(f32)
    wproj_t = w_proj.T.astype(compute_dtype)                                    # (C, C)
    bproj = b_proj.reshape(1, C).astype(f32)
    bias_t = jnp.transpose(rel_bias, (2, 0, 1)).reshape(N, H * N).astype(f32)   # (N, H*N)
    head_mask = (jnp.arange(C)[None, :] // hd
                 == jnp.arange(H)[:, None]).astype(f32)                         # (H, C)

    x2 = x.reshape(B_ * N, C).astype(compute_dtype)              # token-flat view
    grid = (steps,)

    kernel = functools.partial(_window_attention_kernel,
                               num_heads=H, tokens=N, window_batch=Bt,
                               matmul_dtype=compute_dtype)
    const2 = lambda b: (0, 0)

    out2 = pl.pallas_call(
        kernel,
        out_shape=jax.ShapeDtypeStruct((B_ * N, C), x.dtype),
        grid_spec=pltpu.PrefetchScalarGridSpec(
            num_scalar_prefetch=0,
            grid=grid,
            in_specs=[
                pl.BlockSpec((Bt * N, C), lambda b: (b, 0)),      # x tokens, Bt windows
                pl.BlockSpec((C, 3 * C), const2),                 # fused Wqkv (Q scaled)
                pl.BlockSpec((1, 3 * C), const2),                 # fused bqkv (Q scaled)
                pl.BlockSpec((N, H * N), const2),                 # transposed rel-pos bias
                pl.BlockSpec((H, C), const2),                     # head channel mask
                pl.BlockSpec((C, C), const2),                     # Wproj
                pl.BlockSpec((1, C), const2),                     # bproj
            ],
            out_specs=pl.BlockSpec((Bt * N, C), lambda b: (b, 0)),
        ),
        compiler_params=pltpu.CompilerParams(
            dimension_semantics=("parallel",),
            vmem_limit_bytes=32 * 1024 * 1024,
        ),
    )(x2, wqkv_t, bqkv, bias_t, head_mask, wproj_t, bproj)
    return out2.reshape(B_, N, C)


def _relative_position_index(window_size):
    """Exactly mirrors the PyTorch buffer construction."""
    Wh, Ww = window_size
    coords_h = np.arange(Wh)
    coords_w = np.arange(Ww)
    coords = np.stack(np.meshgrid(coords_h, coords_w, indexing="ij"))     # (2, Wh, Ww)
    coords_flatten = coords.reshape(2, -1)                                # (2, N)
    relative_coords = coords_flatten[:, :, None] - coords_flatten[:, None, :]
    relative_coords = relative_coords.transpose(1, 2, 0).copy()           # (N, N, 2)
    relative_coords[:, :, 0] += Wh - 1
    relative_coords[:, :, 1] += Ww - 1
    relative_coords[:, :, 0] *= 2 * Ww - 1
    return relative_coords.sum(-1)                                        # (N, N)


def _reference_forward(x, w_qkv, b_qkv, rel_bias, w_proj, b_proj, *, num_heads):
    """Pure-JAX reference reproducing the PyTorch forward (mask=None)."""
    B_, N, C = x.shape
    hd = C // num_heads
    scale = hd ** (-0.5)
    qkv = x @ w_qkv.T + b_qkv                                    # (B_, N, 3C)
    qkv = qkv.reshape(B_, N, 3, num_heads, hd).transpose(2, 0, 3, 1, 4)
    q, k, v = qkv[0] * scale, qkv[1], qkv[2]                     # (B_, H, N, hd)
    attn = jnp.einsum("bhnd,bhmd->bhnm", q, k)
    attn = attn + rel_bias[None]
    attn = jax.nn.softmax(attn, axis=-1)
    out = jnp.einsum("bhnm,bhmd->bhnd", attn, v)
    out = out.transpose(0, 2, 1, 3).reshape(B_, N, C)
    return out @ w_proj.T + b_proj


if __name__ == "__main__":
    # Small shapes consistent with the module: dim=32, window 4x4 (N=16), 4 heads.
    # B_ = num_windows * batch = 64; grid_steps=2 -> each step handles 32 windows
    # (amortized per-step overhead; 2 steps so v7x megacore can shard it).
    dim = 32
    window_size = (4, 4)
    num_heads = 4
    N = window_size[0] * window_size[1]
    B_ = 64

    key = jax.random.PRNGKey(0)
    kx, kt, kw1, kb1, kw2, kb2 = jax.random.split(key, 6)

    x = jax.random.normal(kx, (B_, N, dim), dtype=jnp.float32)

    # Parameters (deterministic synthetic init; shapes from __init__).
    num_rel = (2 * window_size[0] - 1) * (2 * window_size[1] - 1)
    rel_pos_table = 0.02 * jax.random.normal(kt, (num_rel, num_heads), dtype=jnp.float32)
    w_qkv = 0.1 * jax.random.normal(kw1, (3 * dim, dim), dtype=jnp.float32)   # torch (out, in)
    b_qkv = 0.1 * jax.random.normal(kb1, (3 * dim,), dtype=jnp.float32)
    w_proj = 0.1 * jax.random.normal(kw2, (dim, dim), dtype=jnp.float32)      # torch (out, in)
    b_proj = 0.1 * jax.random.normal(kb2, (dim,), dtype=jnp.float32)

    # Glue: gather the dense (H, N, N) relative-position bias tensor.
    rel_index = jnp.asarray(_relative_position_index(window_size))            # (N, N) int
    rel_bias = rel_pos_table[rel_index.reshape(-1)].reshape(N, N, num_heads)
    rel_bias = jnp.transpose(rel_bias, (2, 0, 1))                             # (H, N, N)

    out = window_attention_pallas(x, w_qkv, b_qkv, rel_bias, w_proj, b_proj,
                                  num_heads=num_heads, grid_steps=2)
    out = jax.block_until_ready(out)

    ref = _reference_forward(x, w_qkv, b_qkv, rel_bias, w_proj, b_proj,
                             num_heads=num_heads)
    assert out.shape == (B_, N, dim)
    # Tolerance loosened slightly vs exact f32 because the softmax denominator uses the
    # EUP approximate reciprocal; real layout/head bugs would be >>1e-2.
    np.testing.assert_allclose(np.asarray(out), np.asarray(ref), rtol=5e-3, atol=5e-3)

    print("KERNEL_OK")
</pallas_src>

<mosaic_0001>
module attributes {stable_mosaic.version = 11 : i64} {
  func.func @_window_attention_kernel(%arg0: i32, %arg1: memref<512x32xf32, #tpu.memory_space<vmem>>, %arg2: memref<32x96xf32, #tpu.memory_space<vmem>>, %arg3: memref<1x96xf32, #tpu.memory_space<vmem>>, %arg4: memref<16x64xf32, #tpu.memory_space<vmem>>, %arg5: memref<4x32xf32, #tpu.memory_space<vmem>>, %arg6: memref<32x32xf32, #tpu.memory_space<vmem>>, %arg7: memref<1x32xf32, #tpu.memory_space<vmem>>, %arg8: memref<512x32xf32, #tpu.memory_space<vmem>>) attributes {dimension_semantics = [#tpu.dimension_semantics<parallel>], iteration_bounds = array<i64: 2>, scalar_prefetch = 0 : i64, scratch_operands = 0 : i64, tpu.core_type = #tpu.core_type<tc>, window_params = [{transform_indices = @transform_0, window_bounds = array<i64: 512, 32>}, {pipeline_mode = #tpu.pipeline_mode<synchronous>, transform_indices = @transform_1, window_bounds = array<i64: 32, 96>}, {pipeline_mode = #tpu.pipeline_mode<synchronous>, transform_indices = @transform_2, window_bounds = array<i64: 1, 96>}, {pipeline_mode = #tpu.pipeline_mode<synchronous>, transform_indices = @transform_3, window_bounds = array<i64: 16, 64>}, {pipeline_mode = #tpu.pipeline_mode<synchronous>, transform_indices = @transform_4, window_bounds = array<i64: 4, 32>}, {pipeline_mode = #tpu.pipeline_mode<synchronous>, transform_indices = @transform_5, window_bounds = array<i64: 32, 32>}, {pipeline_mode = #tpu.pipeline_mode<synchronous>, transform_indices = @transform_6, window_bounds = array<i64: 1, 32>}, {transform_indices = @transform_7, window_bounds = array<i64: 512, 32>}]} {
    %c0 = arith.constant 0 : index
    %c0_0 = arith.constant 0 : index
    %0 = vector.load %arg1[%c0, %c0_0] : memref<512x32xf32, #tpu.memory_space<vmem>>, vector<512x32xf32>
    %c0_1 = arith.constant 0 : index
    %c0_2 = arith.constant 0 : index
    %1 = vector.load %arg2[%c0_1, %c0_2] : memref<32x96xf32, #tpu.memory_space<vmem>>, vector<32x96xf32>
    %cst = arith.constant dense<0.000000e+00> : vector<512x96xf32>
    %2 = tpu.matmul %0, %1, %cst {dimension_numbers = #tpu.dot_dimension_numbers<[1], [0], [0], [1], [0, 0, 1, 1], [], []>} : vector<512x32xf32>, vector<32x96xf32>, vector<512x96xf32> -> vector<512x96xf32>
    %c0_3 = arith.constant 0 : index
    %c0_4 = arith.constant 0 : index
    %3 = vector.load %arg3[%c0_3, %c0_4] : memref<1x96xf32, #tpu.memory_space<vmem>>, vector<1x96xf32>
    %4 = vector.broadcast %3 : vector<1x96xf32> to vector<512x96xf32>
    %5 = arith.addf %2, %4 : vector<512x96xf32>
    %6 = vector.extract_strided_slice %5 {offsets = [0, 0], sizes = [512, 32], strides = [1, 1]} : vector<512x96xf32> to vector<512x32xf32>
    %7 = vector.extract_strided_slice %5 {offsets = [0, 32], sizes = [512, 32], strides = [1, 1]} : vector<512x96xf32> to vector<512x32xf32>
    %8 = vector.extract_strided_slice %5 {offsets = [0, 64], sizes = [512, 32], strides = [1, 1]} : vector<512x96xf32> to vector<512x32xf32>
    %9 = vector.shape_cast %6 : vector<512x32xf32> to vector<32x16x32xf32>
    %10 = vector.shape_cast %7 : vector<512x32xf32> to vector<32x16x32xf32>
    %11 = vector.shape_cast %8 : vector<512x32xf32> to vector<32x16x32xf32>
    %c0_5 = arith.constant 0 : index
    %c0_6 = arith.constant 0 : index
    %12 = vector.load %arg5[%c0_5, %c0_6] : memref<4x32xf32, #tpu.memory_space<vmem>>, vector<4x32xf32>
    %13 = vector.extract_strided_slice %12 {offsets = [0, 0], sizes = [1, 32], strides = [1, 1]} : vector<4x32xf32> to vector<1x32xf32>
    %14 = vector.shape_cast %13 : vector<1x32xf32> to vector<1x1x32xf32>
    %15 = vector.broadcast %14 : vector<1x1x32xf32> to vector<32x16x32xf32>
    %16 = arith.mulf %9, %15 : vector<32x16x32xf32>
    %17 = vector.extract_strided_slice %12 {offsets = [1, 0], sizes = [1, 32], strides = [1, 1]} : vector<4x32xf32> to vector<1x32xf32>
    %18 = vector.shape_cast %17 : vector<1x32xf32> to vector<1x1x32xf32>
    %19 = vector.broadcast %18 : vector<1x1x32xf32> to vector<32x16x32xf32>
    %20 = arith.mulf %9, %19 : vector<32x16x32xf32>
    %21 = vector.extract_strided_slice %12 {offsets = [2, 0], sizes = [1, 32], strides = [1, 1]} : vector<4x32xf32> to vector<1x32xf32>
    %22 = vector.shape_cast %21 : vector<1x32xf32> to vector<1x1x32xf32>
    %23 = vector.broadcast %22 : vector<1x1x32xf32> to vector<32x16x32xf32>
    %24 = arith.mulf %9, %23 : vector<32x16x32xf32>
    %25 = vector.extract_strided_slice %12 {offsets = [3, 0], sizes = [1, 32], strides = [1, 1]} : vector<4x32xf32> to vector<1x32xf32>
    %26 = vector.shape_cast %25 : vector<1x32xf32> to vector<1x1x32xf32>
    %27 = vector.broadcast %26 : vector<1x1x32xf32> to vector<32x16x32xf32>
    %28 = arith.mulf %9, %27 : vector<32x16x32xf32>
    %29 = tpu.concatenate %16, %20, %24, %28 in 1 : vector<32x16x32xf32>, vector<32x16x32xf32>, vector<32x16x32xf32>, vector<32x16x32xf32> -> vector<32x64x32xf32>
    %cst_7 = arith.constant dense<0.000000e+00> : vector<32x16x64xf32>
    %30 = tpu.matmul %10, %29, %cst_7 {dimension_numbers = #tpu.dot_dimension_numbers<[2], [2], [1], [1], [0, 0, 0, 1, 1, 1], [0], [0]>} : vector<32x16x32xf32>, vector<32x64x32xf32>, vector<32x16x64xf32> -> vector<32x16x64xf32>
    %c0_8 = arith.constant 0 : index
    %c0_9 = arith.constant 0 : index
    %31 = vector.load %arg4[%c0_8, %c0_9] : memref<16x64xf32, #tpu.memory_space<vmem>>, vector<16x64xf32>
    %32 = vector.shape_cast %31 : vector<16x64xf32> to vector<1x16x64xf32>
    %33 = vector.broadcast %32 : vector<1x16x64xf32> to vector<32x16x64xf32>
    %34 = arith.addf %30, %33 : vector<32x16x64xf32>
    %cst_10 = arith.constant dense<0xFF800000> : vector<32x64xf32>
    %35 = vector.multi_reduction <maximumf>, %34, %cst_10 [1] : vector<32x16x64xf32> to vector<32x64xf32>
    %36 = vector.shape_cast %35 : vector<32x64xf32> to vector<32x1x64xf32>
    %37 = vector.broadcast %36 : vector<32x1x64xf32> to vector<32x16x64xf32>
    %38 = arith.subf %34, %37 : vector<32x16x64xf32>
    %39 = math.exp %38 : vector<32x16x64xf32>
    %cst_11 = arith.constant dense<0.000000e+00> : vector<32x64xf32>
    %40 = vector.multi_reduction <add>, %39, %cst_11 [1] : vector<32x16x64xf32> to vector<32x64xf32>
    %41 = vector.shape_cast %40 : vector<32x64xf32> to vector<32x1x64xf32>
    %42 = tpu.reciprocal %41 {approx = true} : vector<32x1x64xf32> -> vector<32x1x64xf32>
    %43 = vector.broadcast %42 : vector<32x1x64xf32> to vector<32x16x64xf32>
    %44 = arith.mulf %39, %43 : vector<32x16x64xf32>
    %cst_12 = arith.constant dense<0.000000e+00> : vector<32x64x32xf32>
    %45 = tpu.matmul %44, %11, %cst_12 {dimension_numbers = #tpu.dot_dimension_numbers<[1], [1], [2], [2], [0, 0, 0, 2, 1, 2], [0], [0]>} : vector<32x16x64xf32>, vector<32x16x32xf32>, vector<32x64x32xf32> -> vector<32x64x32xf32>
    %46 = vector.extract_strided_slice %45 {offsets = [0, 0, 0], sizes = [32, 16, 32], strides = [1, 1, 1]} : vector<32x64x32xf32> to vector<32x16x32xf32>
    %47 = vector.extract_strided_slice %12 {offsets = [0, 0], sizes = [1, 32], strides = [1, 1]} : vector<4x32xf32> to vector<1x32xf32>
    %48 = vector.shape_cast %47 : vector<1x32xf32> to vector<1x1x32xf32>
    %49 = vector.broadcast %48 : vector<1x1x32xf32> to vector<32x16x32xf32>
    %50 = arith.mulf %46, %49 : vector<32x16x32xf32>
    %51 = vector.extract_strided_slice %45 {offsets = [0, 16, 0], sizes = [32, 16, 32], strides = [1, 1, 1]} : vector<32x64x32xf32> to vector<32x16x32xf32>
    %52 = vector.extract_strided_slice %12 {offsets = [1, 0], sizes = [1, 32], strides = [1, 1]} : vector<4x32xf32> to vector<1x32xf32>
    %53 = vector.shape_cast %52 : vector<1x32xf32> to vector<1x1x32xf32>
    %54 = vector.broadcast %53 : vector<1x1x32xf32> to vector<32x16x32xf32>
    %55 = arith.mulf %51, %54 : vector<32x16x32xf32>
    %56 = arith.addf %50, %55 : vector<32x16x32xf32>
    %57 = vector.extract_strided_slice %45 {offsets = [0, 32, 0], sizes = [32, 16, 32], strides = [1, 1, 1]} : vector<32x64x32xf32> to vector<32x16x32xf32>
    %58 = vector.extract_strided_slice %12 {offsets = [2, 0], sizes = [1, 32], strides = [1, 1]} : vector<4x32xf32> to vector<1x32xf32>
    %59 = vector.shape_cast %58 : vector<1x32xf32> to vector<1x1x32xf32>
    %60 = vector.broadcast %59 : vector<1x1x32xf32> to vector<32x16x32xf32>
    %61 = arith.mulf %57, %60 : vector<32x16x32xf32>
    %62 = arith.addf %56, %61 : vector<32x16x32xf32>
    %63 = vector.extract_strided_slice %45 {offsets = [0, 48, 0], sizes = [32, 16, 32], strides = [1, 1, 1]} : vector<32x64x32xf32> to vector<32x16x32xf32>
    %64 = vector.extract_strided_slice %12 {offsets = [3, 0], sizes = [1, 32], strides = [1, 1]} : vector<4x32xf32> to vector<1x32xf32>
    %65 = vector.shape_cast %64 : vector<1x32xf32> to vector<1x1x32xf32>
    %66 = vector.broadcast %65 : vector<1x1x32xf32> to vector<32x16x32xf32>
    %67 = arith.mulf %63, %66 : vector<32x16x32xf32>
    %68 = arith.addf %62, %67 : vector<32x16x32xf32>
    %69 = vector.shape_cast %68 : vector<32x16x32xf32> to vector<512x32xf32>
    %c0_13 = arith.constant 0 : index
    %c0_14 = arith.constant 0 : index
    %70 = vector.load %arg6[%c0_13, %c0_14] : memref<32x32xf32, #tpu.memory_space<vmem>>, vector<32x32xf32>
    %cst_15 = arith.constant dense<0.000000e+00> : vector<512x32xf32>
    %71 = tpu.matmul %69, %70, %cst_15 {dimension_numbers = #tpu.dot_dimension_numbers<[1], [0], [0], [1], [0, 0, 1, 1], [], []>} : vector<512x32xf32>, vector<32x32xf32>, vector<512x32xf32> -> vector<512x32xf32>
    %c0_16 = arith.constant 0 : index
    %c0_17 = arith.constant 0 : index
    %72 = vector.load %arg7[%c0_16, %c0_17] : memref<1x32xf32, #tpu.memory_space<vmem>>, vector<1x32xf32>
    %73 = vector.broadcast %72 : vector<1x32xf32> to vector<512x32xf32>
    %74 = arith.addf %71, %73 : vector<512x32xf32>
    %c0_18 = arith.constant 0 : index
    %c0_19 = arith.constant 0 : index
    %75 = vector.load %arg8[%c0_18, %c0_19] : memref<512x32xf32, #tpu.memory_space<vmem>>, vector<512x32xf32>
    tpu.vector_store %arg8[%c0_18, %c0_19], %74 {strides = array<i32>} : memref<512x32xf32, #tpu.memory_space<vmem>>, vector<512x32xf32>,
    return
  }
  func.func @transform_0(%arg0: i32) -> (i32, i32) {
    %c0_i32 = arith.constant 0 : i32
    %c0_i32_0 = arith.constant 0 : i32
    return %arg0, %c0_i32 : i32, i32
  }
  func.func @transform_1(%arg0: i32) -> (i32, i32) {
    %c0_i32 = arith.constant 0 : i32
    %c0_i32_0 = arith.constant 0 : i32
    %c0_i32_1 = arith.constant 0 : i32
    return %c0_i32, %c0_i32_0 : i32, i32
  }
  func.func @transform_2(%arg0: i32) -> (i32, i32) {
    %c0_i32 = arith.constant 0 : i32
    %c0_i32_0 = arith.constant 0 : i32
    %c0_i32_1 = arith.constant 0 : i32
    return %c0_i32, %c0_i32_0 : i32, i32
  }
  func.func @transform_3(%arg0: i32) -> (i32, i32) {
    %c0_i32 = arith.constant 0 : i32
    %c0_i32_0 = arith.constant 0 : i32
    %c0_i32_1 = arith.constant 0 : i32
    return %c0_i32, %c0_i32_0 : i32, i32
  }
  func.func @transform_4(%arg0: i32) -> (i32, i32) {
    %c0_i32 = arith.constant 0 : i32
    %c0_i32_0 = arith.constant 0 : i32
    %c0_i32_1 = arith.constant 0 : i32
    return %c0_i32, %c0_i32_0 : i32, i32
  }
  func.func @transform_5(%arg0: i32) -> (i32, i32) {
    %c0_i32 = arith.constant 0 : i32
    %c0_i32_0 = arith.constant 0 : i32
    %c0_i32_1 = arith.constant 0 : i32
    return %c0_i32, %c0_i32_0 : i32, i32
  }
  func.func @transform_6(%arg0: i32) -> (i32, i32) {
    %c0_i32 = arith.constant 0 : i32
    %c0_i32_0 = arith.constant 0 : i32
    %c0_i32_1 = arith.constant 0 : i32
    return %c0_i32, %c0_i32_0 : i32, i32
  }
  func.func @transform_7(%arg0: i32) -> (i32, i32) {
    %c0_i32 = arith.constant 0 : i32
    %c0_i32_0 = arith.constant 0 : i32
    return %arg0, %c0_i32 : i32, i32
  }
}

</mosaic_0001>

<bundles_post_ra>
// kernel: tpu_custom_call.1
= control target key start
LH: loop header
LB: loop body
LE: loop exit
PB: predicated region body
PF: predicated region fallthrough
CT: control target
= control target key end

     0   :  { %s16220_s24 = smov 0   ;;  %s20234_s0 = inlined_call_operand.vmem [shape: f32[1024,32], index: 0, kind: input, shape index: {}]   ;;  %s20235_s1 = inlined_call_operand.vmem [shape: f32[32,96], index: 1, kind: input, shape index: {}]   ;;  %s20236_s2 = inlined_call_operand.vmem [shape: f32[1,96], index: 2, kind: input, shape index: {}]   ;;  %s20237_s3 = inlined_call_operand.vmem [shape: f32[16,64], index: 3, kind: input, shape index: {}]   ;;  %s20238_s4 = inlined_call_operand.vmem [shape: f32[4,32], index: 4, kind: input, shape index: {}]   ;;  %s20239_s5 = inlined_call_operand.vmem [shape: f32[32,32], index: 5, kind: input, shape index: {}]   ;;  %s20240_s6 = inlined_call_operand.vmem [shape: f32[1,32], index: 6, kind: input, shape index: {}]   ;;  %s20241_s7 = inlined_call_operand.vmem [shape: f32[1024,32], index: 7, kind: output, shape index: {}]  }
   0x1 LB: > { %s12064_s25 = sadd.s32 4294967295, %s16176_s24   ;;  %p12068_p0 = scmp.ge.s32.totalorder %s16176_s24, 1  ;;  %s16176_s24 = sphi %s16220_s24, %s17_s24  }
   0x2   : > { %p238_p1 = scmp.lt.s32.totalorder %s16176_s24, 3 }
   0x4   : > { %p239_p2 = pnand %p12068_p0, %p238_p1 }
   0x6   : > { %242 = sbr.rel (%p239_p2) target bundleno = 1774 (0x6ee), region = 48 }
   0xd   : > { %v346_v0 = vld [vmem:[%s20235_s1] sm:$0xff]  ;;  %v347_v1 = vld [vmem:[%s20235_s1 + $0x8] sm:$0xff]  ;;  %v348_v2 = vld [vmem:[%s20235_s1 + $0x10] sm:$0xff]  ;;  %s12069_s9 = sshll.u32 %s12064_s25, 6  ;;  %vm357_vm0 = vcmask 261120   ;;  %s16178_s20 = smov 96  }
   0xe   : > { %v14885_v3 = vpack.c.bf16 %v347_v1, %v346_v0  ;;  %v349_v4 = vld [vmem:[%s20235_s1 + $0x18] sm:$0xff]  ;;  %p271_p3 = scmp.lt.s32.totalorder %s12069_s9, 127  ;;  %vm16428_vm1 = vmpackc.low %vm357_vm0, %vm357_vm0  ;;  %s16179_s21 = smov 64   ;;  %vm4698_vm2 = vcmask 523264   ;;  %vm5601_vm3 = vcmask 130048  }
   0xf   : > { %v14889_v5 = vpack.c.bf16 %v349_v4, %v348_v2 }
  0x10   : > { %14886 = vmatprep.subr.bf16.mxu0 %v14885_v3  ;;  %s20467_s9 = smov (!%p271_p3, %s12069_s9), 127 }
  0x11   : > { %14888 = vmatpush3.bf16.msra.mxu0 %v14885_v3  ;;  %s12070_s12 = sshll.u32 %s20467_s9, 3 }
  0x12   : > { %14890 = vmatprep.subr.bf16.mxu0 %v14889_v5  ;;  %s16248_s15 = scalar_lea.vmem %s20234_s0, %s12070_s12  ;;  %s20033_s8 = scalar_lea.vmem %s20241_s7, %s12070_s12 }
  0x13   : > { %v282_v6 = vld [vmem:[%s16248_s15] sm:$0xff]  ;;  %v283_v7 = vld [vmem:[%s16248_s15 + $0x8] sm:$0xff]  ;;  %v284_v8 = vld [vmem:[%s16248_s15 + $0x10] sm:$0xff] }
  0x14   : > { %13565 = vmatprep.mubr.msk.f32.mxu0 %vm357_vm0, %v282_v6  ;;  %v285_v9 = vld [vmem:[%s16248_s15 + $0x18] sm:$0xff]  ;;  %v286_v10 = vld [vmem:[%s16248_s15 + $0x20] sm:$0xff]  ;;  %v287_v11 = vld [vmem:[%s16248_s15 + $0x28] sm:$0xff]  ;;  %v936_v6 = vlaneseq }
  0x15   : > { %14892 = vmatpush3.bf16.msra.mxu0 %v14889_v5  ;;  %v288_v12 = vld [vmem:[%s16248_s15 + $0x30] sm:$0xff]  ;;  %v289_v13 = vld [vmem:[%s16248_s15 + $0x38] sm:$0xff]  ;;  %v290_v14 = vld [vmem:[%s16248_s15 + $0x40] sm:$0xff] }
  0x16   : > { %v291_v15 = vld [vmem:[%s16248_s15 + $0x48] sm:$0xff]  ;;  %v292_v16 = vld [vmem:[%s16248_s15 + $0x50] sm:$0xff]  ;;  %v293_v17 = vld [vmem:[%s16248_s15 + $0x58] sm:$0xff] }
  0x17   : > { %v294_v18 = vld [vmem:[%s16248_s15 + $0x60] sm:$0xff]  ;;  %v295_v19 = vld [vmem:[%s16248_s15 + $0x68] sm:$0xff]  ;;  %v296_v20 = vld [vmem:[%s16248_s15 + $0x70] sm:$0xff] }
  0x18   : > { %13566 = vmatmul.mubr.msk.f32.vlgmr.msra.gmra.mrb[0].mxu0 %vm357_vm0, %v283_v7  ;;  %v297_v21 = vld [vmem:[%s16248_s15 + $0x78] sm:$0xff]  ;;  %v298_v22 = vld [vmem:[%s16248_s15 + $0x80] sm:$0xff]  ;;  %v299_v23 = vld [vmem:[%s16248_s15 + $0x88] sm:$0xff]  ;;  %v937_v7 = vshrl.u32 %v936_v6, 7 }
  0x19   : > { %13568 = vmatprep.mubr.msk.f32.mxu0 %vm357_vm0, %v284_v8  ;;  %v300_v24 = vld [vmem:[%s16248_s15 + $0x90] sm:$0xff]  ;;  %v301_v25 = vld [vmem:[%s16248_s15 + $0x98] sm:$0xff]  ;;  %v302_v26 = vld [vmem:[%s16248_s15 + $0xa0] sm:$0xff] }
  0x1a   : > { %v303_v27 = vld [vmem:[%s16248_s15 + $0xa8] sm:$0xff]  ;;  %v304_v28 = vld [vmem:[%s16248_s15 + $0xb0] sm:$0xff]  ;;  %v305_v29 = vld [vmem:[%s16248_s15 + $0xb8] sm:$0xff]  ;;  %v938_v8 = vsub.s32 0, %v937_v7 }
  0x1b   : > { %v306_v30 = vld [vmem:[%s16248_s15 + $0xc0] sm:$0xff]  ;;  %v307_v31 = vld [vmem:[%s16248_s15 + $0xc8] sm:$0xff]  ;;  %v308_v32 = vld [vmem:[%s16248_s15 + $0xd0] sm:$0xff] }
  0x1c   : > { %13569 = vmatmul.mubr.msk.f32.gmra.mrb[2].mxu0 %vm357_vm0, %v285_v9  ;;  %v309_v33 = vld [vmem:[%s16248_s15 + $0xd8] sm:$0xff]  ;;  %v310_v34 = vld [vmem:[%s16248_s15 + $0xe0] sm:$0xff]  ;;  %v311_v35 = vld [vmem:[%s16248_s15 + $0xe8] sm:$0xff]  ;;  %v1006_v9 = vsub.s32 1, %v937_v7 }
  0x1d   : > { %13571 = vmatprep.mubr.msk.f32.mxu0 %vm357_vm0, %v286_v10  ;;  %v312_v36 = vld [vmem:[%s16248_s15 + $0xf0] sm:$0xff]  ;;  %v313_v37 = vld [vmem:[%s16248_s15 + $0xf8] sm:$0xff]  ;;  %v314_v38 = vld [vmem:[%s16248_s15 + $0x100] sm:$0xff]  ;;  %v1074_v10 = vsub.s32 2, %v937_v7 }
  0x1e   : > { %v315_v39 = vld [vmem:[%s16248_s15 + $0x108] sm:$0xff]  ;;  %v316_v40 = vld [vmem:[%s16248_s15 + $0x110] sm:$0xff]  ;;  %v317_v41 = vld [vmem:[%s16248_s15 + $0x118] sm:$0xff] }
  0x1f   : > { %v318_v42 = vld [vmem:[%s16248_s15 + $0x120] sm:$0xff]  ;;  %v319_v43 = vld [vmem:[%s16248_s15 + $0x128] sm:$0xff]  ;;  %v320_v44 = vld [vmem:[%s16248_s15 + $0x130] sm:$0xff] }
  0x20   : > { %13572 = vmatmul.mubr.msk.f32.gmra.mrb[4].mxu0 %vm357_vm0, %v287_v11  ;;  %v321_v45 = vld [vmem:[%s16248_s15 + $0x138] sm:$0xff]  ;;  %v322_v46 = vld [vmem:[%s16248_s15 + $0x140] sm:$0xff]  ;;  %v323_v47 = vld [vmem:[%s16248_s15 + $0x148] sm:$0xff]  ;;  %v1142_v11 = vsub.s32 3, %v937_v7 }
  0x21   : > { %13574 = vmatprep.mubr.msk.f32.mxu0 %vm357_vm0, %v288_v12  ;;  %v324_v48 = vld [vmem:[%s16248_s15 + $0x150] sm:$0xff]  ;;  %v325_v49 = vld [vmem:[%s16248_s15 + $0x158] sm:$0xff]  ;;  %v326_v50 = vld [vmem:[%s16248_s15 + $0x160] sm:$0xff] }
  0x22   : > { %v327_v51 = vld [vmem:[%s16248_s15 + $0x168] sm:$0xff]  ;;  %v328_v52 = vld [vmem:[%s16248_s15 + $0x170] sm:$0xff]  ;;  %v329_v53 = vld [vmem:[%s16248_s15 + $0x178] sm:$0xff] }
  0x23   : > { %v330_v54 = vld [vmem:[%s16248_s15 + $0x180] sm:$0xff]  ;;  %v331_v55 = vld [vmem:[%s16248_s15 + $0x188] sm:$0xff]  ;;  %v332_v56 = vld [vmem:[%s16248_s15 + $0x190] sm:$0xff] }
  0x24   : > { %13575 = vmatmul.mubr.msk.f32.gmra.mrb[6].mxu0 %vm357_vm0, %v289_v13  ;;  %v333_v57 = vld [vmem:[%s16248_s15 + $0x198] sm:$0xff]  ;;  %v334_v58 = vld [vmem:[%s16248_s15 + $0x1a0] sm:$0xff]  ;;  %v335_v59 = vld [vmem:[%s16248_s15 + $0x1a8] sm:$0xff] }
  0x25   : > { %13577 = vmatprep.mubr.msk.f32.mxu0 %vm357_vm0, %v290_v14  ;;  %v336_v60 = vld [vmem:[%s16248_s15 + $0x1b0] sm:$0xff]  ;;  %v337_v61 = vld [vmem:[%s16248_s15 + $0x1b8] sm:$0xff]  ;;  %v338_v62 = vld [vmem:[%s16248_s15 + $0x1c0] sm:$0xff] }
  0x26   : > { %v339_v63 = vld [vmem:[%s16248_s15 + $0x1c8] sm:$0xff]  ;;  %v340_v0 = vld [vmem:[%s16248_s15 + $0x1d0] sm:$0xff]  ;;  %v341_v1 = vld [vmem:[%s16248_s15 + $0x1d8] sm:$0xff] }
  0x27   : > { %v342_v2 = vld [vmem:[%s16248_s15 + $0x1e0] sm:$0xff]  ;;  %v343_v3 = vld [vmem:[%s16248_s15 + $0x1e8] sm:$0xff]  ;;  %v344_v4 = vld [vmem:[%s16248_s15 + $0x1f0] sm:$0xff] }
  0x28   : > { %13578 = vmatmul.mubr.msk.f32.gmra.mrb[8].mxu0 %vm357_vm0, %v291_v15  ;;  %v345_v5 = vld [vmem:[%s16248_s15 + $0x1f8] sm:$0xff]  ;;  %v935_v12 = vld [vmem:[%s20238_s4] sm:$0xf] }
  0x29   : > { %13580 = vmatprep.mubr.msk.f32.mxu0 %vm357_vm0, %v292_v16  ;;  %v16384_v13 = vld [vmem:[%s20236_s2] ss:$0 sm:$0xff]  ;;  %v16386_v14 = vrot.slane %v935_v12, %v938_v8  ;;  %v16388_v15 = vrot.slane %v935_v12, %v1006_v9  ;;  %v16390_v16 = vrot.slane %v935_v12, %v1074_v10 }
  0x2b   : > { %20322 = vst [vmem:[#allocation2_spill] sm:$0xff] %v16386_v14  ;;  %20323 = vst [vmem:[#allocation3_spill] sm:$0xff] %v16388_v15 }
  0x2c   : > { %13581 = vmatmul.mubr.msk.f32.gmra.mrb[10].mxu0 %vm357_vm0, %v293_v17  ;;  %20324 = vst [vmem:[#allocation4_spill] sm:$0xff] %v16390_v16  ;;  %v16392_v17 = vrot.slane %v935_v12, %v1142_v11 }
  0x2d   : > { %13583 = vmatprep.mubr.msk.f32.mxu0 %vm357_vm0, %v294_v18 }
  0x2e   : > { %20325 = vst [vmem:[#allocation5_spill] sm:$0xff] %v16392_v17 }
  0x30   : > { %13584 = vmatmul.mubr.msk.f32.gmra.mrb[12].mxu0 %vm357_vm0, %v295_v19 }
  0x31   : > { %13586 = vmatprep.mubr.msk.f32.mxu0 %vm357_vm0, %v296_v20 }
  0x34   : > { %13587 = vmatmul.mubr.msk.f32.gmra.mrb[14].mxu0 %vm357_vm0, %v297_v21 }
  0x35   : > { %13589 = vmatprep.mubr.msk.f32.mxu0 %vm357_vm0, %v298_v22 }
  0x38   : > { %13590 = vmatmul.mubr.msk.f32.gmra.mrb[16].mxu0 %vm357_vm0, %v299_v23 }
  0x39   : > { %13592 = vmatprep.mubr.msk.f32.mxu0 %vm357_vm0, %v300_v24 }
  0x3c   : > { %13593 = vmatmul.mubr.msk.f32.gmra.mrb[18].mxu0 %vm357_vm0, %v301_v25 }
  0x3d   : > { %13595 = vmatprep.mubr.msk.f32.mxu0 %vm357_vm0, %v302_v26 }
  0x40   : > { %13596 = vmatmul.mubr.msk.f32.gmra.mrb[20].mxu0 %vm357_vm0, %v303_v27 }
  0x41   : > { %13598 = vmatprep.mubr.msk.f32.mxu0 %vm357_vm0, %v304_v28 }
  0x44   : > { %13599 = vmatmul.mubr.msk.f32.gmra.mrb[22].mxu0 %vm357_vm0, %v305_v29 }
  0x45   : > { %13601 = vmatprep.mubr.msk.f32.mxu0 %vm357_vm0, %v306_v30 }
  0x48   : > { %13602 = vmatmul.mubr.msk.f32.gmra.mrb[24].mxu0 %vm357_vm0, %v307_v31 }
  0x49   : > { %13604 = vmatprep.mubr.msk.f32.mxu0 %vm357_vm0, %v308_v32 }
  0x4c   : > { %13605 = vmatmul.mubr.msk.f32.gmra.mrb[26].mxu0 %vm357_vm0, %v309_v33 }
  0x4d   : > { %13607 = vmatprep.mubr.msk.f32.mxu0 %vm357_vm0, %v310_v34 }
  0x50   : > { %13608 = vmatmul.mubr.msk.f32.gmra.mrb[28].mxu0 %vm357_vm0, %v311_v35 }
  0x51   : > { %13610 = vmatprep.mubr.msk.f32.mxu0 %vm357_vm0, %v312_v36 }
  0x54   : > { %13611 = vmatmul.mubr.msk.f32.gmra.mrb[30].mxu0 %vm357_vm0, %v313_v37 }
  0x55   : > { %13613 = vmatprep.mubr.msk.f32.mxu0 %vm357_vm0, %v314_v38 }
  0x58   : > { %13614 = vmatmul.mubr.msk.f32.gmra.mrb[32].mxu0 %vm357_vm0, %v315_v39 }
  0x59   : > { %13616 = vmatprep.mubr.msk.f32.mxu0 %vm357_vm0, %v316_v40 }
  0x5c   : > { %13617 = vmatmul.mubr.msk.f32.gmra.mrb[34].mxu0 %vm357_vm0, %v317_v41 }
  0x5d   : > { %13619 = vmatprep.mubr.msk.f32.mxu0 %vm357_vm0, %v318_v42 }
  0x60   : > { %13620 = vmatmul.mubr.msk.f32.gmra.mrb[36].mxu0 %vm357_vm0, %v319_v43 }
  0x61   : > { %13622 = vmatprep.mubr.msk.f32.mxu0 %vm357_vm0, %v320_v44 }
  0x64   : > { %13623 = vmatmul.mubr.msk.f32.gmra.mrb[38].mxu0 %vm357_vm0, %v321_v45 }
  0x65   : > { %13625 = vmatprep.mubr.msk.f32.mxu0 %vm357_vm0, %v322_v46 }
  0x68   : > { %13626 = vmatmul.mubr.msk.f32.gmra.mrb[40].mxu0 %vm357_vm0, %v323_v47 }
  0x69   : > { %13628 = vmatprep.mubr.msk.f32.mxu0 %vm357_vm0, %v324_v48 }
  0x6c   : > { %13629 = vmatmul.mubr.msk.f32.gmra.mrb[42].mxu0 %vm357_vm0, %v325_v49 }
  0x6d   : > { %13631 = vmatprep.mubr.msk.f32.mxu0 %vm357_vm0, %v326_v50 }
  0x70   : > { %13632 = vmatmul.mubr.msk.f32.gmra.mrb[44].mxu0 %vm357_vm0, %v327_v51 }
  0x71   : > { %13634 = vmatprep.mubr.msk.f32.mxu0 %vm357_vm0, %v328_v52 }
  0x74   : > { %13635 = vmatmul.mubr.msk.f32.gmra.mrb[46].mxu0 %vm357_vm0, %v329_v53 }
  0x75   : > { %13637 = vmatprep.mubr.msk.f32.mxu0 %vm357_vm0, %v330_v54 }
  0x78   : > { %13638 = vmatmul.mubr.msk.f32.gmra.mrb[48].mxu0 %vm357_vm0, %v331_v55 }
  0x79   : > { %13640 = vmatprep.mubr.msk.f32.mxu0 %vm357_vm0, %v332_v56 }
  0x7c   : > { %13641 = vmatmul.mubr.msk.f32.gmra.mrb[50].mxu0 %vm357_vm0, %v333_v57 }
  0x7d   : > { %13643 = vmatprep.mubr.msk.f32.mxu0 %vm357_vm0, %v334_v58 }
  0x80   : > { %13644 = vmatmul.mubr.msk.f32.gmra.mrb[52].mxu0 %vm357_vm0, %v335_v59 }
  0x81   : > { %13646 = vmatprep.mubr.msk.f32.mxu0 %vm357_vm0, %v336_v60 }
  0x84   : > { %13647 = vmatmul.mubr.msk.f32.gmra.mrb[54].mxu0 %vm357_vm0, %v337_v61 }
  0x85   : > { %13649 = vmatprep.mubr.msk.f32.mxu0 %vm357_vm0, %v338_v62 }
  0x88   : > { %13650 = vmatmul.mubr.msk.f32.gmra.mrb[56].mxu0 %vm357_vm0, %v339_v63 }
  0x89   : > { %13652 = vmatprep.mubr.msk.f32.mxu0 %vm357_vm0, %v340_v0 }
  0x8c   : > { %13653 = vmatmul.mubr.msk.f32.gmra.mrb[58].mxu0 %vm357_vm0, %v341_v1 }
  0x8d   : > { %13655 = vmatprep.mubr.msk.f32.mxu0 %vm357_vm0, %v342_v2 }
  0x90   : > { %13656 = vmatmul.mubr.msk.f32.gmra.mrb[60].mxu0 %vm357_vm0, %v343_v3 }
  0x91   : > { %13658 = vmatprep.mubr.msk.f32.mxu0 %vm357_vm0, %v344_v4 }
  0x94   : > { %13659 = vmatmul.mubr.msk.f32.gmra.mrb[62].mxu0 %vm357_vm0, %v345_v5 }
  0xeb   : > { %v13567_v18 = vpop.f32.mrb[0].mxu0 }
  0xec   : > { %v16395_v19 = vadd.f32 %v13567_v18, %v16384_v13  ;;  %v616_v20 = vpop.f32.mrb[1].mxu0 }
  0xed   : > { %v16398_v21 = vadd.f32 %v16384_v13, %v616_v20 }
  0xee   : > { %v941_v22 = vmul.f32 %v16386_v14, %v16395_v19  ;;  %v1009_v23 = vmul.f32 %v16388_v15, %v16395_v19  ;;  %v1077_v24 = vmul.f32 %v16390_v16, %v16395_v19  ;;  %v1145_v25 = vmul.f32 %v16392_v17, %v16395_v19 }
  0xef   : > { %v13570_v26 = vpop.f32.mrb[2].mxu0  ;;  %1212 = vrot.lane.b32.xlu0 %v16398_v21, %s16178_s20  ;;  %v940_v27 = vmul.f32 %v16386_v14, %v16398_v21  ;;  %v1008_v28 = vmul.f32 %v16388_v15, %v16398_v21  ;;  %v1076_v29 = vmul.f32 %v16390_v16, %v16398_v21  ;;  %v1144_v30 = vmul.f32 %v16392_v17, %v16398_v21 }
  0xf0   : > { %v16419_v31 = vadd.f32 %v13570_v26, %v16384_v13  ;;  %v626_v32 = vpop.f32.mrb[3].mxu0 }
  0xf1   : > { %v16424_v34 = vadd.f32 %v16384_v13, %v626_v32  ;;  %v14893_v35 = vpack.c.bf16 %v941_v22, %v940_v27  ;;  %v14899_v37 = vpack.c.bf16 %v1009_v23, %v1008_v28  ;;  %v16432_v38 = vpack.c.bf16 %v1077_v24, %v1076_v29 }
  0xf2   : > { %v16434_v39 = vpack.c.bf16 %v1145_v25, %v1144_v30  ;;  %v943_v40 = vmul.f32 %v16386_v14, %v16419_v31  ;;  %v1011_v41 = vmul.f32 %v16388_v15, %v16419_v31  ;;  %v1079_v42 = vmul.f32 %v16390_v16, %v16419_v31 }
  0xf3   : > { %v13573_v43 = vpop.f32.mrb[4].mxu0  ;;  %1321 = vrot.lane.b32.xlu1 %v16424_v34, %s16178_s20  ;;  %1214 = vrot.lane.b32.xlu0 %v16395_v19, %s16178_s20  ;;  %v942_v44 = vmul.f32 %v16386_v14, %v16424_v34  ;;  %v1010_v46 = vmul.f32 %v16388_v15, %v16424_v34  ;;  %v1078_v49 = vmul.f32 %v16390_v16, %v16424_v34 }
  0xf4   : > { %v16453_v47 = vadd.f32 %v13573_v43, %v16384_v13  ;;  %14895 = vmatprep.subr.msk.bf16.mxu1 %vm16428_vm1, %v14893_v35  ;;  %v636_v48 = vpop.f32.mrb[5].mxu0  ;;  %v1146_v50 = vmul.f32 %v16392_v17, %v16424_v34  ;;  %v1147_v51 = vmul.f32 %v16392_v17, %v16419_v31 }
  0xf5   : > { %v16464_v52 = vadd.f32 %v16384_v13, %v636_v48  ;;  %14898 = vmatpush3.bf16.xpose.msk.msra.mxu1 %vm16428_vm1, %v14893_v35  ;;  %v16468_v53 = vpack.c.bf16 %v943_v40, %v942_v44  ;;  %v16470_v54 = vpack.c.bf16 %v1011_v41, %v1010_v46  ;;  %v16474_v55 = vpack.c.bf16 %v1079_v42, %v1078_v49 }
  0xf6   : > { %14901 = vmatprep.subr.msk.bf16.mxu1 %vm16428_vm1, %v14899_v37  ;;  %v16476_v56 = vpack.c.bf16 %v1147_v51, %v1146_v50  ;;  %v945_v57 = vmul.f32 %v16386_v14, %v16453_v47  ;;  %v1013_v58 = vmul.f32 %v16388_v15, %v16453_v47  ;;  %v1081_v2 = vmul.f32 %v16390_v16, %v16453_v47 }
  0xf7   : > { %v13576_v59 = vpop.f32.mrb[6].mxu0  ;;  %1323 = vrot.lane.b32.xlu1 %v16419_v31, %s16178_s20  ;;  %1430 = vrot.lane.b32.xlu0 %v16464_v52, %s16178_s20  ;;  %v944_v61 = vmul.f32 %v16386_v14, %v16464_v52  ;;  %v1012_v62 = vmul.f32 %v16388_v15, %v16464_v52  ;;  %v1080_v1 = vmul.f32 %v16390_v16, %v16464_v52 }
  0xf8   : > { %v16493_v63 = vadd.f32 %v13576_v59, %v16384_v13  ;;  %v646_v0 = vpop.f32.mrb[7].mxu0  ;;  %v1148_v3 = vmul.f32 %v16392_v17, %v16464_v52  ;;  %v1149_v7 = vmul.f32 %v16392_v17, %v16453_v47 }
  0xf9   : > { %v16502_v4 = vadd.f32 %v16384_v13, %v646_v0  ;;  %v16504_v5 = vpack.c.bf16 %v945_v57, %v944_v61  ;;  %v16506_v6 = vpack.c.bf16 %v1013_v58, %v1012_v62  ;;  %v16510_v8 = vpack.c.bf16 %v1081_v2, %v1080_v1 }
  0xfa   : > { %v947_v9 = vmul.f32 %v16386_v14, %v16493_v63  ;;  %v1015_v10 = vmul.f32 %v16388_v15, %v16493_v63  ;;  %v16522_v18 = vpack.c.bf16 %v1149_v7, %v1148_v3  ;;  %v1083_v26 = vmul.f32 %v16390_v16, %v16493_v63 }
  0xfb   : > { %v13579_v11 = vpop.f32.mrb[8].mxu0  ;;  %1432 = vrot.lane.b32.xlu1 %v16453_v47, %s16178_s20  ;;  %1539 = vrot.lane.b32.xlu0 %v16502_v4, %s16178_s20  ;;  %v946_v20 = vmul.f32 %v16386_v14, %v16502_v4  ;;  %v1014_v24 = vmul.f32 %v16388_v15, %v16502_v4  ;;  %v1082_v25 = vmul.f32 %v16390_v16, %v16502_v4 }
  0xfc   : > { %v16527_v22 = vadd.f32 %v13579_v11, %v16384_v13  ;;  %v656_v23 = vpop.f32.mrb[9].mxu0  ;;  %v1150_v29 = vmul.f32 %v16392_v17, %v16502_v4  ;;  %v1151_v30 = vmul.f32 %v16392_v17, %v16493_v63 }
  0xfd   : > { %v16536_v27 = vadd.f32 %v16384_v13, %v656_v23  ;;  %14904 = vmatpush3.bf16.xpose.msk.msra.mxu1 %vm16428_vm1, %v14899_v37  ;;  %v16540_v28 = vpack.c.bf16 %v947_v9, %v946_v20  ;;  %v16574_v51 = vpack.c.bf16 %v1015_v10, %v1014_v24  ;;  %v16583_v0 = vpack.c.bf16 %v1083_v26, %v1082_v25 }
  0xfe   : > { %14907 = vmatprep.subr.msk.bf16.mxu1 %vm16428_vm1, %v16432_v38  ;;  %v949_v32 = vmul.f32 %v16386_v14, %v16527_v22  ;;  %v1017_v35 = vmul.f32 %v16388_v15, %v16527_v22  ;;  %v1085_v37 = vmul.f32 %v16390_v16, %v16527_v22  ;;  %v1153_v40 = vmul.f32 %v16392_v17, %v16527_v22 }
  0xff   : > { %v13582_v41 = vpop.f32.mrb[10].mxu0  ;;  %1541 = vrot.lane.b32.xlu1 %v16493_v63, %s16178_s20  ;;  %1648 = vrot.lane.b32.xlu0 %v16536_v27, %s16178_s20  ;;  %v948_v42 = vmul.f32 %v16386_v14, %v16536_v27  ;;  %v1016_v43 = vmul.f32 %v16388_v15, %v16536_v27  ;;  %v1084_v44 = vmul.f32 %v16390_v16, %v16536_v27 }
 0x100   : > { %v16568_v46 = vadd.f32 %v13582_v41, %v16384_v13  ;;  %v666_v48 = vpop.f32.mrb[11].mxu0  ;;  %v1152_v50 = vmul.f32 %v16392_v17, %v16536_v27  ;;  %20328 = vst [vmem:[#allocation6_spill] sm:$0xff] %v16574_v51  ;;  %20329 = vst [vmem:[#allocation7_spill] sm:$0xff] %v16583_v0  ;;  %v16585_v1 = vpack.c.bf16 %v1151_v30, %v1150_v29 }
 0x101   : > { %v16577_v57 = vadd.f32 %v16384_v13, %v666_v48  ;;  %v14989_v58 = vpack.c.bf16 %v949_v32, %v948_v42  ;;  %v14995_v59 = vpack.c.bf16 %v1017_v35, %v1016_v43  ;;  %v16579_v61 = vpack.c.bf16 %v1085_v37, %v1084_v44 }
 0x102   : > { %v16581_v62 = vpack.c.bf16 %v1153_v40, %v1152_v50  ;;  %20330 = vst [vmem:[#allocation8_spill] sm:$0xff] %v16585_v1  ;;  %v951_v2 = vmul.f32 %v16386_v14, %v16568_v46  ;;  %v1019_v23 = vmul.f32 %v16388_v15, %v16568_v46  ;;  %v1087_v25 = vmul.f32 %v16390_v16, %v16568_v46 }
 0x103   : > { %v13585_v3 = vpop.f32.mrb[12].mxu0  ;;  %1650 = vrot.lane.b32.xlu1 %v16527_v22, %s16178_s20  ;;  %1757 = vrot.lane.b32.xlu0 %v16577_v57, %s16178_s20  ;;  %v950_v9 = vmul.f32 %v16386_v14, %v16577_v57  ;;  %v1018_v10 = vmul.f32 %v16388_v15, %v16577_v57  ;;  %v1086_v24 = vmul.f32 %v16390_v16, %v16577_v57 }
 0x104   : > { %v16600_v11 = vadd.f32 %v13585_v3, %v16384_v13  ;;  %v676_v20 = vpop.f32.mrb[13].mxu0  ;;  %14991 = vmatprep.subr.msk.bf16.mxu0 %vm16428_vm1, %v14989_v58  ;;  %v1154_v30 = vmul.f32 %v16392_v17, %v16577_v57 }
 0x105   : > { %v16611_v26 = vadd.f32 %v16384_v13, %v676_v20  ;;  %14910 = vmatpush3.bf16.xpose.msk.msra.mxu1 %vm16428_vm1, %v16432_v38  ;;  %14994 = vmatpush3.bf16.xpose.msk.msra.mxu0 %vm16428_vm1, %v14989_v58  ;;  %v16618_v29 = vpack.c.bf16 %v951_v2, %v950_v9  ;;  %v16648_v50 = vpack.c.bf16 %v1019_v23, %v1018_v10 }
 0x106   : > { %14913 = vmatprep.subr.msk.bf16.mxu1 %vm16428_vm1, %v16434_v39  ;;  %14997 = vmatprep.subr.msk.bf16.mxu0 %vm16428_vm1, %v14995_v59  ;;  %v953_v32 = vmul.f32 %v16386_v14, %v16600_v11  ;;  %v1021_v38 = vmul.f32 %v16388_v15, %v16600_v11  ;;  %v1089_v35 = vmul.f32 %v16390_v16, %v16600_v11 }
 0x107   : > { %20331 = vst [vmem:[#allocation9_spill] sm:$0xff] %v16618_v29  ;;  %v13588_v37 = vpop.f32.mrb[14].mxu0  ;;  %1759 = vrot.lane.b32.xlu1 %v16568_v46, %s16178_s20  ;;  %1866 = vrot.lane.b32.xlu0 %v16611_v26, %s16178_s20  ;;  %v952_v40 = vmul.f32 %v16386_v14, %v16611_v26  ;;  %v1020_v41 = vmul.f32 %v16388_v15, %v16611_v26  ;;  %20332 = vst [vmem:[#allocation10_spill] sm:$0xff] %v16648_v50 }
 0x108   : > { %v16644_v43 = vadd.f32 %v13588_v37, %v16384_v13  ;;  %v686_v44 = vpop.f32.mrb[15].mxu0  ;;  %v1088_v48 = vmul.f32 %v16390_v16, %v16611_v26  ;;  %v16650_v58 = vpack.c.bf16 %v1087_v25, %v1086_v24  ;;  %v1155_v20 = vmul.f32 %v16392_v17, %v16568_v46 }
 0x109   : > { %v16653_v2 = vadd.f32 %v16384_v13, %v686_v44  ;;  %v16655_v3 = vpack.c.bf16 %v953_v32, %v952_v40  ;;  %v16657_v9 = vpack.c.bf16 %v1021_v38, %v1020_v41  ;;  %v1156_v42 = vmul.f32 %v16392_v17, %v16611_v26 }
 0x10a   : > { %20333 = vst [vmem:[#allocation11_spill] sm:$0xff] %v16650_v58  ;;  %v16661_v37 = vpack.c.bf16 %v1089_v35, %v1088_v48  ;;  %v1157_v10 = vmul.f32 %v16392_v17, %v16600_v11  ;;  %v16673_v25 = vpack.c.bf16 %v1155_v20, %v1154_v30  ;;  %v955_v48 = vmul.f32 %v16386_v14, %v16644_v43 }
 0x10b   : > { %v13591_v23 = vpop.f32.mrb[16].mxu0  ;;  %1868 = vrot.lane.b32.xlu1 %v16600_v11, %s16178_s20  ;;  %1975 = vrot.lane.b32.xlu0 %v16653_v2, %s16178_s20  ;;  %v954_v44 = vmul.f32 %v16386_v14, %v16653_v2  ;;  %v1022_v20 = vmul.f32 %v16388_v15, %v16653_v2  ;;  %v1091_v24 = vmul.f32 %v16390_v16, %v16644_v43 }
 0x10c   : > { %20334 = vst [vmem:[#allocation12_spill] sm:$0xff] %v16673_v25  ;;  %v696_v32 = vpop.f32.mrb[17].mxu0  ;;  %v16675_v38 = vpack.c.bf16 %v1157_v10, %v1156_v42  ;;  %v16678_v35 = vadd.f32 %v13591_v23, %v16384_v13  ;;  %v1158_v49 = vmul.f32 %v16392_v17, %v16653_v2  ;;  %v1159_v33 = vmul.f32 %v16392_v17, %v16644_v43 }
 0x10d   : > { %v16681_v40 = vadd.f32 %v16384_v13, %v696_v32  ;;  %14916 = vmatpush3.bf16.xpose.msk.msra.mxu1 %vm16428_vm1, %v16434_v39  ;;  %15000 = vmatpush3.bf16.xpose.msk.msra.mxu0 %vm16428_vm1, %v14995_v59  ;;  %v1023_v32 = vmul.f32 %v16388_v15, %v16644_v43  ;;  %v16724_v39 = vpack.c.bf16 %v955_v48, %v954_v44 }
 0x10e   : > { %14919 = vmatprep.subr.msk.bf16.mxu1 %vm16428_vm1, %v16468_v53  ;;  %15003 = vmatprep.subr.msk.bf16.mxu0 %vm16428_vm1, %v16579_v61  ;;  %v957_v23 = vmul.f32 %v16386_v14, %v16678_v35  ;;  %v16747_v48 = vpack.c.bf16 %v1159_v33, %v1158_v49  ;;  %v1025_v33 = vmul.f32 %v16388_v15, %v16678_v35 }
 0x10f   : > { %v13594_v30 = vpop.f32.mrb[18].mxu0  ;;  %1977 = vrot.lane.b32.xlu1 %v16644_v43, %s16178_s20  ;;  %2084 = vrot.lane.b32.xlu0 %v16681_v40, %s16178_s20  ;;  %v956_v10 = vmul.f32 %v16386_v14, %v16681_v40  ;;  %20335 = vst [vmem:[#allocation13_spill] sm:$0xff] %v16724_v39  ;;  %v16732_v7 = vpack.c.bf16 %v1023_v32, %v1022_v20 }
 0x110   : > { %v16701_v59 = vadd.f32 %v13594_v30, %v16384_v13  ;;  %v706_v41 = vpop.f32.mrb[19].mxu0  ;;  %v1090_v30 = vmul.f32 %v16390_v16, %v16653_v2  ;;  %20338 = vst [vmem:[#allocation16_spill] sm:$0xff] %v16747_v48  ;;  %v1160_v25 = vmul.f32 %v16392_v17, %v16681_v40  ;;  %v1161_v58 = vmul.f32 %v16392_v17, %v16678_v35 }
 0x111   : > { %v16704_v42 = vadd.f32 %v16384_v13, %v706_v41  ;;  %v16730_v60 = vpack.c.bf16 %v957_v23, %v956_v10  ;;  %20336 = vst [vmem:[#allocation14_spill] sm:$0xff] %v16732_v7  ;;  %v20346_v29 = vpack.i.bf16 %v16493_v63, %v16502_v4  ;;  %v20351_v63 = vpack.i.bf16 %v16527_v22, %v16536_v27 }
 0x112   : > { %v16742_v44 = vpack.c.bf16 %v1091_v24, %v1090_v30  ;;  %v1024_v24 = vmul.f32 %v16388_v15, %v16681_v40  ;;  %v16814_v50 = vpack.c.bf16 %v1161_v58, %v1160_v25  ;;  %v20344_v58 = vpack.i.bf16 %v16453_v47, %v16464_v52 }
 0x113   : > { %v13597_v41 = vpop.f32.mrb[20].mxu0  ;;  %2086 = vrot.lane.b32.xlu1 %v16678_v35, %s16178_s20  ;;  %2193 = vrot.lane.b32.xlu0 %v16704_v42, %s16178_s20  ;;  %v958_v47 = vmul.f32 %v16386_v14, %v16704_v42  ;;  %v959_v52 = vmul.f32 %v16386_v14, %v16701_v59  ;;  %v20352_v4 = vpack.i.bf16 %v16644_v43, %v16653_v2 }
 0x114   : > { %v716_v12 = vpop.f32.mrb[21].mxu0  ;;  %20337 = vst [vmem:[#allocation15_spill] sm:$0xff] %v16742_v44  ;;  %v16750_v20 = vadd.f32 %v13597_v41, %v16384_v13  ;;  %v16770_v30 = vpack.c.bf16 %v1025_v33, %v1024_v24  ;;  %20341 = vst [vmem:[#allocation18_spill] sm:$0xff] %v16814_v50  ;;  %v20354_v2 = vpack.i.bf16 %v16600_v11, %v16611_v26 }
 0x115   : > { %v16737_v45 = vadd.f32 %v16384_v13, %v716_v12  ;;  %15006 = vmatpush3.bf16.xpose.msk.msra.mxu0 %vm16428_vm1, %v16579_v61 }
 0x116   : > { %15009 = vmatprep.subr.msk.bf16.mxu0 %vm16428_vm1, %v16581_v62  ;;  %v1097_v11 = vmul.f32 %v16390_v16, %v16750_v20 }
 0x117   : > { %v13600_v10 = vpop.f32.mrb[22].mxu0  ;;  %2195 = vrot.lane.b32.xlu1 %v16701_v59, %s16178_s20  ;;  %2302 = vrot.lane.b32.xlu0 %v16737_v45, %s16178_s20 }
 0x118   : > { %v726_v12 = vpop.f32.mrb[23].mxu0  ;;  %v16764_v49 = vadd.f32 %v13600_v10, %v16384_v13 }
 0x119   : > { %v16757_v61 = vadd.f32 %v16384_v13, %v726_v12 }
 0x11b   : > { %v13603_v23 = vpop.f32.mrb[24].mxu0  ;;  %2304 = vrot.lane.b32.xlu1 %v16750_v20, %s16178_s20  ;;  %2411 = vrot.lane.b32.xlu0 %v16757_v61, %s16178_s20 }
 0x11c   : > { %v736_v32 = vpop.f32.mrb[25].mxu0  ;;  %v16782_v10 = vadd.f32 %v13603_v23, %v16384_v13 }
 0x11d   : > { %v16773_v41 = vadd.f32 %v16384_v13, %v736_v32  ;;  %15012 = vmatpush3.bf16.xpose.msk.msra.mxu0 %vm16428_vm1, %v16581_v62  ;;  %v1092_v62 = vmul.f32 %v16390_v16, %v16681_v40  ;;  %v1093_v32 = vmul.f32 %v16390_v16, %v16678_v35 }
 0x11e   : > { %15039 = vmatprep.subr.msk.bf16.mxu0 %vm16428_vm1, %v16655_v3 }
 0x11f   : > { %v13606_v12 = vpop.f32.mrb[26].mxu0  ;;  %2413 = vrot.lane.b32.xlu1 %v16764_v49, %s16178_s20  ;;  %2520 = vrot.lane.b32.xlu0 %v16773_v41, %s16178_s20  ;;  %v16802_v7 = vpack.c.bf16 %v1093_v32, %v1092_v62  ;;  %v20342_v62 = vpack.i.bf16 %v16395_v19, %v16398_v21 }
 0x120   : > { %v746_v24 = vpop.f32.mrb[27].mxu0  ;;  %v16796_v23 = vadd.f32 %v13606_v12, %v16384_v13 }
 0x121   : > { %v16789_v33 = vadd.f32 %v16384_v13, %v746_v24  ;;  %20339 = vst [vmem:[#allocation17_spill] sm:$0xff] %v16802_v7  ;;  %v20340_v24 = vpack.i.bf16 %v16419_v31, %v16424_v34  ;;  %v20343_v31 = vpack.i.bf16 %v16568_v46, %v16577_v57  ;;  %v960_v57 = vmul.f32 %v16386_v14, %v16737_v45 }
 0x122   : > { %v1095_v46 = vmul.f32 %v16390_v16, %v16701_v59 }
 0x123   : > { %2522 = vrot.lane.b32.xlu1 %v16782_v10, %s16178_s20  ;;  %2629 = vrot.lane.b32.xlu0 %v16789_v33, %s16178_s20  ;;  %v13609_v48 = vpop.f32.mrb[28].mxu0 }
 0x124   : > { %v756_v44 = vpop.f32.mrb[29].mxu0  ;;  %v16892_v22 = vadd.f32 %v13609_v48, %v16384_v13 }
 0x125   : > { %v16825_v34 = vadd.f32 %v16384_v13, %v756_v44  ;;  %v961_v44 = vmul.f32 %v16386_v14, %v16750_v20 }
 0x127   : > { %2631 = vrot.lane.b32.xlu1 %v16796_v23, %s16178_s20  ;;  %15818 = vrot.lane.b32.xlu0 %v20340_v24, %s16179_s21  ;;  %v13612_v12 = vpop.f32.mrb[30].mxu0 }
 0x128   : > { %v766_v39 = vpop.f32.mrb[31].mxu0 }
 0x129   : > { %v16834_v19 = vadd.f32 %v16384_v13, %v766_v39  ;;  %v1026_v39 = vmul.f32 %v16388_v15, %v16704_v42 }
 0x12b   : > { %15813 = vrot.lane.b32.xlu1 %v20342_v62, %s16179_s21  ;;  %15838 = vrot.lane.b32.xlu0 %v20343_v31, %s16179_s21  ;;  %v13615_v32 = vpop.f32.mrb[32].mxu0  ;;  %v16848_v62 = vpack.c.bf16 %v961_v44, %v960_v57  ;;  %v1027_v31 = vmul.f32 %v16388_v15, %v16701_v59  ;;  %v16862_v57 = vpack.c.bf16 %v959_v52, %v958_v47 }
 0x12c   : > { %v776_v24 = vpop.f32.mrb[33].mxu0  ;;  %v1162_v44 = vmul.f32 %v16392_v17, %v16704_v42 }
 0x12d   : > { %20345 = vst [vmem:[#allocation19_spill] sm:$0xff] %v16848_v62  ;;  %20347 = vst [vmem:[#allocation20_spill] sm:$0xff] %v16862_v57  ;;  %v1163_v62 = vmul.f32 %v16392_v17, %v16701_v59  ;;  %v16868_v50 = vpack.c.bf16 %v1027_v31, %v1026_v39  ;;  %v1029_v39 = vmul.f32 %v16388_v15, %v16750_v20 }
 0x12e   : > { %v16904_v31 = vadd.f32 %v13612_v12, %v16384_v13 }
 0x12f   : > { %15823 = vrot.lane.b32.xlu1 %v20344_v58, %s16179_s21  ;;  %2738 = vrot.lane.b32.xlu0 %v16825_v34, %s16178_s20  ;;  %v13618_v21 = vpop.f32.mrb[34].mxu0  ;;  %v1094_v58 = vmul.f32 %v16390_v16, %v16704_v42  ;;  %20348 = vst [vmem:[#allocation21_spill] sm:$0xff] %v16868_v50  ;;  %v16872_v7 = vpack.c.bf16 %v1163_v62, %v1162_v44 }
 0x130   : > { %v786_v25 = vpop.f32.mrb[35].mxu0  ;;  %v1096_v44 = vmul.f32 %v16390_v16, %v16737_v45  ;;  %v963_v50 = vmul.f32 %v16386_v14, %v16764_v49 }
 0x131   : > { %v16870_v51 = vpack.c.bf16 %v1095_v46, %v1094_v58  ;;  %20350 = vst [vmem:[#allocation23_spill] sm:$0xff] %v16872_v7  ;;  %v1028_v46 = vmul.f32 %v16388_v15, %v16737_v45  ;;  %v16897_v27 = vadd.f32 %v16384_v13, %v786_v25 }
 0x133   : > { %15828 = vrot.lane.b32.xlu1 %v20346_v29, %s16179_s21  ;;  %2847 = vrot.lane.b32.xlu0 %v16834_v19, %s16178_s20  ;;  %v13621_v1 = vpop.f32.mrb[36].mxu0  ;;  %20349 = vst [vmem:[#allocation22_spill] sm:$0xff] %v16870_v51  ;;  %v16883_v29 = vadd.f32 %v16384_v13, %v776_v24  ;;  %v16889_v62 = vpack.c.bf16 %v1029_v39, %v1028_v46 }
 0x134   : > { %v796_v0 = vpop.f32.mrb[37].mxu0  ;;  %v16961_v51 = vadd.f32 %v13621_v1, %v16384_v13  ;;  %v962_v1 = vmul.f32 %v16386_v14, %v16757_v61 }
 0x135   : > { %20353 = vst [vmem:[#allocation24_spill] sm:$0xff] %v16889_v62  ;;  %v16909_v48 = vadd.f32 %v16384_v13, %v796_v0 }
 0x136   : > { %v16996_v14 = vpack.c.bf16 %v963_v50, %v962_v1 }
 0x137   : > { %15833 = vrot.lane.b32.xlu1 %v20351_v63, %s16179_s21  ;;  %15848 = vrot.lane.b32.xlu0 %v20352_v4, %s16179_s21  ;;  %v13624_v47 = vpop.f32.mrb[38].mxu0  ;;  %v16924_v63 = vpack.c.bf16 %v1097_v11, %v1096_v44  ;;  %v16927_v4 = vadd.f32 %v13615_v32, %v16384_v13  ;;  %v1164_v44 = vmul.f32 %v16392_v17, %v16737_v45 }
 0x138   : > { %v806_v52 = vpop.f32.mrb[39].mxu0  ;;  %v1165_v32 = vmul.f32 %v16392_v17, %v16750_v20  ;;  %v16975_v11 = vadd.f32 %v13624_v47, %v16384_v13  ;;  %v1099_v47 = vmul.f32 %v16390_v16, %v16764_v49  ;;  %20361 = vst [vmem:[#allocation30_spill] sm:$0xff] %v16996_v14 }
 0x139   : > { %v16920_v26 = vadd.f32 %v16384_v13, %v806_v52  ;;  %20355 = vst [vmem:[#allocation25_spill] sm:$0xff] %v16924_v63  ;;  %v20357_v52 = vpack.i.bf16 %v16678_v35, %v16681_v40 }
 0x13a   : > { %v16946_v7 = vpack.c.bf16 %v1165_v32, %v1164_v44  ;;  %v1098_v32 = vmul.f32 %v16390_v16, %v16757_v61 }
 0x13b   : > { %2956 = vrot.lane.b32.xlu0 %v16883_v29, %s16178_s20  ;;  %v13627_v43 = vpop.f32.mrb[40].mxu0  ;;  %15843 = vrot.lane.b32.xlu1 %v20354_v2, %s16179_s21 }
 0x13c   : > { %v816_v24 = vpop.f32.mrb[41].mxu0  ;;  %20358 = vst [vmem:[#allocation27_spill] sm:$0xff] %v16946_v7  ;;  %v1031_v7 = vmul.f32 %v16388_v15, %v16764_v49  ;;  %v17004_v62 = vpack.c.bf16 %v1099_v47, %v1098_v32 }
 0x13d   : > { %v16932_v46 = vadd.f32 %v16384_v13, %v816_v24  ;;  %v16949_v24 = vadd.f32 %v13618_v21, %v16384_v13 }
 0x13e   : > { %20363 = vst [vmem:[#allocation32_spill] sm:$0xff] %v17004_v62 }
 0x13f   : > { %3065 = vrot.lane.b32.xlu0 %v16897_v27, %s16178_s20  ;;  %v13630_v58 = vpop.f32.mrb[42].mxu0  ;;  %2740 = vrot.lane.b32.xlu1 %v16892_v22, %s16178_s20  ;;  %20356 = vst [vmem:[#allocation26_spill] sm:$0xff] %v16932_v46 }
 0x140   : > { %v826_v25 = vpop.f32.mrb[43].mxu0 }
 0x141   : > { %v16954_v35 = vadd.f32 %v16384_v13, %v826_v25 }
 0x143   : > { %3174 = vrot.lane.b32.xlu0 %v16909_v48, %s16178_s20  ;;  %v13633_v12 = vpop.f32.mrb[44].mxu0  ;;  %2849 = vrot.lane.b32.xlu1 %v16904_v31, %s16178_s20  ;;  %20359 = vst [vmem:[#allocation28_spill] sm:$0xff] %v16954_v35 }
 0x144   : > { %v836_v0 = vpop.f32.mrb[45].mxu0  ;;  %v17029_v32 = vadd.f32 %v13633_v12, %v16384_v13 }
 0x145   : > { %v16966_v21 = vadd.f32 %v16384_v13, %v836_v0  ;;  %v1030_v0 = vmul.f32 %v16388_v15, %v16757_v61  ;;  %v1167_v15 = vmul.f32 %v16392_v17, %v16764_v49 }
 0x147   : > { %3283 = vrot.lane.b32.xlu0 %v16920_v26, %s16178_s20  ;;  %v16934_v39 = vpop.f32.mrb[46].mxu0  ;;  %15853 = vrot.lane.b32.xlu1 %v20357_v52, %s16179_s21  ;;  %20360 = vst [vmem:[#allocation29_spill] sm:$0xff] %v16966_v21 }
 0x148   : > { %v846_v2 = vpop.f32.mrb[47].mxu0 }
 0x149   : > { %v16984_v57 = vadd.f32 %v16384_v13, %v846_v2  ;;  %v1166_v2 = vmul.f32 %v16392_v17, %v16757_v61 }
 0x14b   : > { %3392 = vrot.lane.b32.xlu0 %v16932_v46, %s16178_s20  ;;  %v16956_v40 = vpop.f32.mrb[48].mxu0  ;;  %2958 = vrot.lane.b32.xlu1 %v16927_v4, %s16178_s20  ;;  %v17002_v46 = vpack.c.bf16 %v1031_v7, %v1030_v0  ;;  %v17006_v16 = vpack.c.bf16 %v1167_v15, %v1166_v2  ;;  %v17019_v7 = vadd.f32 %v13630_v58, %v16384_v13 }
 0x14c   : > { %v856_v52 = vpop.f32.mrb[49].mxu0 }
 0x14d   : > { %20362 = vst [vmem:[#allocation31_spill] sm:$0xff] %v17002_v46  ;;  %20364 = vst [vmem:[#allocation33_spill] sm:$0xff] %v17006_v16  ;;  %v17014_v50 = vadd.f32 %v16384_v13, %v856_v52  ;;  %v17048_v46 = vadd.f32 %v16934_v39, %v16384_v13 }
 0x14f   : > { %3501 = vrot.lane.b32.xlu0 %v16954_v35, %s16178_s20  ;;  %v16968_v44 = vpop.f32.mrb[50].mxu0  ;;  %3067 = vrot.lane.b32.xlu1 %v16949_v24, %s16178_s20 }
 0x150   : > { %v866_v25 = vpop.f32.mrb[51].mxu0 }
 0x151   : > { %v17024_v15 = vadd.f32 %v16384_v13, %v866_v25 }
 0x153   : > { %3610 = vrot.lane.b32.xlu0 %v16966_v21, %s16178_s20  ;;  %v13645_v63 = vpop.f32.mrb[52].mxu0  ;;  %3176 = vrot.lane.b32.xlu1 %v16961_v51, %s16178_s20  ;;  %v17009_v21 = vadd.f32 %v13627_v43, %v16384_v13  ;;  %20365 = vst [vmem:[#allocation34_spill] sm:$0xff] %v17024_v15 }
 0x154   : > { %v876_v35 = vpop.f32.mrb[53].mxu0 }
 0x155   : > { %v17034_v58 = vadd.f32 %v16384_v13, %v876_v35 }
 0x157   : > { %3719 = vrot.lane.b32.xlu0 %v16984_v57, %s16178_s20  ;;  %v13648_v1 = vpop.f32.mrb[54].mxu0  ;;  %3285 = vrot.lane.b32.xlu1 %v16975_v11, %s16178_s20  ;;  %20366 = vst [vmem:[#allocation35_spill] sm:$0xff] %v17034_v58 }
 0x158   : > { %v886_v14 = vpop.f32.mrb[55].mxu0 }
 0x159   : > { %v17044_v12 = vadd.f32 %v16384_v13, %v886_v14 }
 0x15b   : > { %3828 = vrot.lane.b32.xlu0 %v17014_v50, %s16178_s20  ;;  %v13651_v43 = vpop.f32.mrb[56].mxu0  ;;  %3394 = vrot.lane.b32.xlu1 %v17009_v21, %s16178_s20  ;;  %20367 = vst [vmem:[#allocation36_spill] sm:$0xff] %v17044_v12 }
 0x15c   : > { %v896_v52 = vpop.f32.mrb[57].mxu0 }
 0x15d   : > { %v17061_v14 = vadd.f32 %v16384_v13, %v896_v52 }
 0x15f   : > { %3937 = vrot.lane.b32.xlu0 %v17024_v15, %s16178_s20  ;;  %v13654_v0 = vpop.f32.mrb[58].mxu0  ;;  %3503 = vrot.lane.b32.xlu1 %v17019_v7, %s16178_s20  ;;  %20368 = vst [vmem:[#allocation37_spill] sm:$0xff] %v17061_v14 }
 0x160   : > { %v906_v25 = vpop.f32.mrb[59].mxu0 }
 0x161   : > { %v1213_v47 = vpop.permute.xlu0 %1212 }
 0x162   : > { %13677 = vmatprep.mubr.msk.f32.mxu1 %vm357_vm0, %v1213_v47 }
 0x163   : > { %4046 = vrot.lane.b32.xlu0 %v17034_v58, %s16178_s20  ;;  %v13657_v2 = vpop.f32.mrb[60].mxu0  ;;  %3612 = vrot.lane.b32.xlu1 %v17029_v32, %s16178_s20  ;;  %v17065_v58 = vadd.f32 %v16956_v40, %v16384_v13 }
 0x164   : > { %v916_v35 = vpop.f32.mrb[61].mxu0 }
 0x165   : > { %v1322_v16 = vpop.permute.xlu1 %1321  ;;  %v1215_v62 = vpop.permute.xlu0 %1214  ;;  %v17093_v40 = vadd.f32 %v16384_v13, %v916_v35  ;;  %v17108_v35 = vadd.f32 %v13648_v1, %v16384_v13  ;;  %v17129_v1 = vadd.f32 %v13651_v43, %v16384_v13  ;;  %v20381_v43 = vld [vmem:[#allocation19_spill] sm:$0xff] }
 0x166   : > { %13678 = vmatmul.mubr.msk.f32.vlgmr.msra.gmra.mrb[0].mxu1 %vm357_vm0, %v1215_v62 }
 0x167   : > { %14922 = vmatpush3.bf16.xpose.msk.msra.mxu1 %vm16428_vm1, %v16468_v53  ;;  %13696 = vmatprep.mubr.msk.f32.mxu1 %vm357_vm0, %v1322_v16  ;;  %v13660_v47 = vpop.f32.mrb[62].mxu0  ;;  %v17072_v16 = vadd.f32 %v16384_v13, %v906_v25  ;;  %20370 = vst [vmem:[#allocation39_spill] sm:$0xff] %v17108_v35 }
 0x168   : > { %14925 = vmatprep.subr.msk.bf16.mxu1 %vm16428_vm1, %v16470_v54  ;;  %4155 = vrot.lane.b32.xlu0 %v17044_v12, %s16178_s20  ;;  %v926_v39 = vpop.f32.mrb[63].mxu0  ;;  %v17080_v12 = vadd.f32 %v16968_v44, %v16384_v13 }
 0x169   : > { %v1324_v17 = vpop.permute.xlu1 %1323  ;;  %v1431_v62 = vpop.permute.xlu0 %1430  ;;  %3721 = vrot.lane.b32.xlu1 %v17048_v46, %s16178_s20  ;;  %20369 = vst [vmem:[#allocation38_spill] sm:$0xff] %v17072_v16 }
 0x16c   : > { %4264 = vrot.lane.b32.xlu0 %v17061_v14, %s16178_s20  ;;  %v17098_v14 = vadd.f32 %v13645_v63, %v16384_v13 }
 0x16d   : > { %v17074_v53 = vpop.permute.xlu1 %1432  ;;  %v17076_v52 = vpop.permute.xlu0 %1539  ;;  %3830 = vrot.lane.b32.xlu1 %v17065_v58, %s16178_s20 }
 0x16f   : > { %14928 = vmatpush3.bf16.xpose.msk.msra.mxu1 %vm16428_vm1, %v16470_v54 }
 0x170   : > { %14931 = vmatprep.subr.msk.bf16.mxu1 %vm16428_vm1, %v16474_v55  ;;  %4373 = vrot.lane.b32.xlu0 %v17072_v16, %s16178_s20  ;;  %v17111_v16 = vadd.f32 %v16384_v13, %v926_v39  ;;  %v15907_v39 = vpack.i.bf16 %v16975_v11, %v16920_v26 }
 0x171   : > { %v17095_v25 = vpop.permute.xlu1 %1541  ;;  %v1649_v44 = vpop.permute.xlu0 %1648  ;;  %3939 = vrot.lane.b32.xlu1 %v17080_v12, %s16178_s20 }
 0x172   : > { %13753 = vmatprep.mubr.msk.f32.mxu0 %vm357_vm0, %v1649_v44  ;;  %20371 = vst [vmem:[#allocation40_spill] sm:$0xff] %v17111_v16  ;;  %v20384_v44 = vld [vmem:[#allocation26_spill] sm:$0xff] }
 0x174   : > { %4482 = vrot.lane.b32.xlu0 %v17093_v40, %s16178_s20 }
 0x175   : > { %v1651_v54 = vpop.permute.xlu1 %1650  ;;  %v17105_v15 = vpop.permute.xlu0 %1757  ;;  %4048 = vrot.lane.b32.xlu1 %v17098_v14, %s16178_s20 }
 0x176   : > { %13754 = vmatmul.mubr.msk.f32.vlgmr.msra.gmra.mrb[64].mxu0 %vm357_vm0, %v1651_v54  ;;  %v15912_v54 = vpack.i.bf16 %v17009_v21, %v20384_v44 }
 0x177   : > { %14934 = vmatpush3.bf16.xpose.msk.msra.mxu1 %vm16428_vm1, %v16474_v55  ;;  %15042 = vmatpush3.bf16.xpose.msk.msra.mxu0 %vm16428_vm1, %v16655_v3  ;;  %v17137_v55 = vadd.f32 %v13654_v0, %v16384_v13  ;;  %v20373_v3 = vpack.i.bf16 %v16701_v59, %v16704_v42  ;;  %v17158_v59 = vadd.f32 %v13657_v2, %v16384_v13 }
 0x178   : > { %14937 = vmatprep.subr.msk.bf16.mxu1 %vm16428_vm1, %v16476_v56  ;;  %15045 = vmatprep.subr.msk.bf16.mxu0 %vm16428_vm1, %v16657_v9  ;;  %v17169_v42 = vadd.f32 %v13660_v47, %v16384_v13  ;;  %v20376_v13 = vpack.i.bf16 %v16750_v20, %v16737_v45  ;;  %v15887_v45 = vpack.i.bf16 %v16904_v31, %v16834_v19 }
 0x179   : > { %v1867_v63 = vpop.permute.xlu0 %1866  ;;  %4591 = vrot.lane.b32.xlu0 %v17111_v16, %s16178_s20  ;;  %4157 = vrot.lane.b32.xlu1 %v17108_v35, %s16178_s20  ;;  %20372 = vst [vmem:[#allocation41_spill] sm:$0xff] %v17137_v55  ;;  %v15902_v0 = vpack.i.bf16 %v16961_v51, %v16909_v48 }
 0x17a   : > { %13791 = vmatprep.mubr.msk.f32.mxu0 %vm357_vm0, %v1867_v63  ;;  %20375 = vst [vmem:[#allocation42_spill] sm:$0xff] %v17169_v42  ;;  %v20385_v63 = vld [vmem:[#allocation28_spill] sm:$0xff] }
 0x17d   : > { %15858 = vrot.lane.b32.xlu0 %v20373_v3, %s16179_s21  ;;  %4266 = vrot.lane.b32.xlu1 %v17129_v1, %s16178_s20  ;;  %v15917_v3 = vpack.i.bf16 %v17019_v7, %v20385_v63 }
 0x17f   : > { %14940 = vmatpush3.bf16.xpose.msk.msra.mxu1 %vm16428_vm1, %v16476_v56  ;;  %15048 = vmatpush3.bf16.xpose.msk.msra.mxu0 %vm16428_vm1, %v16657_v9  ;;  %v20374_v56 = vpack.i.bf16 %v16764_v49, %v16757_v61  ;;  %v15877_v9 = vpack.i.bf16 %v16796_v23, %v16789_v33  ;;  %v15892_v61 = vpack.i.bf16 %v16927_v4, %v16883_v29 }
 0x180   : > { %14943 = vmatprep.subr.msk.bf16.mxu1 %vm16428_vm1, %v16504_v5  ;;  %15051 = vmatprep.subr.msk.bf16.mxu0 %vm16428_vm1, %v16661_v37 }
 0x181   : > { %4375 = vrot.lane.b32.xlu1 %v17137_v55, %s16178_s20  ;;  %15868 = vrot.lane.b32.xlu0 %v20374_v56, %s16179_s21  ;;  %v20386_v56 = vld [vmem:[#allocation9_spill] sm:$0xff] }
 0x185   : > { %4484 = vrot.lane.b32.xlu1 %v17158_v59, %s16178_s20  ;;  %15878 = vrot.lane.b32.xlu0 %v15877_v9, %s16179_s21  ;;  %v20387_v9 = vld [vmem:[#allocation25_spill] sm:$0xff] }
 0x186   : > { %13697 = vmatmul.mubr.msk.f32.vlgmr.msra.gmra.mrb[2].mxu1 %vm357_vm0, %v1324_v17  ;;  %v15872_v17 = vpack.i.bf16 %v16782_v10, %v16773_v41 }
 0x187   : > { %14946 = vmatpush3.bf16.xpose.msk.msra.mxu1 %vm16428_vm1, %v16504_v5  ;;  %15054 = vmatpush3.bf16.xpose.msk.msra.mxu0 %vm16428_vm1, %v16661_v37  ;;  %v17196_v5 = vpop.permute.xlu1 %1759  ;;  %v17215_v37 = vpop.permute.xlu0 %1975 }
 0x188   : > { %14949 = vmatprep.subr.msk.bf16.mxu1 %vm16428_vm1, %v16506_v6  ;;  %15057 = vmatprep.subr.msk.bf16.mxu0 %vm16428_vm1, %v16675_v38 }
 0x189   : > { %13715 = vmatprep.mubr.msk.f32.mxu1 %vm357_vm0, %v1431_v62  ;;  %4593 = vrot.lane.b32.xlu1 %v17169_v42, %s16178_s20 }
 0x18a   : > { %15888 = vrot.lane.b32.xlu0 %v15887_v45, %s16179_s21  ;;  %v15927_v45 = vpack.i.bf16 %v17048_v46, %v16984_v57 }
 0x18b   : > { %v2085_v20 = vpop.permute.xlu0 %2084 }
 0x18d   : > { %15863 = vrot.lane.b32.xlu1 %v20376_v13, %s16179_s21  ;;  %v20388_v13 = vld [vmem:[#allocation29_spill] sm:$0xff] }
 0x18f   : > { %14952 = vmatpush3.bf16.xpose.msk.msra.mxu1 %vm16428_vm1, %v16506_v6  ;;  %15060 = vmatpush3.bf16.xpose.msk.msra.mxu0 %vm16428_vm1, %v16675_v38  ;;  %v15882_v6 = vpack.i.bf16 %v16892_v22, %v16825_v34  ;;  %v1869_v38 = vpop.permute.xlu1 %1868  ;;  %v17283_v2 = vpop.permute.xlu0 %2193 }
 0x190   : > { %14955 = vmatprep.subr.msk.bf16.mxu1 %vm16428_vm1, %v16510_v8  ;;  %15087 = vmatprep.subr.msk.bf16.mxu0 %vm16428_vm1, %v16730_v60 }
 0x191   : > { %15873 = vrot.lane.b32.xlu1 %v15872_v17, %s16179_s21  ;;  %v15922_v17 = vpack.i.bf16 %v17029_v32, %v20388_v13 }
 0x193   : > { %v17266_v49 = vpop.permute.xlu1 %1977  ;;  %v2303_v62 = vpop.permute.xlu0 %2302 }
 0x195   : > { %15883 = vrot.lane.b32.xlu1 %v15882_v6, %s16179_s21  ;;  %v20389_v6 = vld [vmem:[#allocation10_spill] sm:$0xff] }
 0x196   : > { %13792 = vmatmul.mubr.msk.f32.vlgmr.msra.gmra.mrb[66].mxu0 %vm357_vm0, %v1869_v38  ;;  %v20390_v38 = vld [vmem:[#allocation27_spill] sm:$0xff] }
 0x197   : > { %14958 = vmatpush3.bf16.xpose.msk.msra.mxu1 %vm16428_vm1, %v16510_v8  ;;  %15090 = vmatpush3.bf16.xpose.msk.msra.mxu0 %vm16428_vm1, %v16730_v60  ;;  %v20377_v60 = vld [vmem:[#allocation17_spill] sm:$0xff]  ;;  %v20378_v8 = vld [vmem:[#allocation6_spill] sm:$0xff]  ;;  %v2087_v47 = vpop.permute.xlu1 %2086 }
 0x198   : > { %14961 = vmatprep.subr.msk.bf16.mxu1 %vm16428_vm1, %v16522_v18  ;;  %15093 = vmatprep.subr.msk.bf16.mxu0 %vm16428_vm1, %v16770_v30 }
 0x199   : > { %13829 = vmatprep.mubr.msk.f32.mxu0 %vm357_vm0, %v2085_v20  ;;  %15893 = vrot.lane.b32.xlu1 %v15892_v61, %s16179_s21  ;;  %v20392_v61 = vld [vmem:[#allocation34_spill] sm:$0xff] }
 0x19d   : > { %15903 = vrot.lane.b32.xlu1 %v15902_v0, %s16179_s21 }
 0x19f   : > { %14964 = vmatpush3.bf16.xpose.msk.msra.mxu1 %vm16428_vm1, %v16522_v18  ;;  %15096 = vmatpush3.bf16.xpose.msk.msra.mxu0 %vm16428_vm1, %v16770_v30  ;;  %v20379_v18 = vld [vmem:[#allocation18_spill] sm:$0xff]  ;;  %v20380_v30 = vld [vmem:[#allocation7_spill] sm:$0xff] }
 0x1a0   : > { %14967 = vmatprep.subr.msk.bf16.mxu1 %vm16428_vm1, %v16540_v28  ;;  %15099 = vmatprep.subr.msk.bf16.mxu0 %vm16428_vm1, %v20377_v60 }
 0x1a1   : > { %15913 = vrot.lane.b32.xlu1 %v15912_v54, %s16179_s21  ;;  %v20396_v54 = vld [vmem:[#allocation37_spill] sm:$0xff] }
 0x1a6   : > { %13716 = vmatmul.mubr.msk.f32.vlgmr.msra.gmra.mrb[4].mxu1 %vm357_vm0, %v17074_v53  ;;  %v20382_v53 = vld [vmem:[#allocation8_spill] sm:$0xff] }
 0x1a7   : > { %14970 = vmatpush3.bf16.xpose.msk.msra.mxu1 %vm16428_vm1, %v16540_v28  ;;  %15102 = vmatpush3.bf16.xpose.msk.msra.mxu0 %vm16428_vm1, %v20377_v60  ;;  %v15897_v28 = vpack.i.bf16 %v16949_v24, %v16897_v27 }
 0x1a8   : > { %14973 = vmatprep.subr.msk.bf16.mxu1 %vm16428_vm1, %v20378_v8  ;;  %15105 = vmatprep.subr.msk.bf16.mxu0 %vm16428_vm1, %v20379_v18 }
 0x1a9   : > { %13734 = vmatprep.mubr.msk.f32.mxu1 %vm357_vm0, %v17076_v52  ;;  %15898 = vrot.lane.b32.xlu0 %v15897_v28, %s16179_s21  ;;  %v20383_v52 = vld [vmem:[#allocation24_spill] sm:$0xff]  ;;  %v15937_v28 = vpack.i.bf16 %v17080_v12, %v20392_v61 }
 0x1ad   : > { %15908 = vrot.lane.b32.xlu0 %v15907_v39, %s16179_s21  ;;  %v20395_v39 = vld [vmem:[#allocation35_spill] sm:$0xff] }
 0x1af   : > { %14976 = vmatpush3.bf16.xpose.msk.msra.mxu1 %vm16428_vm1, %v20378_v8  ;;  %15108 = vmatpush3.bf16.xpose.msk.msra.mxu0 %vm16428_vm1, %v20379_v18  ;;  %v15932_v8 = vpack.i.bf16 %v17065_v58, %v17014_v50 }
 0x1b0   : > { %14979 = vmatprep.subr.msk.bf16.mxu1 %vm16428_vm1, %v20380_v30  ;;  %15135 = vmatprep.subr.msk.bf16.mxu0 %vm16428_vm1, %v20381_v43 }
 0x1b1   : > { %15918 = vrot.lane.b32.xlu0 %v15917_v3, %s16179_s21  ;;  %15933 = vrot.lane.b32.xlu1 %v15932_v8, %s16179_s21  ;;  %v15952_v3 = vpack.i.bf16 %v17129_v1, %v20396_v54  ;;  %v15962_v8 = vpack.i.bf16 %v17158_v59, %v17093_v40 }
 0x1b5   : > { %15923 = vrot.lane.b32.xlu0 %v15922_v17, %s16179_s21  ;;  %15938 = vrot.lane.b32.xlu1 %v15937_v28, %s16179_s21  ;;  %v20400_v28 = vld [vmem:[#allocation38_spill] sm:$0xff] }
 0x1b6   : > { %13830 = vmatmul.mubr.msk.f32.vlgmr.msra.gmra.mrb[68].mxu0 %vm357_vm0, %v2087_v47 }
 0x1b7   : > { %14982 = vmatpush3.bf16.xpose.msk.msra.mxu1 %vm16428_vm1, %v20380_v30  ;;  %15138 = vmatpush3.bf16.xpose.msk.msra.mxu0 %vm16428_vm1, %v20381_v43  ;;  %v17352_v30 = vpop.permute.xlu1 %2195  ;;  %v20394_v43 = vld [vmem:[#allocation3_spill] sm:$0xff] }
 0x1b8   : > { %14985 = vmatprep.subr.msk.bf16.mxu1 %vm16428_vm1, %v20382_v53  ;;  %15141 = vmatprep.subr.msk.bf16.mxu0 %vm16428_vm1, %v20383_v52  ;;  %v1032_v0 = vmul.f32 %v20394_v43, %v16773_v41  ;;  %v1033_v47 = vmul.f32 %v20394_v43, %v16782_v10 }
 0x1b9   : > { %13867 = vmatprep.mubr.msk.f32.mxu0 %vm357_vm0, %v2303_v62  ;;  %15928 = vrot.lane.b32.xlu0 %v15927_v45, %s16179_s21  ;;  %v15942_v62 = vpack.i.bf16 %v17098_v14, %v20395_v39 }
 0x1bd   : > { %15943 = vrot.lane.b32.xlu0 %v15942_v62, %s16179_s21 }
 0x1bf   : > { %14988 = vmatpush3.bf16.xpose.msk.msra.mxu1 %vm16428_vm1, %v20382_v53  ;;  %15144 = vmatpush3.bf16.xpose.msk.msra.mxu0 %vm16428_vm1, %v20383_v52  ;;  %v17372_v53 = vpop.permute.xlu0 %2411  ;;  %v15187_v52 = vpack.c.bf16 %v1033_v47, %v1032_v0  ;;  %v20401_v0 = vld [vmem:[#allocation13_spill] sm:$0xff] }
 0x1c0   : > { %15015 = vmatprep.subr.msk.bf16.mxu1 %vm16428_vm1, %v20386_v56  ;;  %15147 = vmatprep.subr.msk.bf16.mxu0 %vm16428_vm1, %v20387_v9  ;;  %v20402_v47 = vld [vmem:[#allocation5_spill] sm:$0xff] }
 0x1c1   : > { %15953 = vrot.lane.b32.xlu0 %v15952_v3, %s16179_s21  ;;  %v1168_v62 = vmul.f32 %v20402_v47, %v16773_v41  ;;  %v1169_v3 = vmul.f32 %v20402_v47, %v16782_v10 }
 0x1c3   : > { %v2521_v45 = vpop.permute.xlu0 %2520 }
 0x1c5   : > { %15963 = vrot.lane.b32.xlu0 %v15962_v8, %s16179_s21  ;;  %v1037_v8 = vmul.f32 %v20394_v43, %v16892_v22 }
 0x1c6   : > { %13735 = vmatmul.mubr.msk.f32.vlgmr.msra.gmra.mrb[6].mxu1 %vm357_vm0, %v17095_v25  ;;  %v20391_v25 = vld [vmem:[#allocation2_spill] sm:$0xff] }
 0x1c7   : > { %15018 = vmatpush3.bf16.xpose.msk.msra.mxu1 %vm16428_vm1, %v20386_v56  ;;  %15150 = vmatpush3.bf16.xpose.msk.msra.mxu0 %vm16428_vm1, %v20387_v9  ;;  %v964_v20 = vmul.f32 %v20391_v25, %v16773_v41  ;;  %v965_v60 = vmul.f32 %v20391_v25, %v16782_v10  ;;  %v2305_v56 = vpop.permute.xlu1 %2304  ;;  %v20397_v9 = vld [vmem:[#allocation36_spill] sm:$0xff] }
 0x1c8   : > { %15021 = vmatprep.subr.msk.bf16.mxu1 %vm16428_vm1, %v20389_v6  ;;  %15153 = vmatprep.subr.msk.bf16.mxu0 %vm16428_vm1, %v20390_v38  ;;  %v15947_v17 = vpack.i.bf16 %v17108_v35, %v20397_v9 }
 0x1c9   : > { %13772 = vmatprep.mubr.msk.f32.mxu1 %vm357_vm0, %v17105_v15  ;;  %v15181_v18 = vpack.c.bf16 %v965_v60, %v964_v20  ;;  %v20393_v15 = vld [vmem:[#allocation11_spill] sm:$0xff] }
 0x1ca   : > { %15948 = vrot.lane.b32.xlu1 %v15947_v17, %s16179_s21  ;;  %v20403_v17 = vld [vmem:[#allocation14_spill] sm:$0xff] }
 0x1cf   : > { %15024 = vmatpush3.bf16.xpose.msk.msra.mxu1 %vm16428_vm1, %v20389_v6  ;;  %15156 = vmatpush3.bf16.xpose.msk.msra.mxu0 %vm16428_vm1, %v20390_v38  ;;  %v20398_v6 = vld [vmem:[#allocation12_spill] sm:$0xff] }
 0x1d0   : > { %15027 = vmatprep.subr.msk.bf16.mxu1 %vm16428_vm1, %v20393_v15  ;;  %15183 = vmatprep.subr.msk.bf16.mxu0 %vm16428_vm1, %v15181_v18  ;;  %v20399_v38 = vld [vmem:[#allocation4_spill] sm:$0xff] }
 0x1d1   : > { %v1100_v20 = vmul.f32 %v20399_v38, %v16773_v41  ;;  %v1101_v60 = vmul.f32 %v20399_v38, %v16782_v10  ;;  %v17426_v41 = vpop.permute.xlu0 %2629  ;;  %v968_v10 = vmul.f32 %v20391_v25, %v16825_v34 }
 0x1d6   : > { %13868 = vmatmul.mubr.msk.f32.vlgmr.msra.gmra.mrb[70].mxu0 %vm357_vm0, %v2305_v56  ;;  %v15199_v56 = vpack.c.bf16 %v1169_v3, %v1168_v62  ;;  %v20407_v3 = vld [vmem:[#allocation16_spill] sm:$0xff] }
 0x1d7   : > { %15030 = vmatpush3.bf16.xpose.msk.msra.mxu1 %vm16428_vm1, %v20393_v15  ;;  %15186 = vmatpush3.bf16.xpose.msk.msra.mxu0 %vm16428_vm1, %v15181_v18  ;;  %v15193_v18 = vpack.c.bf16 %v1101_v60, %v1100_v20  ;;  %v15957_v15 = vpack.i.bf16 %v17137_v55, %v20400_v28  ;;  %v17442_v20 = vpop.permute.xlu0 %15818  ;;  %v20405_v60 = vld [vmem:[#allocation15_spill] sm:$0xff] }
 0x1d8   : > { %15033 = vmatprep.subr.msk.bf16.mxu1 %vm16428_vm1, %v20398_v6  ;;  %15189 = vmatprep.subr.msk.bf16.mxu0 %vm16428_vm1, %v15187_v52  ;;  %20404 = vst [vmem:[#allocation17_spill] sm:$0xff] %v17442_v20 }
 0x1d9   : > { %13905 = vmatprep.mubr.msk.f32.mxu0 %vm357_vm0, %v2521_v45  ;;  %15958 = vrot.lane.b32.xlu1 %v15957_v15, %s16179_s21 }
 0x1df   : > { %15036 = vmatpush3.bf16.xpose.msk.msra.mxu1 %vm16428_vm1, %v20398_v6  ;;  %15192 = vmatpush3.bf16.xpose.msk.msra.mxu0 %vm16428_vm1, %v15187_v52  ;;  %v15967_v52 = vpack.i.bf16 %v17169_v42, %v17111_v16  ;;  %v17440_v6 = vpop.permute.xlu1 %2413 }
 0x1e0   : > { %15063 = vmatprep.subr.msk.bf16.mxu1 %vm16428_vm1, %v20401_v0  ;;  %15195 = vmatprep.subr.msk.bf16.mxu0 %vm16428_vm1, %v15193_v18 }
 0x1e1   : > { %15968 = vrot.lane.b32.xlu1 %v15967_v52, %s16179_s21  ;;  %v1105_v52 = vmul.f32 %v20399_v38, %v16892_v22 }
 0x1e3   : > { %v2523_v15 = vpop.permute.xlu1 %2522 }
 0x1e6   : > { %13773 = vmatmul.mubr.msk.f32.vlgmr.msra.gmra.mrb[8].mxu1 %vm357_vm0, %v17196_v5  ;;  %v969_v5 = vmul.f32 %v20391_v25, %v16892_v22 }
 0x1e7   : > { %15066 = vmatpush3.bf16.xpose.msk.msra.mxu1 %vm16428_vm1, %v20401_v0  ;;  %15198 = vmatpush3.bf16.xpose.msk.msra.mxu0 %vm16428_vm1, %v15193_v18  ;;  %v17458_v18 = vpop.permute.xlu0 %15838 }
 0x1e8   : > { %15069 = vmatprep.subr.msk.bf16.mxu1 %vm16428_vm1, %v20403_v17  ;;  %15201 = vmatprep.subr.msk.bf16.mxu0 %vm16428_vm1, %v15199_v56  ;;  %v15229_v45 = vpack.c.bf16 %v969_v5, %v968_v10  ;;  %20406 = vst [vmem:[#allocation6_spill] sm:$0xff] %v17458_v18 }
 0x1e9   : > { %13810 = vmatprep.mubr.msk.f32.mxu1 %vm357_vm0, %v17215_v37  ;;  %v1036_v37 = vmul.f32 %v20394_v43, %v16825_v34 }
 0x1eb   : > { %v15235_v0 = vpack.c.bf16 %v1037_v8, %v1036_v37  ;;  %v2739_v62 = vpop.permute.xlu0 %2738  ;;  %v1173_v37 = vmul.f32 %v20402_v47, %v16892_v22  ;;  %v973_v22 = vmul.f32 %v20391_v25, %v16927_v4 }
 0x1ef   : > { %15072 = vmatpush3.bf16.xpose.msk.msra.mxu1 %vm16428_vm1, %v20403_v17  ;;  %15204 = vmatpush3.bf16.xpose.msk.msra.mxu0 %vm16428_vm1, %v15199_v56  ;;  %v1104_v56 = vmul.f32 %v20399_v38, %v16825_v34  ;;  %v17475_v17 = vpop.permute.xlu1 %2631 }
 0x1f0   : > { %15075 = vmatprep.subr.msk.bf16.mxu1 %vm16428_vm1, %v20405_v60  ;;  %15231 = vmatprep.subr.msk.bf16.mxu0 %vm16428_vm1, %v15229_v45 }
 0x1f1   : > { %v15241_v10 = vpack.c.bf16 %v1105_v52, %v1104_v56 }
 0x1f3   : > { %v17478_v5 = vpop.permute.xlu1 %15813 }
 0x1f4   : > { %20408 = vst [vmem:[#allocation18_spill] sm:$0xff] %v17478_v5 }
 0x1f6   : > { %13906 = vmatmul.mubr.msk.f32.vlgmr.msra.gmra.mrb[72].mxu0 %vm357_vm0, %v2523_v15 }
 0x1f7   : > { %15078 = vmatpush3.bf16.xpose.msk.msra.mxu1 %vm16428_vm1, %v20405_v60  ;;  %15234 = vmatpush3.bf16.xpose.msk.msra.mxu0 %vm16428_vm1, %v15229_v45  ;;  %v20409_v45 = vld [vmem:[#allocation20_spill] sm:$0xff]  ;;  %v1172_v60 = vmul.f32 %v20402_v47, %v16825_v34  ;;  %v17494_v8 = vpop.permute.xlu1 %15823  ;;  %v972_v34 = vmul.f32 %v20391_v25, %v16883_v29 }
 0x1f8   : > { %15081 = vmatprep.subr.msk.bf16.mxu1 %vm16428_vm1, %v20407_v3  ;;  %15237 = vmatprep.subr.msk.bf16.mxu0 %vm16428_vm1, %v15235_v0  ;;  %20410 = vst [vmem:[#allocation7_spill] sm:$0xff] %v17494_v8 }
 0x1f9   : > { %13943 = vmatprep.mubr.msk.f32.mxu0 %vm357_vm0, %v2739_v62  ;;  %v15247_v15 = vpack.c.bf16 %v1173_v37, %v1172_v60  ;;  %v20412_v62 = vld [vmem:[#allocation21_spill] sm:$0xff]  ;;  %v15277_v56 = vpack.c.bf16 %v973_v22, %v972_v34  ;;  %v20417_v34 = vld [vmem:[#allocation23_spill] sm:$0xff]  ;;  %v1108_v22 = vmul.f32 %v20399_v38, %v16883_v29 }
 0x1ff   : > { %15084 = vmatpush3.bf16.xpose.msk.msra.mxu1 %vm16428_vm1, %v20407_v3  ;;  %15240 = vmatpush3.bf16.xpose.msk.msra.mxu0 %vm16428_vm1, %v15235_v0  ;;  %v17498_v0 = vpop.permute.xlu1 %15828  ;;  %v17518_v3 = vpop.permute.xlu0 %2847 }
 0x200   : > { %15111 = vmatprep.subr.msk.bf16.mxu1 %vm16428_vm1, %v20409_v45  ;;  %15243 = vmatprep.subr.msk.bf16.mxu0 %vm16428_vm1, %v15241_v10  ;;  %20411 = vst [vmem:[#allocation19_spill] sm:$0xff] %v17498_v0 }
 0x203   : > { %v17536_v60 = vpop.permute.xlu0 %15848 }
 0x204   : > { %20416 = vst [vmem:[#allocation26_spill] sm:$0xff] %v17536_v60 }
 0x206   : > { %13811 = vmatmul.mubr.msk.f32.vlgmr.msra.gmra.mrb[10].mxu1 %vm357_vm0, %v17266_v49  ;;  %v17516_v49 = vpop.permute.xlu1 %15833 }
 0x207   : > { %15114 = vmatpush3.bf16.xpose.msk.msra.mxu1 %vm16428_vm1, %v20409_v45  ;;  %15246 = vmatpush3.bf16.xpose.msk.msra.mxu0 %vm16428_vm1, %v15241_v10  ;;  %20413 = vst [vmem:[#allocation8_spill] sm:$0xff] %v17516_v49  ;;  %v20415_v10 = vld [vmem:[#allocation22_spill] sm:$0xff]  ;;  %v1041_v45 = vmul.f32 %v20394_v43, %v16927_v4 }
 0x208   : > { %15117 = vmatprep.subr.msk.bf16.mxu1 %vm16428_vm1, %v20412_v62  ;;  %15249 = vmatprep.subr.msk.bf16.mxu0 %vm16428_vm1, %v15247_v15 }
 0x209   : > { %13848 = vmatprep.mubr.msk.f32.mxu1 %vm357_vm0, %v17283_v2  ;;  %v1040_v2 = vmul.f32 %v20394_v43, %v16883_v29 }
 0x20a   : > { %v17520_v52 = vpop.permute.xlu1 %15843 }
 0x20b   : > { %20414 = vst [vmem:[#allocation24_spill] sm:$0xff] %v17520_v52  ;;  %v15283_v37 = vpack.c.bf16 %v1041_v45, %v1040_v2  ;;  %v1109_v2 = vmul.f32 %v20399_v38, %v16927_v4  ;;  %v1176_v45 = vmul.f32 %v20402_v47, %v16883_v29  ;;  %v976_v29 = vmul.f32 %v20391_v25, %v16909_v48 }
 0x20c   : > { %v1113_v52 = vmul.f32 %v20399_v38, %v16961_v51 }
 0x20f   : > { %15120 = vmatpush3.bf16.xpose.msk.msra.mxu1 %vm16428_vm1, %v20412_v62  ;;  %15252 = vmatpush3.bf16.xpose.msk.msra.mxu0 %vm16428_vm1, %v15247_v15  ;;  %v2741_v62 = vpop.permute.xlu1 %2740  ;;  %v2957_v15 = vpop.permute.xlu0 %2956 }
 0x210   : > { %15123 = vmatprep.subr.msk.bf16.mxu1 %vm16428_vm1, %v20415_v10  ;;  %15279 = vmatprep.subr.msk.bf16.mxu0 %vm16428_vm1, %v15277_v56 }
 0x216   : > { %13944 = vmatmul.mubr.msk.f32.vlgmr.msra.gmra.mrb[74].mxu0 %vm357_vm0, %v2741_v62  ;;  %v1177_v62 = vmul.f32 %v20402_v47, %v16927_v4  ;;  %v977_v4 = vmul.f32 %v20391_v25, %v16961_v51 }
 0x217   : > { %15126 = vmatpush3.bf16.xpose.msk.msra.mxu1 %vm16428_vm1, %v20415_v10  ;;  %15282 = vmatpush3.bf16.xpose.msk.msra.mxu0 %vm16428_vm1, %v15277_v56  ;;  %v15289_v10 = vpack.c.bf16 %v1109_v2, %v1108_v22  ;;  %v20418_v56 = vld [vmem:[#allocation30_spill] sm:$0xff]  ;;  %v20421_v2 = vld [vmem:[#allocation32_spill] sm:$0xff] }
 0x218   : > { %15129 = vmatprep.subr.msk.bf16.mxu1 %vm16428_vm1, %v20417_v34  ;;  %15285 = vmatprep.subr.msk.bf16.mxu0 %vm16428_vm1, %v15283_v37 }
 0x219   : > { %13981 = vmatprep.mubr.msk.f32.mxu0 %vm357_vm0, %v2957_v15  ;;  %v15295_v15 = vpack.c.bf16 %v1177_v62, %v1176_v45 }
 0x21f   : > { %15132 = vmatpush3.bf16.xpose.msk.msra.mxu1 %vm16428_vm1, %v20417_v34  ;;  %15288 = vmatpush3.bf16.xpose.msk.msra.mxu0 %vm16428_vm1, %v15283_v37  ;;  %v20419_v37 = vld [vmem:[#allocation31_spill] sm:$0xff]  ;;  %v15325_v34 = vpack.c.bf16 %v977_v4, %v976_v29  ;;  %v20422_v29 = vld [vmem:[#allocation33_spill] sm:$0xff]  ;;  %v17625_v4 = vld [vmem:[%s20237_s3] sm:$0xff] }
 0x220   : > { %15159 = vmatprep.subr.msk.bf16.mxu1 %vm16428_vm1, %v20418_v56  ;;  %15291 = vmatprep.subr.msk.bf16.mxu0 %vm16428_vm1, %v15289_v10 }
 0x226   : > { %13849 = vmatmul.mubr.msk.f32.vlgmr.msra.gmra.mrb[12].mxu1 %vm357_vm0, %v17352_v30  ;;  %v17584_v30 = vpop.permute.xlu1 %2849 }
 0x227   : > { %15162 = vmatpush3.bf16.xpose.msk.msra.mxu1 %vm16428_vm1, %v20418_v56  ;;  %15294 = vmatpush3.bf16.xpose.msk.msra.mxu0 %vm16428_vm1, %v15289_v10  ;;  %v17600_v10 = vpop.permute.xlu0 %3065  ;;  %v1045_v56 = vmul.f32 %v20394_v43, %v16961_v51 }
 0x228   : > { %15165 = vmatprep.subr.msk.bf16.mxu1 %vm16428_vm1, %v20419_v37  ;;  %15297 = vmatprep.subr.msk.bf16.mxu0 %vm16428_vm1, %v15295_v15 }
 0x229   : > { %13886 = vmatprep.mubr.msk.f32.mxu1 %vm357_vm0, %v17372_v53  ;;  %v1044_v53 = vmul.f32 %v20394_v43, %v16909_v48 }
 0x22a   : > { %v17588_v22 = vpop.permute.xlu1 %15853 }
 0x22b   : > { %20420 = vst [vmem:[#allocation28_spill] sm:$0xff] %v17588_v22  ;;  %v15331_v62 = vpack.c.bf16 %v1045_v56, %v1044_v53  ;;  %v1112_v22 = vmul.f32 %v20399_v38, %v16909_v48 }
 0x22d   : > { %v15337_v60 = vpack.c.bf16 %v1113_v52, %v1112_v22  ;;  %v1180_v52 = vmul.f32 %v20402_v47, %v16909_v48  ;;  %v1181_v22 = vmul.f32 %v20402_v47, %v16961_v51  ;;  %v1102_v51 = vmul.f32 %v20399_v38, %v16789_v33 }
 0x22e   : > { %v2959_v45 = vpop.permute.xlu1 %2958  ;;  %v1103_v48 = vmul.f32 %v20399_v38, %v16796_v23 }
 0x22f   : > { %15168 = vmatpush3.bf16.xpose.msk.msra.mxu1 %vm16428_vm1, %v20419_v37  ;;  %15300 = vmatpush3.bf16.xpose.msk.msra.mxu0 %vm16428_vm1, %v15295_v15  ;;  %v17615_v15 = vld [vmem:[%s20237_s3 + $0x8] sm:$0xff]  ;;  %v3175_v37 = vpop.permute.xlu0 %3174 }
 0x230   : > { %15171 = vmatprep.subr.msk.bf16.mxu1 %vm16428_vm1, %v20421_v2  ;;  %15327 = vmatprep.subr.msk.bf16.mxu0 %vm16428_vm1, %v15325_v34  ;;  %v15217_v55 = vpack.c.bf16 %v1103_v48, %v1102_v51 }
 0x232   : > { %v17681_v35 = vpop.permute.xlu1 %3067 }
 0x233   : > { %v17693_v51 = vpop.permute.xlu0 %3283 }
 0x236   : > { %13982 = vmatmul.mubr.msk.f32.vlgmr.msra.gmra.mrb[76].mxu0 %vm357_vm0, %v2959_v45  ;;  %v967_v45 = vmul.f32 %v20391_v25, %v16796_v23 }
 0x237   : > { %15174 = vmatpush3.bf16.xpose.msk.msra.mxu1 %vm16428_vm1, %v20421_v2  ;;  %15330 = vmatpush3.bf16.xpose.msk.msra.mxu0 %vm16428_vm1, %v15325_v34  ;;  %v966_v34 = vmul.f32 %v20391_v25, %v16789_v33 }
 0x238   : > { %15177 = vmatprep.subr.msk.bf16.mxu1 %vm16428_vm1, %v20422_v29  ;;  %15333 = vmatprep.subr.msk.bf16.mxu0 %vm16428_vm1, %v15331_v62 }
 0x239   : > { %v13679_v2 = vpop.f32.mrb[0].mxu1  ;;  %14019 = vmatprep.mubr.msk.f32.mxu0 %vm357_vm0, %v3175_v37  ;;  %v15205_v37 = vpack.c.bf16 %v967_v45, %v966_v34  ;;  %v15343_v45 = vpack.c.bf16 %v1181_v22, %v1180_v52 }
 0x23a   : > { %v1316_v53 = vadd.f32 %v13679_v2, %v17615_v15  ;;  %v1310_v56 = vpop.f32.mrb[1].mxu1 }
 0x23b   : > { %v1311_v49 = vadd.f32 %v1310_v56, %v17625_v4  ;;  %v1034_v56 = vmul.f32 %v20394_v43, %v16789_v33 }
 0x23c   : > { %v4700_v8 = vsel %vm4698_vm2, %v1316_v53, -inf }
 0x23d   : > { %v4699_v42 = vsel %vm4698_vm2, %v1311_v49, -inf }
 0x23e   : > { %v4701_v16 = vmax.f32 %v4699_v42, %v4700_v8  ;;  %v1035_v8 = vmul.f32 %v20394_v43, %v16796_v23 }
 0x23f   : > { %15180 = vmatpush3.bf16.xpose.msk.msra.mxu1 %vm16428_vm1, %v20422_v29  ;;  %15336 = vmatpush3.bf16.xpose.msk.msra.mxu0 %vm16428_vm1, %v15331_v62 }
 0x240   : > { %v4702_v2 = vrot.slane %v4701_v16, 4  ;;  %15207 = vmatprep.subr.msk.bf16.mxu1 %vm16428_vm1, %v15205_v37  ;;  %15339 = vmatprep.subr.msk.bf16.mxu0 %vm16428_vm1, %v15337_v60  ;;  %v15211_v34 = vpack.c.bf16 %v1035_v8, %v1034_v56 }
 0x242   : > { %v4703_v42 = vmax.f32 %v4701_v16, %v4702_v2  ;;  %v981_v2 = vmul.f32 %v20391_v25, %v17009_v21 }
 0x244   : > { %v4704_v62 = vrot.slane %v4703_v42, 2 }
 0x246   : > { %v4705_v29 = vmax.f32 %v4703_v42, %v4704_v62  ;;  %13887 = vmatmul.mubr.msk.f32.vlgmr.msra.gmra.mrb[14].mxu1 %vm357_vm0, %v17440_v6 }
 0x247   : > { %15210 = vmatpush3.bf16.xpose.msk.msra.mxu1 %vm16428_vm1, %v15205_v37  ;;  %15342 = vmatpush3.bf16.xpose.msk.msra.mxu0 %vm16428_vm1, %v15337_v60  ;;  %v980_v60 = vmul.f32 %v20391_v25, %v20384_v44 }
 0x248   : > { %v4706_v16 = vrot.slane %v4705_v29, 1  ;;  %15213 = vmatprep.subr.msk.bf16.mxu1 %vm16428_vm1, %v15211_v34  ;;  %15345 = vmatprep.subr.msk.bf16.mxu0 %vm16428_vm1, %v15343_v45 }
 0x249   : > { %13924 = vmatprep.mubr.msk.f32.mxu1 %vm357_vm0, %v17426_v41  ;;  %v13755_v6 = vpop.f32.mrb[64].mxu0 }
 0x24a   : > { %v4707_v37 = vmax.f32 %v4705_v29, %v4706_v16  ;;  %v1752_v56 = vadd.f32 %v13755_v6, %v17615_v15  ;;  %v1746_v42 = vpop.f32.mrb[65].mxu0  ;;  %v15373_v16 = vpack.c.bf16 %v981_v2, %v980_v60 }
 0x24b   : > { %v1747_v8 = vadd.f32 %v1746_v42, %v17625_v4 }
 0x24c   : > { %v4987_v52 = vsub.f32 %v1311_v49, %v4707_v37  ;;  %v4988_v22 = vsub.f32 %v1316_v53, %v4707_v37  ;;  %v4736_v62 = vsel %vm4698_vm2, %v1752_v56, -inf  ;;  %v1170_v53 = vmul.f32 %v20402_v47, %v16789_v33  ;;  %v3177_v37 = vpop.permute.xlu1 %3176  ;;  %v3393_v33 = vpop.permute.xlu0 %3392 }
 0x24d   : > { %v4735_v41 = vsel %vm4698_vm2, %v1747_v8, -inf }
 0x24e   : > { %v5051_v28 = vmul.f32 1.442695, %v4987_v52  ;;  %v5053_v29 = vmul.f32 1.442695, %v4988_v22  ;;  %v4737_v18 = vmax.f32 %v4735_v41, %v4736_v62  ;;  %v970_v52 = vmul.f32 %v20391_v25, %v16834_v19 }
 0x24f   : > { %15216 = vmatpush3.bf16.xpose.msk.msra.mxu1 %vm16428_vm1, %v15211_v34  ;;  %15348 = vmatpush3.bf16.xpose.msk.msra.mxu0 %vm16428_vm1, %v15343_v45  ;;  %v1171_v34 = vmul.f32 %v20402_v47, %v16796_v23  ;;  %v1048_v45 = vmul.f32 %v20394_v43, %v20384_v44  ;;  %v971_v22 = vmul.f32 %v20391_v25, %v16904_v31 }
 0x250   : > { %15972 = vpow2.f32 %v5051_v28  ;;  %15219 = vmatprep.subr.msk.bf16.mxu1 %vm16428_vm1, %v15217_v55  ;;  %15375 = vmatprep.subr.msk.bf16.mxu0 %vm16428_vm1, %v15373_v16  ;;  %v4738_v49 = vrot.slane %v4737_v18, 4  ;;  %v1049_v28 = vmul.f32 %v20394_v43, %v17009_v21 }
 0x251   : > { %15974 = vpow2.f32 %v5053_v29  ;;  %v15223_v60 = vpack.c.bf16 %v1171_v34, %v1170_v53  ;;  %v1116_v29 = vmul.f32 %v20399_v38, %v20384_v44  ;;  %v15253_v9 = vpack.c.bf16 %v971_v22, %v970_v52 }
 0x252   : > { %v4739_v48 = vmax.f32 %v4737_v18, %v4738_v49  ;;  %v15379_v2 = vpack.c.bf16 %v1049_v28, %v1048_v45  ;;  %v1185_v22 = vmul.f32 %v20402_v47, %v17009_v21 }
 0x254   : > { %v4740_v6 = vrot.slane %v4739_v48, 2 }
 0x256   : > { %14020 = vmatmul.mubr.msk.f32.vlgmr.msra.gmra.mrb[78].mxu0 %vm357_vm0, %v3177_v37  ;;  %v4741_v42 = vmax.f32 %v4739_v48, %v4740_v6 }
 0x257   : > { %15222 = vmatpush3.bf16.xpose.msk.msra.mxu1 %vm16428_vm1, %v15217_v55  ;;  %15378 = vmatpush3.bf16.xpose.msk.msra.mxu0 %vm16428_vm1, %v15373_v16  ;;  %v1117_v16 = vmul.f32 %v20399_v38, %v17009_v21  ;;  %v1106_v21 = vmul.f32 %v20399_v38, %v16834_v19 }
 0x258   : > { %15225 = vmatprep.subr.msk.bf16.mxu1 %vm16428_vm1, %v15223_v60  ;;  %15381 = vmatprep.subr.msk.bf16.mxu0 %vm16428_vm1, %v15379_v2  ;;  %v4742_v23 = vrot.slane %v4741_v42, 1 }
 0x259   : > { %v13698_v18 = vpop.f32.mrb[2].mxu1  ;;  %14057 = vmatprep.mubr.msk.f32.mxu0 %vm357_vm0, %v3393_v33 }
 0x25a   : > { %v17715_v55 = vpop.eup %15972  ;;  %v17718_v62 = vadd.f32 %v13698_v18, %v17615_v15  ;;  %v1419_v41 = vpop.f32.mrb[3].mxu1  ;;  %v4743_v49 = vmax.f32 %v4741_v42, %v4742_v23  ;;  %v15385_v23 = vpack.c.bf16 %v1117_v16, %v1116_v29 }
 0x25b   : > { %v17724_v53 = vpop.eup %15974  ;;  %v5179_v34 = vsel %vm4698_vm2, %v17715_v55, 0.0  ;;  %v1420_v45 = vadd.f32 %v1419_v41, %v17625_v4 }
 0x25c   : > { %v5180_v28 = vsel %vm4698_vm2, %v17724_v53, 0.0  ;;  %v4709_v48 = vsel %vm4698_vm2, %v17718_v62, -inf  ;;  %v4995_v6 = vsub.f32 %v1747_v8, %v4743_v49  ;;  %v4996_v37 = vsub.f32 %v1752_v56, %v4743_v49 }
 0x25d   : > { %v5181_v33 = vadd.f32 %v5180_v28, %v5179_v34  ;;  %v4708_v18 = vsel %vm4698_vm2, %v1420_v45, -inf  ;;  %v1038_v8 = vmul.f32 %v20394_v43, %v16834_v19 }
 0x25e   : > { %v4710_v42 = vmax.f32 %v4708_v18, %v4709_v48  ;;  %v5067_v0 = vmul.f32 1.442695, %v4995_v6  ;;  %v5069_v20 = vmul.f32 1.442695, %v4996_v37  ;;  %v984_v37 = vmul.f32 %v20391_v25, %v20388_v13 }
 0x25f   : > { %v5182_v5 = vrot.slane %v5181_v33, 4  ;;  %15228 = vmatpush3.bf16.xpose.msk.msra.mxu1 %vm16428_vm1, %v15223_v60  ;;  %15384 = vmatpush3.bf16.xpose.msk.msra.mxu0 %vm16428_vm1, %v15379_v2  ;;  %v1039_v60 = vmul.f32 %v20394_v43, %v16904_v31  ;;  %v1184_v2 = vmul.f32 %v20402_v47, %v20384_v44 }
 0x260   : > { %v4711_v41 = vrot.slane %v4710_v42, 4  ;;  %15255 = vmatprep.subr.msk.bf16.mxu1 %vm16428_vm1, %v15253_v9  ;;  %15387 = vmatprep.subr.msk.bf16.mxu0 %vm16428_vm1, %v15385_v23  ;;  %15976 = vpow2.f32 %v5067_v0 }
 0x261   : > { %v5183_v56 = vadd.f32 %v5182_v5, %v5181_v33  ;;  %15978 = vpow2.f32 %v5069_v20  ;;  %v15259_v5 = vpack.c.bf16 %v1039_v60, %v1038_v8  ;;  %v15391_v0 = vpack.c.bf16 %v1185_v22, %v1184_v2 }
 0x262   : > { %v4712_v52 = vmax.f32 %v4710_v42, %v4711_v41  ;;  %v985_v33 = vmul.f32 %v20391_v25, %v17029_v32 }
 0x263   : > { %v5184_v29 = vrot.slane %v5183_v56, 2 }
 0x264   : > { %v4713_v16 = vrot.slane %v4712_v52, 2 }
 0x265   : > { %v5185_v49 = vadd.f32 %v5184_v29, %v5183_v56 }
 0x266   : > { %v4714_v34 = vmax.f32 %v4712_v52, %v4713_v16  ;;  %13925 = vmatmul.mubr.msk.f32.vlgmr.msra.gmra.mrb[16].mxu1 %vm357_vm0, %v17475_v17  ;;  %v1107_v17 = vmul.f32 %v20399_v38, %v16904_v31 }
 0x267   : > { %15258 = vmatpush3.bf16.xpose.msk.msra.mxu1 %vm16428_vm1, %v15253_v9  ;;  %15390 = vmatpush3.bf16.xpose.msk.msra.mxu0 %vm16428_vm1, %v15385_v23  ;;  %v5186_v20 = vrot.slane %v5185_v49, 1 }
 0x268   : > { %v4715_v44 = vrot.slane %v4714_v34, 1  ;;  %15261 = vmatprep.subr.msk.bf16.mxu1 %vm16428_vm1, %v15259_v5  ;;  %15393 = vmatprep.subr.msk.bf16.mxu0 %vm16428_vm1, %v15391_v0  ;;  %v15265_v2 = vpack.c.bf16 %v1107_v17, %v1106_v21  ;;  %v1174_v21 = vmul.f32 %v20402_v47, %v16834_v19  ;;  %v1175_v17 = vmul.f32 %v20402_v47, %v16904_v31 }
 0x269   : > { %v5187_v28 = vadd.f32 %v5186_v20, %v5185_v49  ;;  %13962 = vmatprep.mubr.msk.f32.mxu1 %vm357_vm0, %v17518_v3  ;;  %v13793_v9 = vpop.f32.mrb[66].mxu0 }
 0x26a   : > { %v17766_v48 = vpop.eup %15976  ;;  %v4716_v6 = vmax.f32 %v4714_v34, %v4715_v44  ;;  %v17773_v18 = vadd.f32 %v13793_v9, %v17615_v15  ;;  %v1964_v42 = vpop.f32.mrb[67].mxu0  ;;  %v15421_v34 = vpack.c.bf16 %v985_v33, %v984_v37  ;;  %v1053_v9 = vmul.f32 %v20394_v43, %v17029_v32 }
 0x26b   : > { %v17775_v23 = vpop.eup %15978  ;;  %15980 = vrcp.f32 %v5187_v28  ;;  %v5215_v3 = vsel %vm4698_vm2, %v17766_v48, 0.0  ;;  %v17780_v41 = vadd.f32 %v1964_v42, %v17625_v4  ;;  %v17789_v44 = vpop.permute.xlu1 %3285 }
 0x26c   : > { %v4989_v56 = vsub.f32 %v1420_v45, %v4716_v6  ;;  %v4990_v8 = vsub.f32 %v17718_v62, %v4716_v6  ;;  %v5216_v52 = vsel %vm4698_vm2, %v17775_v23, 0.0  ;;  %v4754_v60 = vsel %vm4698_vm2, %v17773_v18, -inf  ;;  %v17803_v28 = vpop.permute.xlu0 %3501 }
 0x26d   : > { %v5217_v22 = vadd.f32 %v5216_v52, %v5215_v3  ;;  %v4753_v29 = vsel %vm4698_vm2, %v17780_v41, -inf }
 0x26e   : > { %v5055_v16 = vmul.f32 1.442695, %v4989_v56  ;;  %v5057_v49 = vmul.f32 1.442695, %v4990_v8  ;;  %v4755_v20 = vmax.f32 %v4753_v29, %v4754_v60  ;;  %v15271_v56 = vpack.c.bf16 %v1175_v17, %v1174_v21 }
 0x26f   : > { %15264 = vmatpush3.bf16.xpose.msk.msra.mxu1 %vm16428_vm1, %v15259_v5  ;;  %15396 = vmatpush3.bf16.xpose.msk.msra.mxu0 %vm16428_vm1, %v15391_v0  ;;  %v5218_v62 = vrot.slane %v5217_v22, 4  ;;  %v1052_v0 = vmul.f32 %v20394_v43, %v20388_v13  ;;  %v3395_v3 = vpop.permute.xlu1 %3394  ;;  %v1121_v21 = vmul.f32 %v20399_v38, %v17029_v32 }
 0x270   : > { %15982 = vpow2.f32 %v5055_v16  ;;  %15267 = vmatprep.subr.msk.bf16.mxu1 %vm16428_vm1, %v15265_v2  ;;  %15423 = vmatprep.subr.msk.bf16.mxu0 %vm16428_vm1, %v15421_v34  ;;  %v4756_v45 = vrot.slane %v4755_v20, 4  ;;  %v3611_v29 = vpop.permute.xlu0 %3610 }
 0x271   : > { %15984 = vpow2.f32 %v5057_v49  ;;  %v5219_v5 = vadd.f32 %v5218_v62, %v5217_v22  ;;  %v15427_v19 = vpack.c.bf16 %v1053_v9, %v1052_v0 }
 0x272   : > { %v4757_v6 = vmax.f32 %v4755_v20, %v4756_v45  ;;  %v1120_v45 = vmul.f32 %v20399_v38, %v20388_v13 }
 0x273   : > { %v5220_v37 = vrot.slane %v5219_v5, 2 }
 0x274   : > { %v4758_v33 = vrot.slane %v4757_v6, 2 }
 0x275   : > { %v15981_v42 = vpop.eup %15980  ;;  %v5221_v8 = vadd.f32 %v5220_v37, %v5219_v5 }
 0x276   : > { %14058 = vmatmul.mubr.msk.f32.vlgmr.msra.gmra.mrb[80].mxu0 %vm357_vm0, %v3395_v3  ;;  %v5499_v31 = vmul.f32 %v15981_v42, %v17715_v55  ;;  %v5500_v52 = vmul.f32 %v15981_v42, %v17724_v53  ;;  %v4759_v60 = vmax.f32 %v4757_v6, %v4758_v33  ;;  %v974_v53 = vmul.f32 %v20391_v25, %v16897_v27 }
 0x277   : > { %15270 = vmatpush3.bf16.xpose.msk.msra.mxu1 %vm16428_vm1, %v15265_v2  ;;  %15426 = vmatpush3.bf16.xpose.msk.msra.mxu0 %vm16428_vm1, %v15421_v34  ;;  %v5222_v22 = vrot.slane %v5221_v8, 1  ;;  %v975_v2 = vmul.f32 %v20391_v25, %v16949_v24 }
 0x278   : > { %15273 = vmatprep.subr.msk.bf16.mxu1 %vm16428_vm1, %v15271_v56  ;;  %15429 = vmatprep.subr.msk.bf16.mxu0 %vm16428_vm1, %v15427_v19  ;;  %v4760_v16 = vrot.slane %v4759_v60, 1 }
 0x279   : > { %5563 = vxpose.xlu0.b32.start [1/2] (short) (narrow) %v5499_v31, 64  ;;  %v13717_v55 = vpop.f32.mrb[4].mxu1  ;;  %14095 = vmatprep.mubr.msk.f32.mxu0 %vm357_vm0, %v3611_v29  ;;  %v5223_v49 = vadd.f32 %v5222_v22, %v5221_v8  ;;  %v15301_v31 = vpack.c.bf16 %v975_v2, %v974_v53  ;;  %v15433_v22 = vpack.c.bf16 %v1121_v21, %v1120_v45 }
 0x27a   : > { %v17825_v34 = vpop.eup %15982  ;;  %v17828_v20 = vadd.f32 %v13717_v55, %v17615_v15  ;;  %v1528_v62 = vpop.f32.mrb[5].mxu1  ;;  %v4761_v17 = vmax.f32 %v4759_v60, %v4760_v16  ;;  %v1043_v53 = vmul.f32 %v20394_v43, %v16949_v24  ;;  %v1189_v2 = vmul.f32 %v20402_v47, %v17029_v32 }
 0x27b   : > { %v17834_v5 = vpop.eup %15984  ;;  %v5188_v0 = vsel %vm4698_vm2, %v17825_v34, 0.0  ;;  %v17839_v9 = vadd.f32 %v1528_v62, %v17625_v4  ;;  %15986 = vrcp.f32 %v5223_v49 }
 0x27c   : > { %v5189_v6 = vsel %vm4698_vm2, %v17834_v5, 0.0  ;;  %v4718_v37 = vsel %vm4698_vm2, %v17828_v20, -inf  ;;  %v4999_v33 = vsub.f32 %v17780_v41, %v4761_v17  ;;  %v5000_v42 = vsub.f32 %v17773_v18, %v4761_v17 }
 0x27d   : > { %v5190_v3 = vadd.f32 %v5189_v6, %v5188_v0  ;;  %v4717_v8 = vsel %vm4698_vm2, %v17839_v9, -inf  ;;  %5564 = vxpose.xlu0.b32.end [2/2] (short) (narrow) %v5500_v52, 64  ;;  %v1042_v52 = vmul.f32 %v20394_v43, %v16897_v27 }
 0x27e   : > { %v4719_v60 = vmax.f32 %v4717_v8, %v4718_v37  ;;  %v5075_v29 = vmul.f32 1.442695, %v4999_v33  ;;  %v5077_v16 = vmul.f32 1.442695, %v5000_v42 }
 0x27f   : > { %v5191_v55 = vrot.slane %v5190_v3, 4  ;;  %15276 = vmatpush3.bf16.xpose.msk.msra.mxu1 %vm16428_vm1, %v15271_v56  ;;  %15432 = vmatpush3.bf16.xpose.msk.msra.mxu0 %vm16428_vm1, %v15427_v19  ;;  %v1188_v19 = vmul.f32 %v20402_v47, %v20388_v13  ;;  %v15307_v21 = vpack.c.bf16 %v1043_v53, %v1042_v52 }
 0x280   : > { %v4720_v41 = vrot.slane %v4719_v60, 4  ;;  %15303 = vmatprep.subr.msk.bf16.mxu1 %vm16428_vm1, %v15301_v31  ;;  %15435 = vmatprep.subr.msk.bf16.mxu0 %vm16428_vm1, %v15433_v22  ;;  %15988 = vpow2.f32 %v5075_v29 }
 0x281   : > { %v5192_v18 = vadd.f32 %v5191_v55, %v5190_v3  ;;  %15990 = vpow2.f32 %v5077_v16  ;;  %v15439_v6 = vpack.c.bf16 %v1189_v2, %v1188_v19 }
 0x282   : > { %v4721_v56 = vmax.f32 %v4719_v60, %v4720_v41  ;;  %v989_v60 = vmul.f32 %v20391_v25, %v17065_v58 }
 0x283   : > { %v5193_v49 = vrot.slane %v5192_v18, 2 }
 0x284   : > { %v4722_v62 = vrot.slane %v4721_v56, 2 }
 0x285   : > { %v15987_v45 = vpop.eup %15986  ;;  %v5194_v17 = vadd.f32 %v5193_v49, %v5192_v18 }
 0x286   : > { %v4723_v0 = vmax.f32 %v4721_v56, %v4722_v62  ;;  %13963 = vmatmul.mubr.msk.f32.vlgmr.msra.gmra.mrb[18].mxu1 %vm357_vm0, %v17584_v30  ;;  %v17868_v37 = vmul.f32 %v15987_v45, %v17766_v48  ;;  %v17871_v33 = vmul.f32 %v15987_v45, %v17775_v23  ;;  %v1110_v30 = vmul.f32 %v20399_v38, %v16897_v27 }
 0x287   : > { %15306 = vmatpush3.bf16.xpose.msk.msra.mxu1 %vm16428_vm1, %v15301_v31  ;;  %15438 = vmatpush3.bf16.xpose.msk.msra.mxu0 %vm16428_vm1, %v15433_v22  ;;  %v5195_v32 = vrot.slane %v5194_v17, 1  ;;  %v1111_v48 = vmul.f32 %v20399_v38, %v16949_v24  ;;  %v988_v31 = vmul.f32 %v20391_v25, %v17014_v50 }
 0x288   : > { %v4724_v13 = vrot.slane %v4723_v0, 1  ;;  %15309 = vmatprep.subr.msk.bf16.mxu1 %vm16428_vm1, %v15307_v21  ;;  %15441 = vmatprep.subr.msk.bf16.mxu0 %vm16428_vm1, %v15439_v6 }
 0x289   : > { %v5196_v23 = vadd.f32 %v5195_v32, %v5194_v17  ;;  %14000 = vmatprep.mubr.msk.f32.mxu1 %vm357_vm0, %v17600_v10  ;;  %v13831_v42 = vpop.f32.mrb[68].mxu0  ;;  %v15313_v56 = vpack.c.bf16 %v1111_v48, %v1110_v30  ;;  %v15469_v45 = vpack.c.bf16 %v989_v60, %v988_v31  ;;  %v1178_v30 = vmul.f32 %v20402_v47, %v16897_v27 }
 0x28a   : > { %v17887_v3 = vpop.eup %15988  ;;  %v4725_v8 = vmax.f32 %v4723_v0, %v4724_v13  ;;  %v17894_v22 = vadd.f32 %v13831_v42, %v17615_v15  ;;  %v2182_v29 = vpop.f32.mrb[69].mxu0  ;;  %v1056_v48 = vmul.f32 %v20394_v43, %v17014_v50 }
 0x28b   : > { %v17896_v16 = vpop.eup %15990  ;;  %15992 = vrcp.f32 %v5196_v23  ;;  %v5233_v10 = vsel %vm4698_vm2, %v17887_v3, 0.0  ;;  %v17901_v55 = vadd.f32 %v2182_v29, %v17625_v4  ;;  %v17911_v0 = vpop.permute.xlu1 %3503  ;;  %v1057_v23 = vmul.f32 %v20394_v43, %v17065_v58 }
 0x28c   : > { %v4991_v41 = vsub.f32 %v17839_v9, %v4725_v8  ;;  %v4992_v18 = vsub.f32 %v17828_v20, %v4725_v8  ;;  %v5234_v52 = vsel %vm4698_vm2, %v17896_v16, 0.0  ;;  %v4772_v53 = vsel %vm4698_vm2, %v17894_v22, -inf  ;;  %v17917_v9 = vpop.permute.xlu0 %3719 }
 0x28d   : > { %v5235_v19 = vadd.f32 %v5234_v52, %v5233_v10  ;;  %v4771_v2 = vsel %vm4698_vm2, %v17901_v55, -inf  ;;  %v15475_v52 = vpack.c.bf16 %v1057_v23, %v1056_v48 }
 0x28e   : > { %v5059_v49 = vmul.f32 1.442695, %v4991_v41  ;;  %v5061_v62 = vmul.f32 1.442695, %v4992_v18  ;;  %v4773_v17 = vmax.f32 %v4771_v2, %v4772_v53 }
 0x28f   : > { %15312 = vmatpush3.bf16.xpose.msk.msra.mxu1 %vm16428_vm1, %v15307_v21  ;;  %15444 = vmatpush3.bf16.xpose.msk.msra.mxu0 %vm16428_vm1, %v15439_v6  ;;  %v5236_v20 = vrot.slane %v5235_v19, 4  ;;  %v1179_v21 = vmul.f32 %v20402_v47, %v16949_v24  ;;  %v3613_v60 = vpop.permute.xlu1 %3612 }
 0x290   : > { %15994 = vpow2.f32 %v5059_v49  ;;  %15315 = vmatprep.subr.msk.bf16.mxu1 %vm16428_vm1, %v15313_v56  ;;  %15471 = vmatprep.subr.msk.bf16.mxu0 %vm16428_vm1, %v15469_v45  ;;  %v4774_v32 = vrot.slane %v4773_v17, 4  ;;  %v3829_v10 = vpop.permute.xlu0 %3828 }
 0x291   : > { %15996 = vpow2.f32 %v5061_v62  ;;  %v5237_v13 = vadd.f32 %v5236_v20, %v5235_v19  ;;  %v15319_v41 = vpack.c.bf16 %v1179_v21, %v1178_v30  ;;  %v1125_v20 = vmul.f32 %v20399_v38, %v17065_v58 }
 0x292   : > { %v4775_v6 = vmax.f32 %v4773_v17, %v4774_v32  ;;  %v1124_v17 = vmul.f32 %v20399_v38, %v17014_v50 }
 0x293   : > { %v5238_v42 = vrot.slane %v5237_v13, 2 }
 0x294   : > { %v4776_v8 = vrot.slane %v4775_v6, 2 }
 0x295   : > { %v15993_v31 = vpop.eup %15992  ;;  %v5239_v29 = vadd.f32 %v5238_v42, %v5237_v13 }
 0x296   : > { %14096 = vmatmul.mubr.msk.f32.vlgmr.msra.gmra.mrb[82].mxu0 %vm357_vm0, %v3613_v60  ;;  %v5501_v27 = vmul.f32 %v15993_v31, %v17825_v34  ;;  %v5502_v24 = vmul.f32 %v15993_v31, %v17834_v5  ;;  %v4777_v18 = vmax.f32 %v4775_v6, %v4776_v8  ;;  %v978_v5 = vmul.f32 %v20391_v25, %v16920_v26  ;;  %v17963_v6 = vpop.permute.xlu0 %3937 }
 0x297   : > { %15318 = vmatpush3.bf16.xpose.msk.msra.mxu1 %vm16428_vm1, %v15313_v56  ;;  %15474 = vmatpush3.bf16.xpose.msk.msra.mxu0 %vm16428_vm1, %v15469_v45  ;;  %v5240_v53 = vrot.slane %v5239_v29, 1  ;;  %v979_v56 = vmul.f32 %v20391_v25, %v16975_v11 }
 0x298   : > { %5731 = vxpose.xlu1.b32.start [1/2] (short) (narrow) %v5501_v27, 64  ;;  %15321 = vmatprep.subr.msk.bf16.mxu1 %vm16428_vm1, %v15319_v41  ;;  %v4778_v19 = vrot.slane %v4777_v18, 1  ;;  %v15481_v27 = vpack.c.bf16 %v1125_v20, %v1124_v17 }
 0x299   : > { %15477 = vmatprep.subr.msk.bf16.mxu0 %vm16428_vm1, %v15475_v52  ;;  %v13736_v34 = vpop.f32.mrb[6].mxu1  ;;  %14133 = vmatprep.mubr.msk.f32.mxu0 %vm357_vm0, %v3829_v10  ;;  %v5241_v2 = vadd.f32 %v5240_v53, %v5239_v29  ;;  %v15349_v29 = vpack.c.bf16 %v979_v56, %v978_v5  ;;  %v1193_v56 = vmul.f32 %v20402_v47, %v17065_v58 }
 0x29a   : > { %v17947_v49 = vpop.eup %15994  ;;  %v17950_v62 = vadd.f32 %v13736_v34, %v17615_v15  ;;  %v1637_v45 = vpop.f32.mrb[7].mxu1  ;;  %v4779_v32 = vmax.f32 %v4777_v18, %v4778_v19  ;;  %v1047_v34 = vmul.f32 %v20394_v43, %v16975_v11 }
 0x29b   : > { %v17956_v13 = vpop.eup %15996  ;;  %v5197_v30 = vsel %vm4698_vm2, %v17947_v49, 0.0  ;;  %v17961_v21 = vadd.f32 %v1637_v45, %v17625_v4  ;;  %15998 = vrcp.f32 %v5241_v2 }
 0x29c   : > { %v5198_v48 = vsel %vm4698_vm2, %v17956_v13, 0.0  ;;  %v4727_v23 = vsel %vm4698_vm2, %v17950_v62, -inf  ;;  %5732 = vxpose.xlu1.b32.end [2/2] (short) (narrow) %v5502_v24, 64  ;;  %v5003_v42 = vsub.f32 %v17901_v55, %v4779_v32  ;;  %v5004_v8 = vsub.f32 %v17894_v22, %v4779_v32 }
 0x29d   : > { %v5199_v31 = vadd.f32 %v5198_v48, %v5197_v30  ;;  %v4726_v60 = vsel %vm4698_vm2, %v17961_v21, -inf  ;;  %v1046_v55 = vmul.f32 %v20394_v43, %v16920_v26 }
 0x29e   : > { %v4728_v10 = vmax.f32 %v4726_v60, %v4727_v23  ;;  %v5083_v18 = vmul.f32 1.442695, %v5003_v42  ;;  %v5085_v53 = vmul.f32 1.442695, %v5004_v8 }
 0x29f   : > { %v5200_v19 = vrot.slane %v5199_v31, 4  ;;  %15324 = vmatpush3.bf16.xpose.msk.msra.mxu1 %vm16428_vm1, %v15319_v41  ;;  %15480 = vmatpush3.bf16.xpose.msk.msra.mxu0 %vm16428_vm1, %v15475_v52  ;;  %v17985_v41 = vpop.permute.xlu0 %4046  ;;  %v1192_v52 = vmul.f32 %v20402_v47, %v17014_v50  ;;  %v15355_v20 = vpack.c.bf16 %v1047_v34, %v1046_v55 }
 0x2a0   : > { %v4729_v24 = vrot.slane %v4728_v10, 4  ;;  %15351 = vmatprep.subr.msk.bf16.mxu1 %vm16428_vm1, %v15349_v29  ;;  %15483 = vmatprep.subr.msk.bf16.mxu0 %vm16428_vm1, %v15481_v27  ;;  %16000 = vpow2.f32 %v5083_v18 }
 0x2a1   : > { %v5201_v22 = vadd.f32 %v5200_v19, %v5199_v31  ;;  %16002 = vpow2.f32 %v5085_v53  ;;  %v15487_v48 = vpack.c.bf16 %v1193_v56, %v1192_v52 }
 0x2a2   : > { %v4730_v5 = vmax.f32 %v4728_v10, %v4729_v24  ;;  %v992_v10 = vmul.f32 %v20391_v25, %v20395_v39 }
 0x2a3   : > { %v5202_v2 = vrot.slane %v5201_v22, 2  ;;  %v18003_v58 = vpop.permute.xlu0 %4155 }
 0x2a4   : > { %v4731_v45 = vrot.slane %v4730_v5, 2 }
 0x2a5   : > { %v15999_v17 = vpop.eup %15998  ;;  %v5203_v32 = vadd.f32 %v5202_v2, %v5201_v22 }
 0x2a6   : > { %v4732_v30 = vmax.f32 %v4730_v5, %v4731_v45  ;;  %14001 = vmatmul.mubr.msk.f32.vlgmr.msra.gmra.mrb[20].mxu1 %vm357_vm0, %v17681_v35  ;;  %v17994_v23 = vmul.f32 %v15999_v17, %v17887_v3  ;;  %v17997_v42 = vmul.f32 %v15999_v17, %v17896_v16  ;;  %v1114_v35 = vmul.f32 %v20399_v38, %v16920_v26 }
 0x2a7   : > { %15354 = vmatpush3.bf16.xpose.msk.msra.mxu1 %vm16428_vm1, %v15349_v29  ;;  %15486 = vmatpush3.bf16.xpose.msk.msra.mxu0 %vm16428_vm1, %v15481_v27  ;;  %v5204_v50 = vrot.slane %v5203_v32, 1  ;;  %v1115_v3 = vmul.f32 %v20399_v38, %v16975_v11  ;;  %v993_v27 = vmul.f32 %v20391_v25, %v17098_v14  ;;  %v18039_v45 = vpop.permute.xlu0 %4264 }
 0x2a8   : > { %v4733_v8 = vrot.slane %v4732_v30, 1  ;;  %15357 = vmatprep.subr.msk.bf16.mxu1 %vm16428_vm1, %v15355_v20  ;;  %15489 = vmatprep.subr.msk.bf16.mxu0 %vm16428_vm1, %v15487_v48 }
 0x2a9   : > { %14038 = vmatprep.mubr.msk.f32.mxu1 %vm357_vm0, %v17693_v51  ;;  %v5205_v16 = vadd.f32 %v5204_v50, %v5203_v32  ;;  %v13869_v31 = vpop.f32.mrb[70].mxu0  ;;  %v15361_v52 = vpack.c.bf16 %v1115_v3, %v1114_v35  ;;  %v1182_v3 = vmul.f32 %v20402_v47, %v16920_v26 }
 0x2aa   : > { %v18015_v60 = vpop.eup %16000  ;;  %v4734_v29 = vmax.f32 %v4732_v30, %v4733_v8  ;;  %v18022_v18 = vadd.f32 %v13869_v31, %v17615_v15  ;;  %v2400_v51 = vpop.f32.mrb[71].mxu0  ;;  %v15517_v30 = vpack.c.bf16 %v993_v27, %v992_v10  ;;  %v1061_v31 = vmul.f32 %v20394_v43, %v17098_v14 }
 0x2ab   : > { %v18024_v53 = vpop.eup %16002  ;;  %16004 = vrcp.f32 %v5205_v16  ;;  %v5251_v19 = vsel %vm4698_vm2, %v18015_v60, 0.0  ;;  %v18029_v24 = vadd.f32 %v2400_v51, %v17625_v4  ;;  %v18059_v10 = vpop.permute.xlu0 %4373 }
 0x2ac   : > { %v4993_v22 = vsub.f32 %v17961_v21, %v4734_v29  ;;  %v4994_v55 = vsub.f32 %v17950_v62, %v4734_v29  ;;  %v5252_v34 = vsel %vm4698_vm2, %v18024_v53, 0.0  ;;  %v4790_v5 = vsel %vm4698_vm2, %v18022_v18, -inf  ;;  %v18041_v21 = vpop.permute.xlu1 %3721 }
 0x2ad   : > { %v5253_v56 = vadd.f32 %v5252_v34, %v5251_v19  ;;  %v4789_v2 = vsel %vm4698_vm2, %v18029_v24, -inf }
 0x2ae   : > { %v5063_v17 = vmul.f32 1.442695, %v4993_v22  ;;  %v5065_v32 = vmul.f32 1.442695, %v4994_v55  ;;  %v4791_v50 = vmax.f32 %v4789_v2, %v4790_v5 }
 0x2af   : > { %15360 = vmatpush3.bf16.xpose.msk.msra.mxu1 %vm16428_vm1, %v15355_v20  ;;  %15492 = vmatpush3.bf16.xpose.msk.msra.mxu0 %vm16428_vm1, %v15487_v48  ;;  %v5254_v62 = vrot.slane %v5253_v56, 4  ;;  %v1183_v20 = vmul.f32 %v20402_v47, %v16975_v11  ;;  %v1060_v48 = vmul.f32 %v20394_v43, %v20395_v39 }
 0x2b0   : > { %16006 = vpow2.f32 %v5063_v17  ;;  %15363 = vmatprep.subr.msk.bf16.mxu1 %vm16428_vm1, %v15361_v52  ;;  %15519 = vmatprep.subr.msk.bf16.mxu0 %vm16428_vm1, %v15517_v30  ;;  %v4792_v8 = vrot.slane %v4791_v50, 4  ;;  %v3831_v19 = vpop.permute.xlu1 %3830 }
 0x2b1   : > { %16008 = vpow2.f32 %v5065_v32  ;;  %v5255_v35 = vadd.f32 %v5254_v62, %v5253_v56  ;;  %v15367_v55 = vpack.c.bf16 %v1183_v20, %v1182_v3  ;;  %v15523_v5 = vpack.c.bf16 %v1061_v31, %v1060_v48 }
 0x2b2   : > { %v4793_v16 = vmax.f32 %v4791_v50, %v4792_v8  ;;  %v1128_v8 = vmul.f32 %v20399_v38, %v20395_v39 }
 0x2b3   : > { %v5256_v29 = vrot.slane %v5255_v35, 2 }
 0x2b4   : > { %v4794_v27 = vrot.slane %v4793_v16, 2 }
 0x2b5   : > { %v16005_v51 = vpop.eup %16004  ;;  %v5257_v22 = vadd.f32 %v5256_v29, %v5255_v35  ;;  %v1129_v35 = vmul.f32 %v20399_v38, %v17098_v14 }
 0x2b6   : > { %14134 = vmatmul.mubr.msk.f32.vlgmr.msra.gmra.mrb[84].mxu0 %vm357_vm0, %v3831_v19  ;;  %v5503_v26 = vmul.f32 %v16005_v51, %v17947_v49  ;;  %v5504_v11 = vmul.f32 %v16005_v51, %v17956_v13  ;;  %v4795_v34 = vmax.f32 %v4793_v16, %v4794_v27  ;;  %v982_v13 = vmul.f32 %v20391_v25, %v20385_v63 }
 0x2b7   : > { %15366 = vmatpush3.bf16.xpose.msk.msra.mxu1 %vm16428_vm1, %v15361_v52  ;;  %15522 = vmatpush3.bf16.xpose.msk.msra.mxu0 %vm16428_vm1, %v15517_v30  ;;  %v5258_v56 = vrot.slane %v5257_v22, 1  ;;  %v983_v52 = vmul.f32 %v20391_v25, %v17019_v7  ;;  %v18080_v30 = vpop.permute.xlu0 %4482 }
 0x2b8   : > { %5898 = vxpose.xlu1.b32.start [1/2] (short) (narrow) %v5503_v26, 64  ;;  %15369 = vmatprep.subr.msk.bf16.mxu1 %vm16428_vm1, %v15367_v55  ;;  %v4796_v2 = vrot.slane %v4795_v34, 1 }
 0x2b9   : > { %15525 = vmatprep.subr.msk.bf16.mxu0 %vm16428_vm1, %v15523_v5  ;;  %v13774_v49 = vpop.f32.mrb[8].mxu1  ;;  %14171 = vmatprep.mubr.msk.f32.mxu0 %vm357_vm0, %v17985_v41  ;;  %v5259_v17 = vadd.f32 %v5258_v56, %v5257_v22  ;;  %v15397_v22 = vpack.c.bf16 %v983_v52, %v982_v13  ;;  %v1050_v52 = vmul.f32 %v20394_v43, %v20385_v63 }
 0x2ba   : > { %v18078_v32 = vpop.eup %16006  ;;  %v18083_v50 = vadd.f32 %v13774_v49, %v17615_v15  ;;  %v1855_v62 = vpop.f32.mrb[9].mxu1  ;;  %v4797_v3 = vmax.f32 %v4795_v34, %v4796_v2  ;;  %v15529_v34 = vpack.c.bf16 %v1129_v35, %v1128_v8 }
 0x2bb   : > { %v18089_v20 = vpop.eup %16008  ;;  %v5206_v41 = vsel %vm4698_vm2, %v18078_v32, 0.0  ;;  %v18094_v16 = vadd.f32 %v1855_v62, %v17625_v4  ;;  %16010 = vrcp.f32 %v5259_v17  ;;  %v18104_v49 = vpop.permute.xlu1 %3939  ;;  %v1197_v62 = vmul.f32 %v20402_v47, %v17098_v14 }
 0x2bc   : > { %v5207_v48 = vsel %vm4698_vm2, %v18089_v20, 0.0  ;;  %v4745_v31 = vsel %vm4698_vm2, %v18083_v50, -inf  ;;  %5899 = vxpose.xlu1.b32.end [2/2] (short) (narrow) %v5504_v11, 64  ;;  %v5007_v29 = vsub.f32 %v18029_v24, %v4797_v3  ;;  %v5008_v27 = vsub.f32 %v18022_v18, %v4797_v3  ;;  %v18110_v24 = vpop.permute.xlu0 %4591 }
 0x2bd   : > { %v5208_v51 = vadd.f32 %v5207_v48, %v5206_v41  ;;  %v4744_v19 = vsel %vm4698_vm2, %v18094_v16, -inf }
 0x2be   : > { %v4746_v26 = vmax.f32 %v4744_v19, %v4745_v31  ;;  %v5091_v56 = vmul.f32 1.442695, %v5007_v29  ;;  %v5093_v2 = vmul.f32 1.442695, %v5008_v27 }
 0x2bf   : > { %v5209_v17 = vrot.slane %v5208_v51, 4  ;;  %15372 = vmatpush3.bf16.xpose.msk.msra.mxu1 %vm16428_vm1, %v15367_v55  ;;  %15528 = vmatpush3.bf16.xpose.msk.msra.mxu0 %vm16428_vm1, %v15523_v5  ;;  %v1051_v55 = vmul.f32 %v20394_v43, %v17019_v7  ;;  %v1196_v5 = vmul.f32 %v20402_v47, %v20395_v39  ;;  %v18124_v41 = vpop.permute.xlu1 %4048 }
 0x2c0   : > { %v4747_v18 = vrot.slane %v4746_v26, 4  ;;  %15399 = vmatprep.subr.msk.bf16.mxu1 %vm16428_vm1, %v15397_v22  ;;  %15531 = vmatprep.subr.msk.bf16.mxu0 %vm16428_vm1, %v15529_v34  ;;  %16012 = vpow2.f32 %v5091_v56  ;;  %v18126_v31 = vpop.permute.xlu0 %15858 }
 0x2c1   : > { %v5210_v11 = vadd.f32 %v5209_v17, %v5208_v51  ;;  %16014 = vpow2.f32 %v5093_v2  ;;  %20423 = vst [vmem:[#allocation9_spill] sm:$0xff] %v18126_v31  ;;  %v15403_v27 = vpack.c.bf16 %v1051_v55, %v1050_v52  ;;  %v15535_v14 = vpack.c.bf16 %v1197_v62, %v1196_v5 }
 0x2c2   : > { %v4748_v13 = vmax.f32 %v4746_v26, %v4747_v18  ;;  %v1119_v2 = vmul.f32 %v20399_v38, %v17019_v7  ;;  %v997_v52 = vmul.f32 %v20391_v25, %v17129_v1 }
 0x2c3   : > { %v5211_v8 = vrot.slane %v5210_v11, 2 }
 0x2c4   : > { %v4749_v35 = vrot.slane %v4748_v13, 2 }
 0x2c5   : > { %v16011_v3 = vpop.eup %16010  ;;  %v5212_v48 = vadd.f32 %v5211_v8, %v5210_v11 }
 0x2c6   : > { %v4750_v29 = vmax.f32 %v4748_v13, %v4749_v35  ;;  %14039 = vmatmul.mubr.msk.f32.vlgmr.msra.gmra.mrb[22].mxu1 %vm357_vm0, %v17789_v44  ;;  %v18131_v51 = vmul.f32 %v16011_v3, %v18015_v60  ;;  %v18134_v39 = vmul.f32 %v16011_v3, %v18024_v53  ;;  %v1118_v44 = vmul.f32 %v20399_v38, %v20385_v63  ;;  %v18161_v13 = vpop.permute.xlu1 %4157 }
 0x2c7   : > { %15402 = vmatpush3.bf16.xpose.msk.msra.mxu1 %vm16428_vm1, %v15397_v22  ;;  %14076 = vmatprep.mubr.msk.f32.mxu1 %vm357_vm0, %v17803_v28  ;;  %v5213_v19 = vrot.slane %v5212_v48, 1  ;;  %v18150_v28 = vpop.permute.xlu0 %15868 }
 0x2c8   : > { %v4751_v26 = vrot.slane %v4750_v29, 1  ;;  %15534 = vmatpush3.bf16.xpose.msk.msra.mxu0 %vm16428_vm1, %v15529_v34  ;;  %15405 = vmatprep.subr.msk.bf16.mxu1 %vm16428_vm1, %v15403_v27  ;;  %20424 = vst [vmem:[#allocation25_spill] sm:$0xff] %v18150_v28  ;;  %v996_v34 = vmul.f32 %v20391_v25, %v20396_v54 }
 0x2c9   : > { %15537 = vmatprep.subr.msk.bf16.mxu0 %vm16428_vm1, %v15535_v14  ;;  %v5214_v60 = vadd.f32 %v5213_v19, %v5212_v48  ;;  %v13907_v53 = vpop.f32.mrb[72].mxu0 }
 0x2ca   : > { %v18148_v22 = vpop.eup %16012  ;;  %v4752_v56 = vmax.f32 %v4750_v29, %v4751_v26  ;;  %v18157_v17 = vadd.f32 %v13907_v53, %v17615_v15  ;;  %v2618_v18 = vpop.f32.mrb[73].mxu0 }
 0x2cb   : > { %v18159_v11 = vpop.eup %16014  ;;  %16016 = vrcp.f32 %v5214_v60  ;;  %v5269_v55 = vsel %vm4698_vm2, %v18148_v22, 0.0  ;;  %v18168_v5 = vadd.f32 %v2618_v18, %v17625_v4  ;;  %v18178_v29 = vpop.permute.xlu0 %15878  ;;  %v15409_v4 = vpack.c.bf16 %v1119_v2, %v1118_v44 }
 0x2cc   : > { %v4997_v62 = vsub.f32 %v18094_v16, %v4752_v56  ;;  %v4998_v15 = vsub.f32 %v18083_v50, %v4752_v56  ;;  %v5270_v8 = vsel %vm4698_vm2, %v18159_v11, 0.0  ;;  %v4808_v35 = vsel %vm4698_vm2, %v18157_v17, -inf  ;;  %20425 = vst [vmem:[#allocation29_spill] sm:$0xff] %v18178_v29  ;;  %v18186_v56 = vpop.permute.xlu1 %4266 }
 0x2cd   : > { %v5271_v3 = vadd.f32 %v5270_v8, %v5269_v55  ;;  %v4807_v48 = vsel %vm4698_vm2, %v18168_v5, -inf  ;;  %v15565_v50 = vpack.c.bf16 %v997_v52, %v996_v34  ;;  %v1186_v34 = vmul.f32 %v20402_v47, %v20385_v63 }
 0x2ce   : > { %v5071_v19 = vmul.f32 1.442695, %v4997_v62  ;;  %v5073_v26 = vmul.f32 1.442695, %v4998_v15  ;;  %v4809_v60 = vmax.f32 %v4807_v48, %v4808_v35  ;;  %v1064_v52 = vmul.f32 %v20394_v43, %v20396_v54 }
 0x2cf   : > { %15408 = vmatpush3.bf16.xpose.msk.msra.mxu1 %vm16428_vm1, %v15403_v27  ;;  %v5272_v16 = vrot.slane %v5271_v3, 4  ;;  %v18190_v2 = vpop.permute.xlu0 %15888  ;;  %v1065_v55 = vmul.f32 %v20394_v43, %v17129_v1 }
 0x2d0   : > { %16018 = vpow2.f32 %v5071_v19  ;;  %15540 = vmatpush3.bf16.xpose.msk.msra.mxu0 %vm16428_vm1, %v15535_v14  ;;  %15411 = vmatprep.subr.msk.bf16.mxu1 %vm16428_vm1, %v15409_v4  ;;  %v4810_v53 = vrot.slane %v4809_v60, 4  ;;  %20426 = vst [vmem:[#allocation10_spill] sm:$0xff] %v18190_v2  ;;  %v1187_v14 = vmul.f32 %v20402_v47, %v17019_v7  ;;  %v18204_v19 = vpop.permute.xlu1 %4375 }
 0x2d1   : > { %16020 = vpow2.f32 %v5073_v26  ;;  %15567 = vmatprep.subr.msk.bf16.mxu0 %vm16428_vm1, %v15565_v50  ;;  %v5273_v44 = vadd.f32 %v5272_v16, %v5271_v3 }
 0x2d2   : > { %v4811_v27 = vmax.f32 %v4809_v60, %v4810_v53  ;;  %v15415_v7 = vpack.c.bf16 %v1187_v14, %v1186_v34  ;;  %v1132_v34 = vmul.f32 %v20399_v38, %v20396_v54 }
 0x2d3   : > { %v5274_v18 = vrot.slane %v5273_v44, 2  ;;  %v18200_v35 = vpop.permute.xlu0 %15898 }
 0x2d4   : > { %v4812_v62 = vrot.slane %v4811_v27, 2  ;;  %20427 = vst [vmem:[#allocation27_spill] sm:$0xff] %v18200_v35 }
 0x2d5   : > { %v16017_v15 = vpop.eup %16016  ;;  %v5275_v8 = vadd.f32 %v5274_v18, %v5273_v44 }
 0x2d6   : > { %v5505_v3 = vmul.f32 %v16017_v15, %v18078_v32  ;;  %v5506_v48 = vmul.f32 %v16017_v15, %v18089_v20  ;;  %v4813_v63 = vmax.f32 %v4811_v27, %v4812_v62  ;;  %v15571_v32 = vpack.c.bf16 %v1065_v55, %v1064_v52  ;;  %v18243_v55 = vld [vmem:[%s20237_s3] sm:$0xff] }
 0x2d7   : > { %14172 = vmatmul.mubr.msk.f32.vlgmr.msra.gmra.mrb[86].mxu0 %vm357_vm0, %v18124_v41  ;;  %15414 = vmatpush3.bf16.xpose.msk.msra.mxu1 %vm16428_vm1, %v15409_v4  ;;  %v5276_v26 = vrot.slane %v5275_v8, 1  ;;  %v986_v41 = vmul.f32 %v20391_v25, %v16984_v57  ;;  %v18220_v53 = vpop.permute.xlu0 %15908  ;;  %v987_v27 = vmul.f32 %v20391_v25, %v17048_v46  ;;  %v1133_v15 = vmul.f32 %v20399_v38, %v17129_v1 }
 0x2d8   : > { %15570 = vmatpush3.bf16.xpose.msk.msra.mxu0 %vm16428_vm1, %v15565_v50  ;;  %14209 = vmatprep.mubr.msk.f32.mxu0 %vm357_vm0, %v18039_v45  ;;  %v4814_v60 = vrot.slane %v4813_v63, 1  ;;  %20428 = vst [vmem:[#allocation2_spill] sm:$0xff] %v18220_v53  ;;  %v18227_v45 = vld [vmem:[%s20237_s3 + $0x8] sm:$0xff] }
 0x2d9   : > { %6065 = vxpose.xlu0.b32.start [1/2] (short) (narrow) %v5505_v3, 64  ;;  %15417 = vmatprep.subr.msk.bf16.mxu1 %vm16428_vm1, %v15415_v7  ;;  %v13812_v20 = vpop.f32.mrb[10].mxu1  ;;  %v5277_v16 = vadd.f32 %v5276_v26, %v5275_v8  ;;  %v15445_v35 = vpack.c.bf16 %v987_v27, %v986_v41  ;;  %v1054_v41 = vmul.f32 %v20394_v43, %v16984_v57 }
 0x2da   : > { %v18218_v4 = vpop.eup %16018  ;;  %15573 = vmatprep.subr.msk.bf16.mxu0 %vm16428_vm1, %v15571_v32  ;;  %v18230_v50 = vadd.f32 %v18227_v45, %v13812_v20  ;;  %v2073_v44 = vpop.f32.mrb[11].mxu1  ;;  %v4815_v14 = vmax.f32 %v4813_v63, %v4814_v60 }
 0x2db   : > { %v18236_v18 = vpop.eup %16020  ;;  %v5224_v52 = vsel %vm4698_vm2, %v18218_v4, 0.0  ;;  %v18246_v62 = vadd.f32 %v18243_v55, %v2073_v44  ;;  %16022 = vrcp.f32 %v5277_v16  ;;  %v18256_v60 = vpop.permute.xlu1 %4484 }
 0x2dc   : > { %v5225_v8 = vsel %vm4698_vm2, %v18236_v18, 0.0  ;;  %v4763_v3 = vsel %vm4698_vm2, %v18230_v50, -inf  ;;  %v5011_v63 = vsub.f32 %v18168_v5, %v4815_v14  ;;  %v5012_v26 = vsub.f32 %v18157_v17, %v4815_v14  ;;  %v18260_v53 = vpop.permute.xlu0 %15918 }
 0x2dd   : > { %v5226_v20 = vadd.f32 %v5225_v8, %v5224_v52  ;;  %v4762_v44 = vsel %vm4698_vm2, %v18246_v62, -inf  ;;  %6066 = vxpose.xlu0.b32.end [2/2] (short) (narrow) %v5506_v48, 64  ;;  %20429 = vst [vmem:[#allocation34_spill] sm:$0xff] %v18260_v53  ;;  %v15577_v5 = vpack.c.bf16 %v1133_v15, %v1132_v34 }
 0x2de   : > { %v4764_v16 = vmax.f32 %v4762_v44, %v4763_v3  ;;  %v5099_v2 = vmul.f32 1.442695, %v5011_v63  ;;  %v5101_v29 = vmul.f32 1.442695, %v5012_v26  ;;  %v1123_v44 = vmul.f32 %v20399_v38, %v17048_v46 }
 0x2df   : > { %v5227_v28 = vrot.slane %v5226_v20, 4  ;;  %15420 = vmatpush3.bf16.xpose.msk.msra.mxu1 %vm16428_vm1, %v15415_v7  ;;  %v1055_v7 = vmul.f32 %v20394_v43, %v17048_v46  ;;  %v18274_v27 = vpop.permute.xlu1 %4593 }
 0x2e0   : > { %v4765_v31 = vrot.slane %v4764_v16, 4  ;;  %15576 = vmatpush3.bf16.xpose.msk.msra.mxu0 %vm16428_vm1, %v15571_v32  ;;  %15447 = vmatprep.subr.msk.bf16.mxu1 %vm16428_vm1, %v15445_v35  ;;  %16024 = vpow2.f32 %v5099_v2  ;;  %v1200_v32 = vmul.f32 %v20402_v47, %v20396_v54  ;;  %v1201_v2 = vmul.f32 %v20402_v47, %v17129_v1  ;;  %v18280_v34 = vpop.permute.xlu0 %15923 }
 0x2e1   : > { %v5228_v17 = vadd.f32 %v5227_v28, %v5226_v20  ;;  %15579 = vmatprep.subr.msk.bf16.mxu0 %vm16428_vm1, %v15577_v5  ;;  %16026 = vpow2.f32 %v5101_v29  ;;  %20430 = vst [vmem:[#allocation11_spill] sm:$0xff] %v18280_v34  ;;  %v15451_v15 = vpack.c.bf16 %v1055_v7, %v1054_v41  ;;  %v1001_v41 = vmul.f32 %v20391_v25, %v17158_v59 }
 0x2e2   : > { %v4766_v48 = vmax.f32 %v4764_v16, %v4765_v31  ;;  %v15583_v1 = vpack.c.bf16 %v1201_v2, %v1200_v32  ;;  %v1000_v16 = vmul.f32 %v20391_v25, %v17093_v40 }
 0x2e3   : > { %v5229_v28 = vrot.slane %v5228_v17, 2 }
 0x2e4   : > { %v4767_v14 = vrot.slane %v4766_v48, 2  ;;  %v18306_v26 = vpop.permute.xlu0 %15928 }
 0x2e5   : > { %v16023_v29 = vpop.eup %16022  ;;  %v5230_v31 = vadd.f32 %v5229_v28, %v5228_v17  ;;  %20431 = vst [vmem:[#allocation3_spill] sm:$0xff] %v18306_v26 }
 0x2e6   : > { %v4768_v52 = vmax.f32 %v4766_v48, %v4767_v14  ;;  %14077 = vmatmul.mubr.msk.f32.vlgmr.msra.gmra.mrb[24].mxu1 %vm357_vm0, %v17911_v0  ;;  %v18285_v8 = vmul.f32 %v16023_v29, %v18148_v22  ;;  %v18288_v3 = vmul.f32 %v16023_v29, %v18159_v11  ;;  %v18298_v0 = vpop.permute.xlu1 %15863  ;;  %v1122_v22 = vmul.f32 %v20399_v38, %v16984_v57 }
 0x2e7   : > { %15450 = vmatpush3.bf16.xpose.msk.msra.mxu1 %vm16428_vm1, %v15445_v35  ;;  %14114 = vmatprep.mubr.msk.f32.mxu1 %vm357_vm0, %v17917_v9  ;;  %v5231_v54 = vrot.slane %v5230_v31, 1 }
 0x2e8   : > { %v4769_v63 = vrot.slane %v4768_v52, 1  ;;  %15582 = vmatpush3.bf16.xpose.msk.msra.mxu0 %vm16428_vm1, %v15577_v5  ;;  %15453 = vmatprep.subr.msk.bf16.mxu1 %vm16428_vm1, %v15451_v15 }
 0x2e9   : > { %15585 = vmatprep.subr.msk.bf16.mxu0 %vm16428_vm1, %v15583_v1  ;;  %v5232_v11 = vadd.f32 %v5231_v54, %v5230_v31  ;;  %v13945_v35 = vpop.f32.mrb[74].mxu0 }
 0x2ea   : > { %v18304_v9 = vpop.eup %16024  ;;  %v4770_v20 = vmax.f32 %v4768_v52, %v4769_v63  ;;  %v18313_v5 = vadd.f32 %v18227_v45, %v13945_v35  ;;  %v2836_v17 = vpop.f32.mrb[75].mxu0 }
 0x2eb   : > { %v18315_v48 = vpop.eup %16026  ;;  %16028 = vrcp.f32 %v5232_v11  ;;  %v5287_v7 = vsel %vm4698_vm2, %v18304_v9, 0.0  ;;  %v18322_v32 = vadd.f32 %v18243_v55, %v2836_v17  ;;  %v18330_v31 = vpop.permute.xlu1 %15873  ;;  %v15457_v17 = vpack.c.bf16 %v1123_v44, %v1122_v22 }
 0x2ec   : > { %v5001_v2 = vsub.f32 %v18246_v62, %v4770_v20  ;;  %v5002_v28 = vsub.f32 %v18230_v50, %v4770_v20  ;;  %v5288_v14 = vsel %vm4698_vm2, %v18315_v48, 0.0  ;;  %v4826_v29 = vsel %vm4698_vm2, %v18313_v5, -inf  ;;  %v18334_v63 = vpop.permute.xlu0 %15943 }
 0x2ed   : > { %v5289_v52 = vadd.f32 %v5288_v14, %v5287_v7  ;;  %v4825_v54 = vsel %vm4698_vm2, %v18322_v32, -inf  ;;  %20432 = vst [vmem:[#allocation35_spill] sm:$0xff] %v18334_v63  ;;  %v15613_v50 = vpack.c.bf16 %v1001_v41, %v1000_v16  ;;  %v1190_v16 = vmul.f32 %v20402_v47, %v16984_v57 }
 0x2ee   : > { %v5079_v11 = vmul.f32 1.442695, %v5001_v2  ;;  %v5081_v35 = vmul.f32 1.442695, %v5002_v28  ;;  %v4827_v62 = vmax.f32 %v4825_v54, %v4826_v29  ;;  %v1068_v2 = vmul.f32 %v20394_v43, %v17093_v40 }
 0x2ef   : > { %15456 = vmatpush3.bf16.xpose.msk.msra.mxu1 %vm16428_vm1, %v15451_v15  ;;  %v5290_v20 = vrot.slane %v5289_v52, 4  ;;  %v18342_v14 = vpop.permute.xlu1 %15883  ;;  %v1069_v28 = vmul.f32 %v20394_v43, %v17158_v59 }
 0x2f0   : > { %16030 = vpow2.f32 %v5079_v11  ;;  %15588 = vmatpush3.bf16.xpose.msk.msra.mxu0 %vm16428_vm1, %v15583_v1  ;;  %15459 = vmatprep.subr.msk.bf16.mxu1 %vm16428_vm1, %v15457_v17  ;;  %v4828_v7 = vrot.slane %v4827_v62, 4  ;;  %v18346_v44 = vpop.permute.xlu0 %15953  ;;  %v1191_v1 = vmul.f32 %v20402_v47, %v17048_v46 }
 0x2f1   : > { %16032 = vpow2.f32 %v5081_v35  ;;  %15615 = vmatprep.subr.msk.bf16.mxu0 %vm16428_vm1, %v15613_v50  ;;  %v5291_v22 = vadd.f32 %v5290_v20, %v5289_v52  ;;  %20433 = vst [vmem:[#allocation37_spill] sm:$0xff] %v18346_v44 }
 0x2f2   : > { %v4829_v15 = vmax.f32 %v4827_v62, %v4828_v7  ;;  %v15463_v20 = vpack.c.bf16 %v1191_v1, %v1190_v16  ;;  %v1136_v1 = vmul.f32 %v20399_v38, %v17093_v40 }
 0x2f3   : > { %v5292_v41 = vrot.slane %v5291_v22, 2  ;;  %v18356_v11 = vpop.permute.xlu1 %15893 }
 0x2f4   : > { %v4830_v29 = vrot.slane %v4829_v15, 2  ;;  %v18358_v35 = vpop.permute.xlu0 %15963 }
 0x2f5   : > { %v16029_v54 = vpop.eup %16028  ;;  %v5293_v52 = vadd.f32 %v5292_v41, %v5291_v22  ;;  %20434 = vst [vmem:[#allocation12_spill] sm:$0xff] %v18358_v35 }
 0x2f6   : > { %6232 = vxpose.xlu0.b32.start [1/2] (short) (narrow) %v17868_v37, 64  ;;  %v5509_v57 = vmul.f32 %v16029_v54, %v18218_v4  ;;  %v5510_v46 = vmul.f32 %v16029_v54, %v18236_v18  ;;  %v4831_v62 = vmax.f32 %v4829_v15, %v4830_v29  ;;  %v15619_v37 = vpack.c.bf16 %v1069_v28, %v1068_v2 }
 0x2f7   : > { %14210 = vmatmul.mubr.msk.f32.vlgmr.msra.gmra.mrb[88].mxu0 %vm357_vm0, %v18186_v56  ;;  %15462 = vmatpush3.bf16.xpose.msk.msra.mxu1 %vm16428_vm1, %v15457_v17  ;;  %v5294_v7 = vrot.slane %v5293_v52, 1  ;;  %v18371_v4 = vpop.permute.xlu1 %15903  ;;  %v990_v18 = vmul.f32 %v20391_v25, %v20392_v61  ;;  %v991_v17 = vmul.f32 %v20391_v25, %v17080_v12 }
 0x2f8   : > { %15618 = vmatpush3.bf16.xpose.msk.msra.mxu0 %vm16428_vm1, %v15613_v50  ;;  %14247 = vmatprep.mubr.msk.f32.mxu0 %vm357_vm0, %v18080_v30  ;;  %v4832_v22 = vrot.slane %v4831_v62, 1 }
 0x2f9   : > { %6399 = vxpose.xlu1.b32.start [1/2] (short) (narrow) %v5509_v57, 64  ;;  %15465 = vmatprep.subr.msk.bf16.mxu1 %vm16428_vm1, %v15463_v20  ;;  %v13850_v56 = vpop.f32.mrb[12].mxu1  ;;  %v5295_v15 = vadd.f32 %v5294_v7, %v5293_v52  ;;  %v18389_v41 = vpop.trf.xlu0  ;;  %v15493_v44 = vpack.c.bf16 %v991_v17, %v990_v18  ;;  %v1204_v17 = vmul.f32 %v20402_v47, %v17093_v40 }
 0x2fa   : > { %v18379_v50 = vpop.eup %16030  ;;  %15621 = vmatprep.subr.msk.bf16.mxu0 %vm16428_vm1, %v15619_v37  ;;  %6233 = vxpose.xlu0.b32.end [2/2] (short) (narrow) %v17871_v33, 64  ;;  %v18385_v30 = vadd.f32 %v18227_v45, %v13850_v56  ;;  %v2291_v16 = vpop.f32.mrb[13].mxu1  ;;  %v4833_v2 = vmax.f32 %v4831_v62, %v4832_v22  ;;  %v1137_v33 = vmul.f32 %v20399_v38, %v17158_v59 }
 0x2fb   : > { %v18391_v28 = vpop.eup %16032  ;;  %v5242_v29 = vsel %vm4698_vm2, %v18379_v50, 0.0  ;;  %v18396_v54 = vadd.f32 %v18243_v55, %v2291_v16  ;;  %16034 = vrcp.f32 %v5295_v15  ;;  %v18408_v16 = vpop.permute.xlu1 %15913 }
 0x2fc   : > { %v5243_v52 = vsel %vm4698_vm2, %v18391_v28, 0.0  ;;  %v4781_v57 = vsel %vm4698_vm2, %v18385_v30, -inf  ;;  %v5015_v62 = vsub.f32 %v18322_v32, %v4833_v2  ;;  %v5016_v7 = vsub.f32 %v18313_v5, %v4833_v2 }
 0x2fd   : > { %v5244_v22 = vadd.f32 %v5243_v52, %v5242_v29  ;;  %v4780_v56 = vsel %vm4698_vm2, %v18396_v54, -inf  ;;  %6400 = vxpose.xlu1.b32.end [2/2] (short) (narrow) %v5510_v46, 64  ;;  %v15625_v34 = vpack.c.bf16 %v1137_v33, %v1136_v1  ;;  %v18416_v5 = vpop.trf.xlu0  ;;  %v1205_v1 = vmul.f32 %v20402_v47, %v17158_v59 }
 0x2fe   : > { %v4782_v35 = vmax.f32 %v4780_v56, %v4781_v57  ;;  %v5107_v15 = vmul.f32 1.442695, %v5015_v62  ;;  %v5109_v63 = vmul.f32 1.442695, %v5016_v7  ;;  %v1126_v56 = vmul.f32 %v20399_v38, %v20392_v61 }
 0x2ff   : > { %v5245_v26 = vrot.slane %v5244_v22, 4  ;;  %15468 = vmatpush3.bf16.xpose.msk.msra.mxu1 %vm16428_vm1, %v15463_v20  ;;  %v18420_v46 = vpop.permute.xlu1 %15933  ;;  %v1058_v20 = vmul.f32 %v20394_v43, %v20392_v61  ;;  %v15631_v40 = vpack.c.bf16 %v1205_v1, %v1204_v17 }
 0x300   : > { %v4783_v53 = vrot.slane %v4782_v35, 4  ;;  %15624 = vmatpush3.bf16.xpose.msk.msra.mxu0 %vm16428_vm1, %v15619_v37  ;;  %15495 = vmatprep.subr.msk.bf16.mxu1 %vm16428_vm1, %v15493_v44  ;;  %16036 = vpow2.f32 %v5107_v15  ;;  %v1059_v37 = vmul.f32 %v20394_v43, %v17080_v12  ;;  %v1127_v15 = vmul.f32 %v20399_v38, %v17080_v12 }
 0x301   : > { %v5246_v32 = vadd.f32 %v5245_v26, %v5244_v22  ;;  %15627 = vmatprep.subr.msk.bf16.mxu0 %vm16428_vm1, %v15625_v34  ;;  %16038 = vpow2.f32 %v5109_v63 }
 0x302   : > { %v4784_v18 = vmax.f32 %v4782_v35, %v4783_v53  ;;  %v15499_v53 = vpack.c.bf16 %v1059_v37, %v1058_v20  ;;  %v18432_v35 = vpop.trf.xlu0 }
 0x303   : > { %v5247_v26 = vrot.slane %v5246_v32, 2  ;;  %v18444_v62 = vpop.permute.xlu1 %15938 }
 0x304   : > { %v4785_v2 = vrot.slane %v4784_v18, 2 }
 0x305   : > { %v16035_v29 = vpop.eup %16034  ;;  %v5248_v33 = vadd.f32 %v5247_v26, %v5246_v32 }
 0x306   : > { %v4786_v63 = vmax.f32 %v4784_v18, %v4785_v2  ;;  %14115 = vmatmul.mubr.msk.f32.vlgmr.msra.gmra.mrb[26].mxu1 %vm357_vm0, %v18041_v21  ;;  %v18435_v52 = vmul.f32 %v16035_v29, %v18304_v9  ;;  %v18438_v57 = vmul.f32 %v16035_v29, %v18315_v48  ;;  %v20435_v9 = vld [vmem:[#allocation18_spill] sm:$0xff]  ;;  %v18474_v29 = vpop.trf.xlu0 }
 0x307   : > { %15498 = vmatpush3.bf16.xpose.msk.msra.mxu1 %vm16428_vm1, %v15493_v44  ;;  %14152 = vmatprep.mubr.msk.f32.mxu1 %vm357_vm0, %v17963_v6  ;;  %v5249_v59 = vrot.slane %v5248_v33, 1  ;;  %v15816_v48 = vunpack.i.h.bf16 %v20435_v9  ;;  %v15815_v20 = vunpack.i.l.bf16 %v20435_v9  ;;  %v18470_v1 = vpop.permute.xlu1 %15948 }
 0x308   : > { %v4787_v21 = vrot.slane %v4786_v63, 1  ;;  %15630 = vmatpush3.bf16.xpose.msk.msra.mxu0 %vm16428_vm1, %v15625_v34  ;;  %15501 = vmatprep.subr.msk.bf16.mxu1 %vm16428_vm1, %v15499_v53  ;;  %20436 = vst [vmem:[#allocation4_spill] sm:$0xff] %v18470_v1 }
 0x309   : > { %15633 = vmatprep.subr.msk.bf16.mxu0 %vm16428_vm1, %v15631_v40  ;;  %v5250_v44 = vadd.f32 %v5249_v59, %v5248_v33  ;;  %v13983_v7 = vpop.f32.mrb[76].mxu0  ;;  %v15661_v1 = vpack.c.bf16 %v15816_v48, %v15815_v20  ;;  %v1194_v20 = vmul.f32 %v20402_v47, %v20392_v61 }
 0x30a   : > { %v18453_v22 = vpop.eup %16036  ;;  %v4788_v6 = vmax.f32 %v4786_v63, %v4787_v21  ;;  %v18460_v34 = vadd.f32 %v18227_v45, %v13983_v7  ;;  %v3054_v32 = vpop.f32.mrb[77].mxu0  ;;  %v15505_v7 = vpack.c.bf16 %v1127_v15, %v1126_v56 }
 0x30b   : > { %v18462_v18 = vpop.eup %16038  ;;  %16040 = vrcp.f32 %v5250_v44  ;;  %v5305_v37 = vsel %vm4698_vm2, %v18453_v22, 0.0  ;;  %v18468_v17 = vadd.f32 %v18243_v55, %v3054_v32  ;;  %v18492_v15 = vpop.trf.xlu0 }
 0x30c   : > { %v5005_v26 = vsub.f32 %v18396_v54, %v4788_v6  ;;  %v5006_v2 = vsub.f32 %v18385_v30, %v4788_v6  ;;  %v5306_v33 = vsel %vm4698_vm2, %v18462_v18, 0.0  ;;  %v4844_v63 = vsel %vm4698_vm2, %v18460_v34, -inf  ;;  %v18484_v54 = vpop.permute.xlu1 %15958 }
 0x30d   : > { %v5307_v59 = vadd.f32 %v5306_v33, %v5305_v37  ;;  %v4843_v21 = vsel %vm4698_vm2, %v18468_v17, -inf  ;;  %20437 = vst [vmem:[#allocation13_spill] sm:$0xff] %v18484_v54  ;;  %v20438_v37 = vld [vmem:[#allocation17_spill] sm:$0xff] }
 0x30e   : > { %v5087_v9 = vmul.f32 1.442695, %v5005_v26  ;;  %v5089_v44 = vmul.f32 1.442695, %v5006_v2  ;;  %v4845_v32 = vmax.f32 %v4843_v21, %v4844_v63  ;;  %v15821_v26 = vunpack.i.h.bf16 %v20438_v37 }
 0x30f   : > { %15504 = vmatpush3.bf16.xpose.msk.msra.mxu1 %vm16428_vm1, %v15499_v53  ;;  %v5308_v30 = vrot.slane %v5307_v59, 4  ;;  %v15820_v56 = vunpack.i.l.bf16 %v20438_v37  ;;  %v20439_v37 = vld [vmem:[#allocation19_spill] sm:$0xff] }
 0x310   : > { %16042 = vpow2.f32 %v5087_v9  ;;  %15636 = vmatpush3.bf16.xpose.msk.msra.mxu0 %vm16428_vm1, %v15631_v40  ;;  %15507 = vmatprep.subr.msk.bf16.mxu1 %vm16428_vm1, %v15505_v7  ;;  %v4846_v6 = vrot.slane %v4845_v32, 4  ;;  %v1195_v40 = vmul.f32 %v20402_v47, %v17080_v12  ;;  %v18498_v33 = vpop.permute.xlu1 %15968  ;;  %v15830_v61 = vunpack.i.l.bf16 %v20439_v37 }
 0x311   : > { %16044 = vpow2.f32 %v5089_v44  ;;  %15662 = vmatprep.subr.bf16.mxu0 %v15661_v1  ;;  %v5309_v48 = vadd.f32 %v5308_v30, %v5307_v59  ;;  %v15665_v9 = vpack.c.bf16 %v15821_v26, %v15820_v56  ;;  %v15831_v44 = vunpack.i.h.bf16 %v20439_v37  ;;  %v5584_v26 = vpop.trf.xlu0  ;;  %v20440_v56 = vld [vmem:[#allocation36_spill] sm:$0xff] }
 0x312   : > { %v4847_v53 = vmax.f32 %v4845_v32, %v4846_v6  ;;  %v15511_v12 = vpack.c.bf16 %v1195_v40, %v1194_v20  ;;  %v20441_v20 = vld [vmem:[#allocation39_spill] sm:$0xff] }
 0x313   : > { %v5310_v2 = vrot.slane %v5309_v48, 2  ;;  %v995_v40 = vmul.f32 %v20391_v25, %v20441_v20 }
 0x314   : > { %v4848_v63 = vrot.slane %v4847_v53, 2 }
 0x315   : > { %v16041_v21 = vpop.eup %16040  ;;  %v5311_v54 = vadd.f32 %v5310_v2, %v5309_v48 }
 0x316   : > { %6566 = vxpose.xlu1.b32.start [1/2] (short) (narrow) %v17994_v23, 64  ;;  %v5513_v59 = vmul.f32 %v16041_v21, %v18379_v50  ;;  %v5514_v32 = vmul.f32 %v16041_v21, %v18391_v28  ;;  %v4849_v30 = vmax.f32 %v4847_v53, %v4848_v63  ;;  %v18527_v21 = vpack.c.bf16 %v15831_v44, %v15830_v61 }
 0x317   : > { %14248 = vmatmul.mubr.msk.f32.vlgmr.msra.gmra.mrb[90].mxu0 %vm357_vm0, %v18256_v60  ;;  %15510 = vmatpush3.bf16.xpose.msk.msra.mxu1 %vm16428_vm1, %v15505_v7  ;;  %v5312_v6 = vrot.slane %v5311_v54, 1  ;;  %v994_v60 = vmul.f32 %v20391_v25, %v20440_v56 }
 0x318   : > { %15664 = vmatpush3.bf16.msra.mxu0 %v15661_v1  ;;  %6733 = vxpose.xlu0.b32.start [1/2] (short) (narrow) %v5513_v59, 64  ;;  %v18509_v23 = vpop.trf.xlu1  ;;  %v4850_v50 = vrot.slane %v4849_v30, 1 }
 0x319   : > { %15513 = vmatprep.subr.msk.bf16.mxu1 %vm16428_vm1, %v15511_v12  ;;  %15666 = vmatprep.subr.bf16.mxu0 %v15665_v9  ;;  %v13888_v28 = vpop.f32.mrb[14].mxu1  ;;  %v5313_v48 = vadd.f32 %v5312_v6, %v5311_v54 }
 0x31a   : > { %v18515_v53 = vpop.eup %16042  ;;  %6567 = vxpose.xlu1.b32.end [2/2] (short) (narrow) %v17997_v42, 64  ;;  %v18519_v1 = vadd.f32 %v18227_v45, %v13888_v28  ;;  %14273 = vmatprep.mubr.msk.f32.mxu0 %vm5601_vm3, %v18389_v41  ;;  %v2509_v7 = vpop.f32.mrb[15].mxu1  ;;  %v4851_v2 = vmax.f32 %v4849_v30, %v4850_v50  ;;  %v15541_v50 = vpack.c.bf16 %v995_v40, %v994_v60 }
 0x31b   : > { %v18525_v63 = vpop.eup %16044  ;;  %v5260_v54 = vsel %vm4698_vm2, %v18515_v53, 0.0  ;;  %v18532_v42 = vadd.f32 %v18243_v55, %v2509_v7  ;;  %14274 = vmatmul.mubr.msk.f32.vlgmr.msra.gmra.mrb[92].mxu0 %vm5601_vm3, %v18416_v5  ;;  %16046 = vrcp.f32 %v5313_v48  ;;  %v5585_v28 = vpop.trf.xlu0  ;;  %v1062_v7 = vmul.f32 %v20394_v43, %v20440_v56 }
 0x31c   : > { %v5261_v41 = vsel %vm4698_vm2, %v18525_v63, 0.0  ;;  %v4799_v37 = vsel %vm4698_vm2, %v18519_v1, -inf  ;;  %6734 = vxpose.xlu0.b32.end [2/2] (short) (narrow) %v5514_v32, 64  ;;  %15668 = vmatpush3.bf16.msra.mxu0 %v15665_v9  ;;  %v5748_v44 = vpop.trf.xlu1  ;;  %v5019_v59 = vsub.f32 %v18468_v17, %v4851_v2  ;;  %v5020_v30 = vsub.f32 %v18460_v34, %v4851_v2 }
 0x31d   : > { %v5262_v61 = vadd.f32 %v5261_v41, %v5260_v54  ;;  %v4798_v6 = vsel %vm4698_vm2, %v18532_v42, -inf  ;;  %15674 = vmatprep.subr.bf16.mxu0 %v18527_v21  ;;  %14276 = vmatprep.mubr.msk.f32.mxu0 %vm5601_vm3, %v18432_v35 }
 0x31e   : > { %v4800_v5 = vmax.f32 %v4798_v6, %v4799_v37  ;;  %v5115_v48 = vmul.f32 1.442695, %v5019_v59  ;;  %v5117_v32 = vmul.f32 1.442695, %v5020_v30 }
 0x31f   : > { %v5263_v9 = vrot.slane %v5262_v61, 4  ;;  %14277 = vmatmul.mubr.msk.f32.gmra.mrb[94].mxu0 %vm5601_vm3, %v18474_v29  ;;  %15516 = vmatpush3.bf16.xpose.msk.msra.mxu1 %vm16428_vm1, %v15511_v12  ;;  %v1063_v29 = vmul.f32 %v20394_v43, %v20441_v20  ;;  %v5586_v2 = vpop.trf.xlu0 }
 0x320   : > { %v4801_v34 = vrot.slane %v4800_v5, 4  ;;  %15543 = vmatprep.subr.msk.bf16.mxu1 %vm16428_vm1, %v15541_v50  ;;  %14279 = vmatprep.mubr.msk.f32.mxu0 %vm5601_vm3, %v18492_v15  ;;  %v5749_v35 = vpop.trf.xlu1  ;;  %16048 = vpow2.f32 %v5115_v48 }
 0x321   : > { %v5264_v17 = vadd.f32 %v5263_v9, %v5262_v61  ;;  %16050 = vpow2.f32 %v5117_v32  ;;  %v15547_v59 = vpack.c.bf16 %v1063_v29, %v1062_v7 }
 0x322   : > { %v4802_v60 = vmax.f32 %v4800_v5, %v4801_v34  ;;  %v1131_v34 = vmul.f32 %v20399_v38, %v20441_v20 }
 0x323   : > { %14280 = vmatmul.mubr.msk.f32.gmra.mrb[96].mxu0 %vm5601_vm3, %v5584_v26  ;;  %v5265_v12 = vrot.slane %v5264_v17, 2  ;;  %v20442_v26 = vld [vmem:[#allocation6_spill] sm:$0xff] }
 0x324   : > { %v4803_v40 = vrot.slane %v4802_v60, 2  ;;  %14282 = vmatprep.mubr.msk.f32.mxu0 %vm5601_vm3, %v5585_v28  ;;  %v5750_v54 = vpop.trf.xlu1  ;;  %v15841_v6 = vunpack.i.h.bf16 %v20442_v26  ;;  %v15840_v5 = vunpack.i.l.bf16 %v20442_v26 }
 0x325   : > { %v16047_v15 = vpop.eup %16046  ;;  %v5266_v41 = vadd.f32 %v5265_v12, %v5264_v17 }
 0x326   : > { %v4804_v37 = vmax.f32 %v4802_v60, %v4803_v40  ;;  %14153 = vmatmul.mubr.msk.f32.vlgmr.msra.gmra.mrb[28].mxu1 %vm357_vm0, %v18104_v49  ;;  %v18564_v30 = vmul.f32 %v16047_v15, %v18453_v22  ;;  %v18567_v61 = vmul.f32 %v16047_v15, %v18462_v18  ;;  %v18591_v7 = vpack.c.bf16 %v15841_v6, %v15840_v5 }
 0x327   : > { %14283 = vmatmul.mubr.msk.f32.gmra.mrb[98].mxu0 %vm5601_vm3, %v5586_v2  ;;  %15546 = vmatpush3.bf16.xpose.msk.msra.mxu1 %vm16428_vm1, %v15541_v50  ;;  %v5267_v28 = vrot.slane %v5266_v41, 1  ;;  %v1130_v50 = vmul.f32 %v20399_v38, %v20440_v56 }
 0x328   : > { %v4805_v48 = vrot.slane %v4804_v37, 1  ;;  %14190 = vmatprep.mubr.msk.f32.mxu1 %vm357_vm0, %v18003_v58  ;;  %15549 = vmatprep.subr.msk.bf16.mxu1 %vm16428_vm1, %v15547_v59  ;;  %v5751_v49 = vpop.trf.xlu1 }
 0x329   : > { %14289 = vmatprep.mubr.msk.f32.mxu0 %vm5601_vm3, %v18509_v23  ;;  %v5268_v22 = vadd.f32 %v5267_v28, %v5266_v41  ;;  %v14021_v18 = vpop.f32.mrb[78].mxu0 }
 0x32a   : > { %v18580_v32 = vpop.eup %16048  ;;  %v4806_v9 = vmax.f32 %v4804_v37, %v4805_v48  ;;  %v18587_v58 = vadd.f32 %v18227_v45, %v14021_v18  ;;  %v3272_v17 = vpop.f32.mrb[79].mxu0  ;;  %v1198_v48 = vmul.f32 %v20402_v47, %v20440_v56 }
 0x32b   : > { %v18589_v60 = vpop.eup %16050  ;;  %14290 = vmatmul.mubr.msk.f32.vlgmr.msra.gmra.mrb[100].mxu0 %vm5601_vm3, %v5748_v44  ;;  %16052 = vrcp.f32 %v5268_v22  ;;  %v5323_v23 = vsel %vm4698_vm2, %v18580_v32, 0.0  ;;  %v18597_v29 = vadd.f32 %v18243_v55, %v3272_v17  ;;  %v1199_v22 = vmul.f32 %v20402_v47, %v20441_v20 }
 0x32c   : > { %v5009_v12 = vsub.f32 %v18532_v42, %v4806_v9  ;;  %v5010_v40 = vsub.f32 %v18519_v1, %v4806_v9  ;;  %15676 = vmatpush3.bf16.msra.mxu0 %v18527_v21  ;;  %v5752_v2 = vpop.trf.xlu1  ;;  %14292 = vmatprep.mubr.msk.f32.mxu0 %vm5601_vm3, %v5749_v35  ;;  %v5324_v15 = vsel %vm4698_vm2, %v18589_v60, 0.0  ;;  %v4862_v44 = vsel %vm4698_vm2, %v18587_v58, -inf }
 0x32d   : > { %15682 = vmatprep.subr.bf16.mxu0 %v18591_v7  ;;  %v5325_v41 = vadd.f32 %v5324_v15, %v5323_v23  ;;  %v4861_v37 = vsel %vm4698_vm2, %v18597_v29, -inf  ;;  %v15553_v1 = vpack.c.bf16 %v1131_v34, %v1130_v50  ;;  %v15559_v34 = vpack.c.bf16 %v1199_v22, %v1198_v48 }
 0x32e   : > { %v5095_v42 = vmul.f32 1.442695, %v5009_v12  ;;  %v5097_v26 = vmul.f32 1.442695, %v5010_v40  ;;  %v4863_v6 = vmax.f32 %v4861_v37, %v4862_v44  ;;  %v20444_v44 = vld [vmem:[#allocation41_spill] sm:$0xff] }
 0x32f   : > { %15552 = vmatpush3.bf16.xpose.msk.msra.mxu1 %vm16428_vm1, %v15547_v59  ;;  %14293 = vmatmul.mubr.msk.f32.gmra.mrb[102].mxu0 %vm5601_vm3, %v5750_v54  ;;  %v5326_v21 = vrot.slane %v5325_v41, 4 }
 0x330   : > { %16054 = vpow2.f32 %v5095_v42  ;;  %15555 = vmatprep.subr.msk.bf16.mxu1 %vm16428_vm1, %v15553_v1  ;;  %v5753_v35 = vpop.trf.xlu1  ;;  %14295 = vmatprep.mubr.msk.f32.mxu0 %vm5601_vm3, %v5751_v49  ;;  %v4864_v5 = vrot.slane %v4863_v6, 4 }
 0x331   : > { %16056 = vpow2.f32 %v5097_v26  ;;  %v5327_v28 = vadd.f32 %v5326_v21, %v5325_v41  ;;  %v999_v41 = vmul.f32 %v20391_v25, %v20444_v44 }
 0x332   : > { %v4865_v59 = vmax.f32 %v4863_v6, %v4864_v5 }
 0x333   : > { %6900 = vxpose.xlu1.b32.start [1/2] (short) (narrow) %v18131_v51, 64  ;;  %14296 = vmatmul.mubr.msk.f32.gmra.mrb[104].mxu0 %vm5601_vm3, %v5752_v2  ;;  %v5328_v54 = vrot.slane %v5327_v28, 2 }
 0x334   : > { %14298 = vmatprep.mubr.msk.f32.mxu0 %vm5601_vm3, %v5753_v35  ;;  %v4866_v18 = vrot.slane %v4865_v59, 2  ;;  %v5754_v56 = vpop.trf.xlu1 }
 0x335   : > { %v16053_v9 = vpop.eup %16052  ;;  %v5329_v49 = vadd.f32 %v5328_v54, %v5327_v28 }
 0x336   : > { %v5517_v50 = vmul.f32 %v16053_v9, %v18515_v53  ;;  %v5518_v17 = vmul.f32 %v16053_v9, %v18525_v63  ;;  %v4867_v23 = vmax.f32 %v4865_v59, %v4866_v18 }
 0x337   : > { %6901 = vxpose.xlu1.b32.end [2/2] (short) (narrow) %v18134_v39, 64  ;;  %15558 = vmatpush3.bf16.xpose.msk.msra.mxu1 %vm16428_vm1, %v15553_v1  ;;  %v5330_v51 = vrot.slane %v5329_v49, 1  ;;  %v20443_v39 = vld [vmem:[#allocation38_spill] sm:$0xff] }
 0x338   : > { %7067 = vxpose.xlu0.b32.start [1/2] (short) (narrow) %v5517_v50, 64  ;;  %15561 = vmatprep.subr.msk.bf16.mxu1 %vm16428_vm1, %v15559_v34  ;;  %v4868_v20 = vrot.slane %v4867_v23, 1  ;;  %v998_v15 = vmul.f32 %v20391_v25, %v20443_v39 }
 0x339   : > { %v13926_v12 = vpop.f32.mrb[16].mxu1  ;;  %14299 = vmatmul.mubr.msk.f32.gmra.mrb[106].mxu0 %vm5601_vm3, %v5754_v56  ;;  %v5331_v53 = vadd.f32 %v5330_v51, %v5329_v49 }
 0x33a   : > { %v18631_v40 = vpop.eup %16054  ;;  %v18634_v63 = vadd.f32 %v18227_v45, %v13926_v12  ;;  %v2727_v2 = vpop.f32.mrb[17].mxu1  ;;  %v4869_v37 = vmax.f32 %v4867_v23, %v4868_v20  ;;  %v15589_v59 = vpack.c.bf16 %v999_v41, %v998_v15 }
 0x33b   : > { %v18640_v42 = vpop.eup %16056  ;;  %v5278_v26 = vsel %vm4698_vm2, %v18631_v40, 0.0  ;;  %v2728_v1 = vadd.f32 %v18243_v55, %v2727_v2  ;;  %16058 = vrcp.f32 %v5331_v53 }
 0x33c   : > { %v5279_v6 = vsel %vm4698_vm2, %v18640_v42, 0.0  ;;  %v4817_v21 = vsel %vm4698_vm2, %v18634_v63, -inf  ;;  %7068 = vxpose.xlu0.b32.end [2/2] (short) (narrow) %v5518_v17, 64  ;;  %v5023_v35 = vsub.f32 %v18597_v29, %v4869_v37  ;;  %v5024_v5 = vsub.f32 %v18587_v58, %v4869_v37 }
 0x33d   : > { %v5280_v28 = vadd.f32 %v5279_v6, %v5278_v26  ;;  %v4816_v48 = vsel %vm4698_vm2, %v2728_v1, -inf  ;;  %v1066_v58 = vmul.f32 %v20394_v43, %v20443_v39  ;;  %v1067_v17 = vmul.f32 %v20394_v43, %v20444_v44 }
 0x33e   : > { %v4818_v22 = vmax.f32 %v4816_v48, %v4817_v21  ;;  %v5123_v54 = vmul.f32 1.442695, %v5023_v35  ;;  %v5125_v18 = vmul.f32 1.442695, %v5024_v5  ;;  %v1135_v21 = vmul.f32 %v20399_v38, %v20444_v44 }
 0x33f   : > { %v5281_v9 = vrot.slane %v5280_v28, 4  ;;  %15564 = vmatpush3.bf16.xpose.msk.msra.mxu1 %vm16428_vm1, %v15559_v34  ;;  %v15595_v34 = vpack.c.bf16 %v1067_v17, %v1066_v58 }
 0x340   : > { %v4819_v49 = vrot.slane %v4818_v22, 4  ;;  %15591 = vmatprep.subr.msk.bf16.mxu1 %vm16428_vm1, %v15589_v59  ;;  %16060 = vpow2.f32 %v5123_v54 }
 0x341   : > { %v5282_v50 = vadd.f32 %v5281_v9, %v5280_v28  ;;  %16062 = vpow2.f32 %v5125_v18 }
 0x342   : > { %v4820_v29 = vmax.f32 %v4818_v22, %v4819_v49 }
 0x343   : > { %v5283_v56 = vrot.slane %v5282_v50, 2 }
 0x344   : > { %v4821_v23 = vrot.slane %v4820_v29, 2 }
 0x345   : > { %v16059_v51 = vpop.eup %16058  ;;  %v5284_v20 = vadd.f32 %v5283_v56, %v5282_v50 }
 0x346   : > { %v4822_v12 = vmax.f32 %v4820_v29, %v4821_v23  ;;  %14191 = vmatmul.mubr.msk.f32.vlgmr.msra.gmra.mrb[30].mxu1 %vm357_vm0, %v18161_v13  ;;  %v18663_v53 = vmul.f32 %v16059_v51, %v18580_v32  ;;  %v18666_v2 = vmul.f32 %v16059_v51, %v18589_v60  ;;  %v18674_v13 = vpop.trf.xlu1  ;;  %v1134_v60 = vmul.f32 %v20399_v38, %v20443_v39 }
 0x347   : > { %15594 = vmatpush3.bf16.xpose.msk.msra.mxu1 %vm16428_vm1, %v15589_v59  ;;  %14228 = vmatprep.mubr.msk.f32.mxu1 %vm357_vm0, %v18059_v10  ;;  %v5285_v15 = vrot.slane %v5284_v20, 1 }
 0x348   : > { %v4823_v41 = vrot.slane %v4822_v12, 1  ;;  %15597 = vmatprep.subr.msk.bf16.mxu1 %vm16428_vm1, %v15595_v34  ;;  %v15601_v58 = vpack.c.bf16 %v1135_v21, %v1134_v60 }
 0x349   : > { %v14059_v37 = vpop.f32.mrb[80].mxu0  ;;  %v5286_v26 = vadd.f32 %v5285_v15, %v5284_v20  ;;  %v1202_v20 = vmul.f32 %v20402_v47, %v20443_v39 }
 0x34a   : > { %v18676_v32 = vpop.eup %16060  ;;  %v4824_v6 = vmax.f32 %v4822_v12, %v4823_v41  ;;  %v18683_v10 = vadd.f32 %v18227_v45, %v14059_v37  ;;  %v3490_v35 = vpop.f32.mrb[81].mxu0  ;;  %v1203_v12 = vmul.f32 %v20402_v47, %v20444_v44 }
 0x34b   : > { %v18685_v5 = vpop.eup %16062  ;;  %v5341_v28 = vsel %vm4698_vm2, %v18676_v32, 0.0  ;;  %v18690_v48 = vadd.f32 %v18243_v55, %v3490_v35  ;;  %16064 = vrcp.f32 %v5286_v26 }
 0x34c   : > { %v5013_v22 = vsub.f32 %v2728_v1, %v4824_v6  ;;  %v5014_v59 = vsub.f32 %v18634_v63, %v4824_v6  ;;  %v5342_v54 = vsel %vm4698_vm2, %v18685_v5, 0.0  ;;  %v4880_v18 = vsel %vm4698_vm2, %v18683_v10, -inf  ;;  %v18701_v1 = vpop.trf.xlu1 }
 0x34d   : > { %v5343_v9 = vadd.f32 %v5342_v54, %v5341_v28  ;;  %v4879_v49 = vsel %vm4698_vm2, %v18690_v48, -inf  ;;  %v15607_v60 = vpack.c.bf16 %v1203_v12, %v1202_v20 }
 0x34e   : > { %v5103_v50 = vmul.f32 1.442695, %v5013_v22  ;;  %v5105_v29 = vmul.f32 1.442695, %v5014_v59  ;;  %v4881_v17 = vmax.f32 %v4879_v49, %v4880_v18  ;;  %v20446_v49 = vld [vmem:[#allocation40_spill] sm:$0xff] }
 0x34f   : > { %v5344_v56 = vrot.slane %v5343_v9, 4  ;;  %15600 = vmatpush3.bf16.xpose.msk.msra.mxu1 %vm16428_vm1, %v15595_v34 }
 0x350   : > { %16066 = vpow2.f32 %v5103_v50  ;;  %7234 = vxpose.xlu1.b32.start [1/2] (short) (narrow) %v18285_v8, 64  ;;  %15603 = vmatprep.subr.msk.bf16.mxu1 %vm16428_vm1, %v15601_v58  ;;  %v4882_v63 = vrot.slane %v4881_v17, 4  ;;  %v18711_v37 = vpop.trf.xlu1  ;;  %v1002_v50 = vmul.f32 %v20391_v25, %v20446_v49 }
 0x351   : > { %16068 = vpow2.f32 %v5105_v29  ;;  %v5345_v23 = vadd.f32 %v5344_v56, %v5343_v9  ;;  %v20447_v29 = vld [vmem:[#allocation42_spill] sm:$0xff] }
 0x352   : > { %v4883_v51 = vmax.f32 %v4881_v17, %v4882_v63 }
 0x353   : > { %v5346_v15 = vrot.slane %v5345_v23, 2 }
 0x354   : > { %7235 = vxpose.xlu1.b32.end [2/2] (short) (narrow) %v18288_v3, 64  ;;  %v4884_v34 = vrot.slane %v4883_v51, 2  ;;  %v20445_v3 = vld [vmem:[#allocation26_spill] sm:$0xff] }
 0x355   : > { %v16065_v41 = vpop.eup %16064  ;;  %v5347_v8 = vadd.f32 %v5346_v15, %v5345_v23  ;;  %v15851_v44 = vunpack.i.h.bf16 %v20445_v3  ;;  %v15850_v28 = vunpack.i.l.bf16 %v20445_v3  ;;  %v18738_v23 = vpop.trf.xlu1 }
 0x356   : > { %v4885_v26 = vmax.f32 %v4883_v51, %v4884_v34  ;;  %v5521_v6 = vmul.f32 %v16065_v41, %v18631_v40  ;;  %v5522_v21 = vmul.f32 %v16065_v41, %v18640_v42 }
 0x357   : > { %15606 = vmatpush3.bf16.xpose.msk.msra.mxu1 %vm16428_vm1, %v15601_v58  ;;  %v5348_v39 = vrot.slane %v5347_v8, 1  ;;  %v1003_v58 = vmul.f32 %v20391_v25, %v20447_v29  ;;  %v18746_v15 = vpack.c.bf16 %v15851_v44, %v15850_v28  ;;  %v1070_v44 = vmul.f32 %v20394_v43, %v20446_v49 }
 0x358   : > { %v4886_v35 = vrot.slane %v4885_v26, 1  ;;  %7401 = vxpose.xlu0.b32.start [1/2] (short) (narrow) %v5521_v6, 64  ;;  %15609 = vmatprep.subr.msk.bf16.mxu1 %vm16428_vm1, %v15607_v60 }
 0x359   : > { %v6081_v22 = vpop.trf.xlu0  ;;  %v13964_v59 = vpop.f32.mrb[18].mxu1  ;;  %v5349_v54 = vadd.f32 %v5348_v39, %v5347_v8  ;;  %v15637_v39 = vpack.c.bf16 %v1003_v58, %v1002_v50 }
 0x35a   : > { %v18721_v40 = vpop.eup %16066  ;;  %v4887_v18 = vmax.f32 %v4885_v26, %v4886_v35  ;;  %14321 = vmatprep.mubr.msk.f32.mxu0 %vm5601_vm3, %v6081_v22  ;;  %v18725_v42 = vadd.f32 %v18227_v45, %v13964_v59  ;;  %v2945_v9 = vpop.f32.mrb[19].mxu1 }
 0x35b   : > { %v18731_v17 = vpop.eup %16068  ;;  %v5296_v56 = vsel %vm4698_vm2, %v18721_v40, 0.0  ;;  %v18736_v63 = vadd.f32 %v18243_v55, %v2945_v9  ;;  %16070 = vrcp.f32 %v5349_v54  ;;  %v18757_v3 = vpop.trf.xlu1 }
 0x35c   : > { %v5297_v45 = vsel %vm4698_vm2, %v18731_v17, 0.0  ;;  %v5027_v51 = vsub.f32 %v18690_v48, %v4887_v18  ;;  %v5028_v20 = vsub.f32 %v18683_v10, %v4887_v18  ;;  %v4835_v12 = vsel %vm4698_vm2, %v18725_v42, -inf  ;;  %7402 = vxpose.xlu0.b32.end [2/2] (short) (narrow) %v5522_v21, 64 }
 0x35d   : > { %v5298_v34 = vadd.f32 %v5297_v45, %v5296_v56  ;;  %v4834_v55 = vsel %vm4698_vm2, %v18736_v63, -inf  ;;  %v6082_v41 = vpop.trf.xlu0 }
 0x35e   : > { %v5131_v8 = vmul.f32 1.442695, %v5027_v51  ;;  %v5133_v26 = vmul.f32 1.442695, %v5028_v20  ;;  %v4836_v6 = vmax.f32 %v4834_v55, %v4835_v12  ;;  %14322 = vmatmul.mubr.msk.f32.vlgmr.msra.gmra.mrb[108].mxu0 %vm5601_vm3, %v6082_v41  ;;  %v18787_v55 = vld [vmem:[%s20237_s3 + $0x8] sm:$0xff] }
 0x35f   : > { %v5299_v48 = vrot.slane %v5298_v34, 4  ;;  %15684 = vmatpush3.bf16.msra.mxu0 %v18591_v7  ;;  %15612 = vmatpush3.bf16.xpose.msk.msra.mxu1 %vm16428_vm1, %v15607_v60  ;;  %v1071_v7 = vmul.f32 %v20394_v43, %v20447_v29  ;;  %v18777_v45 = vpop.trf.xlu1 }
 0x360   : > { %16072 = vpow2.f32 %v5131_v8  ;;  %v4837_v10 = vrot.slane %v4836_v6, 4  ;;  %15690 = vmatprep.subr.bf16.mxu0 %v18746_v15  ;;  %15639 = vmatprep.subr.msk.bf16.mxu1 %vm16428_vm1, %v15637_v39  ;;  %v1138_v8 = vmul.f32 %v20399_v38, %v20446_v49 }
 0x361   : > { %v5300_v21 = vadd.f32 %v5299_v48, %v5298_v34  ;;  %16074 = vpow2.f32 %v5133_v26  ;;  %v6083_v35 = vpop.trf.xlu0  ;;  %v15643_v18 = vpack.c.bf16 %v1071_v7, %v1070_v44  ;;  %v1139_v26 = vmul.f32 %v20399_v38, %v20447_v29  ;;  %v18803_v48 = vld [vmem:[%s20237_s3] sm:$0xff] }
 0x362   : > { %v4838_v28 = vmax.f32 %v4836_v6, %v4837_v10  ;;  %14324 = vmatprep.mubr.msk.f32.mxu0 %vm5601_vm3, %v6083_v35 }
 0x363   : > { %v5301_v60 = vrot.slane %v5300_v21, 2 }
 0x364   : > { %v4839_v22 = vrot.slane %v4838_v28, 2 }
 0x365   : > { %v16071_v59 = vpop.eup %16070  ;;  %v6084_v54 = vpop.trf.xlu0  ;;  %v5302_v9 = vadd.f32 %v5301_v60, %v5300_v21 }
 0x366   : > { %v4840_v50 = vmax.f32 %v4838_v28, %v4839_v22  ;;  %14325 = vmatmul.mubr.msk.f32.gmra.mrb[110].mxu0 %vm5601_vm3, %v6084_v54  ;;  %14229 = vmatmul.mubr.msk.f32.vlgmr.msra.gmra.mrb[32].mxu1 %vm357_vm0, %v18204_v19  ;;  %v18768_v58 = vmul.f32 %v16071_v59, %v18676_v32  ;;  %v18771_v56 = vmul.f32 %v16071_v59, %v18685_v5  ;;  %v18817_v59 = vpop.trf.xlu1 }
 0x367   : > { %15642 = vmatpush3.bf16.xpose.msk.msra.mxu1 %vm16428_vm1, %v15637_v39  ;;  %14266 = vmatprep.mubr.msk.f32.mxu1 %vm357_vm0, %v18110_v24  ;;  %v5303_v51 = vrot.slane %v5302_v9, 1 }
 0x368   : > { %v4841_v20 = vrot.slane %v4840_v50, 1  ;;  %15645 = vmatprep.subr.msk.bf16.mxu1 %vm16428_vm1, %v15643_v18 }
 0x369   : > { %v6085_v19 = vpop.trf.xlu0  ;;  %v14097_v12 = vpop.f32.mrb[82].mxu0  ;;  %v5304_v32 = vadd.f32 %v5303_v51, %v5302_v9 }
 0x36a   : > { %v18781_v34 = vpop.eup %16072  ;;  %v4842_v5 = vmax.f32 %v4840_v50, %v4841_v20  ;;  %14327 = vmatprep.mubr.msk.f32.mxu0 %vm5601_vm3, %v6085_v19  ;;  %v18790_v24 = vadd.f32 %v18787_v55, %v14097_v12  ;;  %v3708_v41 = vpop.f32.mrb[83].mxu0  ;;  %v1206_v12 = vmul.f32 %v20402_v47, %v20446_v49 }
 0x36b   : > { %v18796_v6 = vpop.eup %16074  ;;  %v5359_v39 = vsel %vm4698_vm2, %v18781_v34, 0.0  ;;  %v18806_v10 = vadd.f32 %v18803_v48, %v3708_v41  ;;  %16076 = vrcp.f32 %v5304_v32  ;;  %v1207_v32 = vmul.f32 %v20402_v47, %v20447_v29 }
 0x36c   : > { %v5360_v21 = vsel %vm4698_vm2, %v18796_v6, 0.0  ;;  %v5017_v35 = vsub.f32 %v18736_v63, %v4842_v5  ;;  %v5018_v44 = vsub.f32 %v18725_v42, %v4842_v5  ;;  %v4898_v7 = vsel %vm4698_vm2, %v18790_v24, -inf }
 0x36d   : > { %v5361_v28 = vadd.f32 %v5360_v21, %v5359_v39  ;;  %v4897_v60 = vsel %vm4698_vm2, %v18806_v10, -inf  ;;  %7568 = vxpose.xlu1.b32.start [1/2] (short) (narrow) %v18435_v52, 64  ;;  %v6086_v22 = vpop.trf.xlu0  ;;  %v15649_v63 = vpack.c.bf16 %v1139_v26, %v1138_v8 }
 0x36e   : > { %v5111_v54 = vmul.f32 1.442695, %v5017_v35  ;;  %v5113_v9 = vmul.f32 1.442695, %v5018_v44  ;;  %v4899_v50 = vmax.f32 %v4897_v60, %v4898_v7  ;;  %14328 = vmatmul.mubr.msk.f32.gmra.mrb[112].mxu0 %vm5601_vm3, %v6086_v22  ;;  %v15655_v35 = vpack.c.bf16 %v1207_v32, %v1206_v12  ;;  %v20448_v7 = vld [vmem:[#allocation7_spill] sm:$0xff] }
 0x36f   : > { %v5362_v51 = vrot.slane %v5361_v28, 4  ;;  %15648 = vmatpush3.bf16.xpose.msk.msra.mxu1 %vm16428_vm1, %v15643_v18  ;;  %v18830_v18 = vpop.trf.xlu1  ;;  %v15825_v60 = vunpack.i.l.bf16 %v20448_v7 }
 0x370   : > { %16078 = vpow2.f32 %v5111_v54  ;;  %v4900_v42 = vrot.slane %v4899_v50, 4  ;;  %15651 = vmatprep.subr.msk.bf16.mxu1 %vm16428_vm1, %v15649_v63 }
 0x371   : > { %v5363_v20 = vadd.f32 %v5362_v51, %v5361_v28  ;;  %16080 = vpow2.f32 %v5113_v9  ;;  %7569 = vxpose.xlu1.b32.end [2/2] (short) (narrow) %v18438_v57, 64  ;;  %v6087_v52 = vpop.trf.xlu0  ;;  %v15826_v28 = vunpack.i.h.bf16 %v20448_v7 }
 0x372   : > { %v4901_v19 = vmax.f32 %v4899_v50, %v4900_v42  ;;  %14330 = vmatprep.mubr.msk.f32.mxu0 %vm5601_vm3, %v6087_v52 }
 0x373   : > { %v5364_v5 = vrot.slane %v5363_v20, 2 }
 0x374   : > { %v4902_v41 = vrot.slane %v4901_v19, 2 }
 0x375   : > { %v16077_v8 = vpop.eup %16076  ;;  %v6088_v26 = vpop.trf.xlu0  ;;  %v5365_v39 = vadd.f32 %v5364_v5, %v5363_v20 }
 0x376   : > { %v4903_v21 = vmax.f32 %v4901_v19, %v4902_v41  ;;  %14331 = vmatmul.mubr.msk.f32.gmra.mrb[114].mxu0 %vm5601_vm3, %v6088_v26  ;;  %v5525_v57 = vmul.f32 %v16077_v8, %v18721_v40  ;;  %v5526_v44 = vmul.f32 %v16077_v8, %v18731_v17  ;;  %v20449_v17 = vld [vmem:[#allocation9_spill] sm:$0xff] }
 0x377   : > { %15654 = vmatpush3.bf16.xpose.msk.msra.mxu1 %vm16428_vm1, %v15649_v63  ;;  %v5366_v49 = vrot.slane %v5365_v39, 1  ;;  %v15861_v50 = vunpack.i.h.bf16 %v20449_v17  ;;  %v15860_v63 = vunpack.i.l.bf16 %v20449_v17 }
 0x378   : > { %v4904_v29 = vrot.slane %v4903_v21, 1  ;;  %7735 = vxpose.xlu0.b32.start [1/2] (short) (narrow) %v5525_v57, 64  ;;  %15657 = vmatprep.subr.msk.bf16.mxu1 %vm16428_vm1, %v15655_v35 }
 0x379   : > { %v6415_v22 = vpop.trf.xlu1  ;;  %v18841_v54 = vpop.trf.xlu0  ;;  %v5367_v40 = vadd.f32 %v5366_v49, %v5365_v39  ;;  %v15669_v49 = vpack.c.bf16 %v15826_v28, %v15825_v60 }
 0x37a   : > { %v18843_v9 = vpop.eup %16078  ;;  %v4905_v51 = vmax.f32 %v4903_v21, %v4904_v29  ;;  %v14002_v42 = vpop.f32.mrb[20].mxu1  ;;  %14353 = vmatprep.mubr.msk.f32.mxu0 %vm5601_vm3, %v6415_v22  ;;  %v18866_v29 = vpack.c.bf16 %v15861_v50, %v15860_v63 }
 0x37b   : > { %v18848_v20 = vpop.eup %16080  ;;  %v5314_v52 = vsel %vm4698_vm2, %v18843_v9, 0.0  ;;  %v18853_v19 = vadd.f32 %v18787_v55, %v14002_v42  ;;  %v3163_v12 = vpop.f32.mrb[21].mxu1  ;;  %16082 = vrcp.f32 %v5367_v40 }
 0x37c   : > { %v5315_v32 = vsel %vm4698_vm2, %v18848_v20, 0.0  ;;  %v5031_v5 = vsub.f32 %v18806_v10, %v4905_v51  ;;  %v5032_v41 = vsub.f32 %v18790_v24, %v4905_v51  ;;  %v18860_v8 = vadd.f32 %v18803_v48, %v3163_v12  ;;  %7736 = vxpose.xlu0.b32.end [2/2] (short) (narrow) %v5526_v44, 64  ;;  %v20450_v44 = vld [vmem:[#allocation8_spill] sm:$0xff] }
 0x37d   : > { %v5316_v26 = vadd.f32 %v5315_v32, %v5314_v52  ;;  %v4853_v39 = vsel %vm4698_vm2, %v18853_v19, -inf  ;;  %v6416_v21 = vpop.trf.xlu1  ;;  %v18864_v57 = vpop.trf.xlu0  ;;  %v15836_v17 = vunpack.i.h.bf16 %v20450_v44  ;;  %v15835_v28 = vunpack.i.l.bf16 %v20450_v44 }
 0x37e   : > { %v5139_v7 = vmul.f32 1.442695, %v5031_v5  ;;  %v5141_v22 = vmul.f32 1.442695, %v5032_v41  ;;  %v4852_v10 = vsel %vm4698_vm2, %v18860_v8, -inf  ;;  %14354 = vmatmul.mubr.msk.f32.vlgmr.msra.gmra.mrb[116].mxu0 %vm5601_vm3, %v6416_v21  ;;  %v20451_v41 = vld [vmem:[#allocation24_spill] sm:$0xff] }
 0x37f   : > { %v5317_v24 = vrot.slane %v5316_v26, 4  ;;  %v4854_v40 = vmax.f32 %v4852_v10, %v4853_v39  ;;  %15692 = vmatpush3.bf16.msra.mxu0 %v18746_v15  ;;  %15660 = vmatpush3.bf16.xpose.msk.msra.mxu1 %vm16428_vm1, %v15655_v35  ;;  %v15677_v35 = vpack.c.bf16 %v15836_v17, %v15835_v28  ;;  %v15846_v39 = vunpack.i.h.bf16 %v20451_v41 }
 0x380   : > { %16084 = vpow2.f32 %v5139_v7  ;;  %15698 = vmatprep.subr.bf16.mxu0 %v18866_v29  ;;  %15670 = vmatprep.subr.bf16.mxu1 %v15669_v49 }
 0x381   : > { %v5318_v60 = vadd.f32 %v5317_v24, %v5316_v26  ;;  %16086 = vpow2.f32 %v5141_v22  ;;  %v4855_v50 = vrot.slane %v4854_v40, 4  ;;  %v6417_v63 = vpop.trf.xlu1  ;;  %v18877_v51 = vpop.trf.xlu0  ;;  %v15845_v26 = vunpack.i.l.bf16 %v20451_v41 }
 0x382   : > { %14356 = vmatprep.mubr.msk.f32.mxu0 %vm5601_vm3, %v6417_v63 }
 0x383   : > { %v4856_v15 = vmax.f32 %v4854_v40, %v4855_v50  ;;  %v5319_v42 = vrot.slane %v5318_v60, 2 }
 0x385   : > { %v16083_v36 = vpop.eup %16082  ;;  %v4857_v52 = vrot.slane %v4856_v15, 2  ;;  %v6418_v12 = vpop.trf.xlu1  ;;  %v5320_v5 = vadd.f32 %v5319_v42, %v5318_v60 }
 0x386   : > { %v18880_v32 = vpop.trf.xlu0  ;;  %14357 = vmatmul.mubr.msk.f32.gmra.mrb[118].mxu0 %vm5601_vm3, %v6418_v12  ;;  %14267 = vmatmul.mubr.msk.f32.vlgmr.msra.gmra.mrb[34].mxu1 %vm357_vm0, %v18274_v27  ;;  %v18888_v21 = vmul.f32 %v16083_v36, %v18781_v34  ;;  %v18891_v7 = vmul.f32 %v16083_v36, %v18796_v6  ;;  %v18899_v27 = vpack.c.bf16 %v15846_v39, %v15845_v26 }
 0x387   : > { %v4858_v22 = vmax.f32 %v4856_v15, %v4857_v52  ;;  %15672 = vmatpush3.bf16.msra.mxu1 %v15669_v49  ;;  %14305 = vmatprep.mubr.msk.f32.mxu1 %vm5601_vm3, %v18674_v13  ;;  %v5321_v10 = vrot.slane %v5320_v5, 1 }
 0x388   : > { %15678 = vmatprep.subr.bf16.mxu1 %v15677_v35 }
 0x389   : > { %v4859_v24 = vrot.slane %v4858_v22, 1  ;;  %v6419_v40 = vpop.trf.xlu1  ;;  %v5322_v17 = vadd.f32 %v5321_v10, %v5320_v5  ;;  %v14135_v34 = vpop.f32.mrb[84].mxu0 }
 0x38a   : > { %v18895_v44 = vpop.trf.xlu0  ;;  %v18897_v28 = vpop.eup %16084  ;;  %7902 = vxpose.xlu1.b32.start [1/2] (short) (narrow) %v18564_v30, 64  ;;  %14306 = vmatmul.mubr.msk.f32.vlgmr.msra.gmra.mrb[36].mxu1 %vm5601_vm3, %v18701_v1  ;;  %v18909_v60 = vadd.f32 %v18787_v55, %v14135_v34 }
 0x38b   : > { %v18904_v6 = vpop.eup %16086  ;;  %v5377_v13 = vsel %vm4698_vm2, %v18897_v28, 0.0  ;;  %v4860_v49 = vmax.f32 %v4858_v22, %v4859_v24  ;;  %v3926_v50 = vpop.f32.mrb[85].mxu0  ;;  %14308 = vmatprep.mubr.msk.f32.mxu1 %vm5601_vm3, %v18711_v37  ;;  %15680 = vmatpush3.bf16.msra.mxu1 %v15677_v35  ;;  %16088 = vrcp.f32 %v5322_v17 }
 0x38c   : > { %v5378_v30 = vsel %vm4698_vm2, %v18904_v6, 0.0  ;;  %v18916_v1 = vadd.f32 %v18803_v48, %v3926_v50  ;;  %14359 = vmatprep.mubr.msk.f32.mxu0 %vm5601_vm3, %v6419_v40  ;;  %15686 = vmatprep.subr.bf16.mxu1 %v18899_v27  ;;  %v4916_v37 = vsel %vm4698_vm2, %v18909_v60, -inf }
 0x38d   : > { %v5379_v63 = vadd.f32 %v5378_v30, %v5377_v13  ;;  %v5021_v15 = vsub.f32 %v18860_v8, %v4860_v49  ;;  %v5022_v42 = vsub.f32 %v18853_v19, %v4860_v49  ;;  %v6420_v36 = vpop.trf.xlu1  ;;  %v20452_v49 = vld [vmem:[#allocation28_spill] sm:$0xff] }
 0x38e   : > { %v18924_v35 = vpop.trf.xlu0  ;;  %v4915_v52 = vsel %vm4698_vm2, %v18916_v1, -inf  ;;  %7903 = vxpose.xlu1.b32.end [2/2] (short) (narrow) %v18567_v61, 64  ;;  %14360 = vmatmul.mubr.msk.f32.gmra.mrb[120].mxu0 %vm5601_vm3, %v6420_v36  ;;  %v15856_v50 = vunpack.i.h.bf16 %v20452_v49 }
 0x38f   : > { %v5380_v12 = vrot.slane %v5379_v63, 4  ;;  %v5119_v5 = vmul.f32 1.442695, %v5021_v15  ;;  %v5121_v41 = vmul.f32 1.442695, %v5022_v42  ;;  %v4917_v39 = vmax.f32 %v4915_v52, %v4916_v37  ;;  %14309 = vmatmul.mubr.msk.f32.gmra.mrb[38].mxu1 %vm5601_vm3, %v18738_v23  ;;  %v20453_v37 = vld [vmem:[#allocation25_spill] sm:$0xff] }
 0x390   : > { %14311 = vmatprep.mubr.msk.f32.mxu1 %vm5601_vm3, %v18757_v3  ;;  %v15870_v36 = vunpack.i.l.bf16 %v20453_v37 }
 0x391   : > { %v5381_v19 = vadd.f32 %v5380_v12, %v5379_v63  ;;  %16090 = vpow2.f32 %v5119_v5  ;;  %v4918_v8 = vrot.slane %v4917_v39, 4  ;;  %v6421_v26 = vpop.trf.xlu1 }
 0x392   : > { %v18934_v22 = vpop.trf.xlu0  ;;  %16092 = vpow2.f32 %v5121_v41  ;;  %14362 = vmatprep.mubr.msk.f32.mxu0 %vm5601_vm3, %v6421_v26 }
 0x393   : > { %v4919_v61 = vmax.f32 %v4917_v39, %v4918_v8  ;;  %14312 = vmatmul.mubr.msk.f32.gmra.mrb[40].mxu1 %vm5601_vm3, %v18777_v45  ;;  %v5382_v10 = vrot.slane %v5381_v19, 2  ;;  %v15855_v45 = vunpack.i.l.bf16 %v20452_v49 }
 0x394   : > { %14314 = vmatprep.mubr.msk.f32.mxu1 %vm5601_vm3, %v18817_v59 }
 0x395   : > { %v16089_v23 = vpop.eup %16088  ;;  %v4920_v24 = vrot.slane %v4919_v61, 2  ;;  %v6422_v3 = vpop.trf.xlu1  ;;  %v5383_v17 = vadd.f32 %v5382_v10, %v5381_v19 }
 0x396   : > { %v18941_v40 = vpop.trf.xlu0  ;;  %14363 = vmatmul.mubr.msk.f32.gmra.mrb[122].mxu0 %vm5601_vm3, %v6422_v3  ;;  %v5529_v34 = vmul.f32 %v16089_v23, %v18843_v9  ;;  %v5530_v13 = vmul.f32 %v16089_v23, %v18848_v20  ;;  %v15871_v20 = vunpack.i.h.bf16 %v20453_v37 }
 0x397   : > { %v4921_v30 = vmax.f32 %v4919_v61, %v4920_v24  ;;  %14315 = vmatmul.mubr.msk.f32.gmra.mrb[42].mxu1 %vm5601_vm3, %v18830_v18  ;;  %v5384_v59 = vrot.slane %v5383_v17, 1  ;;  %v18959_v18 = vpack.c.bf16 %v15856_v50, %v15855_v45 }
 0x398   : > { %8069 = vxpose.xlu0.b32.start [1/2] (short) (narrow) %v5529_v34, 64  ;;  %14337 = vmatprep.mubr.msk.f32.mxu1 %vm5601_vm3, %v18841_v54  ;;  %v18983_v3 = vpack.c.bf16 %v15871_v20, %v15870_v36  ;;  %v15866_v20 = vunpack.i.h.bf16 %v18298_v0 }
 0x399   : > { %v4922_v63 = vrot.slane %v4921_v30, 1  ;;  %v18952_v15 = vpop.trf.xlu1  ;;  %v5385_v9 = vadd.f32 %v5384_v59, %v5383_v17  ;;  %v14040_v52 = vpop.f32.mrb[22].mxu1 }
 0x39a   : > { %v6749_v42 = vpop.trf.xlu0  ;;  %v18962_v41 = vadd.f32 %v18787_v55, %v14040_v52  ;;  %v3381_v54 = vpop.f32.mrb[23].mxu1 }
 0x39b   : > { %14385 = vmatprep.mubr.msk.f32.mxu0 %vm5601_vm3, %v6749_v42  ;;  %v18957_v12 = vpop.eup %16090  ;;  %v4923_v5 = vmax.f32 %v4921_v30, %v4922_v63  ;;  %14338 = vmatmul.mubr.msk.f32.vlgmr.msra.gmra.mrb[44].mxu1 %vm5601_vm3, %v18864_v57  ;;  %16094 = vrcp.f32 %v5385_v9  ;;  %v18971_v8 = vadd.f32 %v18803_v48, %v3381_v54 }
 0x39c   : > { %v18966_v39 = vpop.eup %16092  ;;  %v5332_v19 = vsel %vm4698_vm2, %v18957_v12, 0.0  ;;  %15688 = vmatpush3.bf16.msra.mxu1 %v18899_v27  ;;  %8070 = vxpose.xlu0.b32.end [2/2] (short) (narrow) %v5530_v13, 64  ;;  %v4871_v57 = vsel %vm4698_vm2, %v18962_v41, -inf }
 0x39d   : > { %v5333_v26 = vsel %vm4698_vm2, %v18966_v39, 0.0  ;;  %v5035_v61 = vsub.f32 %v18916_v1, %v4923_v5  ;;  %v5036_v10 = vsub.f32 %v18909_v60, %v4923_v5  ;;  %v6583_v23 = vpop.trf.xlu1  ;;  %14340 = vmatprep.mubr.msk.f32.mxu1 %vm5601_vm3, %v18877_v51  ;;  %15694 = vmatprep.subr.bf16.mxu1 %v18959_v18  ;;  %v4870_v17 = vsel %vm4698_vm2, %v18971_v8, -inf }
 0x39e   : > { %v6750_v24 = vpop.trf.xlu0  ;;  %v5334_v27 = vadd.f32 %v5333_v26, %v5332_v19  ;;  %v4872_v34 = vmax.f32 %v4870_v17, %v4871_v57 }
 0x39f   : > { %14386 = vmatmul.mubr.msk.f32.vlgmr.msra.gmra.mrb[124].mxu0 %vm5601_vm3, %v6750_v24  ;;  %v5147_v1 = vmul.f32 1.442695, %v5035_v61  ;;  %v5149_v60 = vmul.f32 1.442695, %v5036_v10  ;;  %14341 = vmatmul.mubr.msk.f32.gmra.mrb[46].mxu1 %vm5601_vm3, %v18880_v32 }
 0x3a0   : > { %15700 = vmatpush3.bf16.msra.mxu0 %v18866_v29  ;;  %v5335_v51 = vrot.slane %v5334_v27, 4  ;;  %14343 = vmatprep.mubr.msk.f32.mxu1 %vm5601_vm3, %v18895_v44  ;;  %v4873_v13 = vrot.slane %v4872_v34, 4 }
 0x3a1   : > { %15706 = vmatprep.subr.bf16.mxu0 %v18983_v3  ;;  %16096 = vpow2.f32 %v5147_v1  ;;  %v6584_v49 = vpop.trf.xlu1 }
 0x3a2   : > { %v6751_v50 = vpop.trf.xlu0  ;;  %v5336_v45 = vadd.f32 %v5335_v51, %v5334_v27  ;;  %16098 = vpow2.f32 %v5149_v60  ;;  %v4874_v30 = vmax.f32 %v4872_v34, %v4873_v13 }
 0x3a3   : > { %14388 = vmatprep.mubr.msk.f32.mxu0 %vm5601_vm3, %v6751_v50  ;;  %14344 = vmatmul.mubr.msk.f32.gmra.mrb[48].mxu1 %vm5601_vm3, %v18924_v35  ;;  %v15865_v35 = vunpack.i.l.bf16 %v18298_v0 }
 0x3a4   : > { %14346 = vmatprep.mubr.msk.f32.mxu1 %vm5601_vm3, %v18934_v22  ;;  %v5337_v29 = vrot.slane %v5336_v45, 2  ;;  %v4875_v59 = vrot.slane %v4874_v30, 2 }
 0x3a5   : > { %v16095_v32 = vpop.eup %16094  ;;  %v6585_v63 = vpop.trf.xlu1  ;;  %v19016_v0 = vpack.c.bf16 %v15866_v20, %v15865_v35 }
 0x3a6   : > { %v6752_v44 = vpop.trf.xlu0  ;;  %v5338_v42 = vadd.f32 %v5337_v29, %v5336_v45  ;;  %v19001_v9 = vmul.f32 %v16095_v32, %v18897_v28  ;;  %v19004_v37 = vmul.f32 %v16095_v32, %v18904_v6  ;;  %v4876_v36 = vmax.f32 %v4874_v30, %v4875_v59 }
 0x3a7   : > { %14389 = vmatmul.mubr.msk.f32.gmra.mrb[126].mxu0 %vm5601_vm3, %v6752_v44  ;;  %8236 = vxpose.xlu1.b32.start [1/2] (short) (narrow) %v18663_v53, 64 }
 0x3a8   : > { %14347 = vmatmul.mubr.msk.f32.gmra.mrb[50].mxu1 %vm5601_vm3, %v18941_v40  ;;  %v5339_v22 = vrot.slane %v5338_v42, 1  ;;  %v4877_v52 = vrot.slane %v4876_v36, 1 }
 0x3a9   : > { %14369 = vmatprep.mubr.msk.f32.mxu1 %vm5601_vm3, %v18952_v15  ;;  %v6586_v28 = vpop.trf.xlu1 }
 0x3aa   : > { %v6753_v5 = vpop.trf.xlu0  ;;  %v14173_v6 = vpop.f32.mrb[86].mxu0  ;;  %v5340_v54 = vadd.f32 %v5339_v22, %v5338_v42  ;;  %v4878_v26 = vmax.f32 %v4876_v36, %v4877_v52  ;;  %v20454_v22 = vld [vmem:[#allocation29_spill] sm:$0xff] }
 0x3ab   : > { %14391 = vmatprep.mubr.msk.f32.mxu0 %vm5601_vm3, %v6753_v5  ;;  %v19014_v19 = vpop.eup %16096  ;;  %v19019_v53 = vadd.f32 %v18787_v55, %v14173_v6  ;;  %8237 = vxpose.xlu1.b32.end [2/2] (short) (narrow) %v18666_v2, 64  ;;  %v4144_v40 = vpop.f32.mrb[87].mxu0  ;;  %v15881_v52 = vunpack.i.h.bf16 %v20454_v22 }
 0x3ac   : > { %14370 = vmatmul.mubr.msk.f32.vlgmr.msra.gmra.mrb[52].mxu1 %vm5601_vm3, %v6583_v23  ;;  %v19023_v15 = vpop.eup %16098  ;;  %v5395_v61 = vsel %vm4698_vm2, %v19014_v19, 0.0  ;;  %v19028_v10 = vadd.f32 %v18803_v48, %v4144_v40  ;;  %16100 = vrcp.f32 %v5340_v54  ;;  %v5025_v2 = vsub.f32 %v18971_v8, %v4878_v26 }
 0x3ad   : > { %15696 = vmatpush3.bf16.msra.mxu1 %v18959_v18  ;;  %14372 = vmatprep.mubr.msk.f32.mxu1 %vm5601_vm3, %v6584_v49  ;;  %v5396_v57 = vsel %vm4698_vm2, %v19023_v15, 0.0  ;;  %v5026_v23 = vsub.f32 %v18962_v41, %v4878_v26  ;;  %v4934_v24 = vsel %vm4698_vm2, %v19019_v53, -inf  ;;  %v6587_v27 = vpop.trf.xlu1  ;;  %v15876_v54 = vunpack.i.h.bf16 %v18330_v31 }
 0x3ae   : > { %15702 = vmatprep.subr.bf16.mxu1 %v19016_v0  ;;  %v6754_v17 = vpop.trf.xlu0  ;;  %v5397_v1 = vadd.f32 %v5396_v57, %v5395_v61  ;;  %v4933_v18 = vsel %vm4698_vm2, %v19028_v10, -inf  ;;  %v5127_v60 = vmul.f32 1.442695, %v5025_v2  ;;  %v15875_v26 = vunpack.i.l.bf16 %v18330_v31 }
 0x3af   : > { %14392 = vmatmul.mubr.msk.f32.gmra.mrb[128].mxu0 %vm5601_vm3, %v6754_v17  ;;  %v5129_v34 = vmul.f32 1.442695, %v5026_v23  ;;  %v4935_v51 = vmax.f32 %v4933_v18, %v4934_v24  ;;  %v15880_v40 = vunpack.i.l.bf16 %v20454_v22 }
 0x3b0   : > { %14373 = vmatmul.mubr.msk.f32.gmra.mrb[54].mxu1 %vm5601_vm3, %v6585_v63  ;;  %v5398_v8 = vrot.slane %v5397_v1, 4  ;;  %16102 = vpow2.f32 %v5127_v60 }
 0x3b1   : > { %14375 = vmatprep.mubr.msk.f32.mxu1 %vm5601_vm3, %v6586_v28  ;;  %v4936_v41 = vrot.slane %v4935_v51, 4  ;;  %v6588_v13 = vpop.trf.xlu1  ;;  %16104 = vpow2.f32 %v5129_v34 }
 0x3b2   : > { %v6755_v49 = vpop.trf.xlu0  ;;  %v5399_v50 = vadd.f32 %v5398_v8, %v5397_v1 }
 0x3b3   : > { %14394 = vmatprep.mubr.msk.f32.mxu0 %vm5601_vm3, %v6755_v49  ;;  %v4937_v45 = vmax.f32 %v4935_v51, %v4936_v41  ;;  %v19081_v49 = vpack.c.bf16 %v15881_v52, %v15880_v40 }
 0x3b4   : > { %14376 = vmatmul.mubr.msk.f32.gmra.mrb[56].mxu1 %vm5601_vm3, %v6587_v27  ;;  %v5400_v30 = vrot.slane %v5399_v50, 2 }
 0x3b5   : > { %14378 = vmatprep.mubr.msk.f32.mxu1 %vm5601_vm3, %v6588_v13  ;;  %v4938_v29 = vrot.slane %v4937_v45, 2  ;;  %v6589_v32 = vpop.trf.xlu1  ;;  %v19079_v13 = vpack.c.bf16 %v15876_v54, %v15875_v26 }
 0x3b6   : > { %v6756_v59 = vpop.trf.xlu0  ;;  %v16101_v63 = vpop.eup %16100  ;;  %v5401_v44 = vadd.f32 %v5400_v30, %v5399_v50 }
 0x3b7   : > { %14395 = vmatmul.mubr.msk.f32.gmra.mrb[130].mxu0 %vm5601_vm3, %v6756_v59  ;;  %v4939_v42 = vmax.f32 %v4937_v45, %v4938_v29  ;;  %v5533_v20 = vmul.f32 %v16101_v63, %v18957_v12  ;;  %v5534_v35 = vmul.f32 %v16101_v63, %v18966_v39 }
 0x3b8   : > { %14379 = vmatmul.mubr.msk.f32.gmra.mrb[58].mxu1 %vm5601_vm3, %v6589_v32  ;;  %v5402_v36 = vrot.slane %v5401_v44, 1 }
 0x3b9   : > { %v4940_v28 = vrot.slane %v4939_v42, 1  ;;  %v6916_v5 = vpop.trf.xlu1  ;;  %8403 = vxpose.xlu0.b32.start [1/2] (short) (narrow) %v5533_v20, 64  ;;  %v14078_v61 = vpop.f32.mrb[24].mxu1 }
 0x3ba   : > { %v7083_v6 = vpop.trf.xlu0  ;;  %14401 = vmatprep.mubr.msk.f32.mxu1 %vm5601_vm3, %v6916_v5  ;;  %v5403_v12 = vadd.f32 %v5402_v36, %v5401_v44  ;;  %v19057_v39 = vpop.eup %16102  ;;  %v19060_v2 = vadd.f32 %v18787_v55, %v14078_v61 }
 0x3bb   : > { %14417 = vmatprep.mubr.msk.f32.mxu0 %vm5601_vm3, %v7083_v6  ;;  %v4941_v57 = vmax.f32 %v4939_v42, %v4940_v28  ;;  %v3599_v23 = vpop.f32.mrb[25].mxu1  ;;  %v19062_v24 = vpop.eup %16104  ;;  %v5350_v31 = vsel %vm4698_vm2, %v19057_v39, 0.0 }
 0x3bc   : > { %v19067_v27 = vadd.f32 %v18803_v48, %v3599_v23  ;;  %16106 = vrcp.f32 %v5403_v12  ;;  %v5351_v17 = vsel %vm4698_vm2, %v19062_v24, 0.0  ;;  %v4889_v60 = vsel %vm4698_vm2, %v19060_v2, -inf }
 0x3bd   : > { %v5039_v1 = vsub.f32 %v19028_v10, %v4941_v57  ;;  %v5040_v18 = vsub.f32 %v19019_v53, %v4941_v57  ;;  %v6917_v34 = vpop.trf.xlu1  ;;  %8404 = vxpose.xlu0.b32.end [2/2] (short) (narrow) %v5534_v35, 64  ;;  %v5352_v8 = vadd.f32 %v5351_v17, %v5350_v31 }
 0x3be   : > { %v7084_v51 = vpop.trf.xlu0  ;;  %v4888_v41 = vsel %vm4698_vm2, %v19067_v27, -inf  ;;  %14402 = vmatmul.mubr.msk.f32.vlgmr.msra.gmra.mrb[60].mxu1 %vm5601_vm3, %v6917_v34 }
 0x3bf   : > { %14418 = vmatmul.mubr.msk.f32.vlgmr.msra.gmra.mrb[132].mxu0 %vm5601_vm3, %v7084_v51  ;;  %v5155_v10 = vmul.f32 1.442695, %v5039_v1  ;;  %v5157_v53 = vmul.f32 1.442695, %v5040_v18  ;;  %v4890_v50 = vmax.f32 %v4888_v41, %v4889_v60  ;;  %15704 = vmatpush3.bf16.msra.mxu1 %v19016_v0  ;;  %v5353_v45 = vrot.slane %v5352_v8, 4 }
 0x3c0   : > { %15708 = vmatpush3.bf16.msra.mxu0 %v18983_v3  ;;  %15710 = vmatprep.subr.bf16.mxu1 %v19079_v13 }
 0x3c1   : > { %15714 = vmatprep.subr.bf16.mxu0 %v19081_v49  ;;  %16108 = vpow2.f32 %v5155_v10  ;;  %v4891_v30 = vrot.slane %v4890_v50, 4  ;;  %v6918_v29 = vpop.trf.xlu1  ;;  %v5354_v59 = vadd.f32 %v5353_v45, %v5352_v8 }
 0x3c2   : > { %v7085_v32 = vpop.trf.xlu0  ;;  %16110 = vpow2.f32 %v5157_v53  ;;  %14404 = vmatprep.mubr.msk.f32.mxu1 %vm5601_vm3, %v6918_v29 }
 0x3c3   : > { %14420 = vmatprep.mubr.msk.f32.mxu0 %vm5601_vm3, %v7085_v32  ;;  %v4892_v63 = vmax.f32 %v4890_v50, %v4891_v30  ;;  %v5355_v0 = vrot.slane %v5354_v59, 2 }
 0x3c4   : > { %8570 = vxpose.xlu1.b32.start [1/2] (short) (narrow) %v18768_v58, 64 }
 0x3c5   : > { %v4893_v3 = vrot.slane %v4892_v63, 2  ;;  %v6919_v44 = vpop.trf.xlu1  ;;  %v5356_v35 = vadd.f32 %v5355_v0, %v5354_v59 }
 0x3c6   : > { %v7086_v42 = vpop.trf.xlu0  ;;  %v16107_v20 = vpop.eup %16106  ;;  %14405 = vmatmul.mubr.msk.f32.gmra.mrb[62].mxu1 %vm5601_vm3, %v6919_v44 }
 0x3c7   : > { %14421 = vmatmul.mubr.msk.f32.gmra.mrb[134].mxu0 %vm5601_vm3, %v7086_v42  ;;  %v4894_v36 = vmax.f32 %v4892_v63, %v4893_v3  ;;  %v19093_v22 = vmul.f32 %v16107_v20, %v19014_v19  ;;  %v19096_v52 = vmul.f32 %v16107_v20, %v19023_v15  ;;  %v5357_v58 = vrot.slane %v5356_v35, 1 }
 0x3c8   : > { %8571 = vxpose.xlu1.b32.end [2/2] (short) (narrow) %v18771_v56, 64 }
 0x3c9   : > { %v4895_v28 = vrot.slane %v4894_v36, 1  ;;  %v6920_v5 = vpop.trf.xlu1  ;;  %v5358_v26 = vadd.f32 %v5357_v58, %v5356_v35 }
 0x3ca   : > { %v7087_v6 = vpop.trf.xlu0  ;;  %v14211_v54 = vpop.f32.mrb[88].mxu0  ;;  %14407 = vmatprep.mubr.msk.f32.mxu1 %vm5601_vm3, %v6920_v5 }
 0x3cb   : > { %14423 = vmatprep.mubr.msk.f32.mxu0 %vm5601_vm3, %v7087_v6  ;;  %v19101_v40 = vpop.eup %16108  ;;  %v4896_v61 = vmax.f32 %v4894_v36, %v4895_v28  ;;  %v19104_v19 = vadd.f32 %v18787_v55, %v14211_v54  ;;  %v4362_v15 = vpop.f32.mrb[89].mxu0  ;;  %16112 = vrcp.f32 %v5358_v26  ;;  %v20455_v36 = vld [vmem:[#allocation10_spill] sm:$0xff]  ;;  %v15886_v54 = vunpack.i.h.bf16 %v18342_v14 }
 0x3cc   : > { %v19106_v12 = vpop.eup %16110  ;;  %v5413_v56 = vsel %vm4698_vm2, %v19101_v40, 0.0  ;;  %v19111_v57 = vadd.f32 %v18803_v48, %v4362_v15  ;;  %v15891_v58 = vunpack.i.h.bf16 %v20455_v36  ;;  %v15885_v26 = vunpack.i.l.bf16 %v18342_v14 }
 0x3cd   : > { %v5414_v23 = vsel %vm4698_vm2, %v19106_v12, 0.0  ;;  %v5029_v31 = vsub.f32 %v19067_v27, %v4896_v61  ;;  %v5030_v17 = vsub.f32 %v19060_v2, %v4896_v61  ;;  %v4952_v1 = vsel %vm4698_vm2, %v19104_v19, -inf  ;;  %v6921_v18 = vpop.trf.xlu1 }
 0x3ce   : > { %v7088_v60 = vpop.trf.xlu0  ;;  %v5415_v34 = vadd.f32 %v5414_v23, %v5413_v56  ;;  %v4951_v51 = vsel %vm4698_vm2, %v19111_v57, -inf  ;;  %14408 = vmatmul.mubr.msk.f32.gmra.mrb[64].mxu1 %vm5601_vm3, %v6921_v18  ;;  %v15890_v61 = vunpack.i.l.bf16 %v20455_v36 }
 0x3cf   : > { %14424 = vmatmul.mubr.msk.f32.gmra.mrb[136].mxu0 %vm5601_vm3, %v7088_v60  ;;  %v5135_v8 = vmul.f32 1.442695, %v5029_v31  ;;  %v5137_v41 = vmul.f32 1.442695, %v5030_v17  ;;  %v4953_v10 = vmax.f32 %v4951_v51, %v4952_v1 }
 0x3d0   : > { %v5416_v53 = vrot.slane %v5415_v34, 4 }
 0x3d1   : > { %16114 = vpow2.f32 %v5135_v8  ;;  %v4954_v27 = vrot.slane %v4953_v10, 4  ;;  %v6922_v2 = vpop.trf.xlu1 }
 0x3d2   : > { %v7089_v50 = vpop.trf.xlu0  ;;  %v5417_v45 = vadd.f32 %v5416_v53, %v5415_v34  ;;  %16116 = vpow2.f32 %v5137_v41  ;;  %14410 = vmatprep.mubr.msk.f32.mxu1 %vm5601_vm3, %v6922_v2  ;;  %v19155_v53 = vpack.c.bf16 %v15891_v58, %v15890_v61 }
 0x3d3   : > { %14426 = vmatprep.mubr.msk.f32.mxu0 %vm5601_vm3, %v7089_v50  ;;  %v4955_v30 = vmax.f32 %v4953_v10, %v4954_v27  ;;  %v19153_v10 = vpack.c.bf16 %v15886_v54, %v15885_v26 }
 0x3d4   : > { %v5418_v29 = vrot.slane %v5417_v45, 2 }
 0x3d5   : > { %v4956_v32 = vrot.slane %v4955_v30, 2  ;;  %v6923_v59 = vpop.trf.xlu1  ;;  %v16113_v0 = vpop.eup %16112 }
 0x3d6   : > { %v7090_v63 = vpop.trf.xlu0  ;;  %14411 = vmatmul.mubr.msk.f32.gmra.mrb[66].mxu1 %vm5601_vm3, %v6923_v59  ;;  %v5419_v3 = vadd.f32 %v5418_v29, %v5417_v45  ;;  %v5537_v42 = vmul.f32 %v16113_v0, %v19057_v39  ;;  %v5538_v20 = vmul.f32 %v16113_v0, %v19062_v24 }
 0x3d7   : > { %14427 = vmatmul.mubr.msk.f32.gmra.mrb[138].mxu0 %vm5601_vm3, %v7090_v63  ;;  %v4957_v44 = vmax.f32 %v4955_v30, %v4956_v32 }
 0x3d8   : > { %v5420_v35 = vrot.slane %v5419_v3, 1  ;;  %8737 = vxpose.xlu0.b32.start [1/2] (short) (narrow) %v5537_v42, 64 }
 0x3d9   : > { %v4958_v28 = vrot.slane %v4957_v44, 1  ;;  %v7250_v5 = vpop.trf.xlu1  ;;  %v14116_v15 = vpop.f32.mrb[26].mxu1 }
 0x3da   : > { %v7417_v6 = vpop.trf.xlu0  ;;  %14433 = vmatprep.mubr.msk.f32.mxu1 %vm5601_vm3, %v7250_v5  ;;  %v5421_v39 = vadd.f32 %v5420_v35, %v5419_v3  ;;  %v19138_v23 = vadd.f32 %v18787_v55, %v14116_v15  ;;  %v3817_v31 = vpop.f32.mrb[27].mxu1 }
 0x3db   : > { %14449 = vmatprep.mubr.msk.f32.mxu0 %vm5601_vm3, %v7417_v6  ;;  %v19135_v24 = vpop.eup %16114  ;;  %v4959_v56 = vmax.f32 %v4957_v44, %v4958_v28  ;;  %v19145_v1 = vadd.f32 %v18803_v48, %v3817_v31 }
 0x3dc   : > { %v19140_v17 = vpop.eup %16116  ;;  %v5368_v14 = vsel %vm4698_vm2, %v19135_v24, 0.0  ;;  %16118 = vrcp.f32 %v5421_v39  ;;  %v4907_v51 = vsel %vm4698_vm2, %v19138_v23, -inf  ;;  %8738 = vxpose.xlu0.b32.end [2/2] (short) (narrow) %v5538_v20, 64 }
 0x3dd   : > { %v5369_v18 = vsel %vm4698_vm2, %v19140_v17, 0.0  ;;  %v5043_v60 = vsub.f32 %v19111_v57, %v4959_v56  ;;  %v5044_v34 = vsub.f32 %v19104_v19, %v4959_v56  ;;  %v7251_v8 = vpop.trf.xlu1  ;;  %v4906_v2 = vsel %vm4698_vm2, %v19145_v1, -inf }
 0x3de   : > { %v7418_v41 = vpop.trf.xlu0  ;;  %v5370_v27 = vadd.f32 %v5369_v18, %v5368_v14  ;;  %14434 = vmatmul.mubr.msk.f32.vlgmr.msra.gmra.mrb[68].mxu1 %vm5601_vm3, %v7251_v8  ;;  %v4908_v50 = vmax.f32 %v4906_v2, %v4907_v51 }
 0x3df   : > { %14450 = vmatmul.mubr.msk.f32.vlgmr.msra.gmra.mrb[140].mxu0 %vm5601_vm3, %v7418_v41  ;;  %v5163_v57 = vmul.f32 1.442695, %v5043_v60  ;;  %v5165_v19 = vmul.f32 1.442695, %v5044_v34  ;;  %15712 = vmatpush3.bf16.msra.mxu1 %v19079_v13 }
 0x3e0   : > { %15716 = vmatpush3.bf16.msra.mxu0 %v19081_v49  ;;  %v5371_v45 = vrot.slane %v5370_v27, 4  ;;  %15718 = vmatprep.subr.bf16.mxu1 %v19153_v10  ;;  %v4909_v30 = vrot.slane %v4908_v50, 4 }
 0x3e1   : > { %15722 = vmatprep.subr.bf16.mxu0 %v19155_v53  ;;  %16120 = vpow2.f32 %v5163_v57  ;;  %8904 = vxpose.xlu1.b32.start [1/2] (short) (narrow) %v18888_v21, 64  ;;  %v7252_v29 = vpop.trf.xlu1 }
 0x3e2   : > { %v7419_v32 = vpop.trf.xlu0  ;;  %v5372_v59 = vadd.f32 %v5371_v45, %v5370_v27  ;;  %16122 = vpow2.f32 %v5165_v19  ;;  %14436 = vmatprep.mubr.msk.f32.mxu1 %vm5601_vm3, %v7252_v29  ;;  %v4910_v13 = vmax.f32 %v4908_v50, %v4909_v30 }
 0x3e3   : > { %14452 = vmatprep.mubr.msk.f32.mxu0 %vm5601_vm3, %v7419_v32 }
 0x3e4   : > { %v5373_v63 = vrot.slane %v5372_v59, 2  ;;  %v4911_v49 = vrot.slane %v4910_v13, 2 }
 0x3e5   : > { %8905 = vxpose.xlu1.b32.end [2/2] (short) (narrow) %v18891_v7, 64  ;;  %v7253_v0 = vpop.trf.xlu1 }
 0x3e6   : > { %v7420_v3 = vpop.trf.xlu0  ;;  %v16119_v44 = vpop.eup %16118  ;;  %14437 = vmatmul.mubr.msk.f32.gmra.mrb[70].mxu1 %vm5601_vm3, %v7253_v0  ;;  %v5374_v21 = vadd.f32 %v5373_v63, %v5372_v59  ;;  %v4912_v42 = vmax.f32 %v4910_v13, %v4911_v49  ;;  %v15896_v0 = vunpack.i.h.bf16 %v18356_v11 }
 0x3e7   : > { %14453 = vmatmul.mubr.msk.f32.gmra.mrb[142].mxu0 %vm5601_vm3, %v7420_v3  ;;  %v19172_v20 = vmul.f32 %v16119_v44, %v19101_v40  ;;  %v19175_v35 = vmul.f32 %v16119_v44, %v19106_v12  ;;  %v15895_v3 = vunpack.i.l.bf16 %v18356_v11 }
 0x3e8   : > { %v5375_v36 = vrot.slane %v5374_v21, 1  ;;  %v4913_v58 = vrot.slane %v4912_v42, 1 }
 0x3e9   : > { %v7254_v28 = vpop.trf.xlu1 }
 0x3ea   : > { %v7421_v5 = vpop.trf.xlu0  ;;  %v14249_v7 = vpop.f32.mrb[90].mxu0  ;;  %14439 = vmatprep.mubr.msk.f32.mxu1 %vm5601_vm3, %v7254_v28  ;;  %v5376_v6 = vadd.f32 %v5375_v36, %v5374_v21  ;;  %v4914_v26 = vmax.f32 %v4912_v42, %v4913_v58  ;;  %v20456_v28 = vld [vmem:[#allocation27_spill] sm:$0xff] }
 0x3eb   : > { %14455 = vmatprep.mubr.msk.f32.mxu0 %vm5601_vm3, %v7421_v5  ;;  %v19179_v54 = vpop.eup %16120  ;;  %v19182_v61 = vadd.f32 %v18787_v55, %v14249_v7  ;;  %v4580_v40 = vpop.f32.mrb[91].mxu0  ;;  %v15901_v5 = vunpack.i.h.bf16 %v20456_v28  ;;  %v15900_v7 = vunpack.i.l.bf16 %v20456_v28 }
 0x3ec   : > { %v19184_v15 = vpop.eup %16122  ;;  %v5431_v12 = vsel %vm4698_vm2, %v19179_v54, 0.0  ;;  %v19189_v39 = vadd.f32 %v18803_v48, %v4580_v40  ;;  %16124 = vrcp.f32 %v5376_v6  ;;  %v5033_v31 = vsub.f32 %v19145_v1, %v4914_v26 }
 0x3ed   : > { %v5432_v56 = vsel %vm4698_vm2, %v19184_v15, 0.0  ;;  %v5034_v14 = vsub.f32 %v19138_v23, %v4914_v26  ;;  %v4970_v55 = vsel %vm4698_vm2, %v19182_v61, -inf  ;;  %v7255_v18 = vpop.trf.xlu1 }
 0x3ee   : > { %v7422_v60 = vpop.trf.xlu0  ;;  %v5433_v34 = vadd.f32 %v5432_v56, %v5431_v12  ;;  %v4969_v51 = vsel %vm4698_vm2, %v19189_v39, -inf  ;;  %14440 = vmatmul.mubr.msk.f32.gmra.mrb[72].mxu1 %vm5601_vm3, %v7255_v18  ;;  %v14275_v48 = vpop.f32.mrb[92].mxu0  ;;  %v5143_v8 = vmul.f32 1.442695, %v5033_v31 }
 0x3ef   : > { %14456 = vmatmul.mubr.msk.f32.gmra.mrb[144].mxu0 %vm5601_vm3, %v7422_v60  ;;  %v5145_v41 = vmul.f32 1.442695, %v5034_v14  ;;  %v4971_v27 = vmax.f32 %v4969_v51, %v4970_v55  ;;  %v5692_v1 = vpop.f32.mrb[93].mxu0  ;;  %v10909_v50 = vmul.f32 %v14275_v48, %v20391_v25 }
 0x3f0   : > { %v5434_v2 = vrot.slane %v5433_v34, 4  ;;  %16126 = vpow2.f32 %v5143_v8  ;;  %v10908_v30 = vmul.f32 %v5692_v1, %v20391_v25  ;;  %v19217_v8 = vpack.c.bf16 %v15896_v0, %v15895_v3 }
 0x3f1   : > { %v4972_v23 = vrot.slane %v4971_v27, 4  ;;  %v7256_v57 = vpop.trf.xlu1  ;;  %16128 = vpow2.f32 %v5145_v41 }
 0x3f2   : > { %v7423_v19 = vpop.trf.xlu0  ;;  %v5435_v45 = vadd.f32 %v5434_v2, %v5433_v34  ;;  %14442 = vmatprep.mubr.msk.f32.mxu1 %vm5601_vm3, %v7256_v57  ;;  %v14278_v29 = vpop.f32.mrb[94].mxu0  ;;  %v19223_v2 = vpack.c.bf16 %v15901_v5, %v15900_v7  ;;  %v19228_v57 = vld [vmem:[%s20237_s3 + $0x8] sm:$0xff] }
 0x3f3   : > { %14458 = vmatprep.mubr.msk.f32.mxu0 %vm5601_vm3, %v7423_v19  ;;  %v4973_v32 = vmax.f32 %v4971_v27, %v4972_v23  ;;  %v10973_v59 = vmul.f32 %v14278_v29, %v20394_v43  ;;  %v5702_v13 = vpop.f32.mrb[95].mxu0 }
 0x3f4   : > { %v10972_v63 = vmul.f32 %v5702_v13, %v20394_v43  ;;  %v5436_v49 = vrot.slane %v5435_v45, 2 }
 0x3f5   : > { %v4974_v44 = vrot.slane %v4973_v32, 2  ;;  %v7257_v21 = vpop.trf.xlu1  ;;  %v11037_v36 = vadd.f32 %v10973_v59, %v10909_v50  ;;  %v19241_v59 = vld [vmem:[%s20237_s3] sm:$0xff] }
 0x3f6   : > { %v7424_v42 = vpop.trf.xlu0  ;;  %v16125_v58 = vpop.eup %16124  ;;  %14443 = vmatmul.mubr.msk.f32.gmra.mrb[74].mxu1 %vm5601_vm3, %v7257_v21  ;;  %v11036_v6 = vadd.f32 %v10972_v63, %v10908_v30  ;;  %v5437_v40 = vadd.f32 %v5436_v49, %v5435_v45 }
 0x3f7   : > { %14459 = vmatmul.mubr.msk.f32.gmra.mrb[146].mxu0 %vm5601_vm3, %v7424_v42  ;;  %v14281_v26 = vpop.f32.mrb[96].mxu0  ;;  %v4975_v12 = vmax.f32 %v4973_v32, %v4974_v44  ;;  %v5541_v56 = vmul.f32 %v16125_v58, %v19135_v24  ;;  %v5542_v11 = vmul.f32 %v16125_v58, %v19140_v17 }
 0x3f8   : > { %v11101_v31 = vmul.f32 %v14281_v26, %v20399_v38  ;;  %v5712_v14 = vpop.f32.mrb[97].mxu0  ;;  %v5438_v18 = vrot.slane %v5437_v40, 1 }
 0x3f9   : > { %v11100_v55 = vmul.f32 %v5712_v14, %v20399_v38  ;;  %v4976_v60 = vrot.slane %v4975_v12, 1  ;;  %v7584_v34 = vpop.trf.xlu1  ;;  %9071 = vxpose.xlu0.b32.start [1/2] (short) (narrow) %v5541_v56, 64  ;;  %v14154_v41 = vpop.f32.mrb[28].mxu1 }
 0x3fa   : > { %v7751_v51 = vpop.trf.xlu0  ;;  %v11165_v48 = vadd.f32 %v11101_v31, %v11037_v36  ;;  %14465 = vmatprep.mubr.msk.f32.mxu1 %vm5601_vm3, %v7584_v34  ;;  %v14284_v17 = vpop.f32.mrb[98].mxu0  ;;  %v5439_v27 = vadd.f32 %v5438_v18, %v5437_v40  ;;  %v19231_v19 = vadd.f32 %v19228_v57, %v14154_v41 }
 0x3fb   : > { %14481 = vmatprep.mubr.msk.f32.mxu0 %vm5601_vm3, %v7751_v51  ;;  %v11164_v24 = vadd.f32 %v11100_v55, %v11036_v6  ;;  %v19221_v1 = vpop.eup %16126  ;;  %v4977_v23 = vmax.f32 %v4975_v12, %v4976_v60  ;;  %v4035_v50 = vpop.f32.mrb[29].mxu1  ;;  %v11229_v45 = vmul.f32 %v14284_v17, %v20402_v47 }
 0x3fc   : > { %v5722_v30 = vpop.f32.mrb[99].mxu0  ;;  %v19234_v29 = vpop.eup %16128  ;;  %v5386_v32 = vsel %vm4698_vm2, %v19221_v1, 0.0  ;;  %v19244_v13 = vadd.f32 %v19241_v59, %v4035_v50  ;;  %16130 = vrcp.f32 %v5439_v27  ;;  %v4925_v44 = vsel %vm4698_vm2, %v19231_v19, -inf }
 0x3fd   : > { %v11228_v63 = vmul.f32 %v5722_v30, %v20402_v47  ;;  %v5387_v49 = vsel %vm4698_vm2, %v19234_v29, 0.0  ;;  %v5047_v0 = vsub.f32 %v19189_v39, %v4977_v23  ;;  %v5048_v3 = vsub.f32 %v19182_v61, %v4977_v23  ;;  %v7585_v21 = vpop.trf.xlu1  ;;  %9072 = vxpose.xlu0.b32.end [2/2] (short) (narrow) %v5542_v11, 64 }
 0x3fe   : > { %v7752_v42 = vpop.trf.xlu0  ;;  %v5388_v36 = vadd.f32 %v5387_v49, %v5386_v32  ;;  %v4924_v58 = vsel %vm4698_vm2, %v19244_v13, -inf  ;;  %14466 = vmatmul.mubr.msk.f32.vlgmr.msra.gmra.mrb[76].mxu1 %vm5601_vm3, %v7585_v21  ;;  %v19257_v28 = vadd.f32 %v11229_v45, %v11165_v48  ;;  %v14291_v39 = vpop.f32.mrb[100].mxu0 }
 0x3ff   : > { %14482 = vmatmul.mubr.msk.f32.vlgmr.msra.gmra.mrb[148].mxu0 %vm5601_vm3, %v7752_v42  ;;  %v19259_v5 = vadd.f32 %v11228_v63, %v11164_v24  ;;  %v5171_v61 = vmul.f32 1.442695, %v5047_v0  ;;  %v5173_v7 = vmul.f32 1.442695, %v5048_v3  ;;  %v4926_v6 = vmax.f32 %v4924_v58, %v4925_v44  ;;  %15720 = vmatpush3.bf16.msra.mxu1 %v19153_v10  ;;  %v5859_v26 = vpop.f32.mrb[101].mxu0 }
 0x400   : > { %15724 = vmatpush3.bf16.msra.mxu0 %v19155_v53  ;;  %v5389_v40 = vrot.slane %v5388_v36, 4  ;;  %15726 = vmatprep.subr.bf16.mxu1 %v19217_v8  ;;  %v10911_v31 = vmul.f32 %v14291_v39, %v20391_v25  ;;  %v10910_v10 = vmul.f32 %v5859_v26, %v20391_v25 }
 0x401   : > { %15730 = vmatprep.subr.bf16.mxu0 %v19223_v2  ;;  %16132 = vpow2.f32 %v5171_v61  ;;  %v4927_v12 = vrot.slane %v4926_v6, 4  ;;  %v7586_v56 = vpop.trf.xlu1 }
 0x402   : > { %v7753_v11 = vpop.trf.xlu0  ;;  %v5390_v14 = vadd.f32 %v5389_v40, %v5388_v36  ;;  %16134 = vpow2.f32 %v5173_v7  ;;  %14468 = vmatprep.mubr.msk.f32.mxu1 %vm5601_vm3, %v7586_v56  ;;  %v14294_v53 = vpop.f32.mrb[102].mxu0 }
 0x403   : > { %14484 = vmatprep.mubr.msk.f32.mxu0 %vm5601_vm3, %v7753_v11  ;;  %v4928_v55 = vmax.f32 %v4926_v6, %v4927_v12  ;;  %v10975_v18 = vmul.f32 %v14294_v53, %v20394_v43  ;;  %v5869_v60 = vpop.f32.mrb[103].mxu0 }
 0x404   : > { %v10974_v34 = vmul.f32 %v5869_v60, %v20394_v43  ;;  %v5391_v51 = vrot.slane %v5390_v14, 2 }
 0x405   : > { %v4929_v48 = vrot.slane %v4928_v55, 2  ;;  %v7587_v41 = vpop.trf.xlu1  ;;  %v11039_v17 = vadd.f32 %v10975_v18, %v10911_v31 }
 0x406   : > { %v7754_v24 = vpop.trf.xlu0  ;;  %v16131_v27 = vpop.eup %16130  ;;  %14469 = vmatmul.mubr.msk.f32.gmra.mrb[78].mxu1 %vm5601_vm3, %v7587_v41  ;;  %v11038_v23 = vadd.f32 %v10974_v34, %v10910_v10  ;;  %v5392_v45 = vadd.f32 %v5391_v51, %v5390_v14 }
 0x407   : > { %14485 = vmatmul.mubr.msk.f32.gmra.mrb[150].mxu0 %vm5601_vm3, %v7754_v24  ;;  %v14297_v50 = vpop.f32.mrb[104].mxu0  ;;  %v4930_v30 = vmax.f32 %v4928_v55, %v4929_v48  ;;  %v19275_v49 = vmul.f32 %v16131_v27, %v19179_v54  ;;  %v19278_v0 = vmul.f32 %v16131_v27, %v19184_v15 }
 0x408   : > { %v11103_v32 = vmul.f32 %v14297_v50, %v20399_v38  ;;  %v5879_v63 = vpop.f32.mrb[105].mxu0  ;;  %v5393_v44 = vrot.slane %v5392_v45, 1 }
 0x409   : > { %v11102_v3 = vmul.f32 %v5879_v63, %v20399_v38  ;;  %v4931_v21 = vrot.slane %v4930_v30, 1  ;;  %v7588_v42 = vpop.trf.xlu1  ;;  %v15906_v63 = vunpack.i.h.bf16 %v18371_v4 }
 0x40a   : > { %v7755_v36 = vpop.trf.xlu0  ;;  %v11167_v58 = vadd.f32 %v11103_v32, %v11039_v17  ;;  %14471 = vmatprep.mubr.msk.f32.mxu1 %vm5601_vm3, %v7588_v42  ;;  %v5394_v61 = vadd.f32 %v5393_v44, %v5392_v45  ;;  %v20457_v42 = vld [vmem:[#allocation2_spill] sm:$0xff] }
 0x40b   : > { %14487 = vmatprep.mubr.msk.f32.mxu0 %vm5601_vm3, %v7755_v36  ;;  %v11166_v39 = vadd.f32 %v11102_v3, %v11038_v23  ;;  %v19283_v7 = vpop.eup %16132  ;;  %v4932_v54 = vmax.f32 %v4930_v30, %v4931_v21  ;;  %v15905_v21 = vunpack.i.l.bf16 %v18371_v4  ;;  %v15911_v36 = vunpack.i.h.bf16 %v20457_v42 }
 0x40c   : > { %v19285_v6 = vpop.eup %16134  ;;  %v5449_v15 = vsel %vm4698_vm2, %v19283_v7, 0.0  ;;  %v14300_v26 = vpop.f32.mrb[106].mxu0  ;;  %16136 = vrcp.f32 %v5394_v61 }
 0x40d   : > { %v5450_v40 = vsel %vm4698_vm2, %v19285_v6, 0.0  ;;  %v5037_v12 = vsub.f32 %v19244_v13, %v4932_v54  ;;  %v5038_v56 = vsub.f32 %v19231_v19, %v4932_v54  ;;  %v7589_v11 = vpop.trf.xlu1  ;;  %v11231_v14 = vmul.f32 %v14300_v26, %v20402_v47  ;;  %v5889_v53 = vpop.f32.mrb[107].mxu0 }
 0x40e   : > { %v7756_v31 = vpop.trf.xlu0  ;;  %v5451_v10 = vadd.f32 %v5450_v40, %v5449_v15  ;;  %14472 = vmatmul.mubr.msk.f32.gmra.mrb[80].mxu1 %vm5601_vm3, %v7589_v11  ;;  %v11230_v34 = vmul.f32 %v5889_v53, %v20402_v47 }
 0x40f   : > { %14488 = vmatmul.mubr.msk.f32.gmra.mrb[152].mxu0 %vm5601_vm3, %v7756_v31  ;;  %v5151_v55 = vmul.f32 1.442695, %v5037_v12  ;;  %v5153_v18 = vmul.f32 1.442695, %v5038_v56  ;;  %v19296_v60 = vadd.f32 %v11231_v14, %v11167_v58  ;;  %v15910_v58 = vunpack.i.l.bf16 %v20457_v42 }
 0x410   : > { %v5452_v51 = vrot.slane %v5451_v10, 4  ;;  %v19299_v48 = vadd.f32 %v11230_v34, %v11166_v39  ;;  %v19326_v56 = vpack.c.bf16 %v15906_v63, %v15905_v21 }
 0x411   : > { %16138 = vpow2.f32 %v5151_v55  ;;  %v7590_v13 = vpop.trf.xlu1  ;;  %v19328_v11 = vpack.c.bf16 %v15911_v36, %v15910_v58 }
 0x412   : > { %v7757_v19 = vpop.trf.xlu0  ;;  %v5453_v41 = vadd.f32 %v5452_v51, %v5451_v10  ;;  %16140 = vpow2.f32 %v5153_v18  ;;  %14474 = vmatprep.mubr.msk.f32.mxu1 %vm5601_vm3, %v7590_v13 }
 0x413   : > { %14490 = vmatprep.mubr.msk.f32.mxu0 %vm5601_vm3, %v7757_v19 }
 0x414   : > { %v5454_v24 = vrot.slane %v5453_v41, 2 }
 0x415   : > { %v7591_v17 = vpop.trf.xlu1 }
 0x416   : > { %v7758_v27 = vpop.trf.xlu0  ;;  %v16137_v23 = vpop.eup %16136  ;;  %14475 = vmatmul.mubr.msk.f32.gmra.mrb[82].mxu1 %vm5601_vm3, %v7591_v17  ;;  %9238 = vxpose.xlu0.b32.start [1/2] (short) (narrow) %v19001_v9, 64  ;;  %v5455_v50 = vadd.f32 %v5454_v24, %v5453_v41 }
 0x417   : > { %14491 = vmatmul.mubr.msk.f32.gmra.mrb[154].mxu0 %vm5601_vm3, %v7758_v27  ;;  %v5545_v45 = vmul.f32 %v16137_v23, %v19221_v1  ;;  %v5546_v30 = vmul.f32 %v16137_v23, %v19234_v29 }
 0x418   : > { %v5456_v32 = vrot.slane %v5455_v50, 1 }
 0x419   : > { %9405 = vxpose.xlu1.b32.start [1/2] (short) (narrow) %v5545_v45, 64  ;;  %v7918_v3 = vpop.trf.xlu1  ;;  %v14192_v9 = vpop.f32.mrb[30].mxu1 }
 0x41a   : > { %v8085_v44 = vpop.trf.xlu0  ;;  %9239 = vxpose.xlu0.b32.end [2/2] (short) (narrow) %v19004_v37, 64  ;;  %v5457_v1 = vadd.f32 %v5456_v32, %v5455_v50  ;;  %v4259_v29 = vadd.f32 %v19228_v57, %v14192_v9  ;;  %v4253_v61 = vpop.f32.mrb[31].mxu1  ;;  %14497 = vmatprep.mubr.msk.f32.mxu1 %vm5601_vm3, %v7918_v3 }
 0x41b   : > { %14513 = vmatprep.mubr.msk.f32.mxu0 %vm5601_vm3, %v8085_v44  ;;  %v19314_v39 = vpop.eup %16138  ;;  %v4254_v15 = vadd.f32 %v19241_v59, %v4253_v61 }
 0x41c   : > { %v19318_v54 = vpop.eup %16140  ;;  %v5404_v4 = vsel %vm4698_vm2, %v19314_v39, 0.0  ;;  %16142 = vrcp.f32 %v5457_v1  ;;  %v4943_v26 = vsel %vm4698_vm2, %v4259_v29, -inf }
 0x41d   : > { %v5405_v37 = vsel %vm4698_vm2, %v19318_v54, 0.0  ;;  %9406 = vxpose.xlu1.b32.end [2/2] (short) (narrow) %v5546_v30, 64  ;;  %v7919_v40 = vpop.trf.xlu1  ;;  %v4942_v14 = vsel %vm4698_vm2, %v4254_v15, -inf }
 0x41e   : > { %v8086_v12 = vpop.trf.xlu0  ;;  %v5406_v31 = vadd.f32 %v5405_v37, %v5404_v4  ;;  %14498 = vmatmul.mubr.msk.f32.vlgmr.msra.gmra.mrb[84].mxu1 %vm5601_vm3, %v7919_v40  ;;  %v4944_v10 = vmax.f32 %v4942_v14, %v4943_v26  ;;  %v15916_v14 = vunpack.i.h.bf16 %v18408_v16 }
 0x41f   : > { %14514 = vmatmul.mubr.msk.f32.vlgmr.msra.gmra.mrb[156].mxu0 %vm5601_vm3, %v8086_v12  ;;  %15728 = vmatpush3.bf16.msra.mxu1 %v19217_v8 }
 0x420   : > { %15732 = vmatpush3.bf16.msra.mxu0 %v19223_v2  ;;  %v5407_v53 = vrot.slane %v5406_v31, 4  ;;  %15734 = vmatprep.subr.bf16.mxu1 %v19326_v56  ;;  %v4945_v55 = vrot.slane %v4944_v10, 4 }
 0x421   : > { %15738 = vmatprep.subr.bf16.mxu0 %v19328_v11  ;;  %v7920_v18 = vpop.trf.xlu1 }
 0x422   : > { %v8087_v34 = vpop.trf.xlu0  ;;  %v5408_v51 = vadd.f32 %v5407_v53, %v5406_v31  ;;  %14500 = vmatprep.mubr.msk.f32.mxu1 %vm5601_vm3, %v7920_v18  ;;  %v4946_v13 = vmax.f32 %v4944_v10, %v4945_v55 }
 0x423   : > { %14516 = vmatprep.mubr.msk.f32.mxu0 %vm5601_vm3, %v8087_v34 }
 0x424   : > { %v5409_v19 = vrot.slane %v5408_v51, 2  ;;  %v4947_v41 = vrot.slane %v4946_v13, 2 }
 0x425   : > { %v7921_v24 = vpop.trf.xlu1 }
 0x426   : > { %v8088_v8 = vpop.trf.xlu0  ;;  %v16143_v17 = vpop.eup %16142  ;;  %14501 = vmatmul.mubr.msk.f32.gmra.mrb[86].mxu1 %vm5601_vm3, %v7921_v24  ;;  %v5410_v2 = vadd.f32 %v5409_v19, %v5408_v51  ;;  %v4948_v27 = vmax.f32 %v4946_v13, %v4947_v41 }
 0x427   : > { %14517 = vmatmul.mubr.msk.f32.gmra.mrb[158].mxu0 %vm5601_vm3, %v8088_v8  ;;  %v19342_v23 = vmul.f32 %v16143_v17, %v19283_v7  ;;  %v19345_v50 = vmul.f32 %v16143_v17, %v19285_v6 }
 0x428   : > { %v5411_v45 = vrot.slane %v5410_v2, 1  ;;  %v4949_v30 = vrot.slane %v4948_v27, 1 }
 0x429   : > { %v7922_v32 = vpop.trf.xlu1 }
 0x42a   : > { %v8089_v63 = vpop.trf.xlu0  ;;  %14503 = vmatprep.mubr.msk.f32.mxu1 %vm5601_vm3, %v7922_v32  ;;  %v5412_v3 = vadd.f32 %v5411_v45, %v5410_v2  ;;  %v4950_v44 = vmax.f32 %v4948_v27, %v4949_v30 }
 0x42b   : > { %14519 = vmatprep.mubr.msk.f32.mxu0 %vm5601_vm3, %v8089_v63 }
 0x42c   : > { %16144 = vrcp.f32 %v5412_v3  ;;  %v5041_v21 = vsub.f32 %v4254_v15, %v4950_v44  ;;  %v5042_v42 = vsub.f32 %v4259_v29, %v4950_v44 }
 0x42d   : > { %v7923_v36 = vpop.trf.xlu1 }
 0x42e   : > { %v8090_v58 = vpop.trf.xlu0  ;;  %14504 = vmatmul.mubr.msk.f32.gmra.mrb[88].mxu1 %vm5601_vm3, %v7923_v36  ;;  %v5159_v7 = vmul.f32 1.442695, %v5041_v21  ;;  %v5161_v6 = vmul.f32 1.442695, %v5042_v42 }
 0x42f   : > { %14520 = vmatmul.mubr.msk.f32.gmra.mrb[160].mxu0 %vm5601_vm3, %v8090_v58 }
 0x430   : > { %16146 = vpow2.f32 %v5159_v7 }
 0x431   : > { %v7924_v9 = vpop.trf.xlu1  ;;  %v14323_v1 = vpop.f32.mrb[108].mxu0  ;;  %16148 = vpow2.f32 %v5161_v6 }
 0x432   : > { %v8091_v61 = vpop.trf.xlu0  ;;  %v6193_v4 = vpop.f32.mrb[109].mxu0  ;;  %14506 = vmatprep.mubr.msk.f32.mxu1 %vm5601_vm3, %v7924_v9  ;;  %v10915_v10 = vmul.f32 %v14323_v1, %v20391_v25 }
 0x433   : > { %14522 = vmatprep.mubr.msk.f32.mxu0 %vm5601_vm3, %v8091_v61  ;;  %9572 = vxpose.xlu0.b32.start [1/2] (short) (narrow) %v19093_v22, 64  ;;  %v15915_v22 = vunpack.i.l.bf16 %v18408_v16  ;;  %v10914_v51 = vmul.f32 %v6193_v4, %v20391_v25 }
 0x435   : > { %v7925_v29 = vpop.trf.xlu1  ;;  %v19381_v32 = vpack.c.bf16 %v15916_v14, %v15915_v22 }
 0x436   : > { %v16145_v15 = vpop.eup %16144  ;;  %v8092_v37 = vpop.trf.xlu0  ;;  %14507 = vmatmul.mubr.msk.f32.gmra.mrb[90].mxu1 %vm5601_vm3, %v7925_v29 }
 0x437   : > { %14523 = vmatmul.mubr.msk.f32.gmra.mrb[162].mxu0 %vm5601_vm3, %v8092_v37  ;;  %9573 = vxpose.xlu0.b32.end [2/2] (short) (narrow) %v19096_v52, 64  ;;  %v5549_v26 = vmul.f32 %v16145_v15, %v19314_v39  ;;  %v5550_v40 = vmul.f32 %v16145_v15, %v19318_v54  ;;  %v20458_v39 = vld [vmem:[#allocation34_spill] sm:$0xff] }
 0x438   : > { %v15921_v34 = vunpack.i.h.bf16 %v20458_v39  ;;  %v15920_v54 = vunpack.i.l.bf16 %v20458_v39 }
 0x439   : > { %9739 = vxpose.xlu1.b32.start [1/2] (short) (narrow) %v5549_v26, 64  ;;  %v8252_v12 = vpop.trf.xlu1  ;;  %v14326_v31 = vpop.f32.mrb[110].mxu0 }
 0x43a   : > { %v10979_v53 = vmul.f32 %v14326_v31, %v20394_v43  ;;  %v8419_v55 = vpop.trf.xlu0  ;;  %v6203_v18 = vpop.f32.mrb[111].mxu0  ;;  %14529 = vmatprep.mubr.msk.f32.mxu1 %vm5601_vm3, %v8252_v12  ;;  %v19386_v21 = vpack.c.bf16 %v15921_v34, %v15920_v54 }
 0x43b   : > { %v19364_v52 = vpop.eup %16146  ;;  %v10978_v13 = vmul.f32 %v6203_v18, %v20394_v43  ;;  %14545 = vmatprep.mubr.msk.f32.mxu0 %vm5601_vm3, %v8419_v55  ;;  %v14230_v16 = vpop.f32.mrb[32].mxu1 }
 0x43c   : > { %v19371_v19 = vpop.eup %16148  ;;  %v5422_v41 = vsel %vm4698_vm2, %v19364_v52, 0.0  ;;  %v11043_v24 = vadd.f32 %v10979_v53, %v10915_v10  ;;  %v19376_v8 = vadd.f32 %v19228_v57, %v14230_v16  ;;  %v4471_v17 = vpop.f32.mrb[33].mxu1 }
 0x43d   : > { %v5423_v2 = vsel %vm4698_vm2, %v19371_v19, 0.0  ;;  %v11042_v27 = vadd.f32 %v10978_v13, %v10914_v51  ;;  %v4472_v45 = vadd.f32 %v19241_v59, %v4471_v17  ;;  %9740 = vxpose.xlu1.b32.end [2/2] (short) (narrow) %v5550_v40, 64  ;;  %v8253_v30 = vpop.trf.xlu1 }
 0x43e   : > { %v5424_v63 = vadd.f32 %v5423_v2, %v5422_v41  ;;  %v4961_v3 = vsel %vm4698_vm2, %v19376_v8, -inf  ;;  %v8420_v44 = vpop.trf.xlu0  ;;  %14530 = vmatmul.mubr.msk.f32.vlgmr.msra.gmra.mrb[92].mxu1 %vm5601_vm3, %v8253_v30 }
 0x43f   : > { %v4960_v42 = vsel %vm4698_vm2, %v4472_v45, -inf  ;;  %14546 = vmatmul.mubr.msk.f32.vlgmr.msra.gmra.mrb[164].mxu0 %vm5601_vm3, %v8420_v44  ;;  %15736 = vmatpush3.bf16.msra.mxu1 %v19326_v56 }
 0x440   : > { %v5425_v36 = vrot.slane %v5424_v63, 4  ;;  %v4962_v58 = vmax.f32 %v4960_v42, %v4961_v3  ;;  %15740 = vmatpush3.bf16.msra.mxu0 %v19328_v11  ;;  %15742 = vmatprep.subr.bf16.mxu1 %v19381_v32 }
 0x441   : > { %15746 = vmatprep.subr.bf16.mxu0 %v19386_v21  ;;  %v8254_v7 = vpop.trf.xlu1  ;;  %v14329_v6 = vpop.f32.mrb[112].mxu0 }
 0x442   : > { %v5426_v9 = vadd.f32 %v5425_v36, %v5424_v63  ;;  %v4963_v1 = vrot.slane %v4962_v58, 4  ;;  %v11107_v61 = vmul.f32 %v14329_v6, %v20399_v38  ;;  %v8421_v4 = vpop.trf.xlu0  ;;  %v6213_v29 = vpop.f32.mrb[113].mxu0  ;;  %14532 = vmatprep.mubr.msk.f32.mxu1 %vm5601_vm3, %v8254_v7 }
 0x443   : > { %v11106_v56 = vmul.f32 %v6213_v29, %v20399_v38  ;;  %14548 = vmatprep.mubr.msk.f32.mxu0 %vm5601_vm3, %v8421_v4 }
 0x444   : > { %v4964_v15 = vmax.f32 %v4962_v58, %v4963_v1  ;;  %v11171_v11 = vadd.f32 %v11107_v61, %v11043_v24  ;;  %v5427_v37 = vrot.slane %v5426_v9, 2  ;;  %v20459_v61 = vld [vmem:[#allocation11_spill] sm:$0xff] }
 0x445   : > { %v11170_v26 = vadd.f32 %v11106_v56, %v11042_v27  ;;  %v8255_v40 = vpop.trf.xlu1  ;;  %v15926_v4 = vunpack.i.h.bf16 %v20459_v61  ;;  %v15925_v29 = vunpack.i.l.bf16 %v20459_v61 }
 0x446   : > { %v4965_v12 = vrot.slane %v4964_v15, 2  ;;  %v8422_v31 = vpop.trf.xlu0  ;;  %14533 = vmatmul.mubr.msk.f32.gmra.mrb[94].mxu1 %vm5601_vm3, %v8255_v40  ;;  %v5428_v14 = vadd.f32 %v5427_v37, %v5426_v9  ;;  %v20460_v37 = vld [vmem:[#allocation3_spill] sm:$0xff] }
 0x447   : > { %14549 = vmatmul.mubr.msk.f32.gmra.mrb[166].mxu0 %vm5601_vm3, %v8422_v31 }
 0x448   : > { %v4966_v22 = vmax.f32 %v4964_v15, %v4965_v12  ;;  %v5429_v10 = vrot.slane %v5428_v14, 1 }
 0x449   : > { %v8256_v53 = vpop.trf.xlu1  ;;  %v14332_v55 = vpop.f32.mrb[114].mxu0 }
 0x44a   : > { %v4967_v18 = vrot.slane %v4966_v22, 1  ;;  %v11235_v39 = vmul.f32 %v14332_v55, %v20402_v47  ;;  %v8423_v34 = vpop.trf.xlu0  ;;  %v6223_v54 = vpop.f32.mrb[115].mxu0  ;;  %14535 = vmatprep.mubr.msk.f32.mxu1 %vm5601_vm3, %v8256_v53  ;;  %v5430_v51 = vadd.f32 %v5429_v10, %v5428_v14 }
 0x44b   : > { %v11234_v13 = vmul.f32 %v6223_v54, %v20402_v47  ;;  %14551 = vmatprep.mubr.msk.f32.mxu0 %vm5601_vm3, %v8423_v34 }
 0x44c   : > { %v4968_v16 = vmax.f32 %v4966_v22, %v4967_v18  ;;  %v19404_v41 = vadd.f32 %v11235_v39, %v11171_v11  ;;  %16150 = vrcp.f32 %v5430_v51  ;;  %v19441_v51 = vpack.c.bf16 %v15926_v4, %v15925_v29 }
 0x44d   : > { %v19406_v24 = vadd.f32 %v11234_v13, %v11170_v26  ;;  %v8257_v17 = vpop.trf.xlu1  ;;  %v15931_v26 = vunpack.i.h.bf16 %v20460_v37 }
 0x44e   : > { %v5045_v2 = vsub.f32 %v4472_v45, %v4968_v16  ;;  %v5046_v27 = vsub.f32 %v19376_v8, %v4968_v16  ;;  %v8424_v30 = vpop.trf.xlu0  ;;  %14536 = vmatmul.mubr.msk.f32.gmra.mrb[96].mxu1 %vm5601_vm3, %v8257_v17 }
 0x44f   : > { %14552 = vmatmul.mubr.msk.f32.gmra.mrb[168].mxu0 %vm5601_vm3, %v8424_v30 }
 0x450   : > { %v5167_v63 = vmul.f32 1.442695, %v5045_v2  ;;  %v5169_v3 = vmul.f32 1.442695, %v5046_v27  ;;  %9906 = vxpose.xlu0.b32.start [1/2] (short) (narrow) %v19172_v20, 64 }
 0x451   : > { %v8258_v44 = vpop.trf.xlu1  ;;  %v14355_v42 = vpop.f32.mrb[116].mxu0 }
 0x452   : > { %16152 = vpow2.f32 %v5167_v63  ;;  %v8425_v36 = vpop.trf.xlu0  ;;  %v6527_v58 = vpop.f32.mrb[117].mxu0  ;;  %14538 = vmatprep.mubr.msk.f32.mxu1 %vm5601_vm3, %v8258_v44 }
 0x453   : > { %16154 = vpow2.f32 %v5169_v3  ;;  %14554 = vmatprep.mubr.msk.f32.mxu0 %vm5601_vm3, %v8425_v36 }
 0x454   : > { %9907 = vxpose.xlu0.b32.end [2/2] (short) (narrow) %v19175_v35, 64  ;;  %v10919_v35 = vmul.f32 %v14355_v42, %v20391_v25 }
 0x455   : > { %v8259_v8 = vpop.trf.xlu1 }
 0x456   : > { %v16151_v45 = vpop.eup %16150  ;;  %v8426_v7 = vpop.trf.xlu0  ;;  %14539 = vmatmul.mubr.msk.f32.gmra.mrb[98].mxu1 %vm5601_vm3, %v8259_v8 }
 0x457   : > { %14555 = vmatmul.mubr.msk.f32.gmra.mrb[170].mxu0 %vm5601_vm3, %v8426_v7  ;;  %v5553_v20 = vmul.f32 %v16151_v45, %v19364_v52  ;;  %v5554_v6 = vmul.f32 %v16151_v45, %v19371_v19  ;;  %v15930_v52 = vunpack.i.l.bf16 %v20460_v37  ;;  %v10918_v19 = vmul.f32 %v6527_v58, %v20391_v25 }
 0x459   : > { %10073 = vxpose.xlu1.b32.start [1/2] (short) (narrow) %v5553_v20, 64  ;;  %v8586_v9 = vpop.trf.xlu1  ;;  %v14358_v1 = vpop.f32.mrb[118].mxu0  ;;  %v19448_v2 = vpack.c.bf16 %v15931_v26, %v15930_v52 }
 0x45a   : > { %v10983_v56 = vmul.f32 %v14358_v1, %v20394_v43  ;;  %v8753_v15 = vpop.trf.xlu0  ;;  %v6537_v11 = vpop.f32.mrb[119].mxu0  ;;  %14561 = vmatprep.mubr.msk.f32.mxu1 %vm5601_vm3, %v8586_v9 }
 0x45b   : > { %v10982_v40 = vmul.f32 %v6537_v11, %v20394_v43  ;;  %14577 = vmatprep.mubr.msk.f32.mxu0 %vm5601_vm3, %v8753_v15  ;;  %v14268_v12 = vpop.f32.mrb[34].mxu1 }
 0x45c   : > { %v19429_v31 = vpop.eup %16152  ;;  %v11047_v14 = vadd.f32 %v10983_v56, %v10919_v35  ;;  %v19432_v22 = vadd.f32 %v19228_v57, %v14268_v12  ;;  %v4689_v10 = vpop.f32.mrb[35].mxu1 }
 0x45d   : > { %v19434_v53 = vpop.eup %16154  ;;  %v5440_v55 = vsel %vm4698_vm2, %v19429_v31, 0.0  ;;  %v11046_v18 = vadd.f32 %v10982_v40, %v10918_v19  ;;  %v19439_v39 = vadd.f32 %v19241_v59, %v4689_v10  ;;  %10074 = vxpose.xlu1.b32.end [2/2] (short) (narrow) %v5554_v6, 64  ;;  %v8587_v34 = vpop.trf.xlu1 }
 0x45e   : > { %v14307_v54 = vpop.f32.mrb[36].mxu1  ;;  %v5441_v13 = vsel %vm4698_vm2, %v19434_v53, 0.0  ;;  %v4979_v57 = vsel %vm4698_vm2, %v19432_v22, -inf  ;;  %v8754_v16 = vpop.trf.xlu0  ;;  %14562 = vmatmul.mubr.msk.f32.vlgmr.msra.gmra.mrb[100].mxu1 %vm5601_vm3, %v8587_v34 }
 0x45f   : > { %v6026_v17 = vpop.f32.mrb[37].mxu1  ;;  %v5442_v27 = vadd.f32 %v5441_v13, %v5440_v55  ;;  %v4978_v59 = vsel %vm4698_vm2, %v19439_v39, -inf  ;;  %14578 = vmatmul.mubr.msk.f32.vlgmr.msra.gmra.mrb[172].mxu0 %vm5601_vm3, %v8754_v16  ;;  %15744 = vmatpush3.bf16.msra.mxu1 %v19381_v32  ;;  %v10913_v20 = vmul.f32 %v14307_v54, %v20391_v25 }
 0x460   : > { %v4980_v30 = vmax.f32 %v4978_v59, %v4979_v57  ;;  %15748 = vmatpush3.bf16.msra.mxu0 %v19386_v21  ;;  %15750 = vmatprep.subr.bf16.mxu1 %v19441_v51  ;;  %v10912_v61 = vmul.f32 %v6026_v17, %v20391_v25 }
 0x461   : > { %v5443_v63 = vrot.slane %v5442_v27, 4  ;;  %15754 = vmatprep.subr.bf16.mxu0 %v19448_v2  ;;  %v8588_v3 = vpop.trf.xlu1  ;;  %v14361_v44 = vpop.f32.mrb[120].mxu0 }
 0x462   : > { %v4981_v42 = vrot.slane %v4980_v30, 4  ;;  %v11111_v36 = vmul.f32 %v14361_v44, %v20399_v38  ;;  %v8755_v58 = vpop.trf.xlu0  ;;  %v6547_v8 = vpop.f32.mrb[121].mxu0  ;;  %14564 = vmatprep.mubr.msk.f32.mxu1 %vm5601_vm3, %v8588_v3 }
 0x463   : > { %v5444_v45 = vadd.f32 %v5443_v63, %v5442_v27  ;;  %v11110_v32 = vmul.f32 %v6547_v8, %v20399_v38  ;;  %14580 = vmatprep.mubr.msk.f32.mxu0 %vm5601_vm3, %v8755_v58  ;;  %v14310_v21 = vpop.f32.mrb[38].mxu1 }
 0x464   : > { %v4982_v7 = vmax.f32 %v4980_v30, %v4981_v42  ;;  %v11175_v6 = vadd.f32 %v11111_v36, %v11047_v14  ;;  %v10977_v9 = vmul.f32 %v14310_v21, %v20394_v43  ;;  %v6036_v1 = vpop.f32.mrb[39].mxu1 }
 0x465   : > { %v11174_v4 = vadd.f32 %v11110_v32, %v11046_v18  ;;  %v10976_v29 = vmul.f32 %v6036_v1, %v20394_v43  ;;  %v8589_v35 = vpop.trf.xlu1  ;;  %v5445_v56 = vrot.slane %v5444_v45, 2 }
 0x466   : > { %v4983_v15 = vrot.slane %v4982_v7, 2  ;;  %v11041_v11 = vadd.f32 %v10977_v9, %v10913_v20  ;;  %v8756_v37 = vpop.trf.xlu0  ;;  %14565 = vmatmul.mubr.msk.f32.gmra.mrb[102].mxu1 %vm5601_vm3, %v8589_v35  ;;  %v14313_v26 = vpop.f32.mrb[40].mxu1 }
 0x467   : > { %v11040_v52 = vadd.f32 %v10976_v29, %v10912_v61  ;;  %14581 = vmatmul.mubr.msk.f32.gmra.mrb[174].mxu0 %vm5601_vm3, %v8756_v37  ;;  %v11105_v19 = vmul.f32 %v14313_v26, %v20399_v38  ;;  %v6046_v40 = vpop.f32.mrb[41].mxu1  ;;  %v5446_v12 = vadd.f32 %v5445_v56, %v5444_v45 }
 0x468   : > { %v4984_v14 = vmax.f32 %v4982_v7, %v4983_v15  ;;  %v11104_v10 = vmul.f32 %v6046_v40, %v20399_v38 }
 0x469   : > { %v11169_v55 = vadd.f32 %v11105_v19, %v11041_v11  ;;  %v8590_v18 = vpop.trf.xlu1  ;;  %v14364_v34 = vpop.f32.mrb[122].mxu0  ;;  %v5447_v54 = vrot.slane %v5446_v12, 1 }
 0x46a   : > { %v4985_v13 = vrot.slane %v4984_v14, 1  ;;  %v11168_v57 = vadd.f32 %v11104_v10, %v11040_v52  ;;  %v11239_v16 = vmul.f32 %v14364_v34, %v20402_v47  ;;  %v8757_v17 = vpop.trf.xlu0  ;;  %v6557_v27 = vpop.f32.mrb[123].mxu0  ;;  %14567 = vmatprep.mubr.msk.f32.mxu1 %vm5601_vm3, %v8590_v18 }
 0x46b   : > { %v11238_v59 = vmul.f32 %v6557_v27, %v20402_v47  ;;  %14583 = vmatprep.mubr.msk.f32.mxu0 %vm5601_vm3, %v8757_v17  ;;  %v14316_v30 = vpop.f32.mrb[42].mxu1  ;;  %v5448_v63 = vadd.f32 %v5447_v54, %v5446_v12  ;;  %v15935_v27 = vunpack.i.l.bf16 %v18420_v46 }
 0x46c   : > { %v4986_v3 = vmax.f32 %v4984_v14, %v4985_v13  ;;  %v19473_v44 = vadd.f32 %v11239_v16, %v11175_v6  ;;  %v11233_v42 = vmul.f32 %v14316_v30, %v20402_v47  ;;  %v6056_v36 = vpop.f32.mrb[43].mxu1  ;;  %v15936_v13 = vunpack.i.h.bf16 %v18420_v46 }
 0x46d   : > { %v19476_v58 = vadd.f32 %v11238_v59, %v11174_v4  ;;  %v11232_v8 = vmul.f32 %v6056_v36, %v20402_v47  ;;  %v8591_v45 = vpop.trf.xlu1  ;;  %10240 = vxpose.xlu0.b32.start [1/2] (short) (narrow) %v19275_v49, 64  ;;  %16156 = vrcp.f32 %v5448_v63 }
 0x46e   : > { %v5049_v32 = vsub.f32 %v19439_v39, %v4986_v3  ;;  %v5050_v21 = vsub.f32 %v19432_v22, %v4986_v3  ;;  %v19482_v7 = vadd.f32 %v11233_v42, %v11169_v55  ;;  %v8758_v20 = vpop.trf.xlu0  ;;  %14568 = vmatmul.mubr.msk.f32.gmra.mrb[104].mxu1 %vm5601_vm3, %v8591_v45  ;;  %v14339_v6 = vpop.f32.mrb[44].mxu1 }
 0x46f   : > { %v19485_v9 = vadd.f32 %v11232_v8, %v11168_v57  ;;  %14584 = vmatmul.mubr.msk.f32.gmra.mrb[176].mxu0 %vm5601_vm3, %v8758_v20  ;;  %v6360_v1 = vpop.f32.mrb[45].mxu1  ;;  %v10917_v56 = vmul.f32 %v14339_v6, %v20391_v25 }
 0x470   : > { %v5175_v61 = vmul.f32 1.442695, %v5049_v32  ;;  %v5177_v4 = vmul.f32 1.442695, %v5050_v21  ;;  %v10916_v37 = vmul.f32 %v6360_v1, %v20391_v25 }
 0x471   : > { %v8592_v29 = vpop.trf.xlu1  ;;  %10241 = vxpose.xlu0.b32.end [2/2] (short) (narrow) %v19278_v0, 64 }
 0x472   : > { %v14387_v49 = vpop.f32.mrb[124].mxu0  ;;  %16158 = vpow2.f32 %v5175_v61  ;;  %v8759_v39 = vpop.trf.xlu0  ;;  %14570 = vmatprep.mubr.msk.f32.mxu1 %vm5601_vm3, %v8592_v29  ;;  %v19519_v29 = vpack.c.bf16 %v15936_v13, %v15935_v27 }
 0x473   : > { %v6861_v22 = vpop.f32.mrb[125].mxu0  ;;  %16160 = vpow2.f32 %v5177_v4  ;;  %14586 = vmatprep.mubr.msk.f32.mxu0 %vm5601_vm3, %v8759_v39  ;;  %v14342_v35 = vpop.f32.mrb[46].mxu1  ;;  %v10923_v59 = vmul.f32 %v14387_v49, %v20391_v25 }
 0x474   : > { %v10981_v15 = vmul.f32 %v14342_v35, %v20394_v43  ;;  %v6370_v11 = vpop.f32.mrb[47].mxu1  ;;  %v10922_v36 = vmul.f32 %v6861_v22, %v20391_v25 }
 0x475   : > { %v10980_v26 = vmul.f32 %v6370_v11, %v20394_v43  ;;  %v8593_v52 = vpop.trf.xlu1 }
 0x476   : > { %v11045_v0 = vadd.f32 %v10981_v15, %v10917_v56  ;;  %v8760_v19 = vpop.trf.xlu0  ;;  %14571 = vmatmul.mubr.msk.f32.gmra.mrb[106].mxu1 %vm5601_vm3, %v8593_v52  ;;  %v14345_v40 = vpop.f32.mrb[48].mxu1 }
 0x477   : > { %v16157_v12 = vpop.eup %16156  ;;  %v11044_v14 = vadd.f32 %v10980_v26, %v10916_v37  ;;  %14587 = vmatmul.mubr.msk.f32.gmra.mrb[178].mxu0 %vm5601_vm3, %v8760_v19  ;;  %v11109_v10 = vmul.f32 %v14345_v40, %v20399_v38  ;;  %v6380_v55 = vpop.f32.mrb[49].mxu1 }
 0x478   : > { %v11108_v18 = vmul.f32 %v6380_v55, %v20399_v38  ;;  %v5557_v34 = vmul.f32 %v16157_v12, %v19429_v31  ;;  %v5558_v54 = vmul.f32 %v16157_v12, %v19434_v53  ;;  %v15941_v31 = vunpack.i.h.bf16 %v18444_v62 }
 0x479   : > { %v11173_v57 = vadd.f32 %v11109_v10, %v11045_v0  ;;  %v8920_v16 = vpop.trf.xlu1  ;;  %v15940_v53 = vunpack.i.l.bf16 %v18444_v62 }
 0x47a   : > { %v14390_v17 = vpop.f32.mrb[126].mxu0  ;;  %v11172_v30 = vadd.f32 %v11108_v18, %v11044_v14  ;;  %10407 = vxpose.xlu1.b32.start [1/2] (short) (narrow) %v5557_v34, 64  ;;  %v9087_v3 = vpop.trf.xlu0  ;;  %14593 = vmatprep.mubr.msk.f32.mxu1 %vm5601_vm3, %v8920_v16 }
 0x47b   : > { %v10987_v63 = vmul.f32 %v14390_v17, %v20394_v43  ;;  %v6871_v42 = vpop.f32.mrb[127].mxu0  ;;  %14609 = vmatprep.mubr.msk.f32.mxu0 %vm5601_vm3, %v9087_v3  ;;  %v14348_v46 = vpop.f32.mrb[50].mxu1  ;;  %v19526_v56 = vpack.c.bf16 %v15941_v31, %v15940_v53 }
 0x47c   : > { %v10986_v8 = vmul.f32 %v6871_v42, %v20394_v43  ;;  %v19511_v45 = vpop.eup %16158  ;;  %v11237_v21 = vmul.f32 %v14348_v46, %v20402_v47  ;;  %v6390_v20 = vpop.f32.mrb[51].mxu1 }
 0x47d   : > { %v11051_v32 = vadd.f32 %v10987_v63, %v10923_v59  ;;  %v19514_v6 = vpop.eup %16160  ;;  %v5458_v1 = vsel %vm4698_vm2, %v19511_v45, 0.0  ;;  %v11236_v62 = vmul.f32 %v6390_v20, %v20402_v47  ;;  %v8921_v4 = vpop.trf.xlu1 }
 0x47e   : > { %v11050_v61 = vadd.f32 %v10986_v8, %v10922_v36  ;;  %v5459_v49 = vsel %vm4698_vm2, %v19514_v6, 0.0  ;;  %v19523_v39 = vadd.f32 %v11237_v21, %v11173_v57  ;;  %10408 = vxpose.xlu1.b32.end [2/2] (short) (narrow) %v5558_v54, 64  ;;  %v9088_v22 = vpop.trf.xlu0  ;;  %14594 = vmatmul.mubr.msk.f32.vlgmr.msra.gmra.mrb[108].mxu1 %vm5601_vm3, %v8921_v4 }
 0x47f   : > { %v14371_v35 = vpop.f32.mrb[52].mxu1  ;;  %v5460_v15 = vadd.f32 %v5459_v49, %v5458_v1  ;;  %v19528_v11 = vadd.f32 %v11236_v62, %v11172_v30  ;;  %14610 = vmatmul.mubr.msk.f32.vlgmr.msra.gmra.mrb[180].mxu0 %vm5601_vm3, %v9088_v22  ;;  %15752 = vmatpush3.bf16.msra.mxu1 %v19441_v51 }
 0x480   : > { %v6694_v37 = vpop.f32.mrb[53].mxu1  ;;  %15756 = vmatpush3.bf16.msra.mxu0 %v19448_v2  ;;  %15758 = vmatprep.subr.bf16.mxu1 %v19519_v29  ;;  %v10921_v2 = vmul.f32 %v14371_v35, %v20391_v25 }
 0x481   : > { %v5461_v26 = vrot.slane %v5460_v15, 4  ;;  %15762 = vmatprep.subr.bf16.mxu0 %v19526_v56  ;;  %v8922_v52 = vpop.trf.xlu1  ;;  %v10920_v54 = vmul.f32 %v6694_v37, %v20391_v25 }
 0x482   : > { %v14393_v0 = vpop.f32.mrb[128].mxu0  ;;  %v9089_v40 = vpop.trf.xlu0  ;;  %14596 = vmatprep.mubr.msk.f32.mxu1 %vm5601_vm3, %v8922_v52 }
 0x483   : > { %v11115_v19 = vmul.f32 %v14393_v0, %v20399_v38  ;;  %v6881_v12 = vpop.f32.mrb[129].mxu0  ;;  %v5462_v14 = vadd.f32 %v5461_v26, %v5460_v15  ;;  %14612 = vmatprep.mubr.msk.f32.mxu0 %vm5601_vm3, %v9089_v40  ;;  %v14374_v51 = vpop.f32.mrb[54].mxu1 }
 0x484   : > { %v11114_v10 = vmul.f32 %v6881_v12, %v20399_v38  ;;  %v10985_v18 = vmul.f32 %v14374_v51, %v20394_v43  ;;  %v6704_v34 = vpop.f32.mrb[55].mxu1 }
 0x485   : > { %v11179_v55 = vadd.f32 %v11115_v19, %v11051_v32  ;;  %v10984_v57 = vmul.f32 %v6704_v34, %v20394_v43  ;;  %v8923_v16 = vpop.trf.xlu1  ;;  %v5463_v17 = vrot.slane %v5462_v14, 2 }
 0x486   : > { %v11178_v13 = vadd.f32 %v11114_v10, %v11050_v61  ;;  %v11049_v27 = vadd.f32 %v10985_v18, %v10921_v2  ;;  %v9090_v59 = vpop.trf.xlu0  ;;  %14597 = vmatmul.mubr.msk.f32.gmra.mrb[110].mxu1 %vm5601_vm3, %v8923_v16 }
 0x487   : > { %v14377_v30 = vpop.f32.mrb[56].mxu1  ;;  %v11048_v63 = vadd.f32 %v10984_v57, %v10920_v54  ;;  %14613 = vmatmul.mubr.msk.f32.gmra.mrb[182].mxu0 %vm5601_vm3, %v9090_v59  ;;  %v5464_v31 = vadd.f32 %v5463_v17, %v5462_v14 }
 0x488   : > { %v11113_v3 = vmul.f32 %v14377_v30, %v20399_v38  ;;  %v6714_v42 = vpop.f32.mrb[57].mxu1 }
 0x489   : > { %v11112_v53 = vmul.f32 %v6714_v42, %v20399_v38  ;;  %v8924_v8 = vpop.trf.xlu1  ;;  %v5465_v32 = vrot.slane %v5464_v31, 1 }
 0x48a   : > { %v11177_v36 = vadd.f32 %v11113_v3, %v11049_v27  ;;  %v14396_v46 = vpop.f32.mrb[130].mxu0  ;;  %v9091_v1 = vpop.trf.xlu0  ;;  %10574 = vxpose.xlu0.b32.start [1/2] (short) (narrow) %v19342_v23, 64  ;;  %14599 = vmatprep.mubr.msk.f32.mxu1 %vm5601_vm3, %v8924_v8  ;;  %v20462_v27 = vld [vmem:[#allocation4_spill] sm:$0xff] }
 0x48b   : > { %v11176_v21 = vadd.f32 %v11112_v53, %v11048_v63  ;;  %v11243_v20 = vmul.f32 %v14396_v46, %v20402_v47  ;;  %v6891_v61 = vpop.f32.mrb[131].mxu0  ;;  %14615 = vmatprep.mubr.msk.f32.mxu0 %vm5601_vm3, %v9091_v1  ;;  %v14380_v4 = vpop.f32.mrb[58].mxu1  ;;  %v5466_v49 = vadd.f32 %v5465_v32, %v5464_v31  ;;  %v15951_v59 = vunpack.i.h.bf16 %v20462_v27 }
 0x48c   : > { %v11242_v62 = vmul.f32 %v6891_v61, %v20402_v47  ;;  %v11241_v35 = vmul.f32 %v14380_v4, %v20402_v47  ;;  %v6724_v15 = vpop.f32.mrb[59].mxu1  ;;  %v15950_v30 = vunpack.i.l.bf16 %v20462_v27 }
 0x48d   : > { %v19552_v22 = vadd.f32 %v11243_v20, %v11179_v55  ;;  %v11240_v26 = vmul.f32 %v6724_v15, %v20402_v47  ;;  %v8925_v52 = vpop.trf.xlu1  ;;  %16162 = vrcp.f32 %v5466_v49 }
 0x48e   : > { %v19555_v37 = vadd.f32 %v11242_v62, %v11178_v13  ;;  %v19558_v23 = vadd.f32 %v11241_v35, %v11177_v36  ;;  %v9092_v0 = vpop.trf.xlu0  ;;  %14600 = vmatmul.mubr.msk.f32.gmra.mrb[112].mxu1 %vm5601_vm3, %v8925_v52  ;;  %10575 = vxpose.xlu0.b32.end [2/2] (short) (narrow) %v19345_v50, 64  ;;  %v20461_v13 = vld [vmem:[#allocation35_spill] sm:$0xff]  ;;  %v19585_v4 = vpack.c.bf16 %v15951_v59, %v15950_v30 }
 0x48f   : > { %v19562_v19 = vadd.f32 %v11240_v26, %v11176_v21  ;;  %14616 = vmatmul.mubr.msk.f32.gmra.mrb[184].mxu0 %vm5601_vm3, %v9092_v0  ;;  %v15946_v57 = vunpack.i.h.bf16 %v20461_v13 }
 0x491   : > { %v8926_v40 = vpop.trf.xlu1  ;;  %v14403_v51 = vpop.f32.mrb[60].mxu1 }
 0x492   : > { %v14419_v12 = vpop.f32.mrb[132].mxu0  ;;  %v9093_v14 = vpop.trf.xlu0  ;;  %14602 = vmatprep.mubr.msk.f32.mxu1 %vm5601_vm3, %v8926_v40  ;;  %v10925_v63 = vmul.f32 %v14403_v51, %v20391_v25 }
 0x493   : > { %v7195_v10 = vpop.f32.mrb[133].mxu0  ;;  %14618 = vmatprep.mubr.msk.f32.mxu0 %vm5601_vm3, %v9093_v14  ;;  %v7028_v2 = vpop.f32.mrb[61].mxu1 }
 0x494   : > { %v10926_v53 = vmul.f32 %v7195_v10, %v20391_v25  ;;  %v10924_v32 = vmul.f32 %v7028_v2, %v20391_v25 }
 0x495   : > { %v8927_v55 = vpop.trf.xlu1 }
 0x496   : > { %v9094_v18 = vpop.trf.xlu0  ;;  %14603 = vmatmul.mubr.msk.f32.gmra.mrb[114].mxu1 %vm5601_vm3, %v8927_v55 }
 0x497   : > { %v16163_v34 = vpop.eup %16162  ;;  %14619 = vmatmul.mubr.msk.f32.gmra.mrb[186].mxu0 %vm5601_vm3, %v9094_v18 }
 0x498   : > { %v5561_v50 = vmul.f32 %v16163_v34, %v19511_v45  ;;  %v5562_v54 = vmul.f32 %v16163_v34, %v19514_v6  ;;  %v15945_v45 = vunpack.i.l.bf16 %v20461_v13  ;;  %v10927_v6 = vmul.f32 %v14419_v12, %v20391_v25 }
 0x499   : > { %v9421_v16 = vpop.trf.xlu1  ;;  %v14406_v17 = vpop.f32.mrb[62].mxu1 }
 0x49a   : > { %10741 = vxpose.xlu1.b32.start [1/2] (short) (narrow) %v5561_v50, 64  ;;  %v10989_v3 = vmul.f32 %v14406_v17, %v20394_v43  ;;  %v14422_v42 = vpop.f32.mrb[134].mxu0  ;;  %v9254_v31 = vpop.trf.xlu0  ;;  %14641 = vmatprep.mubr.msk.f32.mxu0 %vm5601_vm3, %v9421_v16  ;;  %v19588_v26 = vpack.c.bf16 %v15946_v57, %v15945_v45 }
 0x49b   : > { %v10991_v36 = vmul.f32 %v14422_v42, %v20394_v43  ;;  %v7038_v8 = vpop.f32.mrb[63].mxu1  ;;  %v7205_v46 = vpop.f32.mrb[135].mxu0  ;;  %14625 = vmatprep.mubr.msk.f32.mxu1 %vm5601_vm3, %v9254_v31 }
 0x49c   : > { %v11053_v21 = vadd.f32 %v10989_v3, %v10925_v63  ;;  %v10988_v20 = vmul.f32 %v7038_v8, %v20394_v43  ;;  %v10990_v1 = vmul.f32 %v7205_v46, %v20394_v43 }
 0x49d   : > { %v11055_v61 = vadd.f32 %v10991_v36, %v10927_v6  ;;  %v9422_v62 = vpop.trf.xlu1 }
 0x49e   : > { %v11052_v49 = vadd.f32 %v10988_v20, %v10924_v32  ;;  %v11054_v35 = vadd.f32 %v10990_v1, %v10926_v53  ;;  %10742 = vxpose.xlu1.b32.end [2/2] (short) (narrow) %v5562_v54, 64  ;;  %v9255_v15 = vpop.trf.xlu0  ;;  %14642 = vmatmul.mubr.msk.f32.vlgmr.msra.gmra.mrb[188].mxu0 %vm5601_vm3, %v9422_v62 }
 0x49f   : > { %14626 = vmatmul.mubr.msk.f32.vlgmr.msra.gmra.mrb[116].mxu1 %vm5601_vm3, %v9255_v15  ;;  %15764 = vmatpush3.bf16.msra.mxu0 %v19526_v56  ;;  %v20463_v15 = vld [vmem:[#allocation37_spill] sm:$0xff] }
 0x4a0   : > { %15760 = vmatpush3.bf16.msra.mxu1 %v19519_v29  ;;  %15770 = vmatprep.subr.bf16.mxu0 %v19585_v4 }
 0x4a1   : > { %15766 = vmatprep.subr.bf16.mxu1 %v19588_v26  ;;  %v9423_v52 = vpop.trf.xlu1  ;;  %v14409_v0 = vpop.f32.mrb[64].mxu1 }
 0x4a2   : > { %v11117_v40 = vmul.f32 %v14409_v0, %v20399_v38  ;;  %v14425_v12 = vpop.f32.mrb[136].mxu0  ;;  %v9256_v14 = vpop.trf.xlu0  ;;  %14644 = vmatprep.mubr.msk.f32.mxu0 %vm5601_vm3, %v9423_v52  ;;  %v15956_v52 = vunpack.i.h.bf16 %v20463_v15 }
 0x4a3   : > { %v11119_v10 = vmul.f32 %v14425_v12, %v20399_v38  ;;  %v7048_v51 = vpop.f32.mrb[65].mxu1  ;;  %v7215_v2 = vpop.f32.mrb[137].mxu0  ;;  %14628 = vmatprep.mubr.msk.f32.mxu1 %vm5601_vm3, %v9256_v14  ;;  %v20464_v12 = vld [vmem:[#allocation13_spill] sm:$0xff] }
 0x4a4   : > { %v11181_v56 = vadd.f32 %v11117_v40, %v11053_v21  ;;  %v11116_v29 = vmul.f32 %v7048_v51, %v20399_v38  ;;  %v11118_v55 = vmul.f32 %v7215_v2, %v20399_v38  ;;  %v15961_v14 = vunpack.i.h.bf16 %v20464_v12 }
 0x4a5   : > { %v11183_v18 = vadd.f32 %v11119_v10, %v11055_v61  ;;  %v9424_v34 = vpop.trf.xlu1  ;;  %v15960_v10 = vunpack.i.l.bf16 %v20464_v12 }
 0x4a6   : > { %v11180_v50 = vadd.f32 %v11116_v29, %v11052_v49  ;;  %v11182_v54 = vadd.f32 %v11118_v55, %v11054_v35  ;;  %v9257_v13 = vpop.trf.xlu0  ;;  %14645 = vmatmul.mubr.msk.f32.gmra.mrb[190].mxu0 %vm5601_vm3, %v9424_v34  ;;  %v15955_v55 = vunpack.i.l.bf16 %v20463_v15 }
 0x4a7   : > { %14629 = vmatmul.mubr.msk.f32.gmra.mrb[118].mxu1 %vm5601_vm3, %v9257_v13 }
 0x4a9   : > { %v9425_v57 = vpop.trf.xlu1  ;;  %v14412_v16 = vpop.f32.mrb[66].mxu1 }
 0x4aa   : > { %v11245_v17 = vmul.f32 %v14412_v16, %v20402_v47  ;;  %v14428_v27 = vpop.f32.mrb[138].mxu0  ;;  %v9258_v59 = vpop.trf.xlu0  ;;  %14647 = vmatprep.mubr.msk.f32.mxu0 %vm5601_vm3, %v9425_v57 }
 0x4ab   : > { %v11247_v30 = vmul.f32 %v14428_v27, %v20402_v47  ;;  %v7058_v63 = vpop.f32.mrb[67].mxu1  ;;  %v7225_v3 = vpop.f32.mrb[139].mxu0  ;;  %14631 = vmatprep.mubr.msk.f32.mxu1 %vm5601_vm3, %v9258_v59 }
 0x4ac   : > { %v19607_v42 = vadd.f32 %v11245_v17, %v11181_v56  ;;  %v11244_v31 = vmul.f32 %v7058_v63, %v20402_v47  ;;  %v11246_v45 = vmul.f32 %v7225_v3, %v20402_v47 }
 0x4ad   : > { %v19611_v6 = vadd.f32 %v11247_v30, %v11183_v18  ;;  %v9426_v53 = vpop.trf.xlu1 }
 0x4ae   : > { %v19613_v36 = vadd.f32 %v11244_v31, %v11180_v50  ;;  %v19615_v8 = vadd.f32 %v11246_v45, %v11182_v54  ;;  %v9259_v46 = vpop.trf.xlu0  ;;  %14648 = vmatmul.mubr.msk.f32.gmra.mrb[192].mxu0 %vm5601_vm3, %v9426_v53  ;;  %v19638_v45 = vpack.c.bf16 %v15961_v14, %v15960_v10  ;;  %v19642_v53 = vpack.c.bf16 %v15956_v52, %v15955_v55 }
 0x4af   : > { %14632 = vmatmul.mubr.msk.f32.gmra.mrb[120].mxu1 %vm5601_vm3, %v9259_v46 }
 0x4b1   : > { %v9427_v32 = vpop.trf.xlu1  ;;  %v14435_v61 = vpop.f32.mrb[68].mxu1 }
 0x4b2   : > { %v14451_v21 = vpop.f32.mrb[140].mxu0  ;;  %v9260_v20 = vpop.trf.xlu0  ;;  %14650 = vmatprep.mubr.msk.f32.mxu0 %vm5601_vm3, %v9427_v32  ;;  %v10929_v51 = vmul.f32 %v14435_v61, %v20391_v25 }
 0x4b3   : > { %v7529_v1 = vpop.f32.mrb[141].mxu0  ;;  %14634 = vmatprep.mubr.msk.f32.mxu1 %vm5601_vm3, %v9260_v20  ;;  %v7362_v62 = vpop.f32.mrb[69].mxu1  ;;  %v10931_v18 = vmul.f32 %v14451_v21, %v20391_v25 }
 0x4b4   : > { %v10930_v34 = vmul.f32 %v7529_v1, %v20391_v25  ;;  %v10928_v57 = vmul.f32 %v7362_v62, %v20391_v25 }
 0x4b5   : > { %v9428_v49 = vpop.trf.xlu1 }
 0x4b6   : > { %v9261_v35 = vpop.trf.xlu0  ;;  %14651 = vmatmul.mubr.msk.f32.gmra.mrb[194].mxu0 %vm5601_vm3, %v9428_v49 }
 0x4b7   : > { %14635 = vmatmul.mubr.msk.f32.gmra.mrb[122].mxu1 %vm5601_vm3, %v9261_v35 }
 0x4b9   : > { %v9755_v0 = vpop.trf.xlu1  ;;  %v14438_v40 = vpop.f32.mrb[70].mxu1 }
 0x4ba   : > { %v10993_v2 = vmul.f32 %v14438_v40, %v20394_v43  ;;  %v14454_v56 = vpop.f32.mrb[142].mxu0  ;;  %v9588_v29 = vpop.trf.xlu0  ;;  %14673 = vmatprep.mubr.msk.f32.mxu0 %vm5601_vm3, %v9755_v0 }
 0x4bb   : > { %v10995_v50 = vmul.f32 %v14454_v56, %v20394_v43  ;;  %v7372_v54 = vpop.f32.mrb[71].mxu1  ;;  %v7539_v13 = vpop.f32.mrb[143].mxu0  ;;  %14657 = vmatprep.mubr.msk.f32.mxu1 %vm5601_vm3, %v9588_v29 }
 0x4bc   : > { %v11057_v16 = vadd.f32 %v10993_v2, %v10929_v51  ;;  %v10992_v17 = vmul.f32 %v7372_v54, %v20394_v43  ;;  %v10994_v27 = vmul.f32 %v7539_v13, %v20394_v43 }
 0x4bd   : > { %v11059_v59 = vadd.f32 %v10995_v50, %v10931_v18  ;;  %v9756_v30 = vpop.trf.xlu1 }
 0x4be   : > { %v11056_v63 = vadd.f32 %v10992_v17, %v10928_v57  ;;  %v11058_v3 = vadd.f32 %v10994_v27, %v10930_v34  ;;  %v9589_v31 = vpop.trf.xlu0  ;;  %14674 = vmatmul.mubr.msk.f32.vlgmr.msra.gmra.mrb[196].mxu0 %vm5601_vm3, %v9756_v30 }
 0x4bf   : > { %14658 = vmatmul.mubr.msk.f32.vlgmr.msra.gmra.mrb[124].mxu1 %vm5601_vm3, %v9589_v31  ;;  %15772 = vmatpush3.bf16.msra.mxu0 %v19585_v4 }
 0x4c0   : > { %15768 = vmatpush3.bf16.msra.mxu1 %v19588_v26  ;;  %15778 = vmatprep.subr.bf16.mxu0 %v19638_v45 }
 0x4c1   : > { %15774 = vmatprep.subr.bf16.mxu1 %v19642_v53  ;;  %v9757_v46 = vpop.trf.xlu1  ;;  %v14441_v32 = vpop.f32.mrb[72].mxu1 }
 0x4c2   : > { %v11121_v21 = vmul.f32 %v14441_v32, %v20399_v38  ;;  %v14457_v20 = vpop.f32.mrb[144].mxu0  ;;  %v9590_v1 = vpop.trf.xlu0  ;;  %14676 = vmatprep.mubr.msk.f32.mxu0 %vm5601_vm3, %v9757_v46 }
 0x4c3   : > { %v11123_v61 = vmul.f32 %v14457_v20, %v20399_v38  ;;  %v7382_v62 = vpop.f32.mrb[73].mxu1  ;;  %v7549_v4 = vpop.f32.mrb[145].mxu0  ;;  %14660 = vmatprep.mubr.msk.f32.mxu1 %vm5601_vm3, %v9590_v1  ;;  %v20465_v20 = vld [vmem:[#allocation12_spill] sm:$0xff] }
 0x4c4   : > { %v11185_v49 = vadd.f32 %v11121_v21, %v11057_v16  ;;  %v11120_v26 = vmul.f32 %v7382_v62, %v20399_v38  ;;  %v11122_v35 = vmul.f32 %v7549_v4, %v20399_v38  ;;  %v15966_v1 = vunpack.i.h.bf16 %v20465_v20 }
 0x4c5   : > { %v11187_v15 = vadd.f32 %v11123_v61, %v11059_v59  ;;  %v9758_v52 = vpop.trf.xlu1  ;;  %v15971_v4 = vunpack.i.h.bf16 %v18498_v33 }
 0x4c6   : > { %v11184_v0 = vadd.f32 %v11120_v26, %v11056_v63  ;;  %v11186_v40 = vadd.f32 %v11122_v35, %v11058_v3  ;;  %v9591_v12 = vpop.trf.xlu0  ;;  %14677 = vmatmul.mubr.msk.f32.gmra.mrb[198].mxu0 %vm5601_vm3, %v9758_v52 }
 0x4c7   : > { %14661 = vmatmul.mubr.msk.f32.gmra.mrb[126].mxu1 %vm5601_vm3, %v9591_v12 }
 0x4c9   : > { %v9759_v14 = vpop.trf.xlu1  ;;  %v14444_v10 = vpop.f32.mrb[74].mxu1 }
 0x4ca   : > { %v11249_v51 = vmul.f32 %v14444_v10, %v20402_v47  ;;  %v14460_v2 = vpop.f32.mrb[146].mxu0  ;;  %v9592_v56 = vpop.trf.xlu0  ;;  %14679 = vmatprep.mubr.msk.f32.mxu0 %vm5601_vm3, %v9759_v14 }
 0x4cb   : > { %v11251_v29 = vmul.f32 %v14460_v2, %v20402_v47  ;;  %v7392_v55 = vpop.f32.mrb[75].mxu1  ;;  %v7559_v18 = vpop.f32.mrb[147].mxu0  ;;  %14663 = vmatprep.mubr.msk.f32.mxu1 %vm5601_vm3, %v9592_v56 }
 0x4cc   : > { %v19659_v34 = vadd.f32 %v11249_v51, %v11185_v49  ;;  %v11248_v50 = vmul.f32 %v7392_v55, %v20402_v47  ;;  %v11250_v54 = vmul.f32 %v7559_v18, %v20402_v47  ;;  %v15970_v49 = vunpack.i.l.bf16 %v18498_v33 }
 0x4cd   : > { %v19663_v13 = vadd.f32 %v11251_v29, %v11187_v15  ;;  %v9760_v57 = vpop.trf.xlu1 }
 0x4ce   : > { %v19665_v16 = vadd.f32 %v11248_v50, %v11184_v0  ;;  %v19667_v17 = vadd.f32 %v11250_v54, %v11186_v40  ;;  %v9593_v27 = vpop.trf.xlu0  ;;  %14680 = vmatmul.mubr.msk.f32.gmra.mrb[200].mxu0 %vm5601_vm3, %v9760_v57  ;;  %v15965_v0 = vunpack.i.l.bf16 %v20465_v20  ;;  %v19689_v50 = vpack.c.bf16 %v15971_v4, %v15970_v49 }
 0x4cf   : > { %14664 = vmatmul.mubr.msk.f32.gmra.mrb[128].mxu1 %vm5601_vm3, %v9593_v27 }
 0x4d1   : > { %v9761_v59 = vpop.trf.xlu1  ;;  %v14467_v31 = vpop.f32.mrb[76].mxu1 }
 0x4d2   : > { %v14483_v30 = vpop.f32.mrb[148].mxu0  ;;  %v9594_v63 = vpop.trf.xlu0  ;;  %14682 = vmatprep.mubr.msk.f32.mxu0 %vm5601_vm3, %v9761_v59  ;;  %v10933_v26 = vmul.f32 %v14467_v31, %v20391_v25  ;;  %v19692_v59 = vpack.c.bf16 %v15966_v1, %v15965_v0 }
 0x4d3   : > { %v7863_v3 = vpop.f32.mrb[149].mxu0  ;;  %14666 = vmatprep.mubr.msk.f32.mxu1 %vm5601_vm3, %v9594_v63  ;;  %v7696_v46 = vpop.f32.mrb[77].mxu1  ;;  %v10935_v40 = vmul.f32 %v14483_v30, %v20391_v25 }
 0x4d4   : > { %v10934_v12 = vmul.f32 %v7863_v3, %v20391_v25  ;;  %v10932_v33 = vmul.f32 %v7696_v46, %v20391_v25 }
 0x4d5   : > { %v9762_v32 = vpop.trf.xlu1 }
 0x4d6   : > { %v9595_v21 = vpop.trf.xlu0  ;;  %14683 = vmatmul.mubr.msk.f32.gmra.mrb[202].mxu0 %vm5601_vm3, %v9762_v32 }
 0x4d7   : > { %14667 = vmatmul.mubr.msk.f32.gmra.mrb[130].mxu1 %vm5601_vm3, %v9595_v21 }
 0x4d9   : > { %v10089_v61 = vpop.trf.xlu1  ;;  %v14470_v62 = vpop.f32.mrb[78].mxu1 }
 0x4da   : > { %v10997_v35 = vmul.f32 %v14470_v62, %v20394_v43  ;;  %v14486_v15 = vpop.f32.mrb[150].mxu0  ;;  %v9922_v52 = vpop.trf.xlu0  ;;  %14705 = vmatprep.mubr.msk.f32.mxu0 %vm5601_vm3, %v10089_v61 }
 0x4db   : > { %v10999_v14 = vmul.f32 %v14486_v15, %v20394_v43  ;;  %v7706_v10 = vpop.f32.mrb[79].mxu1  ;;  %v7873_v51 = vpop.f32.mrb[151].mxu0  ;;  %14689 = vmatprep.mubr.msk.f32.mxu1 %vm5601_vm3, %v9922_v52 }
 0x4dc   : > { %v11061_v2 = vadd.f32 %v10997_v35, %v10933_v26  ;;  %v10996_v56 = vmul.f32 %v7706_v10, %v20394_v43  ;;  %v10998_v29 = vmul.f32 %v7873_v51, %v20394_v43 }
 0x4dd   : > { %v11063_v55 = vadd.f32 %v10999_v14, %v10935_v40  ;;  %v10090_v18 = vpop.trf.xlu1 }
 0x4de   : > { %v11060_v54 = vadd.f32 %v10996_v56, %v10932_v33  ;;  %v11062_v57 = vadd.f32 %v10998_v29, %v10934_v12  ;;  %v9923_v27 = vpop.trf.xlu0  ;;  %14706 = vmatmul.mubr.msk.f32.vlgmr.msra.gmra.mrb[204].mxu0 %vm5601_vm3, %v10090_v18 }
 0x4df   : > { %14690 = vmatmul.mubr.msk.f32.vlgmr.msra.gmra.mrb[132].mxu1 %vm5601_vm3, %v9923_v27  ;;  %15780 = vmatpush3.bf16.msra.mxu0 %v19638_v45 }
 0x4e0   : > { %15776 = vmatpush3.bf16.msra.mxu1 %v19642_v53  ;;  %15786 = vmatprep.subr.bf16.mxu0 %v19689_v50 }
 0x4e1   : > { %15782 = vmatprep.subr.bf16.mxu1 %v19692_v59  ;;  %v10091_v30 = vpop.trf.xlu1  ;;  %v14473_v63 = vpop.f32.mrb[80].mxu1 }
 0x4e2   : > { %v11125_v3 = vmul.f32 %v14473_v63, %v20399_v38  ;;  %v14489_v31 = vpop.f32.mrb[152].mxu0  ;;  %v9924_v46 = vpop.trf.xlu0  ;;  %14708 = vmatprep.mubr.msk.f32.mxu0 %vm5601_vm3, %v10091_v30 }
 0x4e3   : > { %v11127_v32 = vmul.f32 %v14489_v31, %v20399_v38  ;;  %v7716_v21 = vpop.f32.mrb[81].mxu1  ;;  %v7883_v20 = vpop.f32.mrb[153].mxu0  ;;  %14692 = vmatprep.mubr.msk.f32.mxu1 %vm5601_vm3, %v9924_v46 }
 0x4e4   : > { %v11189_v45 = vadd.f32 %v11125_v3, %v11061_v2  ;;  %v11124_v53 = vmul.f32 %v7716_v21, %v20399_v38  ;;  %v11126_v1 = vmul.f32 %v7883_v20, %v20399_v38 }
 0x4e5   : > { %v11191_v61 = vadd.f32 %v11127_v32, %v11063_v55  ;;  %v10092_v62 = vpop.trf.xlu1 }
 0x4e6   : > { %v11188_v4 = vadd.f32 %v11124_v53, %v11060_v54  ;;  %v11190_v49 = vadd.f32 %v11126_v1, %v11062_v57  ;;  %v9925_v26 = vpop.trf.xlu0  ;;  %14709 = vmatmul.mubr.msk.f32.gmra.mrb[206].mxu0 %vm5601_vm3, %v10092_v62 }
 0x4e7   : > { %14693 = vmatmul.mubr.msk.f32.gmra.mrb[134].mxu1 %vm5601_vm3, %v9925_v26  ;;  %v11357_v26 = vld [vmem:[%s20239_s5 + $0x8] sm:$0xff] }
 0x4e9   : > { %v10093_v35 = vpop.trf.xlu1  ;;  %v14476_v15 = vpop.f32.mrb[82].mxu1 }
 0x4ea   : > { %v11253_v52 = vmul.f32 %v14476_v15, %v20402_v47  ;;  %v14492_v0 = vpop.f32.mrb[154].mxu0  ;;  %v9926_v40 = vpop.trf.xlu0  ;;  %14711 = vmatprep.mubr.msk.f32.mxu0 %vm5601_vm3, %v10093_v35 }
 0x4eb   : > { %v11255_v12 = vmul.f32 %v14492_v0, %v20402_v47  ;;  %v7726_v14 = vpop.f32.mrb[83].mxu1  ;;  %v7893_v10 = vpop.f32.mrb[155].mxu0  ;;  %14695 = vmatprep.mubr.msk.f32.mxu1 %vm5601_vm3, %v9926_v40 }
 0x4ec   : > { %v19711_v51 = vadd.f32 %v11253_v52, %v11189_v45  ;;  %v11252_v33 = vmul.f32 %v7726_v14, %v20402_v47  ;;  %v11254_v2 = vmul.f32 %v7893_v10, %v20402_v47 }
 0x4ed   : > { %v19715_v56 = vadd.f32 %v11255_v12, %v11191_v61  ;;  %v10094_v29 = vpop.trf.xlu1 }
 0x4ee   : > { %v19717_v55 = vadd.f32 %v11252_v33, %v11188_v4  ;;  %v19719_v18 = vadd.f32 %v11254_v2, %v11190_v49  ;;  %v9927_v54 = vpop.trf.xlu0  ;;  %14712 = vmatmul.mubr.msk.f32.gmra.mrb[208].mxu0 %vm5601_vm3, %v10094_v29  ;;  %v11356_v49 = vld [vmem:[%s20239_s5] sm:$0xff] }
 0x4ef   : > { %14696 = vmatmul.mubr.msk.f32.gmra.mrb[136].mxu1 %vm5601_vm3, %v9927_v54  ;;  %v19743_v33 = vpack.c.bf16 %v11357_v26, %v11356_v49 }
 0x4f1   : > { %v10095_v57 = vpop.trf.xlu1  ;;  %v14499_v3 = vpop.f32.mrb[84].mxu1 }
 0x4f2   : > { %v14515_v27 = vpop.f32.mrb[156].mxu0  ;;  %v9928_v30 = vpop.trf.xlu0  ;;  %14714 = vmatprep.mubr.msk.f32.mxu0 %vm5601_vm3, %v10095_v57  ;;  %v10937_v53 = vmul.f32 %v14499_v3, %v20391_v25 }
 0x4f3   : > { %v8197_v63 = vpop.f32.mrb[157].mxu0  ;;  %14698 = vmatprep.mubr.msk.f32.mxu1 %vm5601_vm3, %v9928_v30  ;;  %v8030_v31 = vpop.f32.mrb[85].mxu1  ;;  %v10939_v45 = vmul.f32 %v14515_v27, %v20391_v25 }
 0x4f4   : > { %v10938_v35 = vmul.f32 %v8197_v63, %v20391_v25  ;;  %v10936_v15 = vmul.f32 %v8030_v31, %v20391_v25 }
 0x4f5   : > { %v10096_v46 = vpop.trf.xlu1 }
 0x4f6   : > { %v9929_v32 = vpop.trf.xlu0  ;;  %14715 = vmatmul.mubr.msk.f32.gmra.mrb[210].mxu0 %vm5601_vm3, %v10096_v46 }
 0x4f7   : > { %14699 = vmatmul.mubr.msk.f32.gmra.mrb[138].mxu1 %vm5601_vm3, %v9929_v32 }
 0x4f9   : > { %v14502_v21 = vpop.f32.mrb[86].mxu1 }
 0x4fa   : > { %v14518_v20 = vpop.f32.mrb[158].mxu0  ;;  %v10423_v1 = vpop.trf.xlu1  ;;  %v11001_v61 = vmul.f32 %v14502_v21, %v20394_v43 }
 0x4fb   : > { %v11003_v62 = vmul.f32 %v14518_v20, %v20394_v43  ;;  %v10256_v4 = vpop.trf.xlu0  ;;  %v8040_v52 = vpop.f32.mrb[87].mxu1  ;;  %14737 = vmatprep.mubr.msk.f32.mxu0 %vm5601_vm3, %v10423_v1 }
 0x4fc   : > { %v8207_v0 = vpop.f32.mrb[159].mxu0  ;;  %14721 = vmatprep.mubr.msk.f32.mxu1 %vm5601_vm3, %v10256_v4  ;;  %v11065_v40 = vadd.f32 %v11001_v61, %v10937_v53  ;;  %v11000_v14 = vmul.f32 %v8040_v52, %v20394_v43 }
 0x4fd   : > { %v11067_v12 = vadd.f32 %v11003_v62, %v10939_v45  ;;  %v11002_v10 = vmul.f32 %v8207_v0, %v20394_v43 }
 0x4fe   : > { %v11064_v2 = vadd.f32 %v11000_v14, %v10936_v15  ;;  %v10424_v54 = vpop.trf.xlu1 }
 0x4ff   : > { %v11066_v29 = vadd.f32 %v11002_v10, %v10938_v35  ;;  %v10257_v57 = vpop.trf.xlu0  ;;  %14738 = vmatmul.mubr.msk.f32.vlgmr.msra.gmra.mrb[212].mxu0 %vm5601_vm3, %v10424_v54 }
 0x500   : > { %14722 = vmatmul.mubr.msk.f32.vlgmr.msra.gmra.mrb[140].mxu1 %vm5601_vm3, %v10257_v57  ;;  %15788 = vmatpush3.bf16.msra.mxu0 %v19689_v50 }
 0x501   : > { %15784 = vmatpush3.bf16.msra.mxu1 %v19692_v59  ;;  %v14505_v27 = vpop.f32.mrb[88].mxu1  ;;  %15790 = vmatprep.subr.bf16.mxu0 %v19743_v33 }
 0x502   : > { %v14521_v30 = vpop.f32.mrb[160].mxu0  ;;  %15797 = vmatprep.subr.bf16.mxu1 %v19743_v33  ;;  %v10425_v63 = vpop.trf.xlu1  ;;  %v11129_v3 = vmul.f32 %v14505_v27, %v20399_v38 }
 0x503   : > { %v11131_v31 = vmul.f32 %v14521_v30, %v20399_v38  ;;  %v10258_v46 = vpop.trf.xlu0  ;;  %v8050_v32 = vpop.f32.mrb[89].mxu1  ;;  %14740 = vmatprep.mubr.msk.f32.mxu0 %vm5601_vm3, %v10425_v63 }
 0x504   : > { %v8217_v21 = vpop.f32.mrb[161].mxu0  ;;  %14724 = vmatprep.mubr.msk.f32.mxu1 %vm5601_vm3, %v10258_v46  ;;  %v11193_v59 = vadd.f32 %v11129_v3, %v11065_v40  ;;  %v11128_v20 = vmul.f32 %v8050_v32, %v20399_v38 }
 0x505   : > { %v11195_v50 = vadd.f32 %v11131_v31, %v11067_v12  ;;  %v11130_v45 = vmul.f32 %v8217_v21, %v20399_v38 }
 0x506   : > { %v11192_v53 = vadd.f32 %v11128_v20, %v11064_v2  ;;  %v10426_v61 = vpop.trf.xlu1 }
 0x507   : > { %v11194_v1 = vadd.f32 %v11130_v45, %v11066_v29  ;;  %v10259_v62 = vpop.trf.xlu0  ;;  %14741 = vmatmul.mubr.msk.f32.gmra.mrb[214].mxu0 %vm5601_vm3, %v10426_v61  ;;  %v11358_v61 = vld [vmem:[%s20239_s5 + $0x10] sm:$0xff] }
 0x508   : > { %14725 = vmatmul.mubr.msk.f32.gmra.mrb[142].mxu1 %vm5601_vm3, %v10259_v62  ;;  %v11359_v62 = vld [vmem:[%s20239_s5 + $0x18] sm:$0xff] }
 0x509   : > { %v14508_v4 = vpop.f32.mrb[90].mxu1 }
 0x50a   : > { %v10427_v49 = vpop.trf.xlu1  ;;  %v11257_v26 = vmul.f32 %v14508_v4, %v20402_v47  ;;  %v14524_v35 = vpop.f32.mrb[162].mxu0 }
 0x50b   : > { %v11259_v15 = vmul.f32 %v14524_v35, %v20402_v47  ;;  %v10260_v52 = vpop.trf.xlu0  ;;  %v8060_v0 = vpop.f32.mrb[91].mxu1  ;;  %14743 = vmatprep.mubr.msk.f32.mxu0 %vm5601_vm3, %v10427_v49 }
 0x50c   : > { %v19762_v40 = vadd.f32 %v11257_v26, %v11193_v59  ;;  %v11256_v12 = vmul.f32 %v8060_v0, %v20402_v47  ;;  %v8227_v14 = vpop.f32.mrb[163].mxu0  ;;  %14727 = vmatprep.mubr.msk.f32.mxu1 %vm5601_vm3, %v10260_v52 }
 0x50d   : > { %v19766_v10 = vadd.f32 %v11259_v15, %v11195_v50  ;;  %v11258_v2 = vmul.f32 %v8227_v14, %v20402_v47 }
 0x50e   : > { %v19769_v29 = vadd.f32 %v11256_v12, %v11192_v53  ;;  %v10428_v54 = vpop.trf.xlu1 }
 0x50f   : > { %v19771_v57 = vadd.f32 %v11258_v2, %v11194_v1  ;;  %v10261_v27 = vpop.trf.xlu0  ;;  %14744 = vmatmul.mubr.msk.f32.gmra.mrb[216].mxu0 %vm5601_vm3, %v10428_v54 }
 0x510   : > { %14728 = vmatmul.mubr.msk.f32.gmra.mrb[144].mxu1 %vm5601_vm3, %v10261_v27  ;;  %v15793_v27 = vpack.c.bf16 %v11359_v62, %v11358_v61 }
 0x511   : > { %v14531_v30 = vpop.f32.mrb[92].mxu1 }
 0x512   : > { %v10429_v63 = vpop.trf.xlu1  ;;  %v14547_v3 = vpop.f32.mrb[164].mxu0  ;;  %v10941_v20 = vmul.f32 %v14531_v30, %v20391_v25 }
 0x513   : > { %v10262_v31 = vpop.trf.xlu0  ;;  %v8531_v46 = vpop.f32.mrb[165].mxu0  ;;  %14746 = vmatprep.mubr.msk.f32.mxu0 %vm5601_vm3, %v10429_v63  ;;  %v10943_v4 = vmul.f32 %v14547_v3, %v20391_v25 }
 0x514   : > { %14730 = vmatprep.mubr.msk.f32.mxu1 %vm5601_vm3, %v10262_v31  ;;  %v8364_v32 = vpop.f32.mrb[93].mxu1  ;;  %v10942_v14 = vmul.f32 %v8531_v46, %v20391_v25 }
 0x515   : > { %v10940_v15 = vmul.f32 %v8364_v32, %v20391_v25 }
 0x516   : > { %v10430_v21 = vpop.trf.xlu1 }
 0x517   : > { %v10263_v59 = vpop.trf.xlu0  ;;  %14747 = vmatmul.mubr.msk.f32.gmra.mrb[218].mxu0 %vm5601_vm3, %v10430_v21 }
 0x518   : > { %14731 = vmatmul.mubr.msk.f32.gmra.mrb[146].mxu1 %vm5601_vm3, %v10263_v59 }
 0x519   : > { %v14534_v50 = vpop.f32.mrb[94].mxu1 }
 0x51a   : > { %v10757_v45 = vpop.trf.xlu1  ;;  %v11005_v53 = vmul.f32 %v14534_v50, %v20394_v43  ;;  %v14550_v1 = vpop.f32.mrb[166].mxu0 }
 0x51b   : > { %v11007_v49 = vmul.f32 %v14550_v1, %v20394_v43  ;;  %v10590_v26 = vpop.trf.xlu0  ;;  %v8374_v35 = vpop.f32.mrb[95].mxu1  ;;  %14769 = vmatprep.mubr.msk.f32.mxu0 %vm5601_vm3, %v10757_v45 }
 0x51c   : > { %v11069_v52 = vadd.f32 %v11005_v53, %v10941_v20  ;;  %v11004_v0 = vmul.f32 %v8374_v35, %v20394_v43  ;;  %v8541_v12 = vpop.f32.mrb[167].mxu0  ;;  %14753 = vmatprep.mubr.msk.f32.mxu1 %vm5601_vm3, %v10590_v26 }
 0x51d   : > { %v11071_v2 = vadd.f32 %v11007_v49, %v10943_v4  ;;  %v11006_v54 = vmul.f32 %v8541_v12, %v20394_v43 }
 0x51e   : > { %v11068_v30 = vadd.f32 %v11004_v0, %v10940_v15  ;;  %v10758_v63 = vpop.trf.xlu1 }
 0x51f   : > { %v11070_v3 = vadd.f32 %v11006_v54, %v10942_v14  ;;  %v10591_v31 = vpop.trf.xlu0  ;;  %14770 = vmatmul.mubr.msk.f32.vlgmr.msra.gmra.mrb[220].mxu0 %vm5601_vm3, %v10758_v63 }
 0x520   : > { %14754 = vmatmul.mubr.msk.f32.vlgmr.msra.gmra.mrb[148].mxu1 %vm5601_vm3, %v10591_v31  ;;  %15792 = vmatpush3.bf16.msra.mxu0 %v19743_v33 }
 0x521   : > { %v14537_v32 = vpop.f32.mrb[96].mxu1  ;;  %15799 = vmatpush3.bf16.msra.mxu1 %v19743_v33  ;;  %15794 = vmatprep.subr.bf16.mxu0 %v15793_v27 }
 0x522   : > { %v10759_v21 = vpop.trf.xlu1  ;;  %v11133_v46 = vmul.f32 %v14537_v32, %v20399_v38  ;;  %v14553_v59 = vpop.f32.mrb[168].mxu0  ;;  %15798 = vmatprep.subr.bf16.mxu1 %v15793_v27 }
 0x523   : > { %v11135_v50 = vmul.f32 %v14553_v59, %v20399_v38  ;;  %v10592_v20 = vpop.trf.xlu0  ;;  %v8384_v45 = vpop.f32.mrb[97].mxu1  ;;  %14772 = vmatprep.mubr.msk.f32.mxu0 %vm5601_vm3, %v10759_v21 }
 0x524   : > { %v11197_v53 = vadd.f32 %v11133_v46, %v11069_v52  ;;  %v11132_v1 = vmul.f32 %v8384_v45, %v20399_v38  ;;  %v8551_v61 = vpop.f32.mrb[169].mxu0  ;;  %14756 = vmatprep.mubr.msk.f32.mxu1 %vm5601_vm3, %v10592_v20  ;;  %15796 = vmatpush3.bf16.msra.mxu0 %v15793_v27 }
 0x525   : > { %v11199_v33 = vadd.f32 %v11135_v50, %v11071_v2  ;;  %v11134_v62 = vmul.f32 %v8551_v61, %v20399_v38  ;;  %15800 = vmatpush3.bf16.msra.mxu1 %v15793_v27 }
 0x526   : > { %v11196_v4 = vadd.f32 %v11132_v1, %v11068_v30  ;;  %v10760_v49 = vpop.trf.xlu1 }
 0x527   : > { %v11198_v26 = vadd.f32 %v11134_v62, %v11070_v3  ;;  %v10593_v35 = vpop.trf.xlu0  ;;  %14773 = vmatmul.mubr.msk.f32.gmra.mrb[222].mxu0 %vm5601_vm3, %v10760_v49 }
 0x528   : > { %14757 = vmatmul.mubr.msk.f32.gmra.mrb[150].mxu1 %vm5601_vm3, %v10593_v35 }
 0x529   : > { %v14540_v15 = vpop.f32.mrb[98].mxu1 }
 0x52a   : > { %v10761_v52 = vpop.trf.xlu1  ;;  %v11261_v0 = vmul.f32 %v14540_v15, %v20402_v47  ;;  %v14556_v12 = vpop.f32.mrb[170].mxu0 }
 0x52b   : > { %v11263_v14 = vmul.f32 %v14556_v12, %v20402_v47  ;;  %v10594_v54 = vpop.trf.xlu0  ;;  %v8394_v2 = vpop.f32.mrb[99].mxu1  ;;  %14775 = vmatprep.mubr.msk.f32.mxu0 %vm5601_vm3, %v10761_v52 }
 0x52c   : > { %v11325_v27 = vadd.f32 %v11261_v0, %v11197_v53  ;;  %v11260_v30 = vmul.f32 %v8394_v2, %v20402_v47  ;;  %v8561_v63 = vpop.f32.mrb[171].mxu0  ;;  %14759 = vmatprep.mubr.msk.f32.mxu1 %vm5601_vm3, %v10594_v54 }
 0x52d   : > { %v11327_v3 = vadd.f32 %v11263_v14, %v11199_v33  ;;  %v11262_v31 = vmul.f32 %v8561_v63, %v20402_v47 }
 0x52e   : > { %v11324_v32 = vadd.f32 %v11260_v30, %v11196_v4  ;;  %v10762_v21 = vpop.trf.xlu1 }
 0x52f   : > { %v11326_v46 = vadd.f32 %v11262_v31, %v11198_v26  ;;  %v10595_v59 = vpop.trf.xlu0  ;;  %14776 = vmatmul.mubr.msk.f32.gmra.mrb[224].mxu0 %vm5601_vm3, %v10762_v21 }
 0x530   : > { %14760 = vmatmul.mubr.msk.f32.gmra.mrb[152].mxu1 %vm5601_vm3, %v10595_v59 }
 0x531   : > { %v14563_v50 = vpop.f32.mrb[100].mxu1 }
 0x532   : > { %v10763_v20 = vpop.trf.xlu1  ;;  %v14579_v45 = vpop.f32.mrb[172].mxu0  ;;  %v10945_v49 = vmul.f32 %v14563_v50, %v20391_v25 }
 0x533   : > { %v10596_v53 = vpop.trf.xlu0  ;;  %v8865_v1 = vpop.f32.mrb[173].mxu0  ;;  %14778 = vmatprep.mubr.msk.f32.mxu0 %vm5601_vm3, %v10763_v20  ;;  %v10947_v52 = vmul.f32 %v14579_v45, %v20391_v25 }
 0x534   : > { %14762 = vmatprep.mubr.msk.f32.mxu1 %vm5601_vm3, %v10596_v53  ;;  %v8698_v61 = vpop.f32.mrb[101].mxu1 }
 0x535   : > { %v10944_v0 = vmul.f32 %v8698_v61, %v20391_v25 }
 0x536   : > { %v10764_v33 = vpop.trf.xlu1 }
 0x537   : > { %v10597_v62 = vpop.trf.xlu0  ;;  %14779 = vmatmul.mubr.msk.f32.gmra.mrb[226].mxu0 %vm5601_vm3, %v10764_v33 }
 0x538   : > { %14763 = vmatmul.mubr.msk.f32.gmra.mrb[154].mxu1 %vm5601_vm3, %v10597_v62  ;;  %14789 = vmatprep.mubr.msk.f32.mxu0 %vm357_vm0, %v19259_v5  ;;  %v10946_v5 = vmul.f32 %v8865_v1, %v20391_v25 }
 0x539   : > { %14834 = vmatprep.mubr.msk.f32.mxu1 %vm357_vm0, %v19771_v57  ;;  %v14566_v4 = vpop.f32.mrb[102].mxu1 }
 0x53a   : > { %v11009_v26 = vmul.f32 %v14566_v4, %v20394_v43  ;;  %v14582_v35 = vpop.f32.mrb[174].mxu0  ;;  %v8708_v15 = vpop.f32.mrb[103].mxu1 }
 0x53b   : > { %v11011_v12 = vmul.f32 %v14582_v35, %v20394_v43  ;;  %v11008_v14 = vmul.f32 %v8708_v15, %v20394_v43  ;;  %v8875_v54 = vpop.f32.mrb[175].mxu0  ;;  %14790 = vmatmul.mubr.msk.f32.vlgmr.msra.gmra.mrb[228].mxu0 %vm357_vm0, %v19257_v28 }
 0x53c   : > { %v11073_v57 = vadd.f32 %v11009_v26, %v10945_v49  ;;  %v11010_v2 = vmul.f32 %v8875_v54, %v20394_v43  ;;  %14835 = vmatmul.mubr.msk.f32.vlgmr.msra.gmra.mrb[156].mxu1 %vm357_vm0, %v19766_v10  ;;  %14792 = vmatprep.mubr.msk.f32.mxu0 %vm357_vm0, %v19299_v48 }
 0x53d   : > { %v11075_v30 = vadd.f32 %v11011_v12, %v10947_v52  ;;  %v11072_v63 = vadd.f32 %v11008_v14, %v10944_v0  ;;  %14837 = vmatprep.mubr.msk.f32.mxu1 %vm357_vm0, %v11324_v32 }
 0x53e   : > { %v11074_v31 = vadd.f32 %v11010_v2, %v10946_v5 }
 0x53f   : > { %14793 = vmatmul.mubr.msk.f32.gmra.mrb[230].mxu0 %vm357_vm0, %v19296_v60 }
 0x540   : > { %14838 = vmatmul.mubr.msk.f32.gmra.mrb[158].mxu1 %vm357_vm0, %v11325_v27  ;;  %14795 = vmatprep.mubr.msk.f32.mxu0 %vm357_vm0, %v19485_v9 }
 0x541   : > { %14840 = vmatprep.mubr.msk.f32.mxu1 %vm357_vm0, %v11326_v46  ;;  %v14569_v28 = vpop.f32.mrb[104].mxu1 }
 0x542   : > { %v11137_v10 = vmul.f32 %v14569_v28, %v20399_v38  ;;  %v14585_v21 = vpop.f32.mrb[176].mxu0  ;;  %v8718_v48 = vpop.f32.mrb[105].mxu1 }
 0x543   : > { %v11139_v59 = vmul.f32 %v14585_v21, %v20399_v38  ;;  %v11136_v32 = vmul.f32 %v8718_v48, %v20399_v38  ;;  %v8885_v50 = vpop.f32.mrb[177].mxu0  ;;  %14796 = vmatmul.mubr.msk.f32.gmra.mrb[232].mxu0 %vm357_vm0, %v19482_v7 }
 0x544   : > { %v11201_v60 = vadd.f32 %v11137_v10, %v11073_v57  ;;  %v11138_v27 = vmul.f32 %v8885_v50, %v20399_v38  ;;  %14841 = vmatmul.mubr.msk.f32.gmra.mrb[160].mxu1 %vm357_vm0, %v11327_v3  ;;  %14798 = vmatprep.mubr.msk.f32.mxu0 %vm357_vm0, %v19406_v24 }
 0x545   : > { %v11203_v9 = vadd.f32 %v11139_v59, %v11075_v30  ;;  %v11200_v46 = vadd.f32 %v11136_v32, %v11072_v63 }
 0x546   : > { %v11202_v20 = vadd.f32 %v11138_v27, %v11074_v31 }
 0x547   : > { %14799 = vmatmul.mubr.msk.f32.gmra.mrb[234].mxu0 %vm357_vm0, %v19404_v41 }
 0x548   : > { %14801 = vmatprep.mubr.msk.f32.mxu0 %vm357_vm0, %v19528_v11 }
 0x549   : > { %v14572_v45 = vpop.f32.mrb[106].mxu1 }
 0x54a   : > { %v11265_v7 = vmul.f32 %v14572_v45, %v20402_v47  ;;  %v14588_v53 = vpop.f32.mrb[178].mxu0  ;;  %v8728_v1 = vpop.f32.mrb[107].mxu1 }
 0x54b   : > { %v11267_v61 = vmul.f32 %v14588_v53, %v20402_v47  ;;  %v11264_v3 = vmul.f32 %v8728_v1, %v20402_v47  ;;  %v8895_v33 = vpop.f32.mrb[179].mxu0  ;;  %14802 = vmatmul.mubr.msk.f32.gmra.mrb[236].mxu0 %vm357_vm0, %v19523_v39 }
 0x54c   : > { %v11329_v24 = vadd.f32 %v11265_v7, %v11201_v60  ;;  %v11266_v62 = vmul.f32 %v8895_v33, %v20402_v47  ;;  %14804 = vmatprep.mubr.msk.f32.mxu0 %vm357_vm0, %v19476_v58 }
 0x54d   : > { %v11331_v41 = vadd.f32 %v11267_v61, %v11203_v9  ;;  %v11328_v11 = vadd.f32 %v11264_v3, %v11200_v46 }
 0x54e   : > { %v11330_v4 = vadd.f32 %v11266_v62, %v11202_v20 }
 0x54f   : > { %14805 = vmatmul.mubr.msk.f32.gmra.mrb[238].mxu0 %vm357_vm0, %v19473_v44  ;;  %14843 = vmatprep.mubr.msk.f32.mxu1 %vm357_vm0, %v11328_v11 }
 0x550   : > { %14807 = vmatprep.mubr.msk.f32.mxu0 %vm357_vm0, %v19562_v19  ;;  %14844 = vmatmul.mubr.msk.f32.gmra.mrb[162].mxu1 %vm357_vm0, %v11329_v24 }
 0x551   : > { %14846 = vmatprep.mubr.msk.f32.mxu1 %vm357_vm0, %v11330_v4  ;;  %v14595_v39 = vpop.f32.mrb[108].mxu1 }
 0x552   : > { %v14611_v49 = vpop.f32.mrb[180].mxu0  ;;  %v9032_v26 = vpop.f32.mrb[109].mxu1  ;;  %v10949_v58 = vmul.f32 %v14595_v39, %v20391_v25 }
 0x553   : > { %v9199_v35 = vpop.f32.mrb[181].mxu0  ;;  %14808 = vmatmul.mubr.msk.f32.gmra.mrb[240].mxu0 %vm357_vm0, %v19558_v23  ;;  %v10951_v23 = vmul.f32 %v14611_v49, %v20391_v25  ;;  %v10948_v0 = vmul.f32 %v9032_v26, %v20391_v25 }
 0x554   : > { %14810 = vmatprep.mubr.msk.f32.mxu0 %vm357_vm0, %v19555_v37  ;;  %14847 = vmatmul.mubr.msk.f32.gmra.mrb[164].mxu1 %vm357_vm0, %v11331_v41 }
 0x557   : > { %14811 = vmatmul.mubr.msk.f32.gmra.mrb[242].mxu0 %vm357_vm0, %v19552_v22  ;;  %v10950_v22 = vmul.f32 %v9199_v35, %v20391_v25 }
 0x558   : > { %14813 = vmatprep.mubr.msk.f32.mxu0 %vm357_vm0, %v19613_v36 }
 0x559   : > { %v14598_v44 = vpop.f32.mrb[110].mxu1 }
 0x55a   : > { %v11013_v19 = vmul.f32 %v14598_v44, %v20394_v43  ;;  %v14614_v15 = vpop.f32.mrb[182].mxu0  ;;  %v9042_v52 = vpop.f32.mrb[111].mxu1 }
 0x55b   : > { %v11015_v37 = vmul.f32 %v14614_v15, %v20394_v43  ;;  %v11012_v12 = vmul.f32 %v9042_v52, %v20394_v43  ;;  %v9209_v14 = vpop.f32.mrb[183].mxu0  ;;  %14814 = vmatmul.mubr.msk.f32.gmra.mrb[244].mxu0 %vm357_vm0, %v19607_v42 }
 0x55c   : > { %v11077_v36 = vadd.f32 %v11013_v19, %v10949_v58  ;;  %v11014_v54 = vmul.f32 %v9209_v14, %v20394_v43  ;;  %14816 = vmatprep.mubr.msk.f32.mxu0 %vm357_vm0, %v19615_v8 }
 0x55d   : > { %v11079_v5 = vadd.f32 %v11015_v37, %v10951_v23  ;;  %v11076_v57 = vadd.f32 %v11012_v12, %v10948_v0 }
 0x55e   : > { %v11078_v2 = vadd.f32 %v11014_v54, %v10950_v22 }
 0x55f   : > { %14817 = vmatmul.mubr.msk.f32.gmra.mrb[246].mxu0 %vm357_vm0, %v19611_v6 }
 0x560   : > { %14819 = vmatprep.mubr.msk.f32.mxu0 %vm357_vm0, %v19665_v16 }
 0x561   : > { %v14601_v30 = vpop.f32.mrb[112].mxu1 }
 0x562   : > { %v11141_v42 = vmul.f32 %v14601_v30, %v20399_v38  ;;  %v14617_v63 = vpop.f32.mrb[184].mxu0  ;;  %v9052_v31 = vpop.f32.mrb[113].mxu1 }
 0x563   : > { %v11143_v28 = vmul.f32 %v14617_v63, %v20399_v38  ;;  %v11140_v10 = vmul.f32 %v9052_v31, %v20399_v38  ;;  %v9219_v21 = vpop.f32.mrb[185].mxu0  ;;  %14820 = vmatmul.mubr.msk.f32.gmra.mrb[248].mxu0 %vm357_vm0, %v19659_v34 }
 0x564   : > { %v11205_v8 = vadd.f32 %v11141_v42, %v11077_v36  ;;  %v11142_v48 = vmul.f32 %v9219_v21, %v20399_v38  ;;  %14822 = vmatprep.mubr.msk.f32.mxu0 %vm357_vm0, %v19667_v17 }
 0x565   : > { %v11207_v6 = vadd.f32 %v11143_v28, %v11079_v5  ;;  %v11204_v16 = vadd.f32 %v11140_v10, %v11076_v57 }
 0x566   : > { %v11206_v59 = vadd.f32 %v11142_v48, %v11078_v2 }
 0x567   : > { %14823 = vmatmul.mubr.msk.f32.gmra.mrb[250].mxu0 %vm357_vm0, %v19663_v13 }
 0x568   : > { %14825 = vmatprep.mubr.msk.f32.mxu0 %vm357_vm0, %v19717_v55 }
 0x569   : > { %v14604_v32 = vpop.f32.mrb[114].mxu1 }
 0x56a   : > { %v11269_v50 = vmul.f32 %v14604_v32, %v20402_v47  ;;  %v14620_v60 = vpop.f32.mrb[186].mxu0  ;;  %v9062_v34 = vpop.f32.mrb[115].mxu1 }
 0x56b   : > { %v11271_v27 = vmul.f32 %v14620_v60, %v20402_v47  ;;  %v11268_v9 = vmul.f32 %v9062_v34, %v20402_v47  ;;  %v9229_v46 = vpop.f32.mrb[187].mxu0  ;;  %14826 = vmatmul.mubr.msk.f32.gmra.mrb[252].mxu0 %vm357_vm0, %v19711_v51 }
 0x56c   : > { %v11333_v17 = vadd.f32 %v11269_v50, %v11205_v8  ;;  %v11270_v20 = vmul.f32 %v9229_v46, %v20402_v47  ;;  %14828 = vmatprep.mubr.msk.f32.mxu0 %vm357_vm0, %v19719_v18 }
 0x56d   : > { %v11335_v13 = vadd.f32 %v11271_v27, %v11207_v6  ;;  %v11332_v55 = vadd.f32 %v11268_v9, %v11204_v16 }
 0x56e   : > { %v11334_v45 = vadd.f32 %v11270_v20, %v11206_v59 }
 0x56f   : > { %14829 = vmatmul.mubr.msk.f32.gmra.mrb[254].mxu0 %vm357_vm0, %v19715_v56  ;;  %14849 = vmatprep.mubr.msk.f32.mxu1 %vm357_vm0, %v11332_v55 }
 0x570   : > { %14831 = vmatprep.mubr.msk.f32.mxu0 %vm357_vm0, %v19769_v29  ;;  %14850 = vmatmul.mubr.msk.f32.gmra.mrb[166].mxu1 %vm357_vm0, %v11333_v17 }
 0x571   : > { %14852 = vmatprep.mubr.msk.f32.mxu1 %vm357_vm0, %v11334_v45  ;;  %v14643_v51 = vpop.f32.mrb[188].mxu0 }
 0x572   : > { %v14627_v7 = vpop.f32.mrb[116].mxu1  ;;  %v9533_v53 = vpop.f32.mrb[189].mxu0  ;;  %v10955_v56 = vmul.f32 %v14643_v51, %v20391_v25 }
 0x573   : > { %v9366_v1 = vpop.f32.mrb[117].mxu1  ;;  %14832 = vmatmul.mubr.msk.f32.gmra.mrb[0].mxu0 %vm357_vm0, %v19762_v40  ;;  %v10953_v33 = vmul.f32 %v14627_v7, %v20391_v25  ;;  %v10954_v24 = vmul.f32 %v9533_v53, %v20391_v25 }
 0x574   : > { %14853 = vmatmul.mubr.msk.f32.gmra.mrb[168].mxu1 %vm357_vm0, %v11335_v13  ;;  %v10952_v40 = vmul.f32 %v9366_v1, %v20391_v25 }
 0x579   : > { %v14646_v18 = vpop.f32.mrb[190].mxu0 }
 0x57a   : > { %v14630_v61 = vpop.f32.mrb[118].mxu1  ;;  %v11019_v3 = vmul.f32 %v14646_v18, %v20394_v43  ;;  %v9543_v29 = vpop.f32.mrb[191].mxu0 }
 0x57b   : > { %v11017_v62 = vmul.f32 %v14630_v61, %v20394_v43  ;;  %v9376_v41 = vpop.f32.mrb[119].mxu1  ;;  %v11018_v11 = vmul.f32 %v9543_v29, %v20394_v43 }
 0x57c   : > { %v11083_v4 = vadd.f32 %v11019_v3, %v10955_v56  ;;  %v11016_v39 = vmul.f32 %v9376_v41, %v20394_v43 }
 0x57d   : > { %v11081_v49 = vadd.f32 %v11017_v62, %v10953_v33  ;;  %v11082_v26 = vadd.f32 %v11018_v11, %v10954_v24 }
 0x57e   : > { %v11080_v35 = vadd.f32 %v11016_v39, %v10952_v40 }
 0x581   : > { %v14649_v44 = vpop.f32.mrb[192].mxu0 }
 0x582   : > { %v14633_v58 = vpop.f32.mrb[120].mxu1  ;;  %v11147_v19 = vmul.f32 %v14649_v44, %v20399_v38  ;;  %v9553_v15 = vpop.f32.mrb[193].mxu0 }
 0x583   : > { %v11145_v52 = vmul.f32 %v14633_v58, %v20399_v38  ;;  %v9386_v23 = vpop.f32.mrb[121].mxu1  ;;  %v11146_v0 = vmul.f32 %v9553_v15, %v20399_v38 }
 0x584   : > { %v11211_v37 = vadd.f32 %v11147_v19, %v11083_v4  ;;  %v11144_v12 = vmul.f32 %v9386_v23, %v20399_v38 }
 0x585   : > { %v11209_v14 = vadd.f32 %v11145_v52, %v11081_v49  ;;  %v11210_v22 = vadd.f32 %v11146_v0, %v11082_v26 }
 0x586   : > { %v11208_v36 = vadd.f32 %v11144_v12, %v11080_v35 }
 0x589   : > { %v14652_v54 = vpop.f32.mrb[194].mxu0 }
 0x58a   : > { %v14636_v5 = vpop.f32.mrb[122].mxu1  ;;  %v11275_v57 = vmul.f32 %v14652_v54, %v20402_v47  ;;  %v9563_v2 = vpop.f32.mrb[195].mxu0 }
 0x58b   : > { %v11273_v30 = vmul.f32 %v14636_v5, %v20402_v47  ;;  %v9396_v42 = vpop.f32.mrb[123].mxu1  ;;  %v11274_v63 = vmul.f32 %v9563_v2, %v20402_v47 }
 0x58c   : > { %v11339_v31 = vadd.f32 %v11275_v57, %v11211_v37  ;;  %v11272_v28 = vmul.f32 %v9396_v42, %v20402_v47 }
 0x58d   : > { %v11337_v10 = vadd.f32 %v11273_v30, %v11209_v14  ;;  %v11338_v21 = vadd.f32 %v11274_v63, %v11210_v22 }
 0x58e   : > { %v11336_v8 = vadd.f32 %v11272_v28, %v11208_v36 }
 0x590   : > { %14855 = vmatprep.mubr.msk.f32.mxu1 %vm357_vm0, %v11336_v8 }
 0x591   : > { %14856 = vmatmul.mubr.msk.f32.gmra.mrb[170].mxu1 %vm357_vm0, %v11337_v10  ;;  %v14675_v48 = vpop.f32.mrb[196].mxu0 }
 0x592   : > { %v14659_v6 = vpop.f32.mrb[124].mxu1  ;;  %14858 = vmatprep.mubr.msk.f32.mxu1 %vm357_vm0, %v11338_v21  ;;  %v9867_v16 = vpop.f32.mrb[197].mxu0  ;;  %v10959_v50 = vmul.f32 %v14675_v48, %v20391_v25 }
 0x593   : > { %v9700_v59 = vpop.f32.mrb[125].mxu1  ;;  %v10957_v9 = vmul.f32 %v14659_v6, %v20391_v25  ;;  %v10958_v46 = vmul.f32 %v9867_v16, %v20391_v25 }
 0x594   : > { %v10956_v55 = vmul.f32 %v9700_v59, %v20391_v25 }
 0x595   : > { %14859 = vmatmul.mubr.msk.f32.gmra.mrb[172].mxu1 %vm357_vm0, %v11339_v31 }
 0x599   : > { %v14678_v32 = vpop.f32.mrb[198].mxu0 }
 0x59a   : > { %v14662_v60 = vpop.f32.mrb[126].mxu1  ;;  %v11023_v34 = vmul.f32 %v14678_v32, %v20394_v43  ;;  %v9877_v27 = vpop.f32.mrb[199].mxu0 }
 0x59b   : > { %v11021_v17 = vmul.f32 %v14662_v60, %v20394_v43  ;;  %v9710_v20 = vpop.f32.mrb[127].mxu1  ;;  %v11022_v13 = vmul.f32 %v9877_v27, %v20394_v43 }
 0x59c   : > { %v11087_v45 = vadd.f32 %v11023_v34, %v10959_v50  ;;  %v11020_v51 = vmul.f32 %v9710_v20, %v20394_v43 }
 0x59d   : > { %v11085_v7 = vadd.f32 %v11021_v17, %v10957_v9  ;;  %v11086_v53 = vadd.f32 %v11022_v13, %v10958_v46 }
 0x59e   : > { %v11084_v1 = vadd.f32 %v11020_v51, %v10956_v55 }
 0x5a1   : > { %v14681_v18 = vpop.f32.mrb[200].mxu0 }
 0x5a2   : > { %v14665_v56 = vpop.f32.mrb[128].mxu1  ;;  %v11151_v61 = vmul.f32 %v14681_v18, %v20399_v38  ;;  %v9887_v3 = vpop.f32.mrb[201].mxu0 }
 0x5a3   : > { %v11149_v29 = vmul.f32 %v14665_v56, %v20399_v38  ;;  %v9720_v33 = vpop.f32.mrb[129].mxu1  ;;  %v11150_v24 = vmul.f32 %v9887_v3, %v20399_v38 }
 0x5a4   : > { %v11215_v62 = vadd.f32 %v11151_v61, %v11087_v45  ;;  %v11148_v41 = vmul.f32 %v9720_v33, %v20399_v38 }
 0x5a5   : > { %v11213_v11 = vadd.f32 %v11149_v29, %v11085_v7  ;;  %v11214_v40 = vadd.f32 %v11150_v24, %v11086_v53 }
 0x5a6   : > { %v11212_v4 = vadd.f32 %v11148_v41, %v11084_v1 }
 0x5a9   : > { %v14684_v39 = vpop.f32.mrb[202].mxu0 }
 0x5aa   : > { %v14668_v49 = vpop.f32.mrb[130].mxu1  ;;  %v11279_v26 = vmul.f32 %v14684_v39, %v20402_v47  ;;  %v9897_v35 = vpop.f32.mrb[203].mxu0 }
 0x5ab   : > { %v11277_v44 = vmul.f32 %v14668_v49, %v20402_v47  ;;  %v9730_v58 = vpop.f32.mrb[131].mxu1  ;;  %v11278_v19 = vmul.f32 %v9897_v35, %v20402_v47 }
 0x5ac   : > { %v11343_v15 = vadd.f32 %v11279_v26, %v11215_v62  ;;  %v11276_v52 = vmul.f32 %v9730_v58, %v20402_v47 }
 0x5ad   : > { %v11341_v23 = vadd.f32 %v11277_v44, %v11213_v11  ;;  %v11342_v0 = vadd.f32 %v11278_v19, %v11214_v40 }
 0x5ae   : > { %v11340_v37 = vadd.f32 %v11276_v52, %v11212_v4 }
 0x5b0   : > { %14861 = vmatprep.mubr.msk.f32.mxu1 %vm357_vm0, %v11340_v37 }
 0x5b1   : > { %14862 = vmatmul.mubr.msk.f32.gmra.mrb[174].mxu1 %vm357_vm0, %v11341_v23  ;;  %v14707_v12 = vpop.f32.mrb[204].mxu0 }
 0x5b2   : > { %v14691_v14 = vpop.f32.mrb[132].mxu1  ;;  %14864 = vmatprep.mubr.msk.f32.mxu1 %vm357_vm0, %v11342_v0  ;;  %v10201_v22 = vpop.f32.mrb[205].mxu0  ;;  %v10963_v5 = vmul.f32 %v14707_v12, %v20391_v25 }
 0x5b3   : > { %v10034_v36 = vpop.f32.mrb[133].mxu1  ;;  %v10961_v42 = vmul.f32 %v14691_v14, %v20391_v25  ;;  %v10962_v63 = vmul.f32 %v10201_v22, %v20391_v25 }
 0x5b4   : > { %v10960_v21 = vmul.f32 %v10034_v36, %v20391_v25 }
 0x5b5   : > { %14865 = vmatmul.mubr.msk.f32.gmra.mrb[176].mxu1 %vm357_vm0, %v11343_v15 }
 0x5b9   : > { %v14710_v54 = vpop.f32.mrb[206].mxu0 }
 0x5ba   : > { %v14694_v57 = vpop.f32.mrb[134].mxu1  ;;  %v11027_v2 = vmul.f32 %v14710_v54, %v20394_v43  ;;  %v10211_v30 = vpop.f32.mrb[207].mxu0 }
 0x5bb   : > { %v11025_v31 = vmul.f32 %v14694_v57, %v20394_v43  ;;  %v10044_v28 = vpop.f32.mrb[135].mxu1  ;;  %v11026_v10 = vmul.f32 %v10211_v30, %v20394_v43 }
 0x5bc   : > { %v11091_v8 = vadd.f32 %v11027_v2, %v10963_v5  ;;  %v11024_v48 = vmul.f32 %v10044_v28, %v20394_v43 }
 0x5bd   : > { %v11089_v6 = vadd.f32 %v11025_v31, %v10961_v42  ;;  %v11090_v16 = vadd.f32 %v11026_v10, %v10962_v63 }
 0x5be   : > { %v11088_v59 = vadd.f32 %v11024_v48, %v10960_v21 }
 0x5c1   : > { %v14713_v32 = vpop.f32.mrb[208].mxu0 }
 0x5c2   : > { %v14697_v50 = vpop.f32.mrb[136].mxu1  ;;  %v11155_v60 = vmul.f32 %v14713_v32, %v20399_v38  ;;  %v10221_v34 = vpop.f32.mrb[209].mxu0 }
 0x5c3   : > { %v11153_v27 = vmul.f32 %v14697_v50, %v20399_v38  ;;  %v10054_v9 = vpop.f32.mrb[137].mxu1  ;;  %v11154_v46 = vmul.f32 %v10221_v34, %v20399_v38 }
 0x5c4   : > { %v11219_v17 = vadd.f32 %v11155_v60, %v11091_v8  ;;  %v11152_v20 = vmul.f32 %v10054_v9, %v20399_v38 }
 0x5c5   : > { %v11217_v13 = vadd.f32 %v11153_v27, %v11089_v6  ;;  %v11218_v55 = vadd.f32 %v11154_v46, %v11090_v16 }
 0x5c6   : > { %v11216_v45 = vadd.f32 %v11152_v20, %v11088_v59 }
 0x5c9   : > { %v14716_v51 = vpop.f32.mrb[210].mxu0 }
 0x5ca   : > { %v14700_v7 = vpop.f32.mrb[138].mxu1  ;;  %v11283_v53 = vmul.f32 %v14716_v51, %v20402_v47  ;;  %v10231_v1 = vpop.f32.mrb[211].mxu0 }
 0x5cb   : > { %v11281_v18 = vmul.f32 %v14700_v7, %v20402_v47  ;;  %v10064_v56 = vpop.f32.mrb[139].mxu1  ;;  %v11282_v61 = vmul.f32 %v10231_v1, %v20402_v47 }
 0x5cc   : > { %v11347_v3 = vadd.f32 %v11283_v53, %v11219_v17  ;;  %v11280_v29 = vmul.f32 %v10064_v56, %v20402_v47 }
 0x5cd   : > { %v11345_v33 = vadd.f32 %v11281_v18, %v11217_v13  ;;  %v11346_v24 = vadd.f32 %v11282_v61, %v11218_v55 }
 0x5ce   : > { %v11344_v62 = vadd.f32 %v11280_v29, %v11216_v45 }
 0x5d0   : > { %14867 = vmatprep.mubr.msk.f32.mxu1 %vm357_vm0, %v11344_v62 }
 0x5d1   : > { %14868 = vmatmul.mubr.msk.f32.gmra.mrb[178].mxu1 %vm357_vm0, %v11345_v33 }
 0x5d2   : > { %14870 = vmatprep.mubr.msk.f32.mxu1 %vm357_vm0, %v11346_v24  ;;  %v14739_v11 = vpop.f32.mrb[212].mxu0 }
 0x5d3   : > { %v14723_v41 = vpop.f32.mrb[140].mxu1  ;;  %v10535_v4 = vpop.f32.mrb[213].mxu0  ;;  %v10967_v35 = vmul.f32 %v14739_v11, %v20391_v25 }
 0x5d4   : > { %v10368_v40 = vpop.f32.mrb[141].mxu1  ;;  %v10965_v26 = vmul.f32 %v14723_v41, %v20391_v25  ;;  %v10966_v23 = vmul.f32 %v10535_v4, %v20391_v25 }
 0x5d5   : > { %14871 = vmatmul.mubr.msk.f32.gmra.mrb[180].mxu1 %vm357_vm0, %v11347_v3  ;;  %v10964_v52 = vmul.f32 %v10368_v40, %v20391_v25 }
 0x5da   : > { %v14742_v49 = vpop.f32.mrb[214].mxu0 }
 0x5db   : > { %v14726_v39 = vpop.f32.mrb[142].mxu1  ;;  %v11031_v58 = vmul.f32 %v14742_v49, %v20394_v43  ;;  %v10545_v15 = vpop.f32.mrb[215].mxu0 }
 0x5dc   : > { %v11029_v44 = vmul.f32 %v14726_v39, %v20394_v43  ;;  %v10378_v19 = vpop.f32.mrb[143].mxu1  ;;  %v11030_v37 = vmul.f32 %v10545_v15, %v20394_v43 }
 0x5dd   : > { %v11028_v0 = vmul.f32 %v10378_v19, %v20394_v43  ;;  %v11095_v14 = vadd.f32 %v11031_v58, %v10967_v35 }
 0x5de   : > { %v11093_v12 = vadd.f32 %v11029_v44, %v10965_v26  ;;  %v11094_v36 = vadd.f32 %v11030_v37, %v10966_v23 }
 0x5df   : > { %v11092_v22 = vadd.f32 %v11028_v0, %v10964_v52 }
 0x5e2   : > { %v14745_v54 = vpop.f32.mrb[216].mxu0 }
 0x5e3   : > { %v14729_v5 = vpop.f32.mrb[144].mxu1  ;;  %v11159_v57 = vmul.f32 %v14745_v54, %v20399_v38  ;;  %v10555_v2 = vpop.f32.mrb[217].mxu0 }
 0x5e4   : > { %v11157_v30 = vmul.f32 %v14729_v5, %v20399_v38  ;;  %v10388_v42 = vpop.f32.mrb[145].mxu1  ;;  %v11158_v63 = vmul.f32 %v10555_v2, %v20399_v38  ;;  %v20025_v5 = vld [vmem:[%s20240_s6] ss:$0 sm:$0xff] }
 0x5e5   : > { %v11223_v31 = vadd.f32 %v11159_v57, %v11095_v14  ;;  %v11156_v28 = vmul.f32 %v10388_v42, %v20399_v38 }
 0x5e6   : > { %v11221_v10 = vadd.f32 %v11157_v30, %v11093_v12  ;;  %v11222_v21 = vadd.f32 %v11158_v63, %v11094_v36 }
 0x5e7   : > { %v11220_v8 = vadd.f32 %v11156_v28, %v11092_v22 }
 0x5ea   : > { %v14748_v48 = vpop.f32.mrb[218].mxu0 }
 0x5eb   : > { %v14732_v6 = vpop.f32.mrb[146].mxu1  ;;  %v11287_v16 = vmul.f32 %v14748_v48, %v20402_v47  ;;  %v10565_v59 = vpop.f32.mrb[219].mxu0 }
 0x5ec   : > { %v11285_v32 = vmul.f32 %v14732_v6, %v20402_v47  ;;  %v10398_v50 = vpop.f32.mrb[147].mxu1  ;;  %v11286_v60 = vmul.f32 %v10565_v59, %v20402_v47 }
 0x5ed   : > { %v11351_v34 = vadd.f32 %v11287_v16, %v11223_v31  ;;  %v11284_v27 = vmul.f32 %v10398_v50, %v20402_v47 }
 0x5ee   : > { %v11349_v9 = vadd.f32 %v11285_v32, %v11221_v10  ;;  %v11350_v46 = vadd.f32 %v11286_v60, %v11222_v21 }
 0x5ef   : > { %v11348_v17 = vadd.f32 %v11284_v27, %v11220_v8 }
 0x5f1   : > { %14873 = vmatprep.mubr.msk.f32.mxu1 %vm357_vm0, %v11348_v17 }
 0x5f2   : > { %14874 = vmatmul.mubr.msk.f32.gmra.mrb[182].mxu1 %vm357_vm0, %v11349_v9  ;;  %v14771_v20 = vpop.f32.mrb[220].mxu0 }
 0x5f3   : > { %v14755_v13 = vpop.f32.mrb[148].mxu1  ;;  %14876 = vmatprep.mubr.msk.f32.mxu1 %vm357_vm0, %v11350_v46  ;;  %v10869_v55 = vpop.f32.mrb[221].mxu0  ;;  %v10971_v7 = vmul.f32 %v14771_v20, %v20391_v25 }
 0x5f4   : > { %v10702_v45 = vpop.f32.mrb[149].mxu1  ;;  %v10969_v56 = vmul.f32 %v14755_v13, %v20391_v25  ;;  %v10970_v61 = vmul.f32 %v10869_v55, %v20391_v25 }
 0x5f5   : > { %v10968_v24 = vmul.f32 %v10702_v45, %v20391_v25 }
 0x5f6   : > { %14877 = vmatmul.mubr.msk.f32.gmra.mrb[184].mxu1 %vm357_vm0, %v11351_v34 }
 0x5fa   : > { %v14774_v51 = vpop.f32.mrb[222].mxu0 }
 0x5fb   : > { %v14758_v53 = vpop.f32.mrb[150].mxu1  ;;  %v11035_v1 = vmul.f32 %v14774_v51, %v20394_v43  ;;  %v10879_v18 = vpop.f32.mrb[223].mxu0 }
 0x5fc   : > { %v11033_v3 = vmul.f32 %v14758_v53, %v20394_v43  ;;  %v10712_v29 = vpop.f32.mrb[151].mxu1  ;;  %v11034_v33 = vmul.f32 %v10879_v18, %v20394_v43 }
 0x5fd   : > { %v11099_v62 = vadd.f32 %v11035_v1, %v10971_v7  ;;  %v11032_v41 = vmul.f32 %v10712_v29, %v20394_v43 }
 0x5fe   : > { %v11097_v11 = vadd.f32 %v11033_v3, %v10969_v56  ;;  %v11098_v40 = vadd.f32 %v11034_v33, %v10970_v61 }
 0x5ff   : > { %v11096_v4 = vadd.f32 %v11032_v41, %v10968_v24 }
 0x602   : > { %v14777_v39 = vpop.f32.mrb[224].mxu0 }
 0x603   : > { %v14761_v49 = vpop.f32.mrb[152].mxu1  ;;  %v11163_v26 = vmul.f32 %v14777_v39, %v20399_v38  ;;  %v10889_v35 = vpop.f32.mrb[225].mxu0 }
 0x604   : > { %v11161_v44 = vmul.f32 %v14761_v49, %v20399_v38  ;;  %v10722_v58 = vpop.f32.mrb[153].mxu1  ;;  %v11162_v19 = vmul.f32 %v10889_v35, %v20399_v38 }
 0x605   : > { %v11227_v15 = vadd.f32 %v11163_v26, %v11099_v62  ;;  %v11160_v25 = vmul.f32 %v10722_v58, %v20399_v38 }
 0x606   : > { %v11225_v52 = vadd.f32 %v11161_v44, %v11097_v11  ;;  %v11226_v23 = vadd.f32 %v11162_v19, %v11098_v40 }
 0x607   : > { %v11224_v43 = vadd.f32 %v11160_v25, %v11096_v4 }
 0x60a   : > { %v14780_v0 = vpop.f32.mrb[226].mxu0 }
 0x60b   : > { %v14764_v37 = vpop.f32.mrb[154].mxu1  ;;  %v11291_v12 = vmul.f32 %v14780_v0, %v20402_v47  ;;  %v10899_v14 = vpop.f32.mrb[227].mxu0 }
 0x60c   : > { %v11289_v22 = vmul.f32 %v14764_v37, %v20402_v47  ;;  %v10732_v36 = vpop.f32.mrb[155].mxu1  ;;  %v11290_v54 = vmul.f32 %v10899_v14, %v20402_v47 }
 0x60d   : > { %v11355_v57 = vadd.f32 %v11291_v12, %v11227_v15  ;;  %v11288_v38 = vmul.f32 %v10732_v36, %v20402_v47 }
 0x60e   : > { %v11353_v2 = vadd.f32 %v11289_v22, %v11225_v52  ;;  %v11354_v30 = vadd.f32 %v11290_v54, %v11226_v23  ;;  %v14791_v42 = vpop.f32.mrb[228].mxu0 }
 0x60f   : > { %v11352_v63 = vadd.f32 %v11288_v38, %v11224_v43  ;;  %v11631_v31 = vadd.f32 %v14791_v42, %v20025_v5  ;;  %v14836_v28 = vpop.f32.mrb[156].mxu1  ;;  %v11625_v10 = vpop.f32.mrb[229].mxu0 }
 0x610   : > { %v11781_v47 = vadd.f32 %v14836_v28, %v20025_v5  ;;  %v11626_v21 = vadd.f32 %v20025_v5, %v11625_v10  ;;  %v11775_v8 = vpop.f32.mrb[157].mxu1 }
 0x611   : > { %11945 = vst.msk [vmem:[%s20033_s8 + $0x8] sm:$0xff] %vm357_vm0, %v11631_v31  ;;  %v11776_v48 = vadd.f32 %v20025_v5, %v11775_v8  ;;  %14879 = vmatprep.mubr.msk.f32.mxu1 %vm357_vm0, %v11352_v63 }
 0x612   : > { %11975 = vst.msk [vmem:[%s20033_s8 + $0xf8] sm:$0xff] %vm357_vm0, %v11781_v47  ;;  %11944 = vst.msk [vmem:[%s20033_s8] sm:$0xff] %vm357_vm0, %v11626_v21  ;;  %14880 = vmatmul.mubr.msk.f32.gmra.mrb[186].mxu1 %vm357_vm0, %v11353_v2  ;;  %v14794_v6 = vpop.f32.mrb[230].mxu0 }
 0x613   : > { %11974 = vst.msk [vmem:[%s20033_s8 + $0xf0] sm:$0xff] %vm357_vm0, %v11776_v48  ;;  %v11641_v16 = vadd.f32 %v14794_v6, %v20025_v5  ;;  %v14839_v59 = vpop.f32.mrb[158].mxu1  ;;  %14882 = vmatprep.mubr.msk.f32.mxu1 %vm357_vm0, %v11354_v30  ;;  %v11635_v32 = vpop.f32.mrb[231].mxu0 }
 0x614   : > { %v11791_v50 = vadd.f32 %v14839_v59, %v20025_v5  ;;  %v11636_v60 = vadd.f32 %v20025_v5, %v11635_v32  ;;  %v11785_v34 = vpop.f32.mrb[159].mxu1 }
 0x615   : > { %11947 = vst.msk [vmem:[%s20033_s8 + $0x18] sm:$0xff] %vm357_vm0, %v11641_v16  ;;  %v11786_v27 = vadd.f32 %v20025_v5, %v11785_v34 }
 0x616   : > { %11977 = vst.msk [vmem:[%s20033_s8 + $0x108] sm:$0xff] %vm357_vm0, %v11791_v50  ;;  %11946 = vst.msk [vmem:[%s20033_s8 + $0x10] sm:$0xff] %vm357_vm0, %v11636_v60  ;;  %14883 = vmatmul.mubr.msk.f32.gmra.mrb[188].mxu1 %vm357_vm0, %v11355_v57  ;;  %v14797_v9 = vpop.f32.mrb[232].mxu0 }
 0x617   : > { %11976 = vst.msk [vmem:[%s20033_s8 + $0x100] sm:$0xff] %vm357_vm0, %v11786_v27  ;;  %v11651_v46 = vadd.f32 %v14797_v9, %v20025_v5  ;;  %v14842_v17 = vpop.f32.mrb[160].mxu1  ;;  %v11645_v20 = vpop.f32.mrb[233].mxu0 }
 0x618   : > { %v11801_v13 = vadd.f32 %v14842_v17, %v20025_v5  ;;  %v11646_v55 = vadd.f32 %v20025_v5, %v11645_v20  ;;  %v11795_v45 = vpop.f32.mrb[161].mxu1 }
 0x619   : > { %11949 = vst.msk [vmem:[%s20033_s8 + $0x28] sm:$0xff] %vm357_vm0, %v11651_v46  ;;  %v11796_v51 = vadd.f32 %v20025_v5, %v11795_v45 }
 0x61a   : > { %11979 = vst.msk [vmem:[%s20033_s8 + $0x118] sm:$0xff] %vm357_vm0, %v11801_v13  ;;  %11948 = vst.msk [vmem:[%s20033_s8 + $0x20] sm:$0xff] %vm357_vm0, %v11646_v55  ;;  %v14800_v7 = vpop.f32.mrb[234].mxu0 }
 0x61b   : > { %11978 = vst.msk [vmem:[%s20033_s8 + $0x110] sm:$0xff] %vm357_vm0, %v11796_v51  ;;  %v11661_v53 = vadd.f32 %v14800_v7, %v20025_v5  ;;  %v11655_v1 = vpop.f32.mrb[235].mxu0 }
 0x61c   : > { %v11656_v18 = vadd.f32 %v20025_v5, %v11655_v1 }
 0x61d   : > { %11951 = vst.msk [vmem:[%s20033_s8 + $0x38] sm:$0xff] %vm357_vm0, %v11661_v53 }
 0x61e   : > { %11950 = vst.msk [vmem:[%s20033_s8 + $0x30] sm:$0xff] %vm357_vm0, %v11656_v18  ;;  %v14803_v56 = vpop.f32.mrb[236].mxu0 }
 0x61f   : > { %v11671_v61 = vadd.f32 %v14803_v56, %v20025_v5  ;;  %v11665_v3 = vpop.f32.mrb[237].mxu0 }
 0x620   : > { %v11666_v29 = vadd.f32 %v20025_v5, %v11665_v3 }
 0x621   : > { %11953 = vst.msk [vmem:[%s20033_s8 + $0x48] sm:$0xff] %vm357_vm0, %v11671_v61 }
 0x622   : > { %11952 = vst.msk [vmem:[%s20033_s8 + $0x40] sm:$0xff] %vm357_vm0, %v11666_v29  ;;  %v14806_v33 = vpop.f32.mrb[238].mxu0 }
 0x623   : > { %v11681_v24 = vadd.f32 %v14806_v33, %v20025_v5  ;;  %v11675_v62 = vpop.f32.mrb[239].mxu0  ;;  %v14845_v41 = vpop.f32.mrb[162].mxu1 }
 0x624   : > { %v11676_v11 = vadd.f32 %v20025_v5, %v11675_v62  ;;  %v11811_v40 = vadd.f32 %v14845_v41, %v20025_v5  ;;  %v11805_v4 = vpop.f32.mrb[163].mxu1 }
 0x625   : > { %11955 = vst.msk [vmem:[%s20033_s8 + $0x58] sm:$0xff] %vm357_vm0, %v11681_v24  ;;  %v11806_v39 = vadd.f32 %v20025_v5, %v11805_v4 }
 0x626   : > { %11954 = vst.msk [vmem:[%s20033_s8 + $0x50] sm:$0xff] %vm357_vm0, %v11676_v11  ;;  %11981 = vst.msk [vmem:[%s20033_s8 + $0x128] sm:$0xff] %vm357_vm0, %v11811_v40  ;;  %v14809_v49 = vpop.f32.mrb[240].mxu0 }
 0x627   : > { %11980 = vst.msk [vmem:[%s20033_s8 + $0x120] sm:$0xff] %vm357_vm0, %v11806_v39  ;;  %v11691_v26 = vadd.f32 %v14809_v49, %v20025_v5  ;;  %v11685_v35 = vpop.f32.mrb[241].mxu0  ;;  %v14848_v44 = vpop.f32.mrb[164].mxu1 }
 0x628   : > { %v11686_v58 = vadd.f32 %v20025_v5, %v11685_v35  ;;  %v11821_v19 = vadd.f32 %v14848_v44, %v20025_v5  ;;  %v11815_v15 = vpop.f32.mrb[165].mxu1 }
 0x629   : > { %11957 = vst.msk [vmem:[%s20033_s8 + $0x68] sm:$0xff] %vm357_vm0, %v11691_v26  ;;  %v11816_v25 = vadd.f32 %v20025_v5, %v11815_v15 }
 0x62a   : > { %11956 = vst.msk [vmem:[%s20033_s8 + $0x60] sm:$0xff] %vm357_vm0, %v11686_v58  ;;  %11983 = vst.msk [vmem:[%s20033_s8 + $0x138] sm:$0xff] %vm357_vm0, %v11821_v19  ;;  %v14812_v52 = vpop.f32.mrb[242].mxu0 }
 0x62b   : > { %11982 = vst.msk [vmem:[%s20033_s8 + $0x130] sm:$0xff] %vm357_vm0, %v11816_v25  ;;  %v11701_v23 = vadd.f32 %v14812_v52, %v20025_v5  ;;  %v11695_v43 = vpop.f32.mrb[243].mxu0 }
 0x62c   : > { %v11696_v0 = vadd.f32 %v20025_v5, %v11695_v43 }
 0x62d   : > { %11959 = vst.msk [vmem:[%s20033_s8 + $0x78] sm:$0xff] %vm357_vm0, %v11701_v23 }
 0x62e   : > { %11958 = vst.msk [vmem:[%s20033_s8 + $0x70] sm:$0xff] %vm357_vm0, %v11696_v0  ;;  %v14815_v37 = vpop.f32.mrb[244].mxu0 }
 0x62f   : > { %v11711_v12 = vadd.f32 %v14815_v37, %v20025_v5  ;;  %v11705_v14 = vpop.f32.mrb[245].mxu0 }
 0x630   : > { %v11706_v22 = vadd.f32 %v20025_v5, %v11705_v14 }
 0x631   : > { %11961 = vst.msk [vmem:[%s20033_s8 + $0x88] sm:$0xff] %vm357_vm0, %v11711_v12 }
 0x632   : > { %11960 = vst.msk [vmem:[%s20033_s8 + $0x80] sm:$0xff] %vm357_vm0, %v11706_v22  ;;  %v14818_v36 = vpop.f32.mrb[246].mxu0 }
 0x633   : > { %v11721_v54 = vadd.f32 %v14818_v36, %v20025_v5  ;;  %v11715_v57 = vpop.f32.mrb[247].mxu0 }
 0x634   : > { %v11716_v38 = vadd.f32 %v20025_v5, %v11715_v57 }
 0x635   : > { %11963 = vst.msk [vmem:[%s20033_s8 + $0x98] sm:$0xff] %vm357_vm0, %v11721_v54 }
 0x636   : > { %11962 = vst.msk [vmem:[%s20033_s8 + $0x90] sm:$0xff] %vm357_vm0, %v11716_v38  ;;  %v14821_v2 = vpop.f32.mrb[248].mxu0 }
 0x637   : > { %v11731_v30 = vadd.f32 %v14821_v2, %v20025_v5  ;;  %v11725_v42 = vpop.f32.mrb[249].mxu0 }
 0x638   : > { %v11726_v63 = vadd.f32 %v20025_v5, %v11725_v42 }
 0x639   : > { %11965 = vst.msk [vmem:[%s20033_s8 + $0xa8] sm:$0xff] %vm357_vm0, %v11731_v30 }
 0x63a   : > { %11964 = vst.msk [vmem:[%s20033_s8 + $0xa0] sm:$0xff] %vm357_vm0, %v11726_v63  ;;  %v14824_v31 = vpop.f32.mrb[250].mxu0 }
 0x63b   : > { %v11741_v28 = vadd.f32 %v14824_v31, %v20025_v5  ;;  %v11735_v10 = vpop.f32.mrb[251].mxu0 }
 0x63c   : > { %v11736_v47 = vadd.f32 %v20025_v5, %v11735_v10 }
 0x63d   : > { %11967 = vst.msk [vmem:[%s20033_s8 + $0xb8] sm:$0xff] %vm357_vm0, %v11741_v28 }
 0x63e   : > { %11966 = vst.msk [vmem:[%s20033_s8 + $0xb0] sm:$0xff] %vm357_vm0, %v11736_v47  ;;  %v14827_v21 = vpop.f32.mrb[252].mxu0 }
 0x63f   : > { %v11751_v8 = vadd.f32 %v14827_v21, %v20025_v5  ;;  %v11745_v48 = vpop.f32.mrb[253].mxu0 }
 0x640   : > { %v11746_v6 = vadd.f32 %v20025_v5, %v11745_v48 }
 0x641   : > { %11969 = vst.msk [vmem:[%s20033_s8 + $0xc8] sm:$0xff] %vm357_vm0, %v11751_v8 }
 0x642   : > { %11968 = vst.msk [vmem:[%s20033_s8 + $0xc0] sm:$0xff] %vm357_vm0, %v11746_v6  ;;  %v14830_v16 = vpop.f32.mrb[254].mxu0 }
 0x643   : > { %v11761_v59 = vadd.f32 %v14830_v16, %v20025_v5  ;;  %v11755_v32 = vpop.f32.mrb[255].mxu0  ;;  %v14851_v50 = vpop.f32.mrb[166].mxu1 }
 0x644   : > { %v11756_v60 = vadd.f32 %v20025_v5, %v11755_v32  ;;  %v11831_v34 = vadd.f32 %v14851_v50, %v20025_v5  ;;  %v11825_v27 = vpop.f32.mrb[167].mxu1 }
 0x645   : > { %11971 = vst.msk [vmem:[%s20033_s8 + $0xd8] sm:$0xff] %vm357_vm0, %v11761_v59  ;;  %v11826_v9 = vadd.f32 %v20025_v5, %v11825_v27 }
 0x646   : > { %11970 = vst.msk [vmem:[%s20033_s8 + $0xd0] sm:$0xff] %vm357_vm0, %v11756_v60  ;;  %11985 = vst.msk [vmem:[%s20033_s8 + $0x148] sm:$0xff] %vm357_vm0, %v11831_v34  ;;  %v14833_v46 = vpop.f32.mrb[0].mxu0 }
 0x647   : > { %11984 = vst.msk [vmem:[%s20033_s8 + $0x140] sm:$0xff] %vm357_vm0, %v11826_v9  ;;  %v11771_v17 = vadd.f32 %v14833_v46, %v20025_v5  ;;  %v11765_v20 = vpop.f32.mrb[1].mxu0  ;;  %v14854_v13 = vpop.f32.mrb[168].mxu1 }
 0x648   : > { %v11766_v55 = vadd.f32 %v20025_v5, %v11765_v20  ;;  %v11841_v45 = vadd.f32 %v14854_v13, %v20025_v5  ;;  %v11835_v51 = vpop.f32.mrb[169].mxu1 }
 0x649   : > { %11973 = vst.msk [vmem:[%s20033_s8 + $0xe8] sm:$0xff] %vm357_vm0, %v11771_v17  ;;  %v11836_v7 = vadd.f32 %v20025_v5, %v11835_v51 }
 0x64a   : > { %11972 = vst.msk [vmem:[%s20033_s8 + $0xe0] sm:$0xff] %vm357_vm0, %v11766_v55  ;;  %11987 = vst.msk [vmem:[%s20033_s8 + $0x158] sm:$0xff] %vm357_vm0, %v11841_v45 }
 0x64b   : > { %11986 = vst.msk [vmem:[%s20033_s8 + $0x150] sm:$0xff] %vm357_vm0, %v11836_v7 }
 0x664   : > { %v14857_v53 = vpop.f32.mrb[170].mxu1 }
 0x665   : > { %v11851_v1 = vadd.f32 %v14857_v53, %v20025_v5  ;;  %v11845_v18 = vpop.f32.mrb[171].mxu1 }
 0x666   : > { %v11846_v56 = vadd.f32 %v20025_v5, %v11845_v18 }
 0x667   : > { %11989 = vst.msk [vmem:[%s20033_s8 + $0x168] sm:$0xff] %vm357_vm0, %v11851_v1 }
 0x668   : > { %11988 = vst.msk [vmem:[%s20033_s8 + $0x160] sm:$0xff] %vm357_vm0, %v11846_v56  ;;  %v14860_v61 = vpop.f32.mrb[172].mxu1 }
 0x669   : > { %v11861_v3 = vadd.f32 %v14860_v61, %v20025_v5  ;;  %v11855_v29 = vpop.f32.mrb[173].mxu1 }
 0x66a   : > { %v11856_v33 = vadd.f32 %v20025_v5, %v11855_v29 }
 0x66b   : > { %11991 = vst.msk [vmem:[%s20033_s8 + $0x178] sm:$0xff] %vm357_vm0, %v11861_v3 }
 0x66c   : > { %11990 = vst.msk [vmem:[%s20033_s8 + $0x170] sm:$0xff] %vm357_vm0, %v11856_v33 }
 0x684   : > { %v14863_v24 = vpop.f32.mrb[174].mxu1 }
 0x685   : > { %v11871_v62 = vadd.f32 %v14863_v24, %v20025_v5  ;;  %v11865_v41 = vpop.f32.mrb[175].mxu1 }
 0x686   : > { %v11866_v11 = vadd.f32 %v20025_v5, %v11865_v41 }
 0x687   : > { %11993 = vst.msk [vmem:[%s20033_s8 + $0x188] sm:$0xff] %vm357_vm0, %v11871_v62 }
 0x688   : > { %11992 = vst.msk [vmem:[%s20033_s8 + $0x180] sm:$0xff] %vm357_vm0, %v11866_v11  ;;  %v14866_v40 = vpop.f32.mrb[176].mxu1 }
 0x689   : > { %v11881_v4 = vadd.f32 %v14866_v40, %v20025_v5  ;;  %v11875_v39 = vpop.f32.mrb[177].mxu1 }
 0x68a   : > { %v11876_v49 = vadd.f32 %v20025_v5, %v11875_v39 }
 0x68b   : > { %11995 = vst.msk [vmem:[%s20033_s8 + $0x198] sm:$0xff] %vm357_vm0, %v11881_v4 }
 0x68c   : > { %11994 = vst.msk [vmem:[%s20033_s8 + $0x190] sm:$0xff] %vm357_vm0, %v11876_v49 }
 0x6a4   : > { %v14869_v26 = vpop.f32.mrb[178].mxu1 }
 0x6a5   : > { %v11891_v35 = vadd.f32 %v14869_v26, %v20025_v5  ;;  %v11885_v44 = vpop.f32.mrb[179].mxu1 }
 0x6a6   : > { %v11886_v58 = vadd.f32 %v20025_v5, %v11885_v44 }
 0x6a7   : > { %11997 = vst.msk [vmem:[%s20033_s8 + $0x1a8] sm:$0xff] %vm357_vm0, %v11891_v35 }
 0x6a8   : > { %11996 = vst.msk [vmem:[%s20033_s8 + $0x1a0] sm:$0xff] %vm357_vm0, %v11886_v58  ;;  %v14872_v19 = vpop.f32.mrb[180].mxu1 }
 0x6a9   : > { %v11901_v15 = vadd.f32 %v14872_v19, %v20025_v5  ;;  %v11895_v25 = vpop.f32.mrb[181].mxu1 }
 0x6aa   : > { %v11896_v52 = vadd.f32 %v20025_v5, %v11895_v25 }
 0x6ab   : > { %11999 = vst.msk [vmem:[%s20033_s8 + $0x1b8] sm:$0xff] %vm357_vm0, %v11901_v15 }
 0x6ac   : > { %11998 = vst.msk [vmem:[%s20033_s8 + $0x1b0] sm:$0xff] %vm357_vm0, %v11896_v52 }
 0x6c5   : > { %v14875_v23 = vpop.f32.mrb[182].mxu1 }
 0x6c6   : > { %v11911_v43 = vadd.f32 %v14875_v23, %v20025_v5  ;;  %v11905_v0 = vpop.f32.mrb[183].mxu1 }
 0x6c7   : > { %v11906_v37 = vadd.f32 %v20025_v5, %v11905_v0 }
 0x6c8   : > { %12001 = vst.msk [vmem:[%s20033_s8 + $0x1c8] sm:$0xff] %vm357_vm0, %v11911_v43 }
 0x6c9   : > { %12000 = vst.msk [vmem:[%s20033_s8 + $0x1c0] sm:$0xff] %vm357_vm0, %v11906_v37  ;;  %v14878_v12 = vpop.f32.mrb[184].mxu1 }
 0x6ca   : > { %v11921_v14 = vadd.f32 %v14878_v12, %v20025_v5  ;;  %v11915_v22 = vpop.f32.mrb[185].mxu1 }
 0x6cb   : > { %v11916_v36 = vadd.f32 %v20025_v5, %v11915_v22 }
 0x6cc   : > { %12003 = vst.msk [vmem:[%s20033_s8 + $0x1d8] sm:$0xff] %vm357_vm0, %v11921_v14 }
 0x6cd   : > { %12002 = vst.msk [vmem:[%s20033_s8 + $0x1d0] sm:$0xff] %vm357_vm0, %v11916_v36 }
 0x6e5   : > { %v14881_v54 = vpop.f32.mrb[186].mxu1 }
 0x6e6   : > { %v11931_v57 = vadd.f32 %v14881_v54, %v20025_v5  ;;  %v11925_v38 = vpop.f32.mrb[187].mxu1 }
 0x6e7   : > { %v11926_v2 = vadd.f32 %v20025_v5, %v11925_v38 }
 0x6e8   : > { %12005 = vst.msk [vmem:[%s20033_s8 + $0x1e8] sm:$0xff] %vm357_vm0, %v11931_v57 }
 0x6e9   : > { %12004 = vst.msk [vmem:[%s20033_s8 + $0x1e0] sm:$0xff] %vm357_vm0, %v11926_v2  ;;  %v14884_v30 = vpop.f32.mrb[188].mxu1 }
 0x6ea   : > { %v11941_v42 = vadd.f32 %v14884_v30, %v20025_v5  ;;  %v11935_v63 = vpop.f32.mrb[189].mxu1 }
 0x6eb   : > { %v11936_v31 = vadd.f32 %v20025_v5, %v11935_v63 }
 0x6ec   : > { %12007 = vst.msk [vmem:[%s20033_s8 + $0x1f8] sm:$0xff] %vm357_vm0, %v11941_v42 }
 0x6ed   : > { %12006 = vst.msk [vmem:[%s20033_s8 + $0x1f0] sm:$0xff] %vm357_vm0, %v11936_v31 }
 0x6ee PF: > { %s17_s24 = sadd.s32 1, %s16176_s24  }
 0x6ef   : > { %p14_p4 = scmp.ge.s32.totalorder %s17_s24, 4  }
 0x6f1   :  { %16 = sbr.rel (!%p14_p4) target bundleno = 1 (0x1), region = 78 }

</bundles_post_ra>
